<compile_context>
chip_gen: v7x
topology: tpu7x:2x2x1
jax: 0.10.0
libtpu: 0.0.40
codegen_flags: <defaults>
</compile_context>

<pallas_src>
import functools

import jax
import jax.numpy as jnp
from jax.experimental import pallas as pl
from jax.experimental.pallas import tpu as pltpu


def _round_up(x, m):
    return (x + m - 1) // m * m


def _pick_tile(dim, candidates):
    for c in candidates:
        if c <= dim and dim % c == 0:
            return c
    return dim


def _pick_vmem_limit():
    # Generation-gated scoped-VMEM limit: half of physical VMEM, capped at 64MiB
    # (v5e/v6e: 128MiB -> 64MiB; v7x: 64MiB -> 32MiB).
    try:
        cap = int(pltpu.get_tpu_info().vmem_capacity_bytes)
    except Exception:  # pragma: no cover - conservative fallback
        cap = 64 * 1024 * 1024
    return int(min(64 * 1024 * 1024, max(cap // 2, 16 * 1024 * 1024)))


_VMEM_LIMIT = _pick_vmem_limit()


def _cparams(*sem):
    return pltpu.CompilerParams(dimension_semantics=sem,
                                vmem_limit_bytes=_VMEM_LIMIT)


# -----------------------------------------------------------------------------
# Tap-folded conv2d kernel (stride-1; stride-2 handled by space-to-depth).
#   x block  : (1, (Hs+1)*Ws, Cin)  -- flattened padded image (+1 safety row)
#   w block  : (kh*kw, Cin, tCout)  -- resident across the whole grid
#   out block: (1, Ho*Ws, tCout)    -- the (kw-1) rightmost columns per output
#                                      row are scratch and cropped in XLA.
# Bias + activation fused; optional fused BatchNorm column stats.
# -----------------------------------------------------------------------------
def _conv_tap_kernel(x_ref, w_ref, b_ref, *rest, kh, kw, ws, rout, act,
                     with_stats):
    if with_stats:
        m_ref, o_ref, s_ref, q_ref, acc_ref = rest
    else:
        o_ref, acc_ref = rest

    for t in range(kh * kw):
        di, dj = divmod(t, kw)
        start = di * ws + dj
        a = x_ref[0, start:start + rout, :]               # contiguous row slice
        c = jnp.dot(a, w_ref[t], preferred_element_type=jnp.float32)
        if t == 0:
            acc_ref[...] = c
        else:
            acc_ref[...] += c

    y = acc_ref[...] + b_ref[...]                          # (rout, tco) f32

    if with_stats:
        # Fused BatchNorm statistics (garbage columns masked out).
        ym = y * m_ref[...]
        s_ref[...] = jnp.sum(ym, axis=0, keepdims=True)[None]
        q_ref[...] = jnp.sum(ym * y, axis=0, keepdims=True)[None]

    if act == "relu":
        y = jnp.maximum(y, 0.0)
    elif act == "lrelu":
        y = jnp.where(y > 0, y, 0.2 * y)
    o_ref[...] = y[None].astype(o_ref.dtype)


def _prep_conv(w, b=None, stride=1, pad=1):
    """PyTorch weight (Cout, Cin, kh, kw) -> (taps, Cin_pad, Cout_pad) bf16.

    Cin/Cout are padded to multiples of 128 (lane-dense); stride-2 4x4 convs
    are folded to the 2x2 form consumed after space-to-depth.  Done once."""
    cout, cin, kh, kw = w.shape
    cinp = _round_up(cin, 128)
    coutp = _round_up(cout, 128)
    wt = w.transpose(2, 3, 1, 0)                            # (kh, kw, cin, cout)
    wt = jnp.pad(wt, ((0, 0), (0, 0), (0, cinp - cin), (0, coutp - cout)))
    if stride == 2:
        assert kh == 4 and kw == 4
        wt = (wt.reshape(2, 2, 2, 2, cinp, coutp)
                .transpose(0, 2, 1, 3, 4, 5)                # (q, r, a, b, c, o)
                .reshape(4, 4 * cinp, coutp))
        k_eff, cin_w = 2, 4 * cinp
    else:
        wt = wt.reshape(kh * kw, cinp, coutp)
        k_eff, cin_w = kh, cinp
    if b is None:
        b = jnp.zeros((cout,), jnp.float32)
    bp = jnp.pad(b.astype(jnp.float32), (0, coutp - cout)).reshape(1, coutp)
    return {"w": wt.astype(jnp.bfloat16), "b": bp, "k": k_eff, "pad": pad,
            "s2d": stride == 2, "cin_p": cinp, "cin_w": cin_w,
            "cout": cout, "coutp": coutp}


def conv2d(x, cp, act="none", out_dtype=jnp.bfloat16, with_stats=False):
    """x: (N, H, W, Cpad) NHWC -> (N, Ho, Wo, Coutp) [+ per-sample col stats]."""
    n, h, w, c = x.shape
    pad = cp["pad"]
    xs = jnp.pad(x, ((0, 0), (pad, pad), (pad, pad), (0, 0)))
    if cp["s2d"]:                        # stride-2 conv == space-to-depth + 2x2
        hp, wp = xs.shape[1], xs.shape[2]
        xs = (xs.reshape(n, hp // 2, 2, wp // 2, 2, c)
                .transpose(0, 1, 3, 2, 4, 5)
                .reshape(n, hp // 2, wp // 2, 4 * c))
    xs = xs.astype(jnp.bfloat16)
    hs, ws, cin = xs.shape[1], xs.shape[2], xs.shape[3]
    assert cin == cp["cin_w"], (cin, cp["cin_w"])
    kh = kw = cp["k"]
    ho, wo = hs - kh + 1, ws - kw + 1
    rout = ho * ws
    coutp = cp["coutp"]
    # One extra safety row so the last tap's flattened window stays in bounds.
    xs = jnp.pad(xs, ((0, 0), (0, 1), (0, 0), (0, 0)))
    xflat = xs.reshape(n, (hs + 1) * ws, cin)

    tco = coutp if cp["w"].size * 2 <= 8 * 1024 * 1024 else 256
    if coutp % tco:
        tco = coutp
    nco = coutp // tco

    kern = functools.partial(_conv_tap_kernel, kh=kh, kw=kw, ws=ws, rout=rout,
                             act=act, with_stats=with_stats)
    in_specs = [
        pl.BlockSpec((1, (hs + 1) * ws, cin), lambda i, j: (i, 0, 0)),
        pl.BlockSpec((kh * kw, cin, tco), lambda i, j: (0, 0, j)),   # resident
        pl.BlockSpec((1, tco), lambda i, j: (0, j)),
    ]
    operands = [xflat, cp["w"], cp["b"]]
    out_shape = jax.ShapeDtypeStruct((n, rout, coutp), out_dtype)
    out_specs = pl.BlockSpec((1, rout, tco), lambda i, j: (i, 0, j))
    if with_stats:
        mask = ((jnp.arange(rout, dtype=jnp.int32) % ws) < wo)
        mask = mask.astype(jnp.float32).reshape(rout, 1)
        in_specs.append(pl.BlockSpec((rout, 1), lambda i, j: (0, 0)))
        operands.append(mask)
        out_shape = (out_shape,
                     jax.ShapeDtypeStruct((n, 1, coutp), jnp.float32),
                     jax.ShapeDtypeStruct((n, 1, coutp), jnp.float32))
        out_specs = (out_specs,
                     pl.BlockSpec((1, 1, tco), lambda i, j: (i, 0, j)),
                     pl.BlockSpec((1, 1, tco), lambda i, j: (i, 0, j)))

    res = pl.pallas_call(
        kern,
        out_shape=out_shape,
        grid_spec=pltpu.PrefetchScalarGridSpec(
            num_scalar_prefetch=0,
            grid=(n, nco),
            in_specs=in_specs,
            out_specs=out_specs,
            scratch_shapes=[pltpu.VMEM((rout, tco), jnp.float32)],
        ),
        compiler_params=_cparams("parallel", "parallel"),
    )(*operands)

    if with_stats:
        out_full, ssum, ssq = res
    else:
        out_full = res
    out = out_full.reshape(n, ho, ws, coutp)[:, :, :wo, :]
    if with_stats:
        return out, ssum.reshape(n, coutp), ssq.reshape(n, coutp)
    return out


def maxpool2x2(x):
    # TODO(synk): fold the 2x2 pooling into the producing conv's epilogue to
    # save one read+write of the activation.
    n, h, w, c = x.shape
    return x.reshape(n, h // 2, 2, w // 2, 2, c).max(axis=(2, 4))


# -----------------------------------------------------------------------------
# BatchNorm affine + LeakyReLU(0.2); statistics come fused from the conv.
# -----------------------------------------------------------------------------
def _affine_lrelu_kernel(x_ref, sc_ref, sh_ref, o_ref):
    z = x_ref[...].astype(jnp.float32) * sc_ref[...] + sh_ref[...]
    o_ref[...] = jnp.where(z > 0, z, 0.2 * z).astype(o_ref.dtype)


def batchnorm_lrelu_from_stats(y, ssum, ssq, gamma, beta, groups, eps=1e-5):
    """Train-mode BatchNorm2d + LeakyReLU on NHWC conv output.  `groups` splits
    the batch so stats match separate discriminator calls on inputs / recons."""
    n, ho, wo, c = y.shape
    g = groups
    cnt = (n // g) * ho * wo
    gs = ssum.reshape(g, n // g, c).sum(axis=1)
    gq = ssq.reshape(g, n // g, c).sum(axis=1)
    mean = gs / cnt
    var = gq / cnt - mean * mean                       # biased (training BN)
    scale = gamma[None, :] / jnp.sqrt(var + eps)       # (g, C)
    shift = beta[None, :] - mean * scale
    scale_n = jnp.repeat(scale, n // g, axis=0).reshape(n, 1, c)
    shift_n = jnp.repeat(shift, n // g, axis=0).reshape(n, 1, c)

    r = ho * wo
    out = pl.pallas_call(
        _affine_lrelu_kernel,
        out_shape=jax.ShapeDtypeStruct((n, r, c), jnp.bfloat16),
        grid_spec=pltpu.PrefetchScalarGridSpec(
            num_scalar_prefetch=0,
            grid=(n,),
            in_specs=[pl.BlockSpec((1, r, c), lambda i: (i, 0, 0)),
                      pl.BlockSpec((1, 1, c), lambda i: (i, 0, 0)),
                      pl.BlockSpec((1, 1, c), lambda i: (i, 0, 0))],
            out_specs=pl.BlockSpec((1, r, c), lambda i: (i, 0, 0)),
        ),
        compiler_params=_cparams("parallel"),
    )(y.reshape(n, r, c), scale_n.astype(jnp.float32),
      shift_n.astype(jnp.float32))
    return out.reshape(n, ho, wo, c)


# -----------------------------------------------------------------------------
# LPIPS: one batched VGG16 pass + per-layer (normalize, diff^2, 1x1 lin, avg)
# -----------------------------------------------------------------------------
VGG_CFG = [64, 64, "M", 128, 128, "M", 256, 256, 256, "M",
           512, 512, 512, "M", 512, 512, 512]
LPIPS_CHNS = (64, 128, 256, 512, 512)
_FEAT_AFTER_CONV = (2, 4, 7, 10, 13)   # relu1_2, relu2_2, relu3_3, relu4_3, relu5_3

_LPIPS_SHIFT = jnp.array([-0.030, -0.088, -0.188], jnp.float32).reshape(1, 1, 1, 3)
_LPIPS_SCALE = jnp.array([0.458, 0.448, 0.450], jnp.float32).reshape(1, 1, 1, 3)


def _pad_channels(x):
    c = x.shape[-1]
    cp = _round_up(c, 128)
    if cp != c:
        x = jnp.pad(x, ((0, 0), (0, 0), (0, 0), (0, cp - c)))
    return x


def vgg16_features(x, vgg_params):
    feats = []
    ci = 0
    h = x
    for v in VGG_CFG:
        if v == "M":
            h = maxpool2x2(h)
        else:
            h = conv2d(h, vgg_params[ci], act="relu")
            ci += 1
            if ci in _FEAT_AFTER_CONV:
                feats.append(h)
    return feats


def _lpips_layer_kernel(f0_ref, f1_ref, w_ref, o_ref):
    @pl.when(pl.program_id(1) == 0)
    def _():
        o_ref[...] = jnp.zeros_like(o_ref)
    eps = 1e-10
    f0 = f0_ref[...].astype(jnp.float32)               # (1, th, W, C)
    f1 = f1_ref[...].astype(jnp.float32)
    r0 = pl.reciprocal(jnp.sqrt(jnp.sum(f0 * f0, axis=-1, keepdims=True)) + eps,
                       approx=True)
    r1 = pl.reciprocal(jnp.sqrt(jnp.sum(f1 * f1, axis=-1, keepdims=True)) + eps,
                       approx=True)
    d = (f0 * r0 - f1 * r1) ** 2
    o_ref[...] += jnp.sum(d * w_ref[...], axis=(1, 2), keepdims=True)


def _lpips_layer(feats, lin_w, b):
    """feats: (2B, H, W, C) with x-features in [:B], y-features in [B:] -> (B,)"""
    _, h, w, c = feats.shape
    th = _pick_tile(h, (8, 4, 2, 1))
    out = pl.pallas_call(
        _lpips_layer_kernel,
        out_shape=jax.ShapeDtypeStruct((b, 1, 1, c), jnp.float32),
        grid_spec=pltpu.PrefetchScalarGridSpec(
            num_scalar_prefetch=0,
            grid=(b, h // th),
            in_specs=[
                pl.BlockSpec((1, th, w, c), lambda bi, t: (bi, t, 0, 0)),
                pl.BlockSpec((1, th, w, c), lambda bi, t: (bi + b, t, 0, 0)),
                pl.BlockSpec((1, c), lambda bi, t: (0, 0)),
            ],
            out_specs=pl.BlockSpec((1, 1, 1, c), lambda bi, t: (bi, 0, 0, 0)),
        ),
        compiler_params=_cparams("parallel", "arbitrary"),
    )(feats, feats, lin_w)
    return out.reshape(b, c).sum(axis=1) / (h * w)     # spatial average -> (B,)


def lpips_pair(x_nhwc, y_nhwc, vgg_params, lin_ws):
    # TODO(synk): pretrained VGG16 / LPIPS lin weights replaced by deterministic
    # synthetic init (no checkpoint loading allowed).
    b = x_nhwc.shape[0]
    xin = jnp.concatenate([(x_nhwc - _LPIPS_SHIFT) / _LPIPS_SCALE,
                           (y_nhwc - _LPIPS_SHIFT) / _LPIPS_SCALE], axis=0)
    xin = _pad_channels(xin).astype(jnp.bfloat16)
    feats = vgg16_features(xin, vgg_params)            # one batched VGG pass
    vals = [_lpips_layer(f, w, b) for f, w in zip(feats, lin_ws)]
    return sum(vals)                                   # (B,)


# -----------------------------------------------------------------------------
# NLayerDiscriminator (PatchGAN), n_layers=3, ndf=64, BatchNorm (train stats)
# -----------------------------------------------------------------------------
def nlayer_discriminator(x, p, groups):
    h = conv2d(x, p["conv0"], act="lrelu")
    h, s, q = conv2d(h, p["conv1"], act="none", with_stats=True)
    h = batchnorm_lrelu_from_stats(h, s, q, p["bn1_g"], p["bn1_b"], groups)
    h, s, q = conv2d(h, p["conv2"], act="none", with_stats=True)
    h = batchnorm_lrelu_from_stats(h, s, q, p["bn2_g"], p["bn2_b"], groups)
    h, s, q = conv2d(h, p["conv3"], act="none", with_stats=True)
    h = batchnorm_lrelu_from_stats(h, s, q, p["bn3_g"], p["bn3_b"], groups)
    h = conv2d(h, p["conv4"], act="none", out_dtype=jnp.float32)
    return h                                           # (N, H', W', 128) f32, logits in ch 0


# -----------------------------------------------------------------------------
# Loss reduction kernels (sublane-dense operands, lane-dense (1,128) accumulators)
# -----------------------------------------------------------------------------
def _nll_sums_kernel(x_ref, y_ref, p_ref, lv_ref, o_pix, o_rec, o_nll, *,
                     pixel_weight, perceptual_weight):
    @pl.when(pl.program_id(0) == 0)
    def _():
        o_pix[...] = jnp.zeros_like(o_pix)
        o_rec[...] = jnp.zeros_like(o_rec)
        o_nll[...] = jnp.zeros_like(o_nll)
    diff = jnp.abs(x_ref[...] - y_ref[...])            # (B, tr, L)
    rec = pixel_weight * diff + perceptual_weight * p_ref[...]
    lv = lv_ref[...]
    nll = rec * jnp.exp(-lv) + lv
    o_pix[...] += jnp.sum(diff, axis=(0, 1))[None]
    o_rec[...] += jnp.sum(rec, axis=(0, 1))[None]
    o_nll[...] += jnp.sum(nll, axis=(0, 1))[None]


def _nll_reduction(xf, yf, p_loss, logvar, pixel_weight, perceptual_weight):
    B, D = xf.shape
    L = 128 if D % 128 == 0 else D
    R = D // L
    tr = _pick_tile(R, (512, 256, 128, 64, 32, 16, 8))
    pix, rec, nll = pl.pallas_call(
        functools.partial(_nll_sums_kernel, pixel_weight=pixel_weight,
                          perceptual_weight=perceptual_weight),
        out_shape=(jax.ShapeDtypeStruct((1, L), jnp.float32),) * 3,
        grid_spec=pltpu.PrefetchScalarGridSpec(
            num_scalar_prefetch=0,
            grid=(R // tr,),
            in_specs=[
                pl.BlockSpec((B, tr, L), lambda t: (0, t, 0)),
                pl.BlockSpec((B, tr, L), lambda t: (0, t, 0)),
                pl.BlockSpec((B, 1, 1), lambda t: (0, 0, 0)),
                pl.BlockSpec((1, 1, 1), lambda t: (0, 0, 0)),
            ],
            out_specs=(pl.BlockSpec((1, L), lambda t: (0, 0)),) * 3,
        ),
        compiler_params=_cparams("arbitrary"),
    )(xf.reshape(B, R, L), yf.reshape(B, R, L),
      p_loss.reshape(B, 1, 1), logvar.reshape(1, 1, 1))
    return jnp.sum(pix), jnp.sum(rec), jnp.sum(nll)


def _kl_sum_kernel(m_ref, lv_ref, o_ref):
    @pl.when(pl.program_id(0) == 0)
    def _():
        o_ref[...] = jnp.zeros_like(o_ref)
    m = m_ref[...]
    lv = lv_ref[...]
    o_ref[...] += 0.5 * jnp.sum(m * m + jnp.exp(lv) - 1.0 - lv, axis=0)[None]


def _kl_reduction(mean, logvar):
    m = mean.reshape(-1)
    lv = logvar.reshape(-1)
    T = m.shape[0]
    L = 128 if T % 128 == 0 else T
    R = T // L
    tr = _pick_tile(R, (512, 256, 128, 64, 32, 16, 8))
    out = pl.pallas_call(
        _kl_sum_kernel,
        out_shape=jax.ShapeDtypeStruct((1, L), jnp.float32),
        grid_spec=pltpu.PrefetchScalarGridSpec(
            num_scalar_prefetch=0,
            grid=(R // tr,),
            in_specs=[pl.BlockSpec((tr, L), lambda t: (t, 0)),
                      pl.BlockSpec((tr, L), lambda t: (t, 0))],
            out_specs=pl.BlockSpec((1, L), lambda t: (0, 0)),
        ),
        compiler_params=_cparams("arbitrary"),
    )(m.reshape(R, L), lv.reshape(R, L))
    return jnp.sum(out)


# -----------------------------------------------------------------------------
# LPIPSWithDiscriminator forward
# -----------------------------------------------------------------------------
def lpips_with_discriminator_forward(
        params, inputs, reconstructions, posterior_params, global_step,
        cond=None, weights=None, kl_weight=1.0, pixel_weight=1.0,
        perceptual_weight=1.0, disc_factor=1.0, disc_weight=1.0, disc_start=0,
        disc_conditional=False):
    assert cond is None and not disc_conditional
    assert weights is None  # TODO(synk): per-element `weights` path not exercised.
    B, C, H, W = inputs.shape
    x_nhwc = inputs.transpose(0, 2, 3, 1)              # NCHW -> NHWC once
    y_nhwc = reconstructions.transpose(0, 2, 3, 1)

    # ---- perceptual loss (B,), x and y batched through VGG ------------------
    p_loss = lpips_pair(x_nhwc, y_nhwc, params["vgg"], params["lins"])

    # ---- pixel L1 + NLL (tiled Pallas reduction) -----------------------------
    pix_sum, rec_sum, nll_sum = _nll_reduction(
        inputs.reshape(B, C * H * W), reconstructions.reshape(B, C * H * W),
        p_loss, params["logvar"], pixel_weight, perceptual_weight)
    n_elems = B * C * H * W
    # The reference reduces nll/rec with torch.mean over the whole broadcast
    # (B,C,H,W) tensor, so the per-element mean is the correct normalization.
    pix_rec_mean = pix_sum / n_elems
    rec_mean = rec_sum / n_elems
    nll_loss = nll_sum / n_elems
    weighted_nll_loss = nll_loss

    # ---- KL of DiagonalGaussianDistribution(posterior_params) ----------------
    zB = posterior_params.shape[0]
    zc = posterior_params.shape[1] // 2
    mean = posterior_params[:, :zc]
    logvar_p = jnp.clip(posterior_params[:, zc:], -30.0, 20.0)
    kl_loss = _kl_reduction(mean, logvar_p) / zB

    # ---- discriminator: one batched pass over [inputs; reconstructions] ------
    # (detached / non-detached passes share values in the forward; per-half BN
    #  stats keep the numerics identical to separate calls)
    d_in = jnp.concatenate([x_nhwc, y_nhwc], axis=0)
    d_in = _pad_channels(d_in).astype(jnp.bfloat16)
    logits = nlayer_discriminator(d_in, params["disc"], groups=2)
    lr = logits[:B, :, :, 0]                            # logits live in channel 0
    lf = logits[B:, :, :, 0]
    # Tiny (B*H'*W' elements): plain XLA reductions; a Pallas kernel here would
    # be pure launch overhead.
    loss_real = jnp.mean(jnp.maximum(1.0 - lr, 0.0))
    loss_fake = jnp.mean(jnp.maximum(1.0 + lf, 0.0))
    logits_real_mean = jnp.mean(lr)
    logits_fake_mean = jnp.mean(lf)
    g_loss = -logits_fake_mean

    # TODO(synk): adaptive d_weight needs torch.autograd.grad w.r.t. the external
    # decoder's last layer (not reachable from tensor inputs); use the module's
    # eval-mode RuntimeError fallback of 0.0.
    d_weight = jnp.float32(0.0) * disc_weight

    df = disc_factor if global_step >= disc_start else 0.0   # adopt_weight

    ae_loss = weighted_nll_loss + kl_weight * kl_loss + d_weight * df * g_loss
    d_loss = df * 0.5 * (loss_real + loss_fake)               # hinge_d_loss

    log_ae = {
        "ae_loss": ae_loss, "logvar": params["logvar"], "kl_loss": kl_loss,
        "nll_loss": nll_loss, "rec_loss": rec_mean, "pix_rec_loss": pix_rec_mean,
        "perceptual_loss": jnp.mean(p_loss), "d_weight": d_weight,
        "disc_factor": jnp.float32(df), "g_loss": g_loss,
    }
    log_disc = {
        "disc_loss": d_loss, "logits_real": logits_real_mean,
        "logits_fake": logits_fake_mean,
    }
    return ae_loss, d_loss, log_ae, log_disc


# -----------------------------------------------------------------------------
# Deterministic parameter init (synthetic weights, pre-laid-out for the kernels)
# -----------------------------------------------------------------------------
def init_params(key, disc_in_channels=3, ndf=64, logvar_init=0.0):
    keys = iter(jax.random.split(key, 64))

    def nrm(shape, std=0.02, mean=0.0):
        return mean + std * jax.random.normal(next(keys), shape, jnp.float32)

    # VGG16 convs (He-scaled so synthetic features stay well-conditioned)
    vgg = []
    cin = 3
    for v in VGG_CFG:
        if v == "M":
            continue
        std = (2.0 / (cin * 9)) ** 0.5
        vgg.append(_prep_conv(nrm((v, cin, 3, 3), std=std),
                              jnp.zeros((v,), jnp.float32), stride=1, pad=1))
        cin = v
    # LPIPS lin (1x1, bias-free) weights, zero-padded to lane-dense channels
    lins = []
    for c in LPIPS_CHNS:
        cp = _round_up(c, 128)
        w = jnp.abs(nrm((1, c), std=0.05))
        lins.append(jnp.pad(w, ((0, 0), (0, cp - c))))

    def bn_gamma(c):
        cp = _round_up(c, 128)
        return jnp.pad(nrm((c,), mean=1.0), (0, cp - c), constant_values=1.0)

    def bn_beta(c):
        return jnp.zeros((_round_up(c, 128),), jnp.float32)

    # NLayerDiscriminator (n_layers=3): weights_init => conv N(0,.02), BN g N(1,.02)
    disc = {
        "conv0": _prep_conv(nrm((ndf, disc_in_channels, 4, 4)),
                            jnp.zeros((ndf,), jnp.float32), stride=2, pad=1),
        "conv1": _prep_conv(nrm((ndf * 2, ndf, 4, 4)), None, stride=2, pad=1),
        "bn1_g": bn_gamma(ndf * 2), "bn1_b": bn_beta(ndf * 2),
        "conv2": _prep_conv(nrm((ndf * 4, ndf * 2, 4, 4)), None, stride=2, pad=1),
        "bn2_g": bn_gamma(ndf * 4), "bn2_b": bn_beta(ndf * 4),
        "conv3": _prep_conv(nrm((ndf * 8, ndf * 4, 4, 4)), None, stride=1, pad=1),
        "bn3_g": bn_gamma(ndf * 8), "bn3_b": bn_beta(ndf * 8),
        "conv4": _prep_conv(nrm((1, ndf * 8, 4, 4)),
                            jnp.zeros((1,), jnp.float32), stride=1, pad=1),
    }
    return {"vgg": vgg, "lins": lins, "disc": disc,
            "logvar": jnp.full((1,), logvar_init, jnp.float32)}


if __name__ == "__main__":
    key = jax.random.PRNGKey(0)
    kp, k1, k2, k3 = jax.random.split(key, 4)
    params = init_params(kp)

    B, C, H, W = 2, 3, 32, 32          # >=24 spatial needed by the 5-conv PatchGAN
    inputs = jax.random.normal(k1, (B, C, H, W), jnp.float32)
    reconstructions = inputs + 0.1 * jax.random.normal(k2, (B, C, H, W), jnp.float32)
    # posterior parameters: concat(mean, logvar) of a 4-channel 8x8 latent
    posterior_params = jax.random.normal(k3, (B, 8, 8, 8), jnp.float32)

    ae_loss, d_loss, log_ae, log_disc = lpips_with_discriminator_forward(
        params, inputs, reconstructions, posterior_params,
        global_step=1, disc_start=0)

    jax.block_until_ready((ae_loss, d_loss, log_ae, log_disc))
    print("KERNEL_OK")
</pallas_src>

<mosaic_0001>
module attributes {stable_mosaic.version = 11 : i64} {
  func.func @_conv_tap_kernel(%arg0: i32, %arg1: i32, %arg2: memref<1x1190x128xbf16, #tpu.memory_space<vmem>>, %arg3: memref<9x128x128xbf16, #tpu.memory_space<vmem>>, %arg4: memref<1x128xf32, #tpu.memory_space<vmem>>, %arg5: memref<1x1088x128xbf16, #tpu.memory_space<vmem>>, %arg6: memref<1088x128xf32, #tpu.memory_space<vmem>>) attributes {dimension_semantics = [#tpu.dimension_semantics<parallel>, #tpu.dimension_semantics<parallel>], iteration_bounds = array<i64: 4, 1>, scalar_prefetch = 0 : i64, scratch_operands = 1 : i64, tpu.core_type = #tpu.core_type<tc>, window_params = [{transform_indices = @transform_0, window_bounds = array<i64: 1, 1190, 128>}, {transform_indices = @transform_1, window_bounds = array<i64: 9, 128, 128>}, {transform_indices = @transform_2, window_bounds = array<i64: 1, 128>}, {transform_indices = @transform_3, window_bounds = array<i64: 1, 1088, 128>}]} {
    %c0 = arith.constant 0 : index
    %c0_0 = arith.constant 0 : index
    %c0_1 = arith.constant 0 : index
    %0 = vector.load %arg2[%c0, %c0_0, %c0_1] : memref<1x1190x128xbf16, #tpu.memory_space<vmem>>, vector<1x1088x128xbf16>
    %1 = vector.shape_cast %0 : vector<1x1088x128xbf16> to vector<1088x128xbf16>
    %c0_2 = arith.constant 0 : index
    %c0_3 = arith.constant 0 : index
    %c0_4 = arith.constant 0 : index
    %2 = vector.load %arg3[%c0_2, %c0_3, %c0_4] : memref<9x128x128xbf16, #tpu.memory_space<vmem>>, vector<1x128x128xbf16>
    %3 = vector.shape_cast %2 : vector<1x128x128xbf16> to vector<128x128xbf16>
    %cst = arith.constant dense<0.000000e+00> : vector<1088x128xf32>
    %4 = tpu.matmul %1, %3, %cst {dimension_numbers = #tpu.dot_dimension_numbers<[1], [0], [0], [1], [0, 0, 1, 1], [], []>} : vector<1088x128xbf16>, vector<128x128xbf16>, vector<1088x128xf32> -> vector<1088x128xf32>
    %c0_5 = arith.constant 0 : index
    %c0_6 = arith.constant 0 : index
    %5 = vector.load %arg6[%c0_5, %c0_6] : memref<1088x128xf32, #tpu.memory_space<vmem>>, vector<1088x128xf32>
    tpu.vector_store %arg6[%c0_5, %c0_6], %4 {strides = array<i32>} : memref<1088x128xf32, #tpu.memory_space<vmem>>, vector<1088x128xf32>,
    %c0_7 = arith.constant 0 : index
    %c1 = arith.constant 1 : index
    %c0_8 = arith.constant 0 : index
    %6 = vector.load %arg2[%c0_7, %c1, %c0_8] : memref<1x1190x128xbf16, #tpu.memory_space<vmem>>, vector<1x1088x128xbf16>
    %7 = vector.shape_cast %6 : vector<1x1088x128xbf16> to vector<1088x128xbf16>
    %c1_9 = arith.constant 1 : index
    %c0_10 = arith.constant 0 : index
    %c0_11 = arith.constant 0 : index
    %8 = vector.load %arg3[%c1_9, %c0_10, %c0_11] : memref<9x128x128xbf16, #tpu.memory_space<vmem>>, vector<1x128x128xbf16>
    %9 = vector.shape_cast %8 : vector<1x128x128xbf16> to vector<128x128xbf16>
    %cst_12 = arith.constant dense<0.000000e+00> : vector<1088x128xf32>
    %10 = tpu.matmul %7, %9, %cst_12 {dimension_numbers = #tpu.dot_dimension_numbers<[1], [0], [0], [1], [0, 0, 1, 1], [], []>} : vector<1088x128xbf16>, vector<128x128xbf16>, vector<1088x128xf32> -> vector<1088x128xf32>
    %c0_13 = arith.constant 0 : index
    %c0_14 = arith.constant 0 : index
    %11 = vector.load %arg6[%c0_13, %c0_14] : memref<1088x128xf32, #tpu.memory_space<vmem>>, vector<1088x128xf32>
    %12 = arith.addf %11, %10 : vector<1088x128xf32>
    %c0_15 = arith.constant 0 : index
    %c0_16 = arith.constant 0 : index
    %13 = vector.load %arg6[%c0_15, %c0_16] : memref<1088x128xf32, #tpu.memory_space<vmem>>, vector<1088x128xf32>
    tpu.vector_store %arg6[%c0_15, %c0_16], %12 {strides = array<i32>} : memref<1088x128xf32, #tpu.memory_space<vmem>>, vector<1088x128xf32>,
    %c0_17 = arith.constant 0 : index
    %c2 = arith.constant 2 : index
    %c0_18 = arith.constant 0 : index
    %14 = vector.load %arg2[%c0_17, %c2, %c0_18] : memref<1x1190x128xbf16, #tpu.memory_space<vmem>>, vector<1x1088x128xbf16>
    %15 = vector.shape_cast %14 : vector<1x1088x128xbf16> to vector<1088x128xbf16>
    %c2_19 = arith.constant 2 : index
    %c0_20 = arith.constant 0 : index
    %c0_21 = arith.constant 0 : index
    %16 = vector.load %arg3[%c2_19, %c0_20, %c0_21] : memref<9x128x128xbf16, #tpu.memory_space<vmem>>, vector<1x128x128xbf16>
    %17 = vector.shape_cast %16 : vector<1x128x128xbf16> to vector<128x128xbf16>
    %cst_22 = arith.constant dense<0.000000e+00> : vector<1088x128xf32>
    %18 = tpu.matmul %15, %17, %cst_22 {dimension_numbers = #tpu.dot_dimension_numbers<[1], [0], [0], [1], [0, 0, 1, 1], [], []>} : vector<1088x128xbf16>, vector<128x128xbf16>, vector<1088x128xf32> -> vector<1088x128xf32>
    %c0_23 = arith.constant 0 : index
    %c0_24 = arith.constant 0 : index
    %19 = vector.load %arg6[%c0_23, %c0_24] : memref<1088x128xf32, #tpu.memory_space<vmem>>, vector<1088x128xf32>
    %20 = arith.addf %19, %18 : vector<1088x128xf32>
    %c0_25 = arith.constant 0 : index
    %c0_26 = arith.constant 0 : index
    %21 = vector.load %arg6[%c0_25, %c0_26] : memref<1088x128xf32, #tpu.memory_space<vmem>>, vector<1088x128xf32>
    tpu.vector_store %arg6[%c0_25, %c0_26], %20 {strides = array<i32>} : memref<1088x128xf32, #tpu.memory_space<vmem>>, vector<1088x128xf32>,
    %c0_27 = arith.constant 0 : index
    %c34 = arith.constant 34 : index
    %c0_28 = arith.constant 0 : index
    %22 = vector.load %arg2[%c0_27, %c34, %c0_28] : memref<1x1190x128xbf16, #tpu.memory_space<vmem>>, vector<1x1088x128xbf16>
    %23 = vector.shape_cast %22 : vector<1x1088x128xbf16> to vector<1088x128xbf16>
    %c3 = arith.constant 3 : index
    %c0_29 = arith.constant 0 : index
    %c0_30 = arith.constant 0 : index
    %24 = vector.load %arg3[%c3, %c0_29, %c0_30] : memref<9x128x128xbf16, #tpu.memory_space<vmem>>, vector<1x128x128xbf16>
    %25 = vector.shape_cast %24 : vector<1x128x128xbf16> to vector<128x128xbf16>
    %cst_31 = arith.constant dense<0.000000e+00> : vector<1088x128xf32>
    %26 = tpu.matmul %23, %25, %cst_31 {dimension_numbers = #tpu.dot_dimension_numbers<[1], [0], [0], [1], [0, 0, 1, 1], [], []>} : vector<1088x128xbf16>, vector<128x128xbf16>, vector<1088x128xf32> -> vector<1088x128xf32>
    %c0_32 = arith.constant 0 : index
    %c0_33 = arith.constant 0 : index
    %27 = vector.load %arg6[%c0_32, %c0_33] : memref<1088x128xf32, #tpu.memory_space<vmem>>, vector<1088x128xf32>
    %28 = arith.addf %27, %26 : vector<1088x128xf32>
    %c0_34 = arith.constant 0 : index
    %c0_35 = arith.constant 0 : index
    %29 = vector.load %arg6[%c0_34, %c0_35] : memref<1088x128xf32, #tpu.memory_space<vmem>>, vector<1088x128xf32>
    tpu.vector_store %arg6[%c0_34, %c0_35], %28 {strides = array<i32>} : memref<1088x128xf32, #tpu.memory_space<vmem>>, vector<1088x128xf32>,
    %c0_36 = arith.constant 0 : index
    %c35 = arith.constant 35 : index
    %c0_37 = arith.constant 0 : index
    %30 = vector.load %arg2[%c0_36, %c35, %c0_37] : memref<1x1190x128xbf16, #tpu.memory_space<vmem>>, vector<1x1088x128xbf16>
    %31 = vector.shape_cast %30 : vector<1x1088x128xbf16> to vector<1088x128xbf16>
    %c4 = arith.constant 4 : index
    %c0_38 = arith.constant 0 : index
    %c0_39 = arith.constant 0 : index
    %32 = vector.load %arg3[%c4, %c0_38, %c0_39] : memref<9x128x128xbf16, #tpu.memory_space<vmem>>, vector<1x128x128xbf16>
    %33 = vector.shape_cast %32 : vector<1x128x128xbf16> to vector<128x128xbf16>
    %cst_40 = arith.constant dense<0.000000e+00> : vector<1088x128xf32>
    %34 = tpu.matmul %31, %33, %cst_40 {dimension_numbers = #tpu.dot_dimension_numbers<[1], [0], [0], [1], [0, 0, 1, 1], [], []>} : vector<1088x128xbf16>, vector<128x128xbf16>, vector<1088x128xf32> -> vector<1088x128xf32>
    %c0_41 = arith.constant 0 : index
    %c0_42 = arith.constant 0 : index
    %35 = vector.load %arg6[%c0_41, %c0_42] : memref<1088x128xf32, #tpu.memory_space<vmem>>, vector<1088x128xf32>
    %36 = arith.addf %35, %34 : vector<1088x128xf32>
    %c0_43 = arith.constant 0 : index
    %c0_44 = arith.constant 0 : index
    %37 = vector.load %arg6[%c0_43, %c0_44] : memref<1088x128xf32, #tpu.memory_space<vmem>>, vector<1088x128xf32>
    tpu.vector_store %arg6[%c0_43, %c0_44], %36 {strides = array<i32>} : memref<1088x128xf32, #tpu.memory_space<vmem>>, vector<1088x128xf32>,
    %c0_45 = arith.constant 0 : index
    %c36 = arith.constant 36 : index
    %c0_46 = arith.constant 0 : index
    %38 = vector.load %arg2[%c0_45, %c36, %c0_46] : memref<1x1190x128xbf16, #tpu.memory_space<vmem>>, vector<1x1088x128xbf16>
    %39 = vector.shape_cast %38 : vector<1x1088x128xbf16> to vector<1088x128xbf16>
    %c5 = arith.constant 5 : index
    %c0_47 = arith.constant 0 : index
    %c0_48 = arith.constant 0 : index
    %40 = vector.load %arg3[%c5, %c0_47, %c0_48] : memref<9x128x128xbf16, #tpu.memory_space<vmem>>, vector<1x128x128xbf16>
    %41 = vector.shape_cast %40 : vector<1x128x128xbf16> to vector<128x128xbf16>
    %cst_49 = arith.constant dense<0.000000e+00> : vector<1088x128xf32>
    %42 = tpu.matmul %39, %41, %cst_49 {dimension_numbers = #tpu.dot_dimension_numbers<[1], [0], [0], [1], [0, 0, 1, 1], [], []>} : vector<1088x128xbf16>, vector<128x128xbf16>, vector<1088x128xf32> -> vector<1088x128xf32>
    %c0_50 = arith.constant 0 : index
    %c0_51 = arith.constant 0 : index
    %43 = vector.load %arg6[%c0_50, %c0_51] : memref<1088x128xf32, #tpu.memory_space<vmem>>, vector<1088x128xf32>
    %44 = arith.addf %43, %42 : vector<1088x128xf32>
    %c0_52 = arith.constant 0 : index
    %c0_53 = arith.constant 0 : index
    %45 = vector.load %arg6[%c0_52, %c0_53] : memref<1088x128xf32, #tpu.memory_space<vmem>>, vector<1088x128xf32>
    tpu.vector_store %arg6[%c0_52, %c0_53], %44 {strides = array<i32>} : memref<1088x128xf32, #tpu.memory_space<vmem>>, vector<1088x128xf32>,
    %c0_54 = arith.constant 0 : index
    %c68 = arith.constant 68 : index
    %c0_55 = arith.constant 0 : index
    %46 = vector.load %arg2[%c0_54, %c68, %c0_55] : memref<1x1190x128xbf16, #tpu.memory_space<vmem>>, vector<1x1088x128xbf16>
    %47 = vector.shape_cast %46 : vector<1x1088x128xbf16> to vector<1088x128xbf16>
    %c6 = arith.constant 6 : index
    %c0_56 = arith.constant 0 : index
    %c0_57 = arith.constant 0 : index
    %48 = vector.load %arg3[%c6, %c0_56, %c0_57] : memref<9x128x128xbf16, #tpu.memory_space<vmem>>, vector<1x128x128xbf16>
    %49 = vector.shape_cast %48 : vector<1x128x128xbf16> to vector<128x128xbf16>
    %cst_58 = arith.constant dense<0.000000e+00> : vector<1088x128xf32>
    %50 = tpu.matmul %47, %49, %cst_58 {dimension_numbers = #tpu.dot_dimension_numbers<[1], [0], [0], [1], [0, 0, 1, 1], [], []>} : vector<1088x128xbf16>, vector<128x128xbf16>, vector<1088x128xf32> -> vector<1088x128xf32>
    %c0_59 = arith.constant 0 : index
    %c0_60 = arith.constant 0 : index
    %51 = vector.load %arg6[%c0_59, %c0_60] : memref<1088x128xf32, #tpu.memory_space<vmem>>, vector<1088x128xf32>
    %52 = arith.addf %51, %50 : vector<1088x128xf32>
    %c0_61 = arith.constant 0 : index
    %c0_62 = arith.constant 0 : index
    %53 = vector.load %arg6[%c0_61, %c0_62] : memref<1088x128xf32, #tpu.memory_space<vmem>>, vector<1088x128xf32>
    tpu.vector_store %arg6[%c0_61, %c0_62], %52 {strides = array<i32>} : memref<1088x128xf32, #tpu.memory_space<vmem>>, vector<1088x128xf32>,
    %c0_63 = arith.constant 0 : index
    %c69 = arith.constant 69 : index
    %c0_64 = arith.constant 0 : index
    %54 = vector.load %arg2[%c0_63, %c69, %c0_64] : memref<1x1190x128xbf16, #tpu.memory_space<vmem>>, vector<1x1088x128xbf16>
    %55 = vector.shape_cast %54 : vector<1x1088x128xbf16> to vector<1088x128xbf16>
    %c7 = arith.constant 7 : index
    %c0_65 = arith.constant 0 : index
    %c0_66 = arith.constant 0 : index
    %56 = vector.load %arg3[%c7, %c0_65, %c0_66] : memref<9x128x128xbf16, #tpu.memory_space<vmem>>, vector<1x128x128xbf16>
    %57 = vector.shape_cast %56 : vector<1x128x128xbf16> to vector<128x128xbf16>
    %cst_67 = arith.constant dense<0.000000e+00> : vector<1088x128xf32>
    %58 = tpu.matmul %55, %57, %cst_67 {dimension_numbers = #tpu.dot_dimension_numbers<[1], [0], [0], [1], [0, 0, 1, 1], [], []>} : vector<1088x128xbf16>, vector<128x128xbf16>, vector<1088x128xf32> -> vector<1088x128xf32>
    %c0_68 = arith.constant 0 : index
    %c0_69 = arith.constant 0 : index
    %59 = vector.load %arg6[%c0_68, %c0_69] : memref<1088x128xf32, #tpu.memory_space<vmem>>, vector<1088x128xf32>
    %60 = arith.addf %59, %58 : vector<1088x128xf32>
    %c0_70 = arith.constant 0 : index
    %c0_71 = arith.constant 0 : index
    %61 = vector.load %arg6[%c0_70, %c0_71] : memref<1088x128xf32, #tpu.memory_space<vmem>>, vector<1088x128xf32>
    tpu.vector_store %arg6[%c0_70, %c0_71], %60 {strides = array<i32>} : memref<1088x128xf32, #tpu.memory_space<vmem>>, vector<1088x128xf32>,
    %c0_72 = arith.constant 0 : index
    %c70 = arith.constant 70 : index
    %c0_73 = arith.constant 0 : index
    %62 = vector.load %arg2[%c0_72, %c70, %c0_73] : memref<1x1190x128xbf16, #tpu.memory_space<vmem>>, vector<1x1088x128xbf16>
    %63 = vector.shape_cast %62 : vector<1x1088x128xbf16> to vector<1088x128xbf16>
    %c8 = arith.constant 8 : index
    %c0_74 = arith.constant 0 : index
    %c0_75 = arith.constant 0 : index
    %64 = vector.load %arg3[%c8, %c0_74, %c0_75] : memref<9x128x128xbf16, #tpu.memory_space<vmem>>, vector<1x128x128xbf16>
    %65 = vector.shape_cast %64 : vector<1x128x128xbf16> to vector<128x128xbf16>
    %cst_76 = arith.constant dense<0.000000e+00> : vector<1088x128xf32>
    %66 = tpu.matmul %63, %65, %cst_76 {dimension_numbers = #tpu.dot_dimension_numbers<[1], [0], [0], [1], [0, 0, 1, 1], [], []>} : vector<1088x128xbf16>, vector<128x128xbf16>, vector<1088x128xf32> -> vector<1088x128xf32>
    %c0_77 = arith.constant 0 : index
    %c0_78 = arith.constant 0 : index
    %67 = vector.load %arg6[%c0_77, %c0_78] : memref<1088x128xf32, #tpu.memory_space<vmem>>, vector<1088x128xf32>
    %68 = arith.addf %67, %66 : vector<1088x128xf32>
    %c0_79 = arith.constant 0 : index
    %c0_80 = arith.constant 0 : index
    %69 = vector.load %arg6[%c0_79, %c0_80] : memref<1088x128xf32, #tpu.memory_space<vmem>>, vector<1088x128xf32>
    tpu.vector_store %arg6[%c0_79, %c0_80], %68 {strides = array<i32>} : memref<1088x128xf32, #tpu.memory_space<vmem>>, vector<1088x128xf32>,
    %c0_81 = arith.constant 0 : index
    %c0_82 = arith.constant 0 : index
    %70 = vector.load %arg6[%c0_81, %c0_82] : memref<1088x128xf32, #tpu.memory_space<vmem>>, vector<1088x128xf32>
    %c0_83 = arith.constant 0 : index
    %c0_84 = arith.constant 0 : index
    %71 = vector.load %arg4[%c0_83, %c0_84] : memref<1x128xf32, #tpu.memory_space<vmem>>, vector<1x128xf32>
    %72 = vector.broadcast %71 : vector<1x128xf32> to vector<1088x128xf32>
    %73 = arith.addf %70, %72 : vector<1088x128xf32>
    %cst_85 = arith.constant 0.000000e+00 : f32
    %74 = vector.broadcast %cst_85 : f32 to vector<1088x128xf32>
    %75 = arith.maximumf %73, %74 : vector<1088x128xf32>
    %76 = vector.shape_cast %75 : vector<1088x128xf32> to vector<1x1088x128xf32>
    %77 = arith.truncf %76 : vector<1x1088x128xf32> to vector<1x1088x128xbf16>
    %c0_86 = arith.constant 0 : index
    %c0_87 = arith.constant 0 : index
    %c0_88 = arith.constant 0 : index
    %78 = vector.load %arg5[%c0_86, %c0_87, %c0_88] : memref<1x1088x128xbf16, #tpu.memory_space<vmem>>, vector<1x1088x128xbf16>
    tpu.vector_store %arg5[%c0_86, %c0_87, %c0_88], %77 {strides = array<i32>} : memref<1x1088x128xbf16, #tpu.memory_space<vmem>>, vector<1x1088x128xbf16>,
    return
  }
  func.func @transform_0(%arg0: i32, %arg1: i32) -> (i32, i32, i32) {
    %c0_i32 = arith.constant 0 : i32
    %c0_i32_0 = arith.constant 0 : i32
    %c0_i32_1 = arith.constant 0 : i32
    return %arg0, %c0_i32, %c0_i32_0 : i32, i32, i32
  }
  func.func @transform_1(%arg0: i32, %arg1: i32) -> (i32, i32, i32) {
    %c0_i32 = arith.constant 0 : i32
    %c0_i32_0 = arith.constant 0 : i32
    %c0_i32_1 = arith.constant 0 : i32
    return %c0_i32, %c0_i32_0, %arg1 : i32, i32, i32
  }
  func.func @transform_2(%arg0: i32, %arg1: i32) -> (i32, i32) {
    %c0_i32 = arith.constant 0 : i32
    %c0_i32_0 = arith.constant 0 : i32
    return %c0_i32, %arg1 : i32, i32
  }
  func.func @transform_3(%arg0: i32, %arg1: i32) -> (i32, i32, i32) {
    %c0_i32 = arith.constant 0 : i32
    %c0_i32_0 = arith.constant 0 : i32
    return %arg0, %c0_i32, %arg1 : i32, i32, i32
  }
}

</mosaic_0001>

<bundles_post_ra>
// kernel: tpu_custom_call.1
= control target key start
LH: loop header
LB: loop body
LE: loop exit
PB: predicated region body
PF: predicated region fallthrough
CT: control target
= control target key end

     0   :  { %8 = vsyncpa [#allocation4], 0  ;;  %s25537_s0 = inlined_call_operand.vmem [shape: bf16[4,1190,128], index: 0, kind: input, shape index: {}]   ;;  %s25538_s1 = inlined_call_operand.vmem [shape: bf16[9,128,128], index: 1, kind: input, shape index: {}]   ;;  %s25539_s2 = inlined_call_operand.vmem [shape: f32[1,128], index: 2, kind: input, shape index: {}]   ;;  %s25540_s3 = inlined_call_operand.hbm [shape: bf16[4,1088,128], index: 3, kind: output, shape index: {}]  }
   0x1   :  { %10 = vsyncpa [#allocation4 + $0x1], 0  ;;  %s23543_s12 = smov 0   ;;  %s23545_s13 = smov 0  }
   0x2   :  { %s23547_s14 = smov 0   ;;  %s23549_s15 = smov 0  }
   0x3   :  { %s23551_s16 = smov 0   ;;  %s23553_s17 = smov 0  }
   0x4 LB: > { %s18008_s18 = sadd.s32 4294967295, %s23518_s17   ;;  %s18009_s19 = sadd.s32 4294967294, %s23518_s17   ;;  %s23518_s17 = sphi %s23553_s17, %s16_s17   ;;  %s23514_s16 = sphi %s23551_s16, %s25613_s16   ;;  %s23510_s15 = sphi %s23549_s15, %s25612_s15   ;;  %s23506_s14 = sphi %s23547_s14, %s25611_s14   ;;  %s23502_s13 = sphi %s23545_s13, %s25610_s13   ;;  %s23498_s12 = sphi %s23543_s12, %s25609_s12  }
   0x5   : > { %s28_s20 = sadd.s32 1, %s23514_s16  ;;  %s115_s21 = sadd.s32 1, %s23506_s14 }
   0x6   : > { %p30_p0 = scmp.ge.s32.totalorder %s28_s20, 4  ;;  %p125_p1 = scmp.ne.s32.totalorder %s23506_s14, %s23502_s13 }
   0x7   : > { %p126_p2 = scmp.eq.s32.totalorder %s18008_s18, 3  ;;  %p131_p3 = scmp.ne.s32.totalorder %s23502_s13, %s23498_s12 }
   0x8   : > { %s25615_s20 = smov (%p30_p0, %s28_s20), 0  ;;  %p132_p5 = scmp.eq.s32.totalorder %s18009_s19, 3 }
   0x9   : > { %p23583_p4 = por %p126_p2, %p125_p1  ;;  %s110_s23 = ssub.s32 %s23514_s16, %s25615_s20 }
   0xa   : > { %p18014_p6 = scmp.ge.s32.totalorder %s23518_s17, 1  ;;  %p113_p7 = scmp.eq.s32.totalorder %s110_s23, 0 }
   0xb   : > { %p23590_p8 = por %p132_p5, %p131_p3  ;;  %p171_p9 = scmp.lt.s32.totalorder %s23518_s17, 5 }
   0xc   : > { %s23596_s25 = scalar_select %p113_p7, %s23506_s14, %s115_s21  }
   0xd   : > { %p172_p10 = pnand %p18014_p6, %p171_p9 }
   0xf   : > { %175 = sbr.rel (%p172_p10) target bundleno = 1510 (0x5e6), region = 32 }
  0x16   : > { %v22735_v0 = vld [vmem:[%s25538_s1] sm:$0xff]   ;;  %v22737_v2 = vld [vmem:[%s25538_s1 + $0x8] sm:$0xff]   ;;  %p202_p11 = scmp.lt.s32.totalorder %s23510_s15, 3  ;;  %v22739_v4 = vld [vmem:[%s25538_s1 + $0x10] sm:$0xff]   ;;  %vm7651_vm0 = vsmask.f32 6400 }
  0x17   : > { %v22736_v1 = vld [vmem:[%s25538_s1 + $0x100] sm:$0xff]   ;;  %20203 = vmatprep.subr.bf16.mxu1 %v22735_v0  ;;  %v22738_v3 = vld [vmem:[%s25538_s1 + $0x108] sm:$0xff]   ;;  %v22740_v5 = vld [vmem:[%s25538_s1 + $0x110] sm:$0xff]   ;;  %vm9870_vm1 = vcmask 1045504   ;;  %vm2033_vm2 = vsmask.f32 7424 }
  0x18   : > { %20811 = vmatprep.subr.bf16.mxu0 %v22736_v1  ;;  %20204 = vmatpush3.bf16.msra.mxu1 %v22735_v0  ;;  %s203_s11 = scalar_select %p202_p11, %s23510_s15, 3  ;;  %v22741_v6 = vld [vmem:[%s25538_s1 + $0x18] sm:$0xff]   ;;  %v22743_v8 = vld [vmem:[%s25538_s1 + $0x20] sm:$0xff]   ;;  %v22745_v10 = vld [vmem:[%s25538_s1 + $0x28] sm:$0xff]   ;;  %vm4180_vm3 = vcmask 1046528   ;;  %vm15560_vm5 = vcmask 1044480  }
  0x19   : > { %20812 = vmatpush3.bf16.msra.mxu0 %v22736_v1  ;;  %20205 = vmatprep.subr.bf16.mxu1 %v22737_v2  ;;  %v22742_v7 = vld [vmem:[%s25538_s1 + $0x118] sm:$0xff]   ;;  %v22744_v9 = vld [vmem:[%s25538_s1 + $0x120] sm:$0xff]   ;;  %v22746_v11 = vld [vmem:[%s25538_s1 + $0x128] sm:$0xff]   ;;  %vm13341_vm4 = vsmask.f32 5376  ;;  %s199_s19 = sand.u32 1, %s23502_s13  }
  0x1a   : > { %20813 = vmatprep.subr.bf16.mxu0 %v22738_v3  ;;  %s22676_s26 = smul.u32 596, %s203_s11  ;;  %v22747_v15 = vld [vmem:[%s25538_s1 + $0x30] sm:$0xff]   ;;  %v22749_v26 = vld [vmem:[%s25538_s1 + $0x38] sm:$0xff]   ;;  %v22755_v34 = vld [vmem:[%s25538_s1 + $0x40] sm:$0xff]   ;;  %s23520_s6 = smov [#allocation3]  }
  0x1b   : > { %v22748_v16 = vld [vmem:[%s25538_s1 + $0x130] sm:$0xff]   ;;  %v22750_v29 = vld [vmem:[%s25538_s1 + $0x138] sm:$0xff]   ;;  %v22757_v42 = vld [vmem:[%s25538_s1 + $0x140] sm:$0xff]   ;;  %s25149_s21 = smul.u32 544, %s199_s19  ;;  %s23444_s7 = sshll.u32 %s23520_s6, 4  ;;  %s23445_s7 = int_to_ptr.vmem [resolvable:$false] %s23444_s7 }
  0x1c   : > { %20206 = vmatpush3.bf16.msra.mxu1 %v22737_v2  ;;  %s23639_s10 = scalar_lea.vmem %s25537_s0, %s22676_s26  ;;  %v22766_v59 = vld [vmem:[%s25538_s1 + $0x148] sm:$0xff]   ;;  %s22677_s27 = smul.u32 8704, %s23510_s15 }
  0x1d   : > { %20814 = vmatpush3.bf16.msra.mxu0 %v22738_v3  ;;  %20207 = vmatprep.subr.bf16.mxu1 %v22739_v4  ;;  %v22751_v12 = vld [vmem:[%s23639_s10] sm:$0xff]   ;;  %v22752_v13 = vld [vmem:[%s23639_s10 + $0x10] sm:$0xfe]   ;;  %v22753_v14 = vld [vmem:[%s23639_s10 + $0x18] sm:$0xff]   ;;  %s25166_s23 = scalar_lea.vmem [#allocation3], %s25149_s21  ;;  %s25491_s15 = scalar_lea.sflag [#allocation4], %s199_s19 }
  0x1e   : > { %20815 = vmatprep.subr.bf16.mxu0 %v22740_v5  ;;  %20219 = vmatprep.mubr.bf16.mxu1 %v22751_v12  ;;  %v7653_v17 = vshrl.u32 %v22752_v13, 16  ;;  %v7656_v18 = vshll.u32 %v22752_v13, 16  ;;  %v7661_v19 = vshrl.u32 %v22753_v14, 16  ;;  %v7664_v20 = vshll.u32 %v22753_v14, 16  ;;  %v22756_v25 = vld [vmem:[%s23639_s10 + $0x20] sm:$0xff]   ;;  %v22759_v32 = vld [vmem:[%s23639_s10 + $0x28] sm:$0xff]   ;;  %s25483_s4 = scalar_lea.hbm %s25540_s3, %s22677_s27 }
  0x1f   : > { %v7670_v30 = vshrl.u32 %v22756_v25, 16  ;;  %v7673_v31 = vshll.u32 %v22756_v25, 16  ;;  %v7679_v37 = vshrl.u32 %v22759_v32, 16  ;;  %v7682_v38 = vshll.u32 %v22759_v32, 16  ;;  %v22761_v39 = vld [vmem:[%s23639_s10 + $0x30] sm:$0xff]   ;;  %v22754_v40 = vld [vmem:[%s23639_s10 + $0x8] sm:$0xff]  }
  0x20   : > { %20208 = vmatpush3.bf16.msra.mxu1 %v22739_v4  ;;  %v7655_v21 = vrot.slane %v7653_v17, 1  ;;  %v7658_v22 = vrot.slane %v7656_v18, 2  ;;  %v7663_v23 = vrot.slane %v7661_v19, 1  ;;  %v7666_v24 = vrot.slane %v7664_v20, 2  ;;  %v22763_v47 = vld [vmem:[%s23639_s10 + $0x38] sm:$0xff]   ;;  %v22758_v48 = vld [vmem:[%s23639_s10 + $0x10] sm:$0xff]  }
  0x21   : > { %20816 = vmatpush3.bf16.msra.mxu0 %v22740_v5  ;;  %20209 = vmatprep.subr.bf16.mxu1 %v22741_v6  ;;  %v7672_v35 = vrot.slane %v7670_v30, 1  ;;  %v7675_v36 = vrot.slane %v7673_v31, 2  ;;  %v7681_v43 = vrot.slane %v7679_v37, 1  ;;  %v7684_v44 = vrot.slane %v7682_v38, 2  ;;  %v22765_v55 = vld [vmem:[%s23639_s10 + $0x40] sm:$0xff]   ;;  %v22768_v63 = vld [vmem:[%s23639_s10 + $0x48] sm:$0xff]  }
  0x22   : > { %20817 = vmatprep.subr.bf16.mxu0 %v22742_v7  ;;  %v7659_v27 = vor.u32 %v7658_v22, %v7655_v21  ;;  %v7667_v28 = vor.u32 %v7666_v24, %v7663_v23  ;;  %v7688_v45 = vshrl.u32 %v22761_v39, 16  ;;  %v7691_v46 = vshll.u32 %v22761_v39, 16  ;;  %v22760_v0 = vld [vmem:[%s23639_s10 + $0x18] sm:$0xff]   ;;  %v22762_v2 = vld [vmem:[%s23639_s10 + $0x20] sm:$0xff]   ;;  %v22770_v5 = vld [vmem:[%s23639_s10 + $0x50] sm:$0xff]   ;;  %s17909_s28 = sshll.u32 %s25166_s23, 4  ;;  %s25485_s28 = int_to_ptr.vmem [resolvable:$true] %s17909_s28 }
  0x23   : > { %v7676_v41 = vor.u32 %v7675_v36, %v7672_v35  ;;  %v7685_v49 = vor.u32 %v7684_v44, %v7681_v43  ;;  %v7697_v53 = vshrl.u32 %v22763_v47, 16  ;;  %v7700_v54 = vshll.u32 %v22763_v47, 16  ;;  %v22772_v12 = vld [vmem:[%s23639_s10 + $0x58] sm:$0xff]   ;;  %v22775_v17 = vld [vmem:[%s25538_s1 + $0x48] sm:$0xff]   ;;  %v22776_v18 = vld [vmem:[%s25538_s1 + $0x150] sm:$0xff]   ;;  %s23440_s5 = scalar_lea.vmem %s25485_s28, 8704  ;;  %p23447_p1 = scmp.lt.s32.totalorder %s25485_s28, %s23445_s7 }
  0x24   : > { %20210 = vmatpush3.bf16.msra.mxu1 %v22741_v6  ;;  %v7668_v33 = vsel %vm7651_vm0, %v7659_v27, %v7667_v28  ;;  %v7690_v50 = vrot.slane %v7688_v45, 1  ;;  %v7693_v52 = vrot.slane %v7691_v46, 2  ;;  %v7706_v60 = vshrl.u32 %v22765_v55, 16  ;;  %v22767_v22 = vld [vmem:[%s23639_s10 + $0x30] sm:$0xff]   ;;  %v22774_v25 = vld [vmem:[%s23639_s10 + $0x60] sm:$0xff]   ;;  %v22778_v27 = vld [vmem:[%s23639_s10 + $0x68] sm:$0xff]   ;;  %p23441_p12 = scmp.ne.s32.totalorder %s25485_s28, %s23440_s5 }
  0x25   : > { %20818 = vmatpush3.bf16.msra.mxu0 %v22742_v7  ;;  %20211 = vmatprep.subr.bf16.mxu1 %v22743_v8  ;;  %v7677_v51 = vsel %vm7651_vm0, %v7667_v28, %v7676_v41  ;;  %v7686_v56 = vsel %vm7651_vm0, %v7676_v41, %v7685_v49  ;;  %v7699_v57 = vrot.slane %v7697_v53, 1  ;;  %v7702_v58 = vrot.slane %v7700_v54, 2  ;;  %v22769_v32 = vld [vmem:[%s23639_s10 + $0x38] sm:$0xff]   ;;  %v22771_v38 = vld [vmem:[%s23639_s10 + $0x40] sm:$0xff]   ;;  %v22780_v39 = vld [vmem:[%s23639_s10 + $0x70] sm:$0xff]   ;;  %s23446_s8 = scalar_lea.vmem %s23445_s7, 17408 }
  0x26   : > { %20819 = vmatprep.subr.bf16.mxu0 %v22744_v9  ;;  %20827 = vmatprep.mubr.bf16.mxu0 %v7668_v33  ;;  %v7694_v61 = vor.u32 %v7693_v52, %v7690_v50  ;;  %v7709_v62 = vshll.u32 %v22765_v55, 16  ;;  %v7715_v3 = vshrl.u32 %v22768_v63, 16  ;;  %v7718_v4 = vshll.u32 %v22768_v63, 16  ;;  %v22782_v47 = vld [vmem:[%s23639_s10 + $0x78] sm:$0xff]   ;;  %v22777_v55 = vld [vmem:[%s23639_s10 + $0x50] sm:$0xff]   ;;  %p23442_p13 = pnand %p23441_p12, %p23583_p4  ;;  %p23448_p2 = scmp.lt.s32.totalorder %s23446_s8, %s23440_s5 }
  0x27   : > { %v7703_v1 = vor.u32 %v7702_v58, %v7699_v57  ;;  %v7708_v7 = vrot.slane %v7706_v60, 1  ;;  %v7724_v13 = vshrl.u32 %v22770_v5, 16  ;;  %v7727_v14 = vshll.u32 %v22770_v5, 16  ;;  %v22787_v60 = vld [vmem:[%s23639_s10 + $0x88] sm:$0xff]  }
  0x28   : > { %20212 = vmatpush3.bf16.msra.mxu1 %v22743_v8  ;;  %v7695_v6 = vsel %vm7651_vm0, %v7685_v49, %v7694_v61  ;;  %v7711_v8 = vrot.slane %v7709_v62, 2  ;;  %v7733_v20 = vshrl.u32 %v22772_v12, 16  ;;  %v7736_v21 = vshll.u32 %v22772_v12, 16  ;;  %p23443_p0 = pneg %p23442_p13  ;;  %p23449_p3 = por %p23448_p2, %p23447_p1 }
  0x29   : > { %20820 = vmatpush3.bf16.msra.mxu0 %v22744_v9  ;;  %20213 = vmatprep.subr.bf16.mxu1 %v22745_v10  ;;  %v7717_v9 = vrot.slane %v7715_v3, 1  ;;  %v7726_v23 = vrot.slane %v7724_v13, 1  ;;  %v7729_v24 = vrot.slane %v7727_v14, 2  ;;  %v7742_v33 = vshrl.u32 %v22774_v25, 16  ;;  %v22779_v3 = vld [vmem:[%s23639_s10 + $0x58] sm:$0xff]  }
  0x2a   : > { %20821 = vmatprep.subr.bf16.mxu0 %v22746_v11  ;;  %v7738_v30 = vrot.slane %v7736_v21, 2  ;;  %v7751_v35 = vshrl.u32 %v22778_v27, 16  ;;  %v7754_v36 = vshll.u32 %v22778_v27, 16  ;;  %v7763_v49 = vshll.u32 %v22780_v39, 16  ;;  %v22783_v21 = vld [vmem:[%s23639_s10 + $0x68] sm:$0xff]   ;;  %p23450_p5 = pnand %p23449_p3, %p23443_p0 }
  0x2b   : > { %v7730_v31 = vor.u32 %v7729_v24, %v7726_v23  ;;  %v7769_v53 = vshrl.u32 %v22782_v47, 16  ;;  %v7772_v54 = vshll.u32 %v22782_v47, 16 }
  0x2c   : > { %20214 = vmatpush3.bf16.msra.mxu1 %v22745_v10  ;;  %v7704_v10 = vsel %vm7651_vm0, %v7694_v61, %v7703_v1  ;;  %v7753_v45 = vrot.slane %v7751_v35, 1  ;;  %v7756_v46 = vrot.slane %v7754_v36, 2  ;;  %v7765_v57 = vrot.slane %v7763_v49, 2 }
  0x2d   : > { %20822 = vmatpush3.bf16.msra.mxu0 %v22746_v11  ;;  %20215 = vmatprep.subr.bf16.mxu1 %v22747_v15  ;;  %v7720_v11 = vrot.slane %v7718_v4, 2  ;;  %v7771_v62 = vrot.slane %v7769_v53, 1  ;;  %v7774_v63 = vrot.slane %v7772_v54, 2 }
  0x2e   : > { %20823 = vmatprep.subr.bf16.mxu0 %v22748_v16  ;;  %v7757_v52 = vor.u32 %v7756_v46, %v7753_v45  ;;  %v22813_v45 = vld [vmem:[%s25538_s1 + $0x58] sm:$0xff]   ;;  %v22814_v46 = vld [vmem:[%s25538_s1 + $0x170] sm:$0xff]  }
  0x2f   : > { %v7721_v19 = vor.u32 %v7720_v11, %v7717_v9  ;;  %v22781_v9 = vld [vmem:[%s23639_s10 + $0x60] sm:$0xff]  }
  0x30   : > { %20216 = vmatpush3.bf16.msra.mxu1 %v22747_v15  ;;  %v22764_v15 = vld [vmem:[%s23639_s10 + $0x28] sm:$0xff]  }
  0x31   : > { %20824 = vmatpush3.bf16.msra.mxu0 %v22748_v16  ;;  %20217 = vmatprep.subr.bf16.mxu1 %v22749_v26  ;;  %v7712_v16 = vor.u32 %v7711_v8, %v7708_v7  ;;  %v7731_v41 = vsel %vm7651_vm0, %v7721_v19, %v7730_v31  ;;  %v7790_v7 = vshll.u32 %v22787_v60, 16  ;;  %v7775_v8 = vor.u32 %v7774_v63, %v7771_v62  ;;  %v22803_v63 = vld [vmem:[%s23639_s10 + $0xc0] sm:$0xff]  }
  0x32   : > { %20825 = vmatprep.subr.bf16.mxu0 %v22750_v29 }
  0x33   : > { %v7722_v28 = vsel %vm7651_vm0, %v7712_v16, %v7721_v19 }
  0x34   : > { %20218 = vmatpush3.bf16.msra.mxu1 %v22749_v26  ;;  %v7713_v26 = vsel %vm7651_vm0, %v7703_v1, %v7712_v16  ;;  %v22795_v1 = vld [vmem:[%s25538_s1 + $0x160] sm:$0xff]   ;;  %v7792_v16 = vrot.slane %v7790_v7, 2  ;;  %v7850_v7 = vshrl.u32 %v22803_v63, 16 }
  0x35   : > { %20826 = vmatpush3.bf16.msra.mxu0 %v22750_v29  ;;  %20355 = vmatprep.subr.bf16.mxu1 %v22755_v34  ;;  %v7735_v29 = vrot.slane %v7733_v20, 1 }
  0x36   : > { %20963 = vmatprep.subr.bf16.mxu0 %v22757_v42 }
  0x37   : > { %20220 = vmatmul.mubr.bf16.vlgmr.msra.gmra.mrb[0].mxu1 %v22754_v40  ;;  %v7739_v37 = vor.u32 %v7738_v30, %v7735_v29  ;;  %v22785_v40 = vld [vmem:[%s25538_s1 + $0x158] sm:$0xff]  }
  0x38   : > { %20828 = vmatmul.mubr.bf16.vlgmr.msra.gmra.mrb[0].mxu0 %v7677_v51  ;;  %20356 = vmatpush3.bf16.msra.mxu1 %v22755_v34  ;;  %v7745_v34 = vshll.u32 %v22774_v25, 16  ;;  %v22773_v51 = vld [vmem:[%s23639_s10 + $0x48] sm:$0xff]  }
  0x39   : > { %20964 = vmatpush3.bf16.msra.mxu0 %v22757_v42  ;;  %20223 = vmatprep.mubr.bf16.mxu1 %v22758_v48  ;;  %v7744_v42 = vrot.slane %v7742_v33, 1  ;;  %v7740_v44 = vsel %vm7651_vm0, %v7730_v31, %v7739_v37  ;;  %v7760_v48 = vshrl.u32 %v22780_v39, 16  ;;  %v22804_v25 = vld [vmem:[%s25538_s1 + $0x168] sm:$0xff]   ;;  %v22788_v39 = vld [vmem:[%s23639_s10 + $0x78] sm:$0xff]  }
  0x3a   : > { %20831 = vmatprep.mubr.bf16.mxu0 %v7686_v56  ;;  %20965 = vmatprep.subr.bf16.mxu0 %v22766_v59  ;;  %v7747_v43 = vrot.slane %v7745_v34, 2  ;;  %v22797_v31 = vld [vmem:[%s23639_s10 + $0xa8] sm:$0xff]  }
  0x3b   : > { %20357 = vmatprep.subr.bf16.mxu1 %v22775_v17  ;;  %v7762_v56 = vrot.slane %v7760_v48, 1 }
  0x3c   : > { %20358 = vmatpush3.bf16.msra.mxu1 %v22775_v17  ;;  %v7748_v50 = vor.u32 %v7747_v43, %v7744_v42  ;;  %v22791_v17 = vld [vmem:[%s23639_s10 + $0x98] sm:$0xff]   ;;  %v7826_v42 = vshll.u32 %v22797_v31, 16  ;;  %v22799_v43 = vld [vmem:[%s23639_s10 + $0xb0] sm:$0xff]  }
  0x3d   : > { %20966 = vmatpush3.bf16.msra.mxu0 %v22766_v59  ;;  %v22784_v59 = vld [vmem:[%s23639_s10 + $0x80] sm:$0xff]   ;;  %v7805_v23 = vshrl.u32 %v22791_v17, 16  ;;  %v7808_v24 = vshll.u32 %v22791_v17, 16  ;;  %v7832_v53 = vshrl.u32 %v22799_v43, 16  ;;  %v7835_v54 = vshll.u32 %v22799_v43, 16 }
  0x3e   : > { %20967 = vmatprep.subr.bf16.mxu0 %v22776_v18  ;;  %v7749_v58 = vsel %vm7651_vm0, %v7739_v37, %v7748_v50  ;;  %v7758_v61 = vsel %vm7651_vm0, %v7748_v50, %v7757_v52  ;;  %v7778_v4 = vshrl.u32 %v22784_v59, 16  ;;  %v7781_v5 = vshll.u32 %v22784_v59, 16 }
  0x3f   : > { %20224 = vmatmul.mubr.bf16.gmra.mrb[4].mxu1 %v22760_v0  ;;  %v22794_v0 = vld [vmem:[%s25538_s1 + $0x50] sm:$0xff]   ;;  %v7807_v33 = vrot.slane %v7805_v23, 1  ;;  %v7810_v34 = vrot.slane %v7808_v24, 2  ;;  %v7837_v62 = vrot.slane %v7835_v54, 2 }
  0x40   : > { %20832 = vmatmul.mubr.bf16.gmra.mrb[4].mxu0 %v7695_v6  ;;  %20227 = vmatprep.mubr.bf16.mxu1 %v22762_v2  ;;  %v7766_v2 = vor.u32 %v7765_v57, %v7762_v56  ;;  %v7787_v6 = vshrl.u32 %v22787_v60, 16  ;;  %v7780_v12 = vrot.slane %v7778_v4, 1  ;;  %v7783_v13 = vrot.slane %v7781_v5, 2  ;;  %v22792_v56 = vld [vmem:[%s23639_s10 + $0x88] sm:$0xff]   ;;  %v22796_v60 = vld [vmem:[%s23639_s10 + $0x90] sm:$0xff]   ;;  %v22798_v5 = vld [vmem:[%s23639_s10 + $0x98] sm:$0xff]  }
  0x41   : > { %20835 = vmatprep.mubr.bf16.mxu0 %v7704_v10  ;;  %20968 = vmatpush3.bf16.msra.mxu0 %v22776_v18  ;;  %v22789_v10 = vld [vmem:[%s23639_s10 + $0x90] sm:$0xff]   ;;  %v22806_v4 = vld [vmem:[%s23639_s10 + $0xc8] sm:$0xff]  }
  0x42   : > { %20969 = vmatprep.subr.bf16.mxu0 %v22785_v40  ;;  %20359 = vmatprep.subr.bf16.mxu1 %v22794_v0  ;;  %v7767_v11 = vsel %vm7651_vm0, %v7757_v52, %v7766_v2  ;;  %v7789_v14 = vrot.slane %v7787_v6, 1  ;;  %v7796_v18 = vshrl.u32 %v22789_v10, 16  ;;  %v7799_v19 = vshll.u32 %v22789_v10, 16  ;;  %v22801_v52 = vld [vmem:[%s23639_s10 + $0xb8] sm:$0xff]  }
  0x43   : > { %20360 = vmatpush3.bf16.msra.mxu1 %v22794_v0  ;;  %v7784_v20 = vor.u32 %v7783_v13, %v7780_v12  ;;  %v7844_v59 = vshll.u32 %v22801_v52, 16  ;;  %v7862_v12 = vshll.u32 %v22806_v4, 16  ;;  %v22800_v13 = vld [vmem:[%s23639_s10 + $0xa0] sm:$0xff]  }
  0x44   : > { %v7798_v27 = vrot.slane %v7796_v18, 1  ;;  %v7801_v30 = vrot.slane %v7799_v19, 2  ;;  %20361 = vmatprep.subr.bf16.mxu1 %v22813_v45  ;;  %v22810_v18 = vld [vmem:[%s23639_s10 + $0xd8] sm:$0xff]  }
  0x45   : > { %20970 = vmatpush3.bf16.msra.mxu0 %v22785_v40  ;;  %v7785_v29 = vsel %vm7651_vm0, %v7775_v8, %v7784_v20  ;;  %v22790_v40 = vld [vmem:[%s23639_s10 + $0x80] sm:$0xff]  }
  0x46   : > { %20971 = vmatprep.subr.bf16.mxu0 %v22795_v1  ;;  %v7802_v36 = vor.u32 %v7801_v30, %v7798_v27 }
  0x47   : > { %20228 = vmatmul.mubr.bf16.gmra.mrb[8].mxu1 %v22764_v15  ;;  %v7776_v15 = vsel %vm7651_vm0, %v7766_v2, %v7775_v8  ;;  %v7853_v8 = vshll.u32 %v22803_v63, 16  ;;  %v22815_v63 = vld [vmem:[%s23639_s10 + $0xd0] sm:$0xff]  }
  0x48   : > { %20836 = vmatmul.mubr.bf16.gmra.mrb[8].mxu0 %v7713_v26  ;;  %20231 = vmatprep.mubr.bf16.mxu1 %v22767_v22  ;;  %v7793_v22 = vor.u32 %v7792_v16, %v7789_v14  ;;  %v22786_v26 = vld [vmem:[%s23639_s10 + $0x70] sm:$0xff]   ;;  %v7852_v16 = vrot.slane %v7850_v7, 1 }
  0x49   : > { %20839 = vmatprep.mubr.bf16.mxu0 %v7722_v28  ;;  %20972 = vmatpush3.bf16.msra.mxu0 %v22795_v1  ;;  %v22793_v28 = vld [vmem:[%s23639_s10 + $0xa0] sm:$0xff]   ;;  %v22808_v14 = vld [vmem:[%s23639_s10 + $0xd0] sm:$0xff]   ;;  %v7855_v17 = vrot.slane %v7853_v8, 2 }
  0x4a   : > { %20973 = vmatprep.subr.bf16.mxu0 %v22804_v25  ;;  %v7814_v35 = vshrl.u32 %v22793_v28, 16  ;;  %v7817_v37 = vshll.u32 %v22793_v28, 16  ;;  %v7803_v47 = vsel %vm7651_vm0, %v7793_v22, %v7802_v36  ;;  %20362 = vmatpush3.bf16.msra.mxu1 %v22813_v45  ;;  %v7871_v23 = vshll.u32 %v22808_v14, 16 }
  0x4b   : > { %v7856_v24 = vor.u32 %v7855_v17, %v7852_v16  ;;  %v7880_v28 = vshll.u32 %v22810_v18, 16  ;;  %v22819_v16 = vld [vmem:[%s23639_s10 + $0xe0] sm:$0xff]  }
  0x4c   : > { %v7819_v48 = vrot.slane %v7817_v37, 2 }
  0x4d   : > { %20974 = vmatpush3.bf16.msra.mxu0 %v22804_v25  ;;  %v7877_v25 = vshrl.u32 %v22810_v18, 16  ;;  %v7882_v37 = vrot.slane %v7880_v28, 2  ;;  %v22827_v18 = vld [vmem:[%s23639_s10 + $0x110] sm:$0xff]  }
  0x4e   : > { %20975 = vmatprep.subr.bf16.mxu0 %v22814_v46 }
  0x4f   : > { %20232 = vmatmul.mubr.bf16.gmra.mrb[12].mxu1 %v22769_v32  ;;  %v7794_v32 = vsel %vm7651_vm0, %v7784_v20, %v7793_v22  ;;  %v7868_v22 = vshrl.u32 %v22808_v14, 16 }
  0x50   : > { %20840 = vmatmul.mubr.bf16.gmra.mrb[12].mxu0 %v7731_v41  ;;  %20235 = vmatprep.mubr.bf16.mxu1 %v22771_v38  ;;  %v7823_v38 = vshrl.u32 %v22797_v31, 16  ;;  %v7811_v41 = vor.u32 %v7810_v34, %v7807_v33  ;;  %v7873_v31 = vrot.slane %v7871_v23, 2  ;;  %v7879_v34 = vrot.slane %v7877_v25, 1 }
  0x51   : > { %20843 = vmatprep.mubr.bf16.mxu0 %v7740_v44  ;;  %v7816_v44 = vrot.slane %v7814_v35, 1  ;;  %20976 = vmatpush3.bf16.msra.mxu0 %v22814_v46  ;;  %v7870_v30 = vrot.slane %v7868_v22, 1  ;;  %v22816_v35 = vld [vmem:[%s23639_s10 + $0xe8] sm:$0xff]   ;;  %v7940_v25 = vshrl.u32 %v22827_v18, 16 }
  0x52   : > { %v7825_v49 = vrot.slane %v7823_v38, 1  ;;  %v7812_v50 = vsel %vm7651_vm0, %v7802_v36, %v7811_v41  ;;  %v22836_v38 = vld [vmem:[%s25538_s1 + $0x60] sm:$0xff]   ;;  %v7895_v43 = vshrl.u32 %v22816_v35, 16  ;;  %v7883_v45 = vor.u32 %v7882_v37, %v7879_v34 }
  0x53   : > { %20363 = vmatprep.subr.bf16.mxu1 %v22836_v38  ;;  %v7898_v46 = vshll.u32 %v22816_v35, 16 }
  0x54   : > { %20364 = vmatpush3.bf16.msra.mxu1 %v22836_v38 }
  0x55   : > { %v7900_v54 = vrot.slane %v7898_v46, 2 }
  0x57   : > { %20236 = vmatmul.mubr.bf16.gmra.mrb[16].mxu1 %v22773_v51  ;;  %v7828_v51 = vrot.slane %v7826_v42, 2 }
  0x58   : > { %20844 = vmatmul.mubr.bf16.gmra.mrb[16].mxu0 %v7749_v58  ;;  %20239 = vmatprep.mubr.bf16.mxu1 %v22777_v55  ;;  %v7820_v55 = vor.u32 %v7819_v48, %v7816_v44  ;;  %v7841_v58 = vshrl.u32 %v22801_v52, 16  ;;  %v22807_v44 = vld [vmem:[%s23639_s10 + $0xb8] sm:$0xff]   ;;  %v7897_v52 = vrot.slane %v7895_v43, 1 }
  0x59   : > { %20847 = vmatprep.mubr.bf16.mxu0 %v7758_v61  ;;  %v7829_v57 = vor.u32 %v7828_v51, %v7825_v49  ;;  %v7834_v61 = vrot.slane %v7832_v53, 1  ;;  %v22818_v49 = vld [vmem:[%s23639_s10 + $0xf0] sm:$0xff]  }
  0x5a   : > { %v7821_v0 = vsel %vm7651_vm0, %v7811_v41, %v7820_v55  ;;  %v7843_v2 = vrot.slane %v7841_v58, 1  ;;  %v7874_v41 = vor.u32 %v7873_v31, %v7870_v30  ;;  %v22821_v31 = vld [vmem:[%s23639_s10 + $0xe8] sm:$0xff]  }
  0x5b   : > { %v7830_v1 = vsel %vm7651_vm0, %v7820_v55, %v7829_v57  ;;  %v7838_v6 = vor.u32 %v7837_v62, %v7834_v61  ;;  %v22820_v55 = vld [vmem:[%s23639_s10 + $0xf8] sm:$0xff]  }
  0x5c   : > { %v7884_v53 = vsel %vm7651_vm0, %v7874_v41, %v7883_v45  ;;  %v7913_v61 = vshrl.u32 %v22820_v55, 16  ;;  %v7916_v62 = vshll.u32 %v22820_v55, 16 }
  0x5e   : > { %v7918_v7 = vrot.slane %v7916_v62, 2  ;;  %v22840_v62 = vld [vmem:[%s23639_s10 + $0x28] sm:$0xff]  }
  0x5f   : > { %20240 = vmatmul.mubr.bf16.gmra.mrb[20].mxu1 %v22779_v3  ;;  %v7846_v3 = vrot.slane %v7844_v59, 2  ;;  %v7907_v59 = vshll.u32 %v22818_v49, 16 }
  0x60   : > { %20848 = vmatmul.mubr.bf16.gmra.mrb[20].mxu0 %v7767_v11  ;;  %20243 = vmatprep.mubr.bf16.mxu1 %v22781_v9  ;;  %v22825_v9 = vld [vmem:[%s25538_s1 + $0x178] sm:$0xff]   ;;  %v7859_v11 = vshrl.u32 %v22806_v4, 16  ;;  %v22824_v4 = vld [vmem:[%s23639_s10 + $0x108] sm:$0xff]  }
  0x61   : > { %20851 = vmatprep.mubr.bf16.mxu0 %v7776_v15  ;;  %v7847_v10 = vor.u32 %v7846_v3, %v7843_v2  ;;  %20977 = vmatprep.subr.bf16.mxu0 %v22825_v9  ;;  %v7839_v15 = vsel %vm7651_vm0, %v7829_v57, %v7838_v6  ;;  %v22811_v57 = vld [vmem:[%s23639_s10 + $0xc8] sm:$0xff]   ;;  %v7909_v3 = vrot.slane %v7907_v59, 2 }
  0x62   : > { %20978 = vmatpush3.bf16.msra.mxu0 %v22825_v9  ;;  %v7861_v20 = vrot.slane %v7859_v11, 1  ;;  %v7931_v11 = vshrl.u32 %v22824_v4, 16 }
  0x63   : > { %v7848_v19 = vsel %vm7651_vm0, %v7838_v6, %v7847_v10  ;;  %v7857_v33 = vsel %vm7651_vm0, %v7847_v10, %v7856_v24  ;;  %v7915_v6 = vrot.slane %v7913_v61, 1 }
  0x65   : > { %v7919_v14 = vor.u32 %v7918_v7, %v7915_v6  ;;  %v22891_v6 = vld [vmem:[%s25538_s1 + $0x78] sm:$0xff]  }
  0x67   : > { %20244 = vmatmul.mubr.bf16.gmra.mrb[24].mxu1 %v22783_v21  ;;  %v7864_v21 = vrot.slane %v7862_v12, 2  ;;  %v22855_v12 = vld [vmem:[%s25538_s1 + $0x68] sm:$0xff]  }
  0x68   : > { %20852 = vmatmul.mubr.bf16.gmra.mrb[24].mxu0 %v7785_v29  ;;  %20247 = vmatprep.mubr.bf16.mxu1 %v22786_v26  ;;  %v22802_v26 = vld [vmem:[%s23639_s10 + $0xa8] sm:$0xff]   ;;  %v22805_v29 = vld [vmem:[%s23639_s10 + $0xb0] sm:$0xff]  }
  0x69   : > { %20855 = vmatprep.mubr.bf16.mxu0 %v7794_v32  ;;  %v7865_v27 = vor.u32 %v7864_v21, %v7861_v20  ;;  %v22812_v32 = vld [vmem:[%s23639_s10 + $0xe0] sm:$0xff]   ;;  %20365 = vmatprep.subr.bf16.mxu1 %v22855_v12  ;;  %v7933_v21 = vrot.slane %v7931_v11, 1 }
  0x6a   : > { %v7889_v42 = vshll.u32 %v22812_v32, 16  ;;  %20366 = vmatpush3.bf16.msra.mxu1 %v22855_v12  ;;  %v22874_v12 = vld [vmem:[%s25538_s1 + $0x190] sm:$0xff]  }
  0x6b   : > { %v7866_v36 = vsel %vm7651_vm0, %v7856_v24, %v7865_v27  ;;  %v22829_v24 = vld [vmem:[%s23639_s10 + $0x118] sm:$0xff]  }
  0x6c   : > { %v7891_v51 = vrot.slane %v7889_v42, 2  ;;  %v7952_v30 = vshll.u32 %v22829_v24, 16 }
  0x6f   : > { %20248 = vmatmul.mubr.bf16.gmra.mrb[28].mxu1 %v22788_v39  ;;  %v7886_v39 = vshrl.u32 %v22812_v32, 16  ;;  %v22823_v32 = vld [vmem:[%s23639_s10 + $0xf0] sm:$0xff]  }
  0x70   : > { %20856 = vmatmul.mubr.bf16.gmra.mrb[28].mxu0 %v7803_v47  ;;  %20251 = vmatprep.mubr.bf16.mxu1 %v22790_v40  ;;  %v23769_v40 = vld [vmem:[%s25538_s1 + $0x180] sm:$0xff]  }
  0x71   : > { %20859 = vmatprep.mubr.bf16.mxu0 %v7812_v50  ;;  %21115 = vmatprep.subr.bf16.mxu0 %v23769_v40  ;;  %v22809_v47 = vld [vmem:[%s23639_s10 + $0xc0] sm:$0xff]   ;;  %v7888_v48 = vrot.slane %v7886_v39, 1  ;;  %v7875_v50 = vsel %vm7651_vm0, %v7865_v27, %v7874_v41  ;;  %v7943_v27 = vshll.u32 %v22827_v18, 16  ;;  %v7954_v39 = vrot.slane %v7952_v30, 2  ;;  %v22826_v41 = vld [vmem:[%s23639_s10 + $0xf8] sm:$0xff]  }
  0x72   : > { %v22854_v30 = vld [vmem:[%s23639_s10 + $0x60] sm:$0xff]  }
  0x73   : > { %v7892_v58 = vor.u32 %v7891_v51, %v7888_v48  ;;  %v7945_v35 = vrot.slane %v7943_v27, 2  ;;  %v22834_v48 = vld [vmem:[%s23639_s10 + $0x18] sm:$0xff]   ;;  %v22849_v27 = vld [vmem:[%s23639_s10 + $0x148] sm:$0xff]  }
  0x75   : > { %v7893_v2 = vsel %vm7651_vm0, %v7883_v45, %v7892_v58  ;;  %v22828_v45 = vld [vmem:[%s23639_s10 + $0x100] sm:$0xff]  }
  0x77   : > { %20252 = vmatmul.mubr.bf16.gmra.mrb[32].mxu1 %v22792_v56  ;;  %v7904_v56 = vshrl.u32 %v22818_v49, 16 }
  0x78   : > { %20860 = vmatmul.mubr.bf16.gmra.mrb[32].mxu0 %v7821_v0  ;;  %20255 = vmatprep.mubr.bf16.mxu1 %v22796_v60  ;;  %v7901_v60 = vor.u32 %v7900_v54, %v7897_v52 }
  0x79   : > { %20863 = vmatprep.mubr.bf16.mxu0 %v7830_v1  ;;  %v7906_v0 = vrot.slane %v7904_v56, 1  ;;  %v22822_v1 = vld [vmem:[%s23639_s10 + $0x100] sm:$0xff]   ;;  %v9872_v56 = vrot.slane %v22834_v48, 2  ;;  %v22861_v48 = vld [vmem:[%s23639_s10 + $0x170] sm:$0xff]  }
  0x7a   : > { %v7922_v8 = vshrl.u32 %v22822_v1, 16  ;;  %v7925_v9 = vshll.u32 %v22822_v1, 16  ;;  %v22839_v1 = vld [vmem:[%s23639_s10 + $0x120] sm:$0xff]  }
  0x7b   : > { %v7910_v10 = vor.u32 %v7909_v3, %v7906_v0  ;;  %v22842_v3 = vld [vmem:[%s23639_s10 + $0x30] sm:$0xff]  }
  0x7c   : > { %v7924_v17 = vrot.slane %v7922_v8, 1  ;;  %v7927_v20 = vrot.slane %v7925_v9, 2  ;;  %v22856_v8 = vld [vmem:[%s25538_s1 + $0x188] sm:$0xff]  }
  0x7d   : > { %v7920_v22 = vsel %vm7651_vm0, %v7910_v10, %v7919_v14  ;;  %v22841_v9 = vld [vmem:[%s23639_s10 + $0x128] sm:$0xff]  }
  0x7f   : > { %20256 = vmatmul.mubr.bf16.gmra.mrb[36].mxu1 %v22798_v5  ;;  %v7902_v5 = vsel %vm7651_vm0, %v7892_v58, %v7901_v60  ;;  %v22832_v58 = vld [vmem:[%s23639_s10 + $0x110] sm:$0xff]  }
  0x80   : > { %20864 = vmatmul.mubr.bf16.gmra.mrb[36].mxu0 %v7839_v15  ;;  %20259 = vmatprep.mubr.bf16.mxu1 %v22800_v13  ;;  %v22817_v13 = vld [vmem:[%s23639_s10 + $0xd8] sm:$0xff]   ;;  %v7934_v15 = vshll.u32 %v22824_v4, 16 }
  0x81   : > { %20867 = vmatprep.mubr.bf16.mxu0 %v7848_v19  ;;  %v7911_v19 = vsel %vm7651_vm0, %v7901_v60, %v7910_v10  ;;  %v22837_v60 = vld [vmem:[%s23639_s10 + $0x20] sm:$0xff]   ;;  %v22844_v4 = vld [vmem:[%s23639_s10 + $0x38] sm:$0xff]   ;;  %v9878_v10 = vrot.slane %v22842_v3, 2 }
  0x82   : > { %v7936_v23 = vrot.slane %v7934_v15, 2  ;;  %v9874_v0 = vrot.slane %v22837_v60, 2  ;;  %v9880_v11 = vrot.slane %v22844_v4, 2  ;;  %v22868_v60 = vld [vmem:[%s23639_s10 + $0x90] sm:$0xff]   ;;  %v22872_v4 = vld [vmem:[%s23639_s10 + $0xa0] sm:$0xff]  }
  0x84   : > { %v7937_v28 = vor.u32 %v7936_v23, %v7933_v21  ;;  %v22847_v21 = vld [vmem:[%s23639_s10 + $0x140] sm:$0xff]   ;;  %v22850_v23 = vld [vmem:[%s23639_s10 + $0x50] sm:$0xff]  }
  0x87   : > { %20260 = vmatmul.mubr.bf16.gmra.mrb[40].mxu1 %v22802_v26  ;;  %v7928_v26 = vor.u32 %v7927_v20, %v7924_v17  ;;  %v22892_v17 = vld [vmem:[%s25538_s1 + $0x198] sm:$0xff]  }
  0x88   : > { %20868 = vmatmul.mubr.bf16.gmra.mrb[40].mxu0 %v7857_v33  ;;  %20263 = vmatprep.mubr.bf16.mxu1 %v22805_v29  ;;  %v7949_v29 = vshrl.u32 %v22829_v24, 16  ;;  %v7942_v33 = vrot.slane %v7940_v25, 1  ;;  %v22845_v20 = vld [vmem:[%s23639_s10 + $0x138] sm:$0xff]  }
  0x89   : > { %20871 = vmatprep.mubr.bf16.mxu0 %v7866_v36  ;;  %v7929_v34 = vsel %vm7651_vm0, %v7919_v14, %v7928_v26  ;;  %v22831_v36 = vld [vmem:[%s23639_s10 + $0x120] sm:$0xff]   ;;  %v7938_v37 = vsel %vm7651_vm0, %v7928_v26, %v7937_v28  ;;  %v22852_v25 = vld [vmem:[%s23639_s10 + $0x58] sm:$0xff]   ;;  %v9886_v26 = vrot.slane %v22850_v23, 2 }
  0x8a   : > { %v7951_v38 = vrot.slane %v7949_v29, 1  ;;  %v7946_v42 = vor.u32 %v7945_v35, %v7942_v33  ;;  %v7958_v43 = vshrl.u32 %v22831_v36, 16  ;;  %v22846_v14 = vld [vmem:[%s23639_s10 + $0x40] sm:$0xff]   ;;  %v22851_v29 = vld [vmem:[%s23639_s10 + $0x150] sm:$0xff]   ;;  %v22858_v33 = vld [vmem:[%s23639_s10 + $0x68] sm:$0xff]  }
  0x8b   : > { %v9882_v18 = vrot.slane %v22846_v14, 2  ;;  %v22915_v35 = vld [vmem:[%s25538_s1 + $0x1a0] sm:$0xff]  }
  0x8c   : > { %v7955_v46 = vor.u32 %v7954_v39, %v7951_v38  ;;  %v7947_v49 = vsel %vm7651_vm0, %v7937_v28, %v7946_v42  ;;  %v9888_v28 = vrot.slane %v22852_v25, 2  ;;  %v22853_v38 = vld [vmem:[%s23639_s10 + $0x158] sm:$0xff]   ;;  %v22857_v39 = vld [vmem:[%s23639_s10 + $0x160] sm:$0xff]  }
  0x8e   : > { %v7956_v52 = vsel %vm7651_vm0, %v7946_v42, %v7955_v46  ;;  %v22860_v42 = vld [vmem:[%s23639_s10 + $0x70] sm:$0xff]  }
  0x8f   : > { %20264 = vmatmul.mubr.bf16.gmra.mrb[44].mxu1 %v22807_v44  ;;  %v7961_v44 = vshll.u32 %v22831_v36, 16  ;;  %v9890_v36 = vrot.slane %v22854_v30, 2 }
  0x90   : > { %20872 = vmatmul.mubr.bf16.gmra.mrb[44].mxu0 %v7875_v50  ;;  %20267 = vmatprep.mubr.bf16.mxu1 %v22809_v47  ;;  %v22873_v47 = vld [vmem:[%s25538_s1 + $0x70] sm:$0xff]   ;;  %v7960_v50 = vrot.slane %v7958_v43, 1 }
  0x91   : > { %20875 = vmatprep.mubr.bf16.mxu0 %v7884_v53  ;;  %v7963_v51 = vrot.slane %v7961_v44, 2  ;;  %20367 = vmatprep.subr.bf16.mxu1 %v22873_v47  ;;  %v22833_v53 = vld [vmem:[%s23639_s10 + $0x10] sm:$0xfc]   ;;  %v22862_v44 = vld [vmem:[%s23639_s10 + $0x78] sm:$0xff]  }
  0x92   : > { %20368 = vmatpush3.bf16.msra.mxu1 %v22873_v47  ;;  %v9871_v55 = vrot.slane %v22833_v53, 2  ;;  %v22859_v47 = vld [vmem:[%s23639_s10 + $0x168] sm:$0xff]  }
  0x93   : > { %v23807_v54 = vor.u32 %v7963_v51, %v7960_v50  ;;  %20369 = vmatprep.subr.bf16.mxu1 %v22891_v6  ;;  %v22864_v50 = vld [vmem:[%s23639_s10 + $0x80] sm:$0xff]  }
  0x94   : > { %v9873_v61 = vsel %vm9870_vm1, %v9871_v55, %v9872_v56  ;;  %v9898_v53 = vrot.slane %v22864_v50, 2  ;;  %v22863_v55 = vld [vmem:[%s23639_s10 + $0x178] sm:$0xff]   ;;  %v22895_v50 = vld [vmem:[%s23639_s10 + $0x1e8] sm:$0xff]  }
  0x95   : > { %v7965_v59 = vsel %vm7651_vm0, %v7955_v46, %v23807_v54  ;;  %v9896_v46 = vrot.slane %v22862_v44, 2  ;;  %v22893_v44 = vld [vmem:[%s23639_s10 + $0x1e0] sm:$0xff]  }
  0x96   : > { %20370 = vmatpush3.bf16.msra.mxu1 %v22891_v6  ;;  %v22876_v6 = vld [vmem:[%s23639_s10 + $0xa8] sm:$0xff]  }
  0x97   : > { %20268 = vmatmul.mubr.bf16.gmra.mrb[48].mxu1 %v22811_v57  ;;  %v22830_v57 = vld [vmem:[%s23639_s10 + $0x108] sm:$0xff]  }
  0x98   : > { %20876 = vmatmul.mubr.bf16.gmra.mrb[48].mxu0 %v7893_v2  ;;  %20271 = vmatprep.mubr.bf16.mxu1 %v22815_v63  ;;  %v22835_v63 = vld [vmem:[%s23639_s10 + $0x118] sm:$0xff]   ;;  %v9876_v2 = vrot.slane %v22840_v62, 2 }
  0x99   : > { %20879 = vmatprep.mubr.bf16.mxu0 %v7902_v5  ;;  %v9875_v5 = vsel %vm9870_vm1, %v9872_v56, %v9874_v0  ;;  %v22870_v62 = vld [vmem:[%s23639_s10 + $0x98] sm:$0xff]  }
  0x9a   : > { %v9877_v7 = vsel %vm9870_vm1, %v9874_v0, %v9876_v2  ;;  %v9879_v15 = vsel %vm9870_vm1, %v9876_v2, %v9878_v10  ;;  %v9904_v0 = vrot.slane %v22870_v62, 2  ;;  %v22869_v2 = vld [vmem:[%s23639_s10 + $0x190] sm:$0xff]   ;;  %v22901_v62 = vld [vmem:[%s23639_s10 + $0x200] sm:$0xff]  }
  0x9f   : > { %20272 = vmatmul.mubr.bf16.gmra.mrb[52].mxu1 %v22817_v13  ;;  %v22843_v13 = vld [vmem:[%s23639_s10 + $0x130] sm:$0xff]  }
  0xa0   : > { %20880 = vmatmul.mubr.bf16.gmra.mrb[52].mxu0 %v7911_v19  ;;  %20275 = vmatprep.mubr.bf16.mxu1 %v22819_v16  ;;  %v22848_v16 = vld [vmem:[%s23639_s10 + $0x48] sm:$0xff]  }
  0xa1   : > { %20883 = vmatprep.mubr.bf16.mxu0 %v7920_v22  ;;  %v9884_v19 = vrot.slane %v22848_v16, 2  ;;  %v9883_v22 = vsel %vm9870_vm1, %v9880_v11, %v9882_v18  ;;  %v22877_v16 = vld [vmem:[%s23639_s10 + $0x1a8] sm:$0xff]  }
  0xa3   : > { %v9885_v24 = vsel %vm9870_vm1, %v9882_v18, %v9884_v19  ;;  %v22882_v18 = vld [vmem:[%s23639_s10 + $0xc0] sm:$0xff]  }
  0xa4   : > { %v9914_v23 = vrot.slane %v22882_v18, 2 }
  0xa7   : > { %20276 = vmatmul.mubr.bf16.gmra.mrb[56].mxu1 %v22821_v31  ;;  %v23853_v31 = vld [vmem:[%s25538_s1 + $0x80] sm:$0xff]  }
  0xa8   : > { %20884 = vmatmul.mubr.bf16.gmra.mrb[56].mxu0 %v7929_v34  ;;  %20279 = vmatprep.mubr.bf16.mxu1 %v22823_v32  ;;  %v9887_v32 = vsel %vm9870_vm1, %v9884_v19, %v9886_v26  ;;  %v9889_v34 = vsel %vm9870_vm1, %v9886_v26, %v9888_v28  ;;  %v22883_v26 = vld [vmem:[%s23639_s10 + $0x1c0] sm:$0xff]  }
  0xa9   : > { %20887 = vmatprep.mubr.bf16.mxu0 %v7938_v37  ;;  %20507 = vmatprep.subr.bf16.mxu1 %v23853_v31  ;;  %v9892_v37 = vrot.slane %v22858_v33, 2  ;;  %v22885_v33 = vld [vmem:[%s23639_s10 + $0x1c8] sm:$0xff]  }
  0xab   : > { %v9893_v43 = vsel %vm9870_vm1, %v9890_v36, %v9892_v37 }
  0xaf   : > { %20280 = vmatmul.mubr.bf16.gmra.mrb[60].mxu1 %v22826_v41  ;;  %v9891_v41 = vsel %vm9870_vm1, %v9888_v28, %v9890_v36  ;;  %v22890_v36 = vld [vmem:[%s23639_s10 + $0xe0] sm:$0xff]  }
  0xb0   : > { %20888 = vmatmul.mubr.bf16.gmra.mrb[60].mxu0 %v7947_v49  ;;  %20283 = vmatprep.mubr.bf16.mxu1 %v22828_v45  ;;  %v9894_v45 = vrot.slane %v22860_v42, 2  ;;  %v22889_v42 = vld [vmem:[%s23639_s10 + $0x1d8] sm:$0xff]  }
  0xb1   : > { %20891 = vmatprep.mubr.bf16.mxu0 %v7956_v52  ;;  %v22866_v52 = vld [vmem:[%s23639_s10 + $0x88] sm:$0xff]  }
  0xb2   : > { %v9895_v49 = vsel %vm9870_vm1, %v9892_v37, %v9894_v45  ;;  %v9897_v51 = vsel %vm9870_vm1, %v9894_v45, %v9896_v46  ;;  %v9900_v56 = vrot.slane %v22866_v52, 2  ;;  %v22896_v45 = vld [vmem:[%s23639_s10 + $0xf0] sm:$0xff]  }
  0xb3   : > { %v22897_v52 = vld [vmem:[%s23639_s10 + $0x1f0] sm:$0xff]  }
  0xb7   : > { %20284 = vmatmul.mubr.bf16.gmra.mrb[64].mxu1 %v22830_v57  ;;  %v22933_v57 = vld [vmem:[%s25538_s1 + $0x1a8] sm:$0xff]  }
  0xb8   : > { %20892 = vmatmul.mubr.bf16.gmra.mrb[64].mxu0 %v7965_v59  ;;  %20287 = vmatprep.mubr.bf16.mxu1 %v22832_v58  ;;  %v22865_v58 = vld [vmem:[%s23639_s10 + $0x180] sm:$0xff]   ;;  %v9899_v59 = vsel %vm9870_vm1, %v9896_v46, %v9898_v53 }
  0xb9   : > { %20979 = vmatprep.mubr.bf16.mxu0 %v9873_v61  ;;  %v9901_v61 = vsel %vm9870_vm1, %v9898_v53, %v9900_v56  ;;  %v22900_v53 = vld [vmem:[%s23639_s10 + $0x100] sm:$0xff]  }
  0xbf   : > { %20288 = vmatmul.mubr.bf16.gmra.mrb[68].mxu1 %v22835_v63  ;;  %v9902_v63 = vrot.slane %v22868_v60, 2  ;;  %v22899_v60 = vld [vmem:[%s23639_s10 + $0x1f8] sm:$0xff]  }
  0xc0   : > { %20980 = vmatmul.mubr.bf16.vlgmr.msra.gmra.mrb[0].mxu0 %v9875_v5  ;;  %20291 = vmatprep.mubr.bf16.mxu1 %v22839_v1  ;;  %v22867_v1 = vld [vmem:[%s23639_s10 + $0x188] sm:$0xff]  }
  0xc1   : > { %21116 = vmatpush3.bf16.msra.mxu0 %v23769_v40  ;;  %20983 = vmatprep.mubr.bf16.mxu0 %v9877_v7  ;;  %v9881_v40 = vsel %vm9870_vm1, %v9878_v10, %v9880_v11  ;;  %v9903_v3 = vsel %vm9870_vm1, %v9900_v56, %v9902_v63  ;;  %v9905_v5 = vsel %vm9870_vm1, %v9902_v63, %v9904_v0  ;;  %v9906_v7 = vrot.slane %v22872_v4, 2  ;;  %v22875_v10 = vld [vmem:[%s23639_s10 + $0x1a0] sm:$0xff]   ;;  %v22878_v11 = vld [vmem:[%s23639_s10 + $0xb0] sm:$0xff]   ;;  %v22902_v56 = vld [vmem:[%s23639_s10 + $0x108] sm:$0xff]  }
  0xc2   : > { %21117 = vmatprep.subr.bf16.mxu0 %v22856_v8  ;;  %v22904_v63 = vld [vmem:[%s23639_s10 + $0x110] sm:$0xff]   ;;  %v22910_v4 = vld [vmem:[%s23639_s10 + $0x8] sm:$0xff]  }
  0xc5   : > { %21118 = vmatpush3.bf16.msra.mxu0 %v22856_v8  ;;  %v22871_v8 = vld [vmem:[%s23639_s10 + $0x198] sm:$0xff]  }
  0xc6   : > { %21119 = vmatprep.subr.bf16.mxu0 %v22874_v12 }
  0xc7   : > { %20292 = vmatmul.mubr.bf16.gmra.mrb[72].mxu1 %v22841_v9  ;;  %v9908_v9 = vrot.slane %v22876_v6, 2 }
  0xc8   : > { %20984 = vmatmul.mubr.bf16.gmra.mrb[4].mxu0 %v9879_v15  ;;  %20295 = vmatprep.mubr.bf16.mxu1 %v22843_v13  ;;  %v22880_v13 = vld [vmem:[%s23639_s10 + $0xb8] sm:$0xff]   ;;  %v9910_v15 = vrot.slane %v22878_v11, 2 }
  0xc9   : > { %20987 = vmatprep.mubr.bf16.mxu0 %v9881_v40  ;;  %21120 = vmatpush3.bf16.msra.mxu0 %v22874_v12  ;;  %v9907_v12 = vsel %vm9870_vm1, %v9904_v0, %v9906_v7  ;;  %v9909_v14 = vsel %vm9870_vm1, %v9906_v7, %v9908_v9  ;;  %v9912_v40 = vrot.slane %v22880_v13, 2  ;;  %v22906_v0 = vld [vmem:[%s23639_s10 + $0x118] sm:$0xff]   ;;  %v22903_v7 = vld [vmem:[%s23639_s10 + $0x208] sm:$0xff]  }
  0xca   : > { %21121 = vmatprep.subr.bf16.mxu0 %v22892_v17  ;;  %v9911_v19 = vsel %vm9870_vm1, %v9908_v9, %v9910_v15  ;;  %v22905_v9 = vld [vmem:[%s23639_s10 + $0x210] sm:$0xff]  }
  0xcb   : > { %v9915_v28 = vsel %vm9870_vm1, %v9912_v40, %v9914_v23 }
  0xcd   : > { %21122 = vmatpush3.bf16.msra.mxu0 %v22892_v17  ;;  %v22879_v17 = vld [vmem:[%s23639_s10 + $0x1b0] sm:$0xff]  }
  0xce   : > { %21123 = vmatprep.subr.bf16.mxu0 %v22915_v35 }
  0xcf   : > { %20296 = vmatmul.mubr.bf16.gmra.mrb[76].mxu1 %v22845_v20  ;;  %v22884_v20 = vld [vmem:[%s23639_s10 + $0xc8] sm:$0xff]  }
  0xd0   : > { %20988 = vmatmul.mubr.bf16.gmra.mrb[8].mxu0 %v9883_v22  ;;  %20299 = vmatprep.mubr.bf16.mxu1 %v22847_v21  ;;  %v9913_v21 = vsel %vm9870_vm1, %v9910_v15, %v9912_v40  ;;  %v22951_v22 = vld [vmem:[%s25538_s1 + $0x1b0] sm:$0xff]   ;;  %v9916_v25 = vrot.slane %v22884_v20, 2  ;;  %v22911_v15 = vld [vmem:[%s23639_s10 + $0x128] sm:$0xff]   ;;  %v22916_v20 = vld [vmem:[%s23639_s10 + $0x18] sm:$0xff]  }
  0xd1   : > { %20991 = vmatprep.mubr.bf16.mxu0 %v9885_v24  ;;  %21124 = vmatpush3.bf16.msra.mxu0 %v22915_v35  ;;  %v22881_v24 = vld [vmem:[%s23639_s10 + $0x1b8] sm:$0xff]   ;;  %v22887_v35 = vld [vmem:[%s23639_s10 + $0x1d0] sm:$0xff]  }
  0xd2   : > { %21125 = vmatprep.subr.bf16.mxu0 %v22933_v57  ;;  %v9917_v30 = vsel %vm9870_vm1, %v9914_v23, %v9916_v25  ;;  %v22912_v40 = vld [vmem:[%s23639_s10 + $0x10] sm:$0xff]   ;;  %v2046_v23 = vshrl.u32 %v22910_v4, 16 }
  0xd5   : > { %21126 = vmatpush3.bf16.msra.mxu0 %v22933_v57 }
  0xd6   : > { %21127 = vmatprep.subr.bf16.mxu0 %v22951_v22 }
  0xd7   : > { %20300 = vmatmul.mubr.bf16.gmra.mrb[80].mxu1 %v22849_v27  ;;  %v22886_v27 = vld [vmem:[%s23639_s10 + $0xd0] sm:$0xff]  }
  0xd8   : > { %20992 = vmatmul.mubr.bf16.gmra.mrb[12].mxu0 %v9887_v32  ;;  %20303 = vmatprep.mubr.bf16.mxu1 %v22851_v29  ;;  %v22888_v29 = vld [vmem:[%s23639_s10 + $0xd8] sm:$0xff]   ;;  %v9918_v32 = vrot.slane %v22886_v27, 2 }
  0xd9   : > { %20995 = vmatprep.mubr.bf16.mxu0 %v9889_v34  ;;  %21128 = vmatpush3.bf16.msra.mxu0 %v22951_v22  ;;  %v9920_v34 = vrot.slane %v22888_v29, 2  ;;  %v9940_v22 = vrot.slane %v22911_v15, 2  ;;  %v2058_v29 = vshll.u32 %v22916_v20, 16 }
  0xda   : > { %v9919_v37 = vsel %vm9870_vm1, %v9916_v25, %v9918_v32  ;;  %v22914_v25 = vld [vmem:[%s23639_s10 + $0x130] sm:$0xff]  }
  0xdf   : > { %20304 = vmatmul.mubr.bf16.gmra.mrb[84].mxu1 %v22853_v38  ;;  %v22894_v38 = vld [vmem:[%s23639_s10 + $0xe8] sm:$0xff]  }
  0xe0   : > { %20996 = vmatmul.mubr.bf16.gmra.mrb[16].mxu0 %v9891_v41  ;;  %20307 = vmatprep.mubr.bf16.mxu1 %v22857_v39  ;;  %v9921_v39 = vsel %vm9870_vm1, %v9918_v32, %v9920_v34  ;;  %v9922_v41 = vrot.slane %v22890_v36, 2  ;;  %v9942_v36 = vrot.slane %v22914_v25, 2 }
  0xe1   : > { %20999 = vmatprep.mubr.bf16.mxu0 %v9893_v43  ;;  %v9924_v43 = vrot.slane %v22894_v38, 2 }
  0xe2   : > { %v9923_v46 = vsel %vm9870_vm1, %v9920_v34, %v9922_v41 }
  0xe7   : > { %20308 = vmatmul.mubr.bf16.gmra.mrb[88].mxu1 %v22859_v47  ;;  %v22898_v47 = vld [vmem:[%s23639_s10 + $0xf8] sm:$0xff]  }
  0xe8   : > { %21000 = vmatmul.mubr.bf16.gmra.mrb[20].mxu0 %v9895_v49  ;;  %20311 = vmatprep.mubr.bf16.mxu1 %v22861_v48  ;;  %v9925_v48 = vsel %vm9870_vm1, %v9922_v41, %v9924_v43  ;;  %v9926_v49 = vrot.slane %v22896_v45, 2 }
  0xe9   : > { %21003 = vmatprep.mubr.bf16.mxu0 %v9897_v51  ;;  %v9928_v51 = vrot.slane %v22898_v47, 2  ;;  %v22921_v47 = vld [vmem:[%s23639_s10 + $0x148] sm:$0xff]  }
  0xeb   : > { %v9929_v57 = vsel %vm9870_vm1, %v9926_v49, %v9928_v51 }
  0xef   : > { %20312 = vmatmul.mubr.bf16.gmra.mrb[92].mxu1 %v22863_v55  ;;  %v9927_v55 = vsel %vm9870_vm1, %v9924_v43, %v9926_v49 }
  0xf0   : > { %21004 = vmatmul.mubr.bf16.gmra.mrb[24].mxu0 %v9899_v59  ;;  %20315 = vmatprep.mubr.bf16.mxu1 %v22865_v58  ;;  %v22969_v58 = vld [vmem:[%s25538_s1 + $0x1b8] sm:$0xff]   ;;  %v9930_v59 = vrot.slane %v22900_v53, 2 }
  0xf1   : > { %21007 = vmatprep.mubr.bf16.mxu0 %v9901_v61  ;;  %v9932_v61 = vrot.slane %v22902_v56, 2  ;;  %21129 = vmatprep.subr.bf16.mxu0 %v22969_v58 }
  0xf2   : > { %21130 = vmatpush3.bf16.msra.mxu0 %v22969_v58 }
  0xf7   : > { %20316 = vmatmul.mubr.bf16.gmra.mrb[96].mxu1 %v22867_v1  ;;  %v9931_v1 = vsel %vm9870_vm1, %v9928_v51, %v9930_v59 }
  0xf8   : > { %21008 = vmatmul.mubr.bf16.gmra.mrb[28].mxu0 %v9903_v3  ;;  %20319 = vmatprep.mubr.bf16.mxu1 %v22869_v2  ;;  %v22909_v2 = vld [vmem:[%s23639_s10] sm:$0xff]   ;;  %v9933_v3 = vsel %vm9870_vm1, %v9930_v59, %v9932_v61 }
  0xf9   : > { %21011 = vmatprep.mubr.bf16.mxu0 %v9905_v5  ;;  %v9934_v5 = vrot.slane %v22904_v63, 2  ;;  %v2037_v6 = vshll.u32 %v22909_v2, 16  ;;  %v2035_v11 = vshrl.u32 %v22909_v2, 16 }
  0xfb   : > { %v9935_v13 = vsel %vm9870_vm1, %v9932_v61, %v9934_v5  ;;  %v22950_v61 = vld [vmem:[%s25538_s1 + $0x90] sm:$0xff]  }
  0xff   : > { %20320 = vmatmul.mubr.bf16.gmra.mrb[100].mxu1 %v22871_v8  ;;  %v9936_v8 = vrot.slane %v22906_v0, 2 }
 0x100   : > { %21012 = vmatmul.mubr.bf16.gmra.mrb[32].mxu0 %v9907_v12  ;;  %20323 = vmatprep.mubr.bf16.mxu1 %v22875_v10  ;;  %v22908_v10 = vld [vmem:[%s23639_s10 + $0x120] sm:$0xff]   ;;  %v2042_v12 = vshll.u32 %v22910_v4, 16 }
 0x101   : > { %21015 = vmatprep.mubr.bf16.mxu0 %v9909_v14  ;;  %v2039_v14 = vrot.slane %v2037_v6, 1 }
 0x103   : > { %v2040_v18 = vor.u32 %v2039_v14, %v2035_v11 }
 0x107   : > { %20324 = vmatmul.mubr.bf16.gmra.mrb[104].mxu1 %v22877_v16  ;;  %v9937_v16 = vsel %vm9870_vm1, %v9934_v5, %v9936_v8 }
 0x108   : > { %21016 = vmatmul.mubr.bf16.gmra.mrb[36].mxu0 %v9911_v19  ;;  %20327 = vmatprep.mubr.bf16.mxu1 %v22879_v17  ;;  %v9938_v17 = vrot.slane %v22908_v10, 2  ;;  %v2044_v19 = vrot.slane %v2042_v12, 1  ;;  %v22926_v10 = vld [vmem:[%s23639_s10 + $0x40] sm:$0xff]  }
 0x109   : > { %21019 = vmatprep.mubr.bf16.mxu0 %v9913_v21  ;;  %v22907_v21 = vld [vmem:[%s23639_s10 + $0x218] sm:$0xff]   ;;  %v22992_v12 = vld [vmem:[%s25538_s1 + $0x1c0] sm:$0xff]  }
 0x10a   : > { %v9939_v27 = vsel %vm9870_vm1, %v9936_v8, %v9938_v17  ;;  %v9941_v32 = vsel %vm9870_vm1, %v9938_v17, %v9940_v22  ;;  %v2048_v34 = vor.u32 %v2046_v23, %v2044_v19  ;;  %v22990_v17 = vld [vmem:[%s25538_s1 + $0xa0] sm:$0xff]   ;;  %21267 = vmatprep.subr.bf16.mxu0 %v22992_v12  ;;  %v22941_v12 = vld [vmem:[%s23639_s10 + $0x190] sm:$0xff]  }
 0x10f   : > { %20328 = vmatmul.mubr.bf16.gmra.mrb[108].mxu1 %v22881_v24  ;;  %v2050_v24 = vshll.u32 %v22912_v40, 16 }
 0x110   : > { %21020 = vmatmul.mubr.bf16.gmra.mrb[40].mxu0 %v9915_v28  ;;  %20331 = vmatprep.mubr.bf16.mxu1 %v22883_v26  ;;  %v2054_v26 = vshrl.u32 %v22912_v40, 16  ;;  %v2045_v28 = vsel %vm2033_vm2, %v2040_v18, %v2044_v19  ;;  %v22928_v40 = vld [vmem:[%s23639_s10 + $0x48] sm:$0xff]   ;;  %v2098_v19 = vshll.u32 %v22926_v10, 16 }
 0x111   : > { %21023 = vmatprep.mubr.bf16.mxu0 %v9917_v30  ;;  %v22917_v30 = vld [vmem:[%s23639_s10 + $0x138] sm:$0xff]   ;;  %v2106_v25 = vshll.u32 %v22928_v40, 16 }
 0x112   : > { %v9944_v41 = vrot.slane %v22917_v30, 2 }
 0x117   : > { %20332 = vmatmul.mubr.bf16.gmra.mrb[112].mxu1 %v22885_v33  ;;  %v22918_v33 = vld [vmem:[%s23639_s10 + $0x20] sm:$0xff]  }
 0x118   : > { %21024 = vmatmul.mubr.bf16.gmra.mrb[44].mxu0 %v9919_v37  ;;  %20335 = vmatprep.mubr.bf16.mxu1 %v22887_v35  ;;  %v2052_v35 = vrot.slane %v2050_v24, 1  ;;  %v22920_v37 = vld [vmem:[%s23639_s10 + $0x28] sm:$0xff]   ;;  %v2066_v43 = vshll.u32 %v22918_v33, 16  ;;  %v2070_v45 = vshrl.u32 %v22918_v33, 16  ;;  %v2102_v24 = vshrl.u32 %v22926_v10, 16 }
 0x119   : > { %21027 = vmatprep.mubr.bf16.mxu0 %v9921_v39  ;;  %v2060_v39 = vrot.slane %v2058_v29, 1  ;;  %v2074_v49 = vshll.u32 %v22920_v37, 16  ;;  %v2078_v63 = vshrl.u32 %v22920_v37, 16  ;;  %v22930_v29 = vld [vmem:[%s23639_s10 + $0x50] sm:$0xff]   ;;  %v2110_v37 = vshrl.u32 %v22928_v40, 16 }
 0x11a   : > { %v2056_v38 = vor.u32 %v2054_v26, %v2052_v35  ;;  %v2068_v53 = vrot.slane %v2066_v43, 1 }
 0x11b   : > { %v2076_v59 = vrot.slane %v2074_v49, 1  ;;  %v22936_v49 = vld [vmem:[%s23639_s10 + $0x60] sm:$0xff]  }
 0x11c   : > { %v2061_v51 = vsel %vm2033_vm2, %v2056_v38, %v2060_v39  ;;  %v2072_v58 = vor.u32 %v2070_v45, %v2068_v53  ;;  %v2114_v38 = vshll.u32 %v22930_v29, 16 }
 0x11d   : > { %v2080_v11 = vor.u32 %v2078_v63, %v2076_v59 }
 0x11e   : > { %v2077_v5 = vsel %vm2033_vm2, %v2072_v58, %v2076_v59  ;;  %v2130_v58 = vshll.u32 %v22936_v49, 16  ;;  %v22937_v59 = vld [vmem:[%s23639_s10 + $0x180] sm:$0xff]  }
 0x11f   : > { %20336 = vmatmul.mubr.bf16.gmra.mrb[116].mxu1 %v22889_v42  ;;  %v2062_v42 = vshrl.u32 %v22916_v20, 16  ;;  %v22927_v20 = vld [vmem:[%s23639_s10 + $0x160] sm:$0xff]  }
 0x120   : > { %21028 = vmatmul.mubr.bf16.gmra.mrb[48].mxu0 %v9923_v46  ;;  %20339 = vmatprep.mubr.bf16.mxu1 %v22893_v44  ;;  %v22919_v44 = vld [vmem:[%s23639_s10 + $0x140] sm:$0xff]   ;;  %v2053_v46 = vsel %vm2033_vm2, %v2048_v34, %v2052_v35  ;;  %v2108_v34 = vrot.slane %v2106_v25, 1  ;;  %v22934_v35 = vld [vmem:[%s23639_s10 + $0x58] sm:$0xff]  }
 0x121   : > { %21031 = vmatprep.mubr.bf16.mxu0 %v9925_v48  ;;  %v9943_v48 = vsel %vm9870_vm1, %v9940_v22, %v9942_v36  ;;  %v2064_v56 = vor.u32 %v2062_v42, %v2060_v39  ;;  %v22931_v39 = vld [vmem:[%s23639_s10 + $0x170] sm:$0xff]   ;;  %v2122_v45 = vshll.u32 %v22934_v35, 16 }
 0x127   : > { %20340 = vmatmul.mubr.bf16.gmra.mrb[120].mxu1 %v22895_v50  ;;  %v22932_v50 = vld [vmem:[%s25538_s1 + $0x88] sm:$0xff]  }
 0x128   : > { %21032 = vmatmul.mubr.bf16.gmra.mrb[52].mxu0 %v9927_v55  ;;  %20343 = vmatprep.mubr.bf16.mxu1 %v22897_v52  ;;  %v9945_v52 = vsel %vm9870_vm1, %v9942_v36, %v9944_v41  ;;  %v22922_v55 = vld [vmem:[%s23639_s10 + $0x30] sm:$0xff]  }
 0x129   : > { %21035 = vmatprep.mubr.bf16.mxu0 %v9929_v57  ;;  %v9946_v57 = vrot.slane %v22919_v44, 2  ;;  %v2082_v0 = vshll.u32 %v22922_v55, 16  ;;  %v2086_v2 = vshrl.u32 %v22922_v55, 16  ;;  %v22938_v55 = vld [vmem:[%s23639_s10 + $0x68] sm:$0xff]  }
 0x12a   : > { %v2142_v10 = vshrl.u32 %v22938_v55, 16 }
 0x12b   : > { %v9947_v4 = vsel %vm9870_vm1, %v9944_v41, %v9946_v57  ;;  %v2118_v41 = vshrl.u32 %v22930_v29, 16 }
 0x12f   : > { %20344 = vmatmul.mubr.bf16.gmra.mrb[124].mxu1 %v22899_v60  ;;  %v22924_v60 = vld [vmem:[%s23639_s10 + $0x38] sm:$0xff]  }
 0x130   : > { %21036 = vmatmul.mubr.bf16.gmra.mrb[56].mxu0 %v9931_v1  ;;  %20347 = vmatprep.mubr.bf16.mxu1 %v22901_v62  ;;  %v9948_v62 = vrot.slane %v22921_v47, 2  ;;  %v22923_v1 = vld [vmem:[%s23639_s10 + $0x150] sm:$0xff]   ;;  %v2090_v6 = vshll.u32 %v22924_v60, 16  ;;  %v2094_v18 = vshrl.u32 %v22924_v60, 16  ;;  %v2134_v60 = vshrl.u32 %v22936_v49, 16 }
 0x131   : > { %21039 = vmatprep.mubr.bf16.mxu0 %v9933_v3  ;;  %v22925_v3 = vld [vmem:[%s23639_s10 + $0x158] sm:$0xff]  }
 0x132   : > { %v9949_v8 = vsel %vm9870_vm1, %v9946_v57, %v9948_v62  ;;  %v2092_v15 = vrot.slane %v2090_v6, 1  ;;  %v2126_v57 = vshrl.u32 %v22934_v35, 16 }
 0x134   : > { %v2096_v30 = vor.u32 %v2094_v18, %v2092_v15 }
 0x137   : > { %20348 = vmatmul.mubr.bf16.gmra.mrb[128].mxu1 %v22903_v7  ;;  %v22968_v7 = vld [vmem:[%s25538_s1 + $0x98] sm:$0xff]  }
 0x138   : > { %21040 = vmatmul.mubr.bf16.gmra.mrb[60].mxu0 %v9935_v13  ;;  %20351 = vmatprep.mubr.bf16.mxu1 %v22905_v9  ;;  %v2084_v9 = vrot.slane %v2082_v0, 1  ;;  %v9950_v13 = vrot.slane %v22923_v1, 2  ;;  %v2138_v0 = vshll.u32 %v22938_v55, 16  ;;  %v22939_v1 = vld [vmem:[%s23639_s10 + $0x188] sm:$0xff]  }
 0x139   : > { %21043 = vmatprep.mubr.bf16.mxu0 %v9937_v16  ;;  %v9952_v16 = vrot.slane %v22925_v3, 2  ;;  %v2132_v3 = vrot.slane %v2130_v58, 1 }
 0x13a   : > { %v2088_v14 = vor.u32 %v2086_v2, %v2084_v9  ;;  %v9951_v22 = vsel %vm9870_vm1, %v9948_v62, %v9950_v13 }
 0x13b   : > { %v9953_v26 = vsel %vm9870_vm1, %v9950_v13, %v9952_v16  ;;  %v2136_v6 = vor.u32 %v2134_v60, %v2132_v3  ;;  %v22954_v60 = vld [vmem:[%s23639_s10 + $0xa0] sm:$0xff]  }
 0x13c   : > { %v2093_v23 = vsel %vm2033_vm2, %v2088_v14, %v2092_v15 }
 0x13f   : > { %20352 = vmatmul.mubr.bf16.gmra.mrb[132].mxu1 %v22907_v21  ;;  %v2085_v21 = vsel %vm2033_vm2, %v2080_v11, %v2084_v9  ;;  %v9964_v9 = vrot.slane %v22939_v1, 2  ;;  %v22956_v1 = vld [vmem:[%s23639_s10 + $0xa8] sm:$0xff]  }
 0x140   : > { %21044 = vmatmul.mubr.bf16.gmra.mrb[64].mxu0 %v9939_v27  ;;  %20371 = vmatprep.mubr.bf16.mxu1 %v2045_v28  ;;  %v22929_v27 = vld [vmem:[%s23639_s10 + $0x168] sm:$0xff]   ;;  %v2100_v28 = vrot.slane %v2098_v19, 1 }
 0x141   : > { %21047 = vmatprep.mubr.bf16.mxu0 %v9941_v32  ;;  %v9954_v32 = vrot.slane %v22927_v20, 2  ;;  %v9956_v36 = vrot.slane %v22929_v27, 2  ;;  %v22944_v20 = vld [vmem:[%s23639_s10 + $0x80] sm:$0xff]  }
 0x142   : > { %v2104_v33 = vor.u32 %v2102_v24, %v2100_v28  ;;  %v2101_v42 = vsel %vm2033_vm2, %v2096_v30, %v2100_v28  ;;  %v2162_v29 = vshll.u32 %v22944_v20, 16  ;;  %v22945_v30 = vld [vmem:[%s23639_s10 + $0x1a0] sm:$0xff]  }
 0x143   : > { %v9955_v43 = vsel %vm9870_vm1, %v9952_v16, %v9954_v32  ;;  %v9957_v47 = vsel %vm9870_vm1, %v9954_v32, %v9956_v36  ;;  %v2166_v32 = vshrl.u32 %v22944_v20, 16 }
 0x144   : > { %v2109_v44 = vsel %vm2033_vm2, %v2104_v33, %v2108_v34 }
 0x147   : > { %20372 = vmatmul.mubr.bf16.vlgmr.msra.gmra.mrb[0].mxu1 %v2053_v46  ;;  %v22935_v46 = vld [vmem:[%s23639_s10 + $0x178] sm:$0xff]  }
 0x148   : > { %21048 = vmatmul.mubr.bf16.gmra.mrb[68].mxu0 %v9943_v48  ;;  %20508 = vmatpush3.bf16.msra.mxu1 %v23853_v31  ;;  %v2069_v31 = vsel %vm2033_vm2, %v2064_v56, %v2068_v53  ;;  %v2116_v48 = vrot.slane %v2114_v38, 1  ;;  %v2124_v53 = vrot.slane %v2122_v45, 1  ;;  %v9960_v56 = vrot.slane %v22935_v46, 2  ;;  %v22952_v46 = vld [vmem:[%s23639_s10 + $0x98] sm:$0xff]  }
 0x149   : > { %20375 = vmatprep.mubr.bf16.mxu1 %v2061_v51  ;;  %21051 = vmatprep.mubr.bf16.mxu0 %v9945_v52  ;;  %v9958_v51 = vrot.slane %v22931_v39, 2  ;;  %v2164_v39 = vrot.slane %v2162_v29, 1 }
 0x14a   : > { %20509 = vmatprep.subr.bf16.mxu1 %v22932_v50  ;;  %v2120_v52 = vor.u32 %v2118_v41, %v2116_v48  ;;  %v22948_v41 = vld [vmem:[%s23639_s10 + $0x90] sm:$0xff]  }
 0x14b   : > { %v9959_v62 = vsel %vm9870_vm1, %v9956_v36, %v9958_v51  ;;  %v9961_v2 = vsel %vm9870_vm1, %v9958_v51, %v9960_v56  ;;  %v2178_v49 = vshll.u32 %v22948_v41, 16  ;;  %v2182_v51 = vshrl.u32 %v22948_v41, 16 }
 0x14c   : > { %20510 = vmatpush3.bf16.msra.mxu1 %v22932_v50  ;;  %v2112_v50 = vor.u32 %v2110_v37, %v2108_v34  ;;  %v2125_v63 = vsel %vm2033_vm2, %v2120_v52, %v2124_v53  ;;  %v22947_v37 = vld [vmem:[%s23639_s10 + $0x1a8] sm:$0xff]  }
 0x14d   : > { %20511 = vmatprep.subr.bf16.mxu1 %v22950_v61 }
 0x14f   : > { %20376 = vmatmul.mubr.bf16.gmra.mrb[4].mxu1 %v2069_v31  ;;  %v22940_v31 = vld [vmem:[%s23639_s10 + $0x70] sm:$0xff]  }
 0x150   : > { %21052 = vmatmul.mubr.bf16.gmra.mrb[72].mxu0 %v9947_v4  ;;  %20379 = vmatprep.mubr.bf16.mxu1 %v2077_v5  ;;  %v2128_v4 = vor.u32 %v2126_v57, %v2124_v53  ;;  %v9962_v5 = vrot.slane %v22937_v59, 2  ;;  %v2146_v11 = vshll.u32 %v22940_v31, 16  ;;  %v2150_v13 = vshrl.u32 %v22940_v31, 16  ;;  %v22953_v57 = vld [vmem:[%s23639_s10 + $0x1b8] sm:$0xff]  }
 0x151   : > { %21055 = vmatprep.mubr.bf16.mxu0 %v9949_v8  ;;  %20512 = vmatpush3.bf16.msra.mxu1 %v22950_v61  ;;  %v2117_v61 = vsel %vm2033_vm2, %v2112_v50, %v2116_v48  ;;  %v22942_v8 = vld [vmem:[%s23639_s10 + $0x78] sm:$0xff]   ;;  %v22949_v50 = vld [vmem:[%s23639_s10 + $0x1b0] sm:$0xff]   ;;  %v2180_v59 = vrot.slane %v2178_v49, 1  ;;  %v2194_v31 = vshll.u32 %v22954_v60, 16 }
 0x152   : > { %20513 = vmatprep.subr.bf16.mxu1 %v22968_v7  ;;  %v2133_v14 = vsel %vm2033_vm2, %v2128_v4, %v2132_v3  ;;  %v9963_v15 = vsel %vm9870_vm1, %v9960_v56, %v9962_v5  ;;  %v2154_v40 = vshll.u32 %v22942_v8, 16  ;;  %v9965_v18 = vsel %vm9870_vm1, %v9962_v5, %v9964_v9  ;;  %v22955_v4 = vld [vmem:[%s23639_s10 + $0x1c0] sm:$0xff]  }
 0x153   : > { %v2148_v19 = vrot.slane %v2146_v11, 1  ;;  %v2158_v28 = vshrl.u32 %v22942_v8, 16  ;;  %v2186_v56 = vshll.u32 %v22952_v46, 16  ;;  %v2190_v3 = vshrl.u32 %v22952_v46, 16 }
 0x154   : > { %v2156_v25 = vrot.slane %v2154_v40, 1  ;;  %v2198_v5 = vshrl.u32 %v22954_v60, 16 }
 0x155   : > { %20514 = vmatpush3.bf16.msra.mxu1 %v22968_v7  ;;  %v2140_v7 = vrot.slane %v2138_v0, 1  ;;  %v2152_v24 = vor.u32 %v2150_v13, %v2148_v19  ;;  %v2188_v0 = vrot.slane %v2186_v56, 1  ;;  %v22958_v13 = vld [vmem:[%s23639_s10 + $0xb0] sm:$0xff]  }
 0x156   : > { %20515 = vmatprep.subr.bf16.mxu1 %v22990_v17  ;;  %v2210_v20 = vshll.u32 %v22958_v13, 16 }
 0x157   : > { %20380 = vmatmul.mubr.bf16.gmra.mrb[8].mxu1 %v2085_v21  ;;  %v2141_v16 = vsel %vm2033_vm2, %v2136_v6, %v2140_v7  ;;  %v2144_v21 = vor.u32 %v2142_v10, %v2140_v7  ;;  %v2157_v35 = vsel %vm2033_vm2, %v2152_v24, %v2156_v25  ;;  %v22957_v10 = vld [vmem:[%s23639_s10 + $0x1c8] sm:$0xff]  }
 0x158   : > { %21056 = vmatmul.mubr.bf16.gmra.mrb[76].mxu0 %v9951_v22  ;;  %20383 = vmatprep.mubr.bf16.mxu1 %v2093_v23  ;;  %v23009_v22 = vld [vmem:[%s25538_s1 + $0xa8] sm:$0xff]   ;;  %v9966_v23 = vrot.slane %v22941_v12, 2  ;;  %v2196_v12 = vrot.slane %v2194_v31, 1  ;;  %v2212_v29 = vrot.slane %v2210_v20, 1 }
 0x159   : > { %21059 = vmatprep.mubr.bf16.mxu0 %v9953_v26  ;;  %20516 = vmatpush3.bf16.msra.mxu1 %v22990_v17  ;;  %v22943_v17 = vld [vmem:[%s23639_s10 + $0x198] sm:$0xff]   ;;  %v22946_v26 = vld [vmem:[%s23639_s10 + $0x88] sm:$0xff]   ;;  %v2149_v33 = vsel %vm2033_vm2, %v2144_v21, %v2148_v19  ;;  %v2206_v19 = vshrl.u32 %v22956_v1, 16  ;;  %v22959_v21 = vld [vmem:[%s23639_s10 + $0x1d0] sm:$0xff]  }
 0x15a   : > { %v9968_v27 = vrot.slane %v22943_v17, 2  ;;  %20517 = vmatprep.subr.bf16.mxu1 %v23009_v22  ;;  %v9967_v34 = vsel %vm9870_vm1, %v9964_v9, %v9966_v23  ;;  %v2170_v36 = vshll.u32 %v22946_v26, 16  ;;  %v2174_v48 = vshrl.u32 %v22946_v26, 16  ;;  %v22960_v17 = vld [vmem:[%s23639_s10 + $0xb8] sm:$0xff]  }
 0x15b   : > { %v2202_v9 = vshll.u32 %v22956_v1, 16  ;;  %v2218_v26 = vshll.u32 %v22960_v17, 16 }
 0x15c   : > { %v9969_v38 = vsel %vm9870_vm1, %v9966_v23, %v9968_v27  ;;  %v2172_v45 = vrot.slane %v2170_v36, 1 }
 0x15d   : > { %20518 = vmatpush3.bf16.msra.mxu1 %v23009_v22  ;;  %v2204_v40 = vrot.slane %v2202_v9, 1  ;;  %v2214_v22 = vshrl.u32 %v22958_v13, 16  ;;  %v2220_v36 = vrot.slane %v2218_v26, 1 }
 0x15f   : > { %20384 = vmatmul.mubr.bf16.gmra.mrb[12].mxu1 %v2101_v42  ;;  %v2160_v42 = vor.u32 %v2158_v28, %v2156_v25 }
 0x160   : > { %21060 = vmatmul.mubr.bf16.gmra.mrb[80].mxu0 %v9955_v43  ;;  %20387 = vmatprep.mubr.bf16.mxu1 %v2109_v44  ;;  %v9970_v43 = vrot.slane %v22945_v30, 2  ;;  %v2168_v44 = vor.u32 %v2166_v32, %v2164_v39  ;;  %v22962_v30 = vld [vmem:[%s23639_s10 + $0xc0] sm:$0xff]   ;;  %v2208_v32 = vor.u32 %v2206_v19, %v2204_v40  ;;  %v22975_v19 = vld [vmem:[%s23639_s10 + $0x208] sm:$0xff]  }
 0x161   : > { %21063 = vmatprep.mubr.bf16.mxu0 %v9957_v47  ;;  %v9972_v47 = vrot.slane %v22947_v37, 2  ;;  %v2165_v52 = vsel %vm2033_vm2, %v2160_v42, %v2164_v39  ;;  %v22964_v37 = vld [vmem:[%s23639_s10 + $0xc8] sm:$0xff]   ;;  %v2222_v39 = vshrl.u32 %v22960_v17, 16  ;;  %v2226_v41 = vshll.u32 %v22962_v30, 16  ;;  %v22963_v42 = vld [vmem:[%s23639_s10 + $0x1e0] sm:$0xff]  }
 0x162   : > { %v9971_v53 = vsel %vm9870_vm1, %v9968_v27, %v9970_v43  ;;  %v2173_v55 = vsel %vm2033_vm2, %v2168_v44, %v2172_v45  ;;  %v22961_v27 = vld [vmem:[%s23639_s10 + $0x1d8] sm:$0xff]   ;;  %v2213_v44 = vsel %vm2033_vm2, %v2208_v32, %v2212_v29  ;;  %v22977_v32 = vld [vmem:[%s23639_s10 + $0x210] sm:$0xff]  }
 0x163   : > { %v9973_v58 = vsel %vm9870_vm1, %v9970_v43, %v9972_v47  ;;  %v2230_v43 = vshrl.u32 %v22962_v30, 16 }
 0x167   : > { %20388 = vmatmul.mubr.bf16.gmra.mrb[16].mxu1 %v2117_v61  ;;  %v2176_v61 = vor.u32 %v2174_v48, %v2172_v45  ;;  %v22965_v48 = vld [vmem:[%s23639_s10 + $0x1e8] sm:$0xff]  }
 0x168   : > { %21064 = vmatmul.mubr.bf16.gmra.mrb[84].mxu0 %v9959_v62  ;;  %20391 = vmatprep.mubr.bf16.mxu1 %v2125_v63  ;;  %v9974_v62 = vrot.slane %v22949_v50, 2  ;;  %v2184_v63 = vor.u32 %v2182_v51, %v2180_v59  ;;  %v2228_v50 = vrot.slane %v2226_v41, 1  ;;  %v22966_v51 = vld [vmem:[%s23639_s10 + $0xd0] sm:$0xff]  }
 0x169   : > { %21067 = vmatprep.mubr.bf16.mxu0 %v9961_v2  ;;  %v9976_v2 = vrot.slane %v22953_v57, 2  ;;  %v2181_v6 = vsel %vm2033_vm2, %v2176_v61, %v2180_v59  ;;  %v22970_v57 = vld [vmem:[%s23639_s10 + $0xd8] sm:$0xff]   ;;  %v2238_v59 = vshrl.u32 %v22964_v37, 16  ;;  %v2242_v60 = vshll.u32 %v22966_v51, 16  ;;  %v22967_v61 = vld [vmem:[%s23639_s10 + $0x1f0] sm:$0xff]  }
 0x16a   : > { %v9975_v7 = vsel %vm9870_vm1, %v9972_v47, %v9974_v62  ;;  %v2189_v8 = vsel %vm2033_vm2, %v2184_v63, %v2188_v0  ;;  %v2234_v47 = vshll.u32 %v22964_v37, 16 }
 0x16b   : > { %v9977_v11 = vsel %vm9870_vm1, %v9974_v62, %v9976_v2  ;;  %v2246_v62 = vshrl.u32 %v22966_v51, 16 }
 0x16c   : > { %v2236_v56 = vrot.slane %v2234_v47, 1 }
 0x16f   : > { %20392 = vmatmul.mubr.bf16.gmra.mrb[20].mxu1 %v2133_v14  ;;  %v2192_v14 = vor.u32 %v2190_v3, %v2188_v0  ;;  %v22971_v3 = vld [vmem:[%s23639_s10 + $0x1f8] sm:$0xff]  }
 0x170   : > { %21068 = vmatmul.mubr.bf16.gmra.mrb[88].mxu0 %v9963_v15  ;;  %20395 = vmatprep.mubr.bf16.mxu1 %v2141_v16  ;;  %v9978_v15 = vrot.slane %v22955_v4, 2  ;;  %v2200_v16 = vor.u32 %v2198_v5, %v2196_v12  ;;  %v2244_v4 = vrot.slane %v2242_v60, 1  ;;  %v22972_v5 = vld [vmem:[%s23639_s10 + $0xe0] sm:$0xff]  }
 0x171   : > { %21071 = vmatprep.mubr.bf16.mxu0 %v9965_v18  ;;  %v9980_v18 = vrot.slane %v22957_v10, 2  ;;  %v2197_v23 = vsel %vm2033_vm2, %v2192_v14, %v2196_v12  ;;  %v22974_v10 = vld [vmem:[%s23639_s10 + $0xe8] sm:$0xff]   ;;  %v2254_v12 = vshrl.u32 %v22970_v57, 16  ;;  %v2258_v13 = vshll.u32 %v22972_v5, 16  ;;  %v22973_v14 = vld [vmem:[%s23639_s10 + $0x200] sm:$0xff]  }
 0x172   : > { %v9979_v24 = vsel %vm9870_vm1, %v9976_v2, %v9978_v15  ;;  %v2205_v25 = vsel %vm2033_vm2, %v2200_v16, %v2204_v40  ;;  %v2250_v2 = vshll.u32 %v22970_v57, 16 }
 0x173   : > { %v9981_v28 = vsel %vm9870_vm1, %v9978_v15, %v9980_v18  ;;  %v2262_v15 = vshrl.u32 %v22972_v5, 16 }
 0x174   : > { %v2252_v9 = vrot.slane %v2250_v2, 1 }
 0x177   : > { %20396 = vmatmul.mubr.bf16.gmra.mrb[24].mxu1 %v2149_v33  ;;  %v23027_v33 = vld [vmem:[%s25538_s1 + $0xb0] sm:$0xff]  }
 0x178   : > { %21072 = vmatmul.mubr.bf16.gmra.mrb[92].mxu0 %v9967_v34  ;;  %20399 = vmatprep.mubr.bf16.mxu1 %v2157_v35  ;;  %v9982_v34 = vrot.slane %v22959_v21, 2  ;;  %v2216_v35 = vor.u32 %v2214_v22, %v2212_v29  ;;  %v2260_v21 = vrot.slane %v2258_v13, 1  ;;  %v22976_v22 = vld [vmem:[%s23639_s10 + $0xf0] sm:$0xff]   ;;  %v2270_v29 = vshrl.u32 %v22974_v10, 16 }
 0x179   : > { %21075 = vmatprep.mubr.bf16.mxu0 %v9969_v38  ;;  %v9984_v38 = vrot.slane %v22961_v27, 2  ;;  %20519 = vmatprep.subr.bf16.mxu1 %v23027_v33  ;;  %v22978_v27 = vld [vmem:[%s23639_s10 + $0xf8] sm:$0xff]   ;;  %v2274_v30 = vshll.u32 %v22976_v22, 16 }
 0x17a   : > { %20520 = vmatpush3.bf16.msra.mxu1 %v23027_v33  ;;  %v9983_v45 = vsel %vm9870_vm1, %v9980_v18, %v9982_v34  ;;  %v2221_v46 = vsel %vm2033_vm2, %v2216_v35, %v2220_v36  ;;  %v2266_v18 = vshll.u32 %v22974_v10, 16  ;;  %v2278_v33 = vshrl.u32 %v22976_v22, 16  ;;  %v22987_v10 = vld [vmem:[%s23639_s10 + $0x20] sm:$0xfc]   ;;  %v22993_v22 = vld [vmem:[%s23639_s10 + $0x128] sm:$0xff]  }
 0x17b   : > { %v9985_v49 = vsel %vm9870_vm1, %v9982_v34, %v9984_v38  ;;  %v2282_v37 = vshll.u32 %v22978_v27, 16  ;;  %v2276_v41 = vrot.slane %v2274_v30, 1 }
 0x17c   : > { %v2268_v26 = vrot.slane %v2266_v18, 1 }
 0x17d   : > { %v2284_v47 = vrot.slane %v2282_v37, 1  ;;  %v22997_v37 = vld [vmem:[%s23639_s10 + $0x138] sm:$0xff]  }
 0x17f   : > { %20400 = vmatmul.mubr.bf16.gmra.mrb[28].mxu1 %v2165_v52  ;;  %v2224_v52 = vor.u32 %v2222_v39, %v2220_v36 }
 0x180   : > { %21076 = vmatmul.mubr.bf16.gmra.mrb[96].mxu0 %v9971_v53  ;;  %20403 = vmatprep.mubr.bf16.mxu1 %v2173_v55  ;;  %v9986_v53 = vrot.slane %v22963_v42, 2  ;;  %v2232_v55 = vor.u32 %v2230_v43, %v2228_v50  ;;  %v22980_v42 = vld [vmem:[%s23639_s10 + $0x100] sm:$0xff]   ;;  %v2272_v43 = vor.u32 %v2270_v29, %v2268_v26 }
 0x181   : > { %21079 = vmatprep.mubr.bf16.mxu0 %v9973_v58  ;;  %v9988_v58 = vrot.slane %v22965_v48, 2  ;;  %v2229_v63 = vsel %vm2033_vm2, %v2224_v52, %v2228_v50  ;;  %v22982_v48 = vld [vmem:[%s23639_s10 + $0x108] sm:$0xff]   ;;  %v2286_v50 = vshrl.u32 %v22978_v27, 16  ;;  %v2290_v51 = vshll.u32 %v22980_v42, 16  ;;  %v22981_v52 = vld [vmem:[%s23639_s10 + $0x220] sm:$0xff]  }
 0x182   : > { %v9987_v0 = vsel %vm9870_vm1, %v9984_v38, %v9986_v53  ;;  %v2237_v1 = vsel %vm2033_vm2, %v2232_v55, %v2236_v56  ;;  %v22979_v38 = vld [vmem:[%s23639_s10 + $0x218] sm:$0xff]   ;;  %v2277_v55 = vsel %vm2033_vm2, %v2272_v43, %v2276_v41  ;;  %v22999_v43 = vld [vmem:[%s23639_s10 + $0x140] sm:$0xff]  }
 0x183   : > { %v9989_v31 = vsel %vm9870_vm1, %v9986_v53, %v9988_v58  ;;  %v2294_v53 = vshrl.u32 %v22980_v42, 16 }
 0x187   : > { %20404 = vmatmul.mubr.bf16.gmra.mrb[32].mxu1 %v2181_v6  ;;  %v2240_v6 = vor.u32 %v2238_v59, %v2236_v56  ;;  %v22983_v59 = vld [vmem:[%s23639_s10 + $0x228] sm:$0xff]  }
 0x188   : > { %21080 = vmatmul.mubr.bf16.gmra.mrb[100].mxu0 %v9975_v7  ;;  %20407 = vmatprep.mubr.bf16.mxu1 %v2189_v8  ;;  %v9990_v7 = vrot.slane %v22967_v61, 2  ;;  %v2248_v8 = vor.u32 %v2246_v62, %v2244_v4  ;;  %v2292_v61 = vrot.slane %v2290_v51, 1  ;;  %v22984_v62 = vld [vmem:[%s23639_s10 + $0x110] sm:$0xff]   ;;  %v22998_v51 = vld [vmem:[%s23639_s10 + $0x48] sm:$0xff]  }
 0x189   : > { %21083 = vmatprep.mubr.bf16.mxu0 %v9977_v11  ;;  %v9992_v11 = vrot.slane %v22971_v3, 2  ;;  %v2245_v16 = vsel %vm2033_vm2, %v2240_v6, %v2244_v4  ;;  %v22986_v3 = vld [vmem:[%s23639_s10 + $0x118] sm:$0xff]   ;;  %v2302_v4 = vshrl.u32 %v22982_v48, 16  ;;  %v2306_v5 = vshll.u32 %v22984_v62, 16 }
 0x18a   : > { %v9991_v40 = vsel %vm9870_vm1, %v9988_v58, %v9990_v7  ;;  %v2253_v17 = vsel %vm2033_vm2, %v2248_v8, %v2252_v9  ;;  %v2298_v58 = vshll.u32 %v22982_v48, 16  ;;  %v22985_v6 = vld [vmem:[%s23639_s10 + $0x230] ss:$0 sps:$4 sm:$0x33]   ;;  %v22989_v8 = vld [vmem:[%s23639_s10 + $0x120] sm:$0xff]   ;;  %v2314_v13 = vshll.u32 %v22986_v3, 16 }
 0x18b   : > { %v9993_v20 = vsel %vm9870_vm1, %v9990_v7, %v9992_v11  ;;  %v2310_v7 = vshrl.u32 %v22984_v62, 16  ;;  %v10006_v18 = vrot.slane %v22985_v6, 2  ;;  %v2326_v27 = vshrl.u32 %v22989_v8, 16 }
 0x18c   : > { %v2300_v2 = vrot.slane %v2298_v58, 1 }
 0x18f   : > { %20408 = vmatmul.mubr.bf16.gmra.mrb[36].mxu1 %v2197_v23  ;;  %v2256_v23 = vor.u32 %v2254_v12, %v2252_v9 }
 0x190   : > { %21084 = vmatmul.mubr.bf16.gmra.mrb[104].mxu0 %v9979_v24  ;;  %20411 = vmatprep.mubr.bf16.mxu1 %v2205_v25  ;;  %v9994_v24 = vrot.slane %v22973_v14, 2  ;;  %v2264_v25 = vor.u32 %v2262_v15, %v2260_v21  ;;  %v22988_v14 = vld [vmem:[%s23639_s10 + $0x28] sm:$0xff]  }
 0x191   : > { %21087 = vmatprep.mubr.bf16.mxu0 %v9981_v28  ;;  %v9996_v28 = vrot.slane %v22975_v19, 2  ;;  %v2261_v34 = vsel %vm2033_vm2, %v2256_v23, %v2260_v21  ;;  %v2318_v21 = vshrl.u32 %v22986_v3, 16  ;;  %v11606_v23 = vrot.slane %v22987_v10, 2  ;;  %v23028_v3 = vld [vmem:[%s25538_s1 + $0x1d0] sm:$0xff]  }
 0x192   : > { %v9995_v35 = vsel %vm9870_vm1, %v9992_v11, %v9994_v24  ;;  %v2269_v36 = vsel %vm2033_vm2, %v2264_v25, %v2268_v26  ;;  %v22991_v26 = vld [vmem:[%s23639_s10 + $0x30] sm:$0xff]  }
 0x193   : > { %v9997_v39 = vsel %vm9870_vm1, %v9994_v24, %v9996_v28  ;;  %v11607_v24 = vrot.slane %v22988_v14, 2  ;;  %v23067_v14 = vld [vmem:[%s25538_s1 + $0xc0] sm:$0xff]  }
 0x197   : > { %20412 = vmatmul.mubr.bf16.gmra.mrb[40].mxu1 %v2213_v44  ;;  %v23045_v44 = vld [vmem:[%s25538_s1 + $0xb8] sm:$0xff]  }
 0x198   : > { %21088 = vmatmul.mubr.bf16.gmra.mrb[108].mxu0 %v9983_v45  ;;  %20415 = vmatprep.mubr.bf16.mxu1 %v2221_v46  ;;  %v9998_v45 = vrot.slane %v22977_v32, 2  ;;  %v2280_v46 = vor.u32 %v2278_v33, %v2276_v41  ;;  %v2330_v33 = vshll.u32 %v22993_v22, 16 }
 0x199   : > { %21091 = vmatprep.mubr.bf16.mxu0 %v9985_v49  ;;  %v10000_v49 = vrot.slane %v22979_v38, 2  ;;  %20521 = vmatprep.subr.bf16.mxu1 %v23045_v44 }
 0x19a   : > { %20522 = vmatpush3.bf16.msra.mxu1 %v23045_v44  ;;  %v9999_v56 = vsel %vm9870_vm1, %v9996_v28, %v9998_v45  ;;  %v2285_v57 = vsel %vm2033_vm2, %v2280_v46, %v2284_v47  ;;  %v22995_v28 = vld [vmem:[%s23639_s10 + $0x130] sm:$0xff]   ;;  %v2332_v42 = vrot.slane %v2330_v33, 1 }
 0x19b   : > { %v10001_v60 = vsel %vm9870_vm1, %v9998_v45, %v10000_v49  ;;  %v2334_v45 = vshrl.u32 %v22993_v22, 16  ;;  %v2342_v48 = vshrl.u32 %v22995_v28, 16  ;;  %20659 = vmatprep.subr.bf16.mxu1 %v23067_v14 }
 0x19d   : > { %v2336_v58 = vor.u32 %v2334_v45, %v2332_v42 }
 0x19f   : > { %20416 = vmatmul.mubr.bf16.gmra.mrb[44].mxu1 %v2229_v63  ;;  %v2288_v63 = vor.u32 %v2286_v50, %v2284_v47  ;;  %v22996_v47 = vld [vmem:[%s23639_s10 + $0x40] sm:$0xff]  }
 0x1a0   : > { %21092 = vmatmul.mubr.bf16.gmra.mrb[112].mxu0 %v9987_v0  ;;  %20419 = vmatprep.mubr.bf16.mxu1 %v2237_v1  ;;  %v10002_v0 = vrot.slane %v22981_v52, 2  ;;  %v2296_v1 = vor.u32 %v2294_v53, %v2292_v61 }
 0x1a1   : > { %21095 = vmatprep.mubr.bf16.mxu0 %v9989_v31  ;;  %v10004_v31 = vrot.slane %v22983_v59, 2  ;;  %v2293_v9 = vsel %vm2033_vm2, %v2288_v63, %v2292_v61  ;;  %v11613_v59 = vrot.slane %v22996_v47, 2  ;;  %v23001_v63 = vld [vmem:[%s23639_s10 + $0x148] sm:$0xff]   ;;  %v23012_v47 = vld [vmem:[%s23639_s10 + $0x78] sm:$0xff]  }
 0x1a2   : > { %v10003_v11 = vsel %vm9870_vm1, %v10000_v49, %v10002_v0  ;;  %v2301_v12 = vsel %vm2033_vm2, %v2296_v1, %v2300_v2  ;;  %v2346_v49 = vshll.u32 %v22997_v37, 16  ;;  %v2350_v1 = vshrl.u32 %v22997_v37, 16  ;;  %v23011_v37 = vld [vmem:[%s23639_s10 + $0x168] sm:$0xff]  }
 0x1a3   : > { %v10005_v15 = vsel %vm9870_vm1, %v10002_v0, %v10004_v31  ;;  %v10007_v30 = vsel %vm9870_vm1, %v10004_v31, %v10006_v18  ;;  %v11615_v0 = vrot.slane %v22998_v51, 2  ;;  %v23000_v31 = vld [vmem:[%s23639_s10 + $0x50] sm:$0xff]   ;;  %v2362_v10 = vshll.u32 %v23001_v63, 16  ;;  %v23005_v18 = vld [vmem:[%s23639_s10 + $0x158] sm:$0xff]  }
 0x1a4   : > { %v2348_v62 = vrot.slane %v2346_v49, 1  ;;  %v2366_v22 = vshrl.u32 %v23001_v63, 16 }
 0x1a7   : > { %20420 = vmatmul.mubr.bf16.gmra.mrb[48].mxu1 %v2245_v16  ;;  %v2308_v16 = vrot.slane %v2306_v5, 1  ;;  %v23003_v5 = vld [vmem:[%s23639_s10 + $0x150] sm:$0xff]  }
 0x1a8   : > { %21096 = vmatmul.mubr.bf16.gmra.mrb[116].mxu0 %v9991_v40  ;;  %20423 = vmatprep.mubr.bf16.mxu1 %v2253_v17  ;;  %v2322_v40 = vshll.u32 %v22989_v8, 16  ;;  %v2304_v17 = vor.u32 %v2302_v4, %v2300_v2  ;;  %v2358_v4 = vshrl.u32 %v22999_v43, 16 }
 0x1a9   : > { %21099 = vmatprep.mubr.bf16.mxu0 %v9993_v20  ;;  %v2312_v19 = vor.u32 %v2310_v7, %v2308_v16  ;;  %v2316_v20 = vrot.slane %v2314_v13, 1  ;;  %v23002_v7 = vld [vmem:[%s23639_s10 + $0x58] sm:$0xff]   ;;  %v2370_v13 = vshll.u32 %v23003_v5, 16 }
 0x1aa   : > { %v2324_v25 = vrot.slane %v2322_v40, 1  ;;  %v2309_v29 = vsel %vm2033_vm2, %v2304_v17, %v2308_v16  ;;  %v11617_v16 = vrot.slane %v23000_v31, 2  ;;  %v2364_v17 = vrot.slane %v2362_v10, 1 }
 0x1ab   : > { %v2317_v32 = vsel %vm2033_vm2, %v2312_v19, %v2316_v20  ;;  %v2320_v38 = vor.u32 %v2318_v21, %v2316_v20  ;;  %v23007_v19 = vld [vmem:[%s23639_s10 + $0x160] sm:$0xff]   ;;  %v11619_v20 = vrot.slane %v23002_v7, 2 }
 0x1ac   : > { %v2328_v41 = vor.u32 %v2326_v27, %v2324_v25  ;;  %v23069_v21 = vld [vmem:[%s25538_s1 + $0x1e0] sm:$0xff]   ;;  %v23006_v27 = vld [vmem:[%s23639_s10 + $0x68] sm:$0xff]   ;;  %v2390_v45 = vshrl.u32 %v23007_v19, 16 }
 0x1ad   : > { %v2325_v50 = vsel %vm2033_vm2, %v2320_v38, %v2324_v25  ;;  %v2374_v25 = vshrl.u32 %v23003_v5, 16  ;;  %v11620_v33 = vsel %vm9870_vm1, %v11617_v16, %v11619_v20 }
 0x1ae   : > { %v2333_v53 = vsel %vm2033_vm2, %v2328_v41, %v2332_v42  ;;  %v23013_v41 = vld [vmem:[%s23639_s10 + $0x170] sm:$0xff]   ;;  %v11623_v42 = vrot.slane %v23006_v27, 2 }
 0x1af   : > { %20424 = vmatmul.mubr.bf16.gmra.mrb[52].mxu1 %v2261_v34  ;;  %v22994_v34 = vld [vmem:[%s23639_s10 + $0x38] sm:$0xff]   ;;  %v2402_v51 = vshll.u32 %v23013_v41, 16 }
 0x1b0   : > { %21100 = vmatmul.mubr.bf16.gmra.mrb[120].mxu0 %v9995_v35  ;;  %20427 = vmatprep.mubr.bf16.mxu1 %v2269_v36  ;;  %v11608_v35 = vsel %vm9870_vm1, %v11606_v23, %v11607_v24  ;;  %v2338_v36 = vshll.u32 %v22995_v28, 16  ;;  %v11611_v44 = vrot.slane %v22994_v34, 2  ;;  %v2372_v23 = vrot.slane %v2370_v13, 1 }
 0x1b1   : > { %21103 = vmatprep.mubr.bf16.mxu0 %v9997_v39  ;;  %v11609_v39 = vrot.slane %v22991_v26, 2  ;;  %v11618_v28 = vsel %vm9870_vm1, %v11615_v0, %v11617_v16  ;;  %v2368_v34 = vor.u32 %v2366_v22, %v2364_v17  ;;  %v2404_v63 = vrot.slane %v2402_v51, 1  ;;  %v23018_v16 = vld [vmem:[%s23639_s10 + $0x90] sm:$0xff]  }
 0x1b2   : > { %v2340_v46 = vrot.slane %v2338_v36, 1  ;;  %v11614_v8 = vsel %vm9870_vm1, %v11611_v44, %v11613_v59  ;;  %v2382_v36 = vshrl.u32 %v23005_v18, 16  ;;  %v2376_v38 = vor.u32 %v2374_v25, %v2372_v23  ;;  %v23087_v25 = vld [vmem:[%s25538_s1 + $0x1e8] sm:$0xff]   ;;  %v23031_v51 = vld [vmem:[%s23639_s10 + $0x1b0] sm:$0xff]  }
 0x1b3   : > { %v11610_v52 = vsel %vm9870_vm1, %v11607_v24, %v11609_v39  ;;  %v23004_v24 = vld [vmem:[%s23639_s10 + $0x60] sm:$0xff]  }
 0x1b4   : > { %v2344_v61 = vor.u32 %v2342_v48, %v2340_v46  ;;  %v2341_v6 = vsel %vm2033_vm2, %v2336_v58, %v2340_v46  ;;  %v2373_v46 = vsel %vm2033_vm2, %v2368_v34, %v2372_v23 }
 0x1b7   : > { %20428 = vmatmul.mubr.bf16.gmra.mrb[56].mxu1 %v2277_v55  ;;  %v2354_v55 = vshll.u32 %v22999_v43, 16  ;;  %v23008_v43 = vld [vmem:[%s23639_s10 + $0x70] sm:$0xff]  }
 0x1b8   : > { %21104 = vmatmul.mubr.bf16.gmra.mrb[124].mxu0 %v9999_v56  ;;  %20431 = vmatprep.mubr.bf16.mxu1 %v2285_v57  ;;  %v23010_v56 = vld [vmem:[%s25538_s1 + $0x1c8] sm:$0xff]   ;;  %v11612_v57 = vsel %vm9870_vm1, %v11609_v39, %v11611_v44 }
 0x1b9   : > { %21107 = vmatprep.mubr.bf16.mxu0 %v10001_v60  ;;  %v23427_v60 = vld [vmem:[%s25538_s1 + $0x1c0] sm:$0xff]   ;;  %v2356_v2 = vrot.slane %v2354_v55, 1  ;;  %v11625_v55 = vrot.slane %v23008_v43, 2 }
 0x1bb   : > { %v2360_v40 = vor.u32 %v2358_v4, %v2356_v2 }
 0x1bf   : > { %20432 = vmatmul.mubr.bf16.gmra.mrb[60].mxu1 %v2293_v9  ;;  %v2349_v9 = vsel %vm2033_vm2, %v2344_v61, %v2348_v62  ;;  %v11627_v61 = vrot.slane %v23012_v47, 2 }
 0x1c0   : > { %21108 = vmatmul.mubr.bf16.gmra.mrb[128].mxu0 %v10003_v11  ;;  %20435 = vmatprep.mubr.bf16.mxu1 %v2301_v12  ;;  %v23046_v11 = vld [vmem:[%s25538_s1 + $0x1d8] sm:$0xff]   ;;  %v11616_v12 = vsel %vm9870_vm1, %v11613_v59, %v11615_v0  ;;  %v2406_v0 = vshrl.u32 %v23013_v41, 16 }
 0x1c1   : > { %21111 = vmatprep.mubr.bf16.mxu0 %v10005_v15  ;;  %v2352_v15 = vor.u32 %v2350_v1, %v2348_v62  ;;  %v23014_v62 = vld [vmem:[%s23639_s10 + $0x80] sm:$0xff]  }
 0x1c2   : > { %v2408_v10 = vor.u32 %v2406_v0, %v2404_v63 }
 0x1c3   : > { %v2357_v26 = vsel %vm2033_vm2, %v2352_v15, %v2356_v2  ;;  %v23016_v2 = vld [vmem:[%s23639_s10 + $0x88] sm:$0xff]  }
 0x1c4   : > { %v11631_v13 = vrot.slane %v23016_v2, 2 }
 0x1c7   : > { %20436 = vmatmul.mubr.bf16.gmra.mrb[64].mxu1 %v2309_v29  ;;  %v2365_v29 = vsel %vm2033_vm2, %v2360_v40, %v2364_v17 }
 0x1c8   : > { %21112 = vmatmul.mubr.bf16.gmra.mrb[132].mxu0 %v10007_v30  ;;  %20439 = vmatprep.mubr.bf16.mxu1 %v2317_v32  ;;  %v2378_v30 = vshll.u32 %v23005_v18, 16  ;;  %v2386_v32 = vshll.u32 %v23007_v19, 16  ;;  %v23020_v18 = vld [vmem:[%s23639_s10 + $0x98] sm:$0xff]  }
 0x1c9   : > { %21131 = vmatprep.mubr.bf16.mxu0 %v11608_v35  ;;  %v11621_v35 = vrot.slane %v23004_v24, 2 }
 0x1ca   : > { %v2380_v39 = vrot.slane %v2378_v30, 1  ;;  %v2388_v44 = vrot.slane %v2386_v32, 1  ;;  %v23025_v30 = vld [vmem:[%s23639_s10 + $0x1a0] sm:$0xff]   ;;  %v11635_v32 = vrot.slane %v23020_v18, 2  ;;  %v23037_v18 = vld [vmem:[%s23639_s10 + $0x1c8] sm:$0xff]  }
 0x1cb   : > { %v11622_v48 = vsel %vm9870_vm1, %v11619_v20, %v11621_v35  ;;  %v2450_v43 = vshll.u32 %v23025_v30, 16 }
 0x1cc   : > { %v2381_v49 = vsel %vm2033_vm2, %v2376_v38, %v2380_v39  ;;  %v2392_v58 = vor.u32 %v2390_v45, %v2388_v44  ;;  %v23024_v38 = vld [vmem:[%s23639_s10 + $0xa8] sm:$0xff]  }
 0x1cf   : > { %20440 = vmatmul.mubr.bf16.gmra.mrb[68].mxu1 %v2325_v50  ;;  %v2394_v50 = vshll.u32 %v23011_v37, 16 }
 0x1d0   : > { %21132 = vmatmul.mubr.bf16.vlgmr.msra.gmra.mrb[0].mxu0 %v11610_v52  ;;  %20443 = vmatprep.mubr.bf16.mxu1 %v2333_v53  ;;  %v11624_v52 = vsel %vm9870_vm1, %v11621_v35, %v11623_v42  ;;  %v2384_v53 = vor.u32 %v2382_v36, %v2380_v39  ;;  %v23022_v35 = vld [vmem:[%s23639_s10 + $0xa0] sm:$0xff]  }
 0x1d1   : > { %21268 = vmatpush3.bf16.msra.mxu0 %v23427_v60  ;;  %21135 = vmatprep.mubr.bf16.mxu0 %v11612_v57  ;;  %v23015_v57 = vld [vmem:[%s23639_s10 + $0x178] sm:$0xff]   ;;  %v2396_v59 = vrot.slane %v2394_v50, 1  ;;  %v23017_v60 = vld [vmem:[%s23639_s10 + $0x180] sm:$0xff]  }
 0x1d2   : > { %21269 = vmatprep.subr.bf16.mxu0 %v23010_v56  ;;  %v2389_v1 = vsel %vm2033_vm2, %v2384_v53, %v2388_v44  ;;  %v2410_v4 = vshll.u32 %v23015_v57, 16  ;;  %v2418_v5 = vshll.u32 %v23017_v60, 16  ;;  %v2414_v14 = vshrl.u32 %v23015_v57, 16  ;;  %v23026_v53 = vld [vmem:[%s23639_s10 + $0xb0] sm:$0xff]  }
 0x1d3   : > { %v2397_v31 = vsel %vm2033_vm2, %v2392_v58, %v2396_v59  ;;  %v2422_v40 = vshrl.u32 %v23017_v60, 16  ;;  %v23030_v58 = vld [vmem:[%s23639_s10 + $0xb8] sm:$0xff]  }
 0x1d4   : > { %v2420_v15 = vrot.slane %v2418_v5, 1  ;;  %v23035_v5 = vld [vmem:[%s23639_s10 + $0x1c0] sm:$0xff]  }
 0x1d5   : > { %21270 = vmatpush3.bf16.msra.mxu0 %v23010_v56  ;;  %v2398_v56 = vshrl.u32 %v23011_v37, 16 }
 0x1d6   : > { %21271 = vmatprep.subr.bf16.mxu0 %v23028_v3  ;;  %v2424_v27 = vor.u32 %v2422_v40, %v2420_v15 }
 0x1d7   : > { %20444 = vmatmul.mubr.bf16.gmra.mrb[72].mxu1 %v2341_v6  ;;  %v11628_v6 = vsel %vm9870_vm1, %v11625_v55, %v11627_v61  ;;  %v2400_v7 = vor.u32 %v2398_v56, %v2396_v59  ;;  %v2454_v56 = vshrl.u32 %v23025_v30, 16 }
 0x1d8   : > { %21136 = vmatmul.mubr.bf16.gmra.mrb[4].mxu0 %v11614_v8  ;;  %20447 = vmatprep.mubr.bf16.mxu1 %v2349_v9  ;;  %v11629_v8 = vrot.slane %v23014_v62, 2  ;;  %v23019_v9 = vld [vmem:[%s23639_s10 + $0x188] sm:$0xff]   ;;  %v2466_v62 = vshll.u32 %v23031_v51, 16 }
 0x1d9   : > { %21139 = vmatprep.mubr.bf16.mxu0 %v11616_v12  ;;  %21272 = vmatpush3.bf16.msra.mxu0 %v23028_v3  ;;  %v11626_v3 = vsel %vm9870_vm1, %v11623_v42, %v11625_v55  ;;  %v23021_v12 = vld [vmem:[%s23639_s10 + $0x190] sm:$0xff]   ;;  %v2405_v17 = vsel %vm2033_vm2, %v2400_v7, %v2404_v63  ;;  %v2452_v55 = vrot.slane %v2450_v43, 1  ;;  %v23032_v7 = vld [vmem:[%s23639_s10 + $0xc0] sm:$0xff]  }
 0x1da   : > { %21273 = vmatprep.subr.bf16.mxu0 %v23046_v11  ;;  %v11630_v19 = vsel %vm9870_vm1, %v11627_v61, %v11629_v8  ;;  %v2434_v22 = vshll.u32 %v23021_v12, 16  ;;  %v11632_v23 = vsel %vm9870_vm1, %v11629_v8, %v11631_v13  ;;  %v2438_v36 = vshrl.u32 %v23021_v12, 16 }
 0x1db   : > { %v2468_v8 = vrot.slane %v2466_v62, 1  ;;  %v23049_v62 = vld [vmem:[%s23639_s10 + $0x1f0] sm:$0xff]  }
 0x1dc   : > { %v2436_v34 = vrot.slane %v2434_v22, 1 }
 0x1dd   : > { %21274 = vmatpush3.bf16.msra.mxu0 %v23046_v11  ;;  %v2412_v11 = vrot.slane %v2410_v4, 1 }
 0x1de   : > { %21275 = vmatprep.subr.bf16.mxu0 %v23069_v21 }
 0x1df   : > { %20448 = vmatmul.mubr.bf16.gmra.mrb[76].mxu1 %v2357_v26  ;;  %v2413_v20 = vsel %vm2033_vm2, %v2408_v10, %v2412_v11  ;;  %v2416_v24 = vor.u32 %v2414_v14, %v2412_v11  ;;  %v11633_v26 = vrot.slane %v23018_v16, 2  ;;  %v23034_v11 = vld [vmem:[%s23639_s10 + $0xc8] sm:$0xff]  }
 0x1e0   : > { %21140 = vmatmul.mubr.bf16.gmra.mrb[8].mxu0 %v11618_v28  ;;  %20451 = vmatprep.mubr.bf16.mxu1 %v2365_v29  ;;  %v23023_v29 = vld [vmem:[%s23639_s10 + $0x198] sm:$0xff]   ;;  %v11647_v22 = vrot.slane %v23034_v11, 2 }
 0x1e1   : > { %21143 = vmatprep.mubr.bf16.mxu0 %v11620_v33  ;;  %21276 = vmatpush3.bf16.msra.mxu0 %v23069_v21  ;;  %v2426_v21 = vshll.u32 %v23019_v9, 16  ;;  %v2430_v33 = vshrl.u32 %v23019_v9, 16  ;;  %v2421_v37 = vsel %vm2033_vm2, %v2416_v24, %v2420_v15  ;;  %v11634_v39 = vsel %vm9870_vm1, %v11631_v13, %v11633_v26 }
 0x1e2   : > { %21277 = vmatprep.subr.bf16.mxu0 %v23087_v25  ;;  %v2442_v42 = vshll.u32 %v23023_v29, 16  ;;  %v11636_v44 = vsel %vm9870_vm1, %v11633_v26, %v11635_v32  ;;  %v2446_v47 = vshrl.u32 %v23023_v29, 16  ;;  %v2470_v9 = vshrl.u32 %v23031_v51, 16 }
 0x1e3   : > { %v2428_v28 = vrot.slane %v2426_v21, 1  ;;  %v2482_v15 = vshll.u32 %v23035_v5, 16  ;;  %v23039_v21 = vld [vmem:[%s23639_s10 + $0x1d0] sm:$0xff]   ;;  %v2486_v26 = vshrl.u32 %v23035_v5, 16 }
 0x1e4   : > { %v2444_v50 = vrot.slane %v2442_v42, 1  ;;  %v23043_v42 = vld [vmem:[%s23639_s10 + $0x1e0] sm:$0xff]  }
 0x1e5   : > { %21278 = vmatpush3.bf16.msra.mxu0 %v23087_v25  ;;  %v2429_v41 = vsel %vm2033_vm2, %v2424_v27, %v2428_v28  ;;  %v2432_v45 = vor.u32 %v2430_v33, %v2428_v28  ;;  %v2484_v24 = vrot.slane %v2482_v15, 1  ;;  %v23036_v25 = vld [vmem:[%s23639_s10 + $0xd0] sm:$0xff]   ;;  %v23038_v28 = vld [vmem:[%s23639_s10 + $0xd8] sm:$0xff]   ;;  %v2498_v33 = vshll.u32 %v23039_v21, 16  ;;  %v23053_v15 = vld [vmem:[%s23639_s10 + $0x200] sm:$0xff]  }
 0x1e6   : > { %v2448_v0 = vor.u32 %v2446_v47, %v2444_v50  ;;  %v11651_v43 = vrot.slane %v23038_v28, 2  ;;  %v2502_v47 = vshrl.u32 %v23039_v21, 16  ;;  %v23055_v28 = vld [vmem:[%s23639_s10 + $0x208] sm:$0xff]  }
 0x1e7   : > { %20452 = vmatmul.mubr.bf16.gmra.mrb[80].mxu1 %v2373_v46  ;;  %v11637_v46 = vrot.slane %v23022_v35, 2  ;;  %v2437_v57 = vsel %vm2033_vm2, %v2432_v45, %v2436_v34  ;;  %v2500_v45 = vrot.slane %v2498_v33, 1 }
 0x1e8   : > { %21144 = vmatmul.mubr.bf16.gmra.mrb[12].mxu0 %v11622_v48  ;;  %20455 = vmatprep.mubr.bf16.mxu1 %v2381_v49  ;;  %v23029_v48 = vld [vmem:[%s23639_s10 + $0x1a8] sm:$0xff]   ;;  %v2440_v49 = vor.u32 %v2438_v36, %v2436_v34  ;;  %v2453_v10 = vsel %vm2033_vm2, %v2448_v0, %v2452_v55  ;;  %v23105_v36 = vld [vmem:[%s25538_s1 + $0x1f0] sm:$0xff]  }
 0x1e9   : > { %21147 = vmatprep.mubr.bf16.mxu0 %v11624_v52  ;;  %v11639_v52 = vrot.slane %v23024_v38, 2  ;;  %v11638_v59 = vsel %vm9870_vm1, %v11635_v32, %v11637_v46  ;;  %v2458_v61 = vshll.u32 %v23029_v48, 16  ;;  %v2462_v2 = vshrl.u32 %v23029_v48, 16  ;;  %21279 = vmatprep.subr.bf16.mxu0 %v23105_v36  ;;  %v23044_v0 = vld [vmem:[%s23639_s10 + $0xf0] sm:$0xff]  }
 0x1ea   : > { %v2445_v60 = vsel %vm2033_vm2, %v2440_v49, %v2444_v50  ;;  %v2490_v32 = vshll.u32 %v23037_v18, 16  ;;  %v2488_v38 = vor.u32 %v2486_v26, %v2484_v24  ;;  %21280 = vmatpush3.bf16.msra.mxu0 %v23105_v36  ;;  %v23042_v49 = vld [vmem:[%s23639_s10 + $0xe8] sm:$0xff]   ;;  %v23054_v36 = vld [vmem:[%s23639_s10 + $0x110] sm:$0xff]  }
 0x1eb   : > { %v11640_v63 = vsel %vm9870_vm1, %v11637_v46, %v11639_v52  ;;  %v2460_v4 = vrot.slane %v2458_v61, 1  ;;  %v23040_v46 = vld [vmem:[%s23639_s10 + $0xe0] sm:$0xff]  }
 0x1ed   : > { %v2464_v40 = vor.u32 %v2462_v2, %v2460_v4  ;;  %v2518_v2 = vshrl.u32 %v23043_v42, 16 }
 0x1ef   : > { %20456 = vmatmul.mubr.bf16.gmra.mrb[84].mxu1 %v2389_v1  ;;  %v11641_v1 = vrot.slane %v23026_v53, 2  ;;  %v2469_v27 = vsel %vm2033_vm2, %v2464_v40, %v2468_v8  ;;  %v2514_v53 = vshll.u32 %v23043_v42, 16  ;;  %v23050_v40 = vld [vmem:[%s23639_s10 + $0x100] sm:$0xff]  }
 0x1f0   : > { %21148 = vmatmul.mubr.bf16.gmra.mrb[16].mxu0 %v11626_v3  ;;  %20459 = vmatprep.mubr.bf16.mxu1 %v2397_v31  ;;  %v23033_v3 = vld [vmem:[%s23639_s10 + $0x1b8] sm:$0xff]   ;;  %v2456_v31 = vor.u32 %v2454_v56, %v2452_v55 }
 0x1f1   : > { %21151 = vmatprep.mubr.bf16.mxu0 %v11628_v6  ;;  %v11643_v6 = vrot.slane %v23030_v58, 2  ;;  %v11642_v12 = vsel %vm9870_vm1, %v11639_v52, %v11641_v1  ;;  %v2474_v14 = vshll.u32 %v23033_v3, 16 }
 0x1f2   : > { %v2461_v13 = vsel %vm2033_vm2, %v2456_v31, %v2460_v4  ;;  %v23048_v31 = vld [vmem:[%s23639_s10 + $0xf8] sm:$0xff]  }
 0x1f3   : > { %v11644_v16 = vsel %vm9870_vm1, %v11641_v1, %v11643_v6  ;;  %v2516_v1 = vrot.slane %v2514_v53, 1  ;;  %v2558_v53 = vshrl.u32 %v23055_v28, 16 }
 0x1f7   : > { %20460 = vmatmul.mubr.bf16.gmra.mrb[88].mxu1 %v2405_v17  ;;  %v11645_v17 = vrot.slane %v23032_v7, 2  ;;  %v2530_v7 = vshll.u32 %v23049_v62, 16 }
 0x1f8   : > { %21152 = vmatmul.mubr.bf16.gmra.mrb[20].mxu0 %v11630_v19  ;;  %20463 = vmatprep.mubr.bf16.mxu1 %v2413_v20  ;;  %v2472_v19 = vor.u32 %v2470_v9, %v2468_v8  ;;  %v2476_v20 = vrot.slane %v2474_v14, 1 }
 0x1f9   : > { %21155 = vmatprep.mubr.bf16.mxu0 %v11632_v23  ;;  %v2478_v23 = vshrl.u32 %v23033_v3, 16  ;;  %v11646_v29 = vsel %vm9870_vm1, %v11643_v6, %v11645_v17  ;;  %v11648_v34 = vsel %vm9870_vm1, %v11645_v17, %v11647_v22  ;;  %v2532_v17 = vrot.slane %v2530_v7, 1 }
 0x1fa   : > { %v2477_v30 = vsel %vm2033_vm2, %v2472_v19, %v2476_v20 }
 0x1fb   : > { %v2480_v35 = vor.u32 %v2478_v23, %v2476_v20  ;;  %v23052_v20 = vld [vmem:[%s23639_s10 + $0x108] sm:$0xff]  }
 0x1fc   : > { %v11663_v33 = vrot.slane %v23052_v20, 2  ;;  %v23066_v20 = vld [vmem:[%s23639_s10 + $0x10] sm:$0xff]  }
 0x1fd   : > { %v2485_v48 = vsel %vm2033_vm2, %v2480_v35, %v2484_v24  ;;  %v2546_v24 = vshll.u32 %v23053_v15, 16 }
 0x1ff   : > { %20464 = vmatmul.mubr.bf16.gmra.mrb[92].mxu1 %v2421_v37  ;;  %v11649_v37 = vrot.slane %v23036_v25, 2  ;;  %v2548_v35 = vrot.slane %v2546_v24, 1 }
 0x200   : > { %21156 = vmatmul.mubr.bf16.gmra.mrb[24].mxu0 %v11634_v39  ;;  %20467 = vmatprep.mubr.bf16.mxu1 %v2429_v41  ;;  %v2492_v39 = vrot.slane %v2490_v32, 1  ;;  %v23041_v41 = vld [vmem:[%s23639_s10 + $0x1d8] sm:$0xff]   ;;  %v23057_v32 = vld [vmem:[%s23639_s10 + $0x210] sm:$0xff]  }
 0x201   : > { %21159 = vmatprep.mubr.bf16.mxu0 %v11636_v44  ;;  %v2494_v44 = vshrl.u32 %v23037_v18, 16  ;;  %v11650_v50 = vsel %vm9870_vm1, %v11647_v22, %v11649_v37  ;;  %v2506_v52 = vshll.u32 %v23041_v41, 16  ;;  %v11652_v55 = vsel %vm9870_vm1, %v11649_v37, %v11651_v43 }
 0x202   : > { %v2493_v51 = vsel %vm2033_vm2, %v2488_v38, %v2492_v39  ;;  %v2510_v58 = vshrl.u32 %v23041_v41, 16  ;;  %v2534_v18 = vshrl.u32 %v23049_v62, 16  ;;  %v2550_v37 = vshrl.u32 %v23053_v15, 16  ;;  %v23060_v62 = vld [vmem:[%s23639_s10 + $0x128] sm:$0xff]  }
 0x203   : > { %v2496_v56 = vor.u32 %v2494_v44, %v2492_v39  ;;  %v2508_v61 = vrot.slane %v2506_v52, 1  ;;  %v23056_v39 = vld [vmem:[%s23639_s10 + $0x118] sm:$0xff]   ;;  %v2562_v44 = vshll.u32 %v23057_v32, 16 }
 0x204   : > { %v11667_v52 = vrot.slane %v23056_v39, 2 }
 0x205   : > { %v2501_v3 = vsel %vm2033_vm2, %v2496_v56, %v2500_v45  ;;  %v2512_v9 = vor.u32 %v2510_v58, %v2508_v61  ;;  %v23058_v56 = vld [vmem:[%s23639_s10 + $0x120] sm:$0xff]  }
 0x207   : > { %20468 = vmatmul.mubr.bf16.gmra.mrb[96].mxu1 %v2437_v57  ;;  %v11653_v57 = vrot.slane %v23040_v46, 2  ;;  %v2517_v19 = vsel %vm2033_vm2, %v2512_v9, %v2516_v1  ;;  %v23064_v9 = vld [vmem:[%s23639_s10 + $0x8] sm:$0xff]  }
 0x208   : > { %21160 = vmatmul.mubr.bf16.gmra.mrb[28].mxu0 %v11638_v59  ;;  %20471 = vmatprep.mubr.bf16.mxu1 %v2445_v60  ;;  %v23047_v59 = vld [vmem:[%s23639_s10 + $0x1e8] sm:$0xff]   ;;  %v2504_v60 = vor.u32 %v2502_v47, %v2500_v45  ;;  %v23123_v47 = vld [vmem:[%s25538_s1 + $0x1f8] sm:$0xff]  }
 0x209   : > { %21163 = vmatprep.mubr.bf16.mxu0 %v11640_v63  ;;  %v11655_v63 = vrot.slane %v23042_v49, 2  ;;  %v11654_v4 = vsel %vm9870_vm1, %v11651_v43, %v11653_v57  ;;  %v2522_v6 = vshll.u32 %v23047_v59, 16  ;;  %v2526_v11 = vshrl.u32 %v23047_v59, 16  ;;  %21281 = vmatprep.subr.bf16.mxu0 %v23123_v47 }
 0x20a   : > { %v2509_v5 = vsel %vm2033_vm2, %v2504_v60, %v2508_v61  ;;  %v2554_v43 = vshll.u32 %v23055_v28, 16  ;;  %v2552_v49 = vor.u32 %v2550_v37, %v2548_v35  ;;  %21282 = vmatpush3.bf16.msra.mxu0 %v23123_v47  ;;  %v4184_v28 = vrot.slane %v23066_v20, 1  ;;  %v23074_v37 = vld [vmem:[%s23639_s10 + $0x28] sm:$0xff]   ;;  %v23104_v47 = vld [vmem:[%s25538_s1 + $0xd0] sm:$0xff]  }
 0x20b   : > { %v11656_v8 = vsel %vm9870_vm1, %v11653_v57, %v11655_v63  ;;  %v2524_v14 = vrot.slane %v2522_v6, 1  ;;  %v2566_v57 = vshrl.u32 %v23057_v32, 16  ;;  %v23062_v6 = vld [vmem:[%s23639_s10 + $0x130] sm:$0xff]  }
 0x20d   : > { %v2528_v26 = vor.u32 %v2526_v11, %v2524_v14 }
 0x20f   : > { %20472 = vmatmul.mubr.bf16.gmra.mrb[100].mxu1 %v2453_v10  ;;  %v11657_v10 = vrot.slane %v23044_v0, 2  ;;  %v2533_v38 = vsel %vm2033_vm2, %v2528_v26, %v2532_v17  ;;  %v23071_v26 = vld [vmem:[%s23639_s10 + $0x148] sm:$0xff]  }
 0x210   : > { %21164 = vmatmul.mubr.bf16.gmra.mrb[32].mxu0 %v11642_v12  ;;  %20475 = vmatprep.mubr.bf16.mxu1 %v2461_v13  ;;  %v23051_v12 = vld [vmem:[%s23639_s10 + $0x1f8] sm:$0xff]   ;;  %v2520_v13 = vor.u32 %v2518_v2, %v2516_v1  ;;  %v11669_v2 = vrot.slane %v23058_v56, 2  ;;  %v11679_v32 = vrot.slane %v23071_v26, 2 }
 0x211   : > { %21167 = vmatprep.mubr.bf16.mxu0 %v11644_v16  ;;  %v11659_v16 = vrot.slane %v23048_v31, 2  ;;  %v11658_v21 = vsel %vm9870_vm1, %v11655_v63, %v11657_v10  ;;  %v2538_v23 = vshll.u32 %v23051_v12, 16  ;;  %v23061_v63 = vld [vmem:[%s23639_s10 + $0x220] ss:$0 sps:$4 sm:$0x11]  }
 0x212   : > { %v2525_v22 = vsel %vm2033_vm2, %v2520_v13, %v2524_v14  ;;  %v2578_v7 = vshll.u32 %v23061_v63, 16  ;;  %v11670_v11 = vsel %vm9870_vm1, %v11667_v52, %v11669_v2  ;;  %v23065_v13 = vld [vmem:[%s23639_s10 + $0x138] sm:$0xff]  }
 0x213   : > { %v11660_v25 = vsel %vm9870_vm1, %v11657_v10, %v11659_v16 }
 0x217   : > { %20476 = vmatmul.mubr.bf16.gmra.mrb[104].mxu1 %v2469_v27  ;;  %v11661_v27 = vrot.slane %v23050_v40, 2  ;;  %v11673_v40 = vrot.slane %v23062_v6, 2 }
 0x218   : > { %21168 = vmatmul.mubr.bf16.gmra.mrb[36].mxu0 %v11646_v29  ;;  %20479 = vmatprep.mubr.bf16.mxu1 %v2477_v30  ;;  %v2536_v29 = vor.u32 %v2534_v18, %v2532_v17  ;;  %v2540_v30 = vrot.slane %v2538_v23, 1  ;;  %v4182_v18 = vrot.slane %v23064_v9, 1  ;;  %v23070_v23 = vld [vmem:[%s23639_s10 + $0x18] sm:$0xff]  }
 0x219   : > { %21171 = vmatprep.mubr.bf16.mxu0 %v11648_v34  ;;  %v2542_v34 = vshrl.u32 %v23051_v12, 16  ;;  %v11662_v41 = vsel %vm9870_vm1, %v11659_v16, %v11661_v27  ;;  %v11664_v45 = vsel %vm9870_vm1, %v11661_v27, %v11663_v33  ;;  %v2580_v16 = vrot.slane %v2578_v7, 1  ;;  %v23083_v7 = vld [vmem:[%s23639_s10 + $0x178] sm:$0xff]  }
 0x21a   : > { %v2541_v42 = vsel %vm2033_vm2, %v2536_v29, %v2540_v30 }
 0x21b   : > { %v2544_v46 = vor.u32 %v2542_v34, %v2540_v30  ;;  %v4186_v30 = vrot.slane %v23070_v23, 1  ;;  %v23073_v34 = vld [vmem:[%s23639_s10 + $0x150] sm:$0xff]   ;;  %v23090_v23 = vld [vmem:[%s23639_s10 + $0x60] sm:$0xff]  }
 0x21d   : > { %v2549_v58 = vsel %vm2033_vm2, %v2544_v46, %v2548_v35  ;;  %v4185_v35 = vsel %vm4180_vm3, %v4182_v18, %v4184_v28  ;;  %v4190_v46 = vrot.slane %v23074_v37, 1  ;;  %v23095_v37 = vld [vmem:[%s23639_s10 + $0x1a0] sm:$0xff]  }
 0x21f   : > { %20480 = vmatmul.mubr.bf16.gmra.mrb[108].mxu1 %v2485_v48  ;;  %v11665_v48 = vrot.slane %v23054_v36, 2 }
 0x220   : > { %21172 = vmatmul.mubr.bf16.gmra.mrb[40].mxu0 %v11650_v50  ;;  %20483 = vmatprep.mubr.bf16.mxu1 %v2493_v51  ;;  %v2556_v50 = vrot.slane %v2554_v43, 1  ;;  %v23059_v51 = vld [vmem:[%s23639_s10 + $0x218] sm:$0xff]   ;;  %v23428_v43 = vld [vmem:[%s25538_s1 + $0xc0] sm:$0xff]  }
 0x221   : > { %21175 = vmatprep.mubr.bf16.mxu0 %v11652_v55  ;;  %v2564_v55 = vrot.slane %v2562_v44, 1  ;;  %v11666_v59 = vsel %vm9870_vm1, %v11663_v33, %v11665_v48  ;;  %v2570_v61 = vshll.u32 %v23059_v51, 16  ;;  %v11668_v0 = vsel %vm9870_vm1, %v11665_v48, %v11667_v52  ;;  %v23072_v33 = vld [vmem:[%s23639_s10 + $0x20] sm:$0xff]  }
 0x222   : > { %v2557_v60 = vsel %vm2033_vm2, %v2552_v49, %v2556_v50  ;;  %v2560_v1 = vor.u32 %v2558_v53, %v2556_v50  ;;  %v4188_v44 = vrot.slane %v23072_v33, 1  ;;  %v23076_v49 = vld [vmem:[%s23639_s10 + $0x30] sm:$0xff]   ;;  %v23077_v50 = vld [vmem:[%s23639_s10 + $0x160] sm:$0xff]   ;;  %v23079_v53 = vld [vmem:[%s23639_s10 + $0x168] sm:$0xff]  }
 0x223   : > { %v2572_v31 = vrot.slane %v2570_v61, 1  ;;  %v11685_v61 = vrot.slane %v23077_v50, 2  ;;  %v11687_v63 = vrot.slane %v23079_v53, 2  ;;  %v23098_v50 = vld [vmem:[%s23639_s10 + $0x80] sm:$0xff]  }
 0x224   : > { %v2565_v10 = vsel %vm2033_vm2, %v2560_v1, %v2564_v55  ;;  %v4189_v52 = vsel %vm4180_vm3, %v4186_v30, %v4188_v44  ;;  %v4191_v56 = vsel %vm4180_vm3, %v4188_v44, %v4190_v46  ;;  %v23144_v1 = vld [vmem:[%s25538_s1 + $0xe0] sm:$0xff]   ;;  %v23097_v44 = vld [vmem:[%s23639_s10 + $0x1a8] sm:$0xff]  }
 0x225   : > { %v11688_v6 = vsel %vm9870_vm1, %v11685_v61, %v11687_v63 }
 0x227   : > { %20484 = vmatmul.mubr.bf16.gmra.mrb[112].mxu1 %v2501_v3  ;;  %v2568_v3 = vor.u32 %v2566_v57, %v2564_v55 }
 0x228   : > { %21176 = vmatmul.mubr.bf16.gmra.mrb[44].mxu0 %v11654_v4  ;;  %20487 = vmatprep.mubr.bf16.mxu1 %v2509_v5  ;;  %v2574_v4 = vshrl.u32 %v23059_v51, 16  ;;  %v11671_v5 = vrot.slane %v23060_v62, 2  ;;  %v23078_v51 = vld [vmem:[%s23639_s10 + $0x38] sm:$0xff]  }
 0x229   : > { %21179 = vmatprep.mubr.bf16.mxu0 %v11656_v8  ;;  %v23063_v8 = vld [vmem:[%s23639_s10] sm:$0xfe]   ;;  %v2573_v12 = vsel %vm2033_vm2, %v2568_v3, %v2572_v31  ;;  %v4194_v62 = vrot.slane %v23078_v51, 1  ;;  %v23082_v3 = vld [vmem:[%s23639_s10 + $0x48] sm:$0xff]   ;;  %v23099_v51 = vld [vmem:[%s23639_s10 + $0x1b0] sm:$0xff]  }
 0x22a   : > { %v11672_v14 = vsel %vm9870_vm1, %v11669_v2, %v11671_v5  ;;  %v2576_v15 = vor.u32 %v2574_v4, %v2572_v31  ;;  %v4181_v17 = vrot.slane %v23063_v8, 1  ;;  %v11674_v24 = vsel %vm9870_vm1, %v11671_v5, %v11673_v40  ;;  %v23081_v2 = vld [vmem:[%s23639_s10 + $0x170] sm:$0xff]  }
 0x22b   : > { %v11689_v9 = vrot.slane %v23081_v2, 2 }
 0x22f   : > { %20488 = vmatmul.mubr.bf16.gmra.mrb[116].mxu1 %v2517_v19  ;;  %v11675_v19 = vrot.slane %v23065_v13, 2  ;;  %v23085_v13 = vld [vmem:[%s23639_s10 + $0x180] sm:$0xff]  }
 0x230   : > { %21180 = vmatmul.mubr.bf16.gmra.mrb[48].mxu0 %v11658_v21  ;;  %20491 = vmatprep.mubr.bf16.mxu1 %v2525_v22  ;;  %v23068_v21 = vld [vmem:[%s23639_s10 + $0x140] sm:$0xff]   ;;  %v2581_v22 = vsel %vm2033_vm2, %v2576_v15, %v2580_v16  ;;  %v11690_v16 = vsel %vm9870_vm1, %v11687_v63, %v11689_v9  ;;  %v11693_v20 = vrot.slane %v23085_v13, 2  ;;  %v23102_v63 = vld [vmem:[%s23639_s10 + $0x90] sm:$0xff]  }
 0x231   : > { %21183 = vmatprep.mubr.bf16.mxu0 %v11660_v25  ;;  %v4183_v25 = vsel %vm4180_vm3, %v4181_v17, %v4182_v18  ;;  %v11676_v27 = vsel %vm9870_vm1, %v11673_v40, %v11675_v19  ;;  %v11677_v29 = vrot.slane %v23068_v21, 2  ;;  %v23089_v18 = vld [vmem:[%s23639_s10 + $0x188] sm:$0xff]  }
 0x233   : > { %v11678_v36 = vsel %vm9870_vm1, %v11675_v19, %v11677_v29  ;;  %v11680_v39 = vsel %vm9870_vm1, %v11677_v29, %v11679_v32 }
 0x237   : > { %20492 = vmatmul.mubr.bf16.gmra.mrb[120].mxu1 %v2533_v38  ;;  %v4187_v38 = vsel %vm4180_vm3, %v4184_v28, %v4186_v30  ;;  %v23093_v30 = vld [vmem:[%s23639_s10 + $0x198] sm:$0xff]  }
 0x238   : > { %21184 = vmatmul.mubr.bf16.gmra.mrb[52].mxu0 %v11662_v41  ;;  %20495 = vmatprep.mubr.bf16.mxu1 %v2541_v42  ;;  %v23075_v41 = vld [vmem:[%s23639_s10 + $0x158] sm:$0xff]   ;;  %v23086_v42 = vld [vmem:[%s25538_s1 + $0xc8] sm:$0xff]  }
 0x239   : > { %21187 = vmatprep.mubr.bf16.mxu0 %v11664_v45  ;;  %v11681_v45 = vrot.slane %v23073_v34, 2  ;;  %v11683_v48 = vrot.slane %v23075_v41, 2 }
 0x23b   : > { %v11682_v55 = vsel %vm9870_vm1, %v11679_v32, %v11681_v45  ;;  %v11684_v57 = vsel %vm9870_vm1, %v11681_v45, %v11683_v48  ;;  %v11686_v4 = vsel %vm9870_vm1, %v11683_v48, %v11685_v61  ;;  %v4204_v32 = vrot.slane %v23090_v23, 1  ;;  %v23114_v23 = vld [vmem:[%s23639_s10 + $0xb8] sm:$0xff]  }
 0x23f   : > { %20496 = vmatmul.mubr.bf16.gmra.mrb[124].mxu1 %v2549_v58  ;;  %v23122_v58 = vld [vmem:[%s25538_s1 + $0xd8] sm:$0xff]  }
 0x240   : > { %21188 = vmatmul.mubr.bf16.gmra.mrb[56].mxu0 %v11666_v59  ;;  %20499 = vmatprep.mubr.bf16.mxu1 %v2557_v60  ;;  %v4192_v59 = vrot.slane %v23076_v49, 1  ;;  %v23146_v60 = vld [vmem:[%s25538_s1 + $0x200] sm:$0xff]   ;;  %v11703_v49 = vrot.slane %v23097_v44, 2 }
 0x241   : > { %21191 = vmatprep.mubr.bf16.mxu0 %v11668_v0  ;;  %v23080_v0 = vld [vmem:[%s23639_s10 + $0x40] sm:$0xff]   ;;  %21419 = vmatprep.subr.bf16.mxu0 %v23146_v60  ;;  %v11705_v60 = vrot.slane %v23099_v51, 2 }
 0x242   : > { %v4193_v31 = vsel %vm4180_vm3, %v4190_v46, %v4192_v59  ;;  %v4195_v5 = vsel %vm4180_vm3, %v4192_v59, %v4194_v62  ;;  %v4196_v8 = vrot.slane %v23080_v0, 1  ;;  %v23163_v46 = vld [vmem:[%s25538_s1 + $0xe8] sm:$0xff]   ;;  %v4212_v59 = vrot.slane %v23098_v50, 1  ;;  %v23103_v0 = vld [vmem:[%s23639_s10 + $0x1c0] sm:$0xff]   ;;  %v23124_v50 = vld [vmem:[%s23639_s10 + $0xd8] sm:$0xff]  }
 0x244   : > { %v4197_v15 = vsel %vm4180_vm3, %v4194_v62, %v4196_v8 }
 0x247   : > { %20500 = vmatmul.mubr.bf16.gmra.mrb[128].mxu1 %v2565_v10  ;;  %v4198_v10 = vrot.slane %v23082_v3, 1  ;;  %v11706_v3 = vsel %vm9870_vm1, %v11703_v49, %v11705_v60 }
 0x248   : > { %21192 = vmatmul.mubr.bf16.gmra.mrb[60].mxu0 %v11670_v11  ;;  %20503 = vmatprep.mubr.bf16.mxu1 %v2573_v12  ;;  %v11691_v11 = vrot.slane %v23083_v7, 2  ;;  %v23084_v12 = vld [vmem:[%s23639_s10 + $0x50] sm:$0xff]   ;;  %v11709_v7 = vrot.slane %v23103_v0, 2 }
 0x249   : > { %21195 = vmatprep.mubr.bf16.mxu0 %v11672_v14  ;;  %v23088_v14 = vld [vmem:[%s23639_s10 + $0x58] sm:$0xff]   ;;  %v4199_v40 = vsel %vm4180_vm3, %v4196_v8, %v4198_v10  ;;  %v4200_v19 = vrot.slane %v23084_v12, 1  ;;  %v23110_v12 = vld [vmem:[%s23639_s10 + $0xa8] sm:$0xff]  }
 0x24a   : > { %v11692_v17 = vsel %vm9870_vm1, %v11689_v9, %v11691_v11  ;;  %v4202_v21 = vrot.slane %v23088_v14, 1 }
 0x24b   : > { %v4201_v26 = vsel %vm4180_vm3, %v4198_v10, %v4200_v19  ;;  %v23108_v10 = vld [vmem:[%s23639_s10 + $0xa0] sm:$0xff]  }
 0x24c   : > { %v4203_v28 = vsel %vm4180_vm3, %v4200_v19, %v4202_v21  ;;  %v4222_v19 = vrot.slane %v23110_v12, 1 }
 0x24f   : > { %20504 = vmatmul.mubr.bf16.gmra.mrb[132].mxu1 %v2581_v22  ;;  %v11695_v22 = vrot.slane %v23089_v18, 2 }
 0x250   : > { %21196 = vmatmul.mubr.bf16.gmra.mrb[64].mxu0 %v11674_v24  ;;  %20523 = vmatprep.mubr.bf16.mxu1 %v4183_v25  ;;  %v23091_v24 = vld [vmem:[%s23639_s10 + $0x190] sm:$0xff]   ;;  %v23092_v25 = vld [vmem:[%s23639_s10 + $0x68] sm:$0xff]  }
 0x251   : > { %21199 = vmatprep.mubr.bf16.mxu0 %v11676_v27  ;;  %v11694_v27 = vsel %vm9870_vm1, %v11691_v11, %v11693_v20  ;;  %v11696_v29 = vsel %vm9870_vm1, %v11693_v20, %v11695_v22  ;;  %v11697_v33 = vrot.slane %v23091_v24, 2  ;;  %v4206_v34 = vrot.slane %v23092_v25, 1  ;;  %v23109_v11 = vld [vmem:[%s23639_s10 + $0x1d0] sm:$0xff]  }
 0x252   : > { %v11713_v18 = vrot.slane %v23109_v11, 2 }
 0x253   : > { %v11698_v41 = vsel %vm9870_vm1, %v11695_v22, %v11697_v33  ;;  %v23113_v22 = vld [vmem:[%s23639_s10 + $0x1e0] sm:$0xff]  }
 0x257   : > { %20524 = vmatmul.mubr.bf16.vlgmr.msra.gmra.mrb[0].mxu1 %v4185_v35  ;;  %v11699_v35 = vrot.slane %v23093_v30, 2  ;;  %v23181_v30 = vld [vmem:[%s25538_s1 + $0xf0] sm:$0xff]  }
 0x258   : > { %21200 = vmatmul.mubr.bf16.gmra.mrb[68].mxu0 %v11678_v36  ;;  %20660 = vmatpush3.bf16.msra.mxu1 %v23428_v43  ;;  %v23094_v36 = vld [vmem:[%s23639_s10 + $0x70] sm:$0xff]  }
 0x259   : > { %20527 = vmatprep.mubr.bf16.mxu1 %v4187_v38  ;;  %21203 = vmatprep.mubr.bf16.mxu0 %v11680_v39  ;;  %v23096_v38 = vld [vmem:[%s23639_s10 + $0x78] sm:$0xff]   ;;  %v4205_v39 = vsel %vm4180_vm3, %v4202_v21, %v4204_v32  ;;  %v11700_v43 = vsel %vm9870_vm1, %v11697_v33, %v11699_v35  ;;  %v4208_v45 = vrot.slane %v23094_v36, 1  ;;  %v23112_v21 = vld [vmem:[%s23639_s10 + $0xb0] sm:$0xff]   ;;  %v4226_v33 = vrot.slane %v23114_v23, 1  ;;  %v23136_v23 = vld [vmem:[%s23639_s10 + $0x108] sm:$0xff]  }
 0x25a   : > { %20661 = vmatprep.subr.bf16.mxu1 %v23086_v42  ;;  %v4210_v48 = vrot.slane %v23096_v38, 1  ;;  %v23117_v36 = vld [vmem:[%s23639_s10 + $0x1f0] sm:$0xff]  }
 0x25b   : > { %v4209_v53 = vsel %vm4180_vm3, %v4206_v34, %v4208_v45 }
 0x25c   : > { %20662 = vmatpush3.bf16.msra.mxu1 %v23086_v42  ;;  %v4207_v42 = vsel %vm4180_vm3, %v4204_v32, %v4206_v34  ;;  %v4213_v2 = vsel %vm4180_vm3, %v4210_v48, %v4212_v59  ;;  %v11717_v32 = vrot.slane %v23113_v22, 2  ;;  %v23135_v22 = vld [vmem:[%s23639_s10 + $0x230] sm:$0xff]  }
 0x25d   : > { %20663 = vmatprep.subr.bf16.mxu1 %v23104_v47 }
 0x25f   : > { %20528 = vmatmul.mubr.bf16.gmra.mrb[4].mxu1 %v4189_v52  ;;  %v23100_v52 = vld [vmem:[%s23639_s10 + $0x88] sm:$0xff]  }
 0x260   : > { %21204 = vmatmul.mubr.bf16.gmra.mrb[72].mxu0 %v11682_v55  ;;  %20531 = vmatprep.mubr.bf16.mxu1 %v4191_v56  ;;  %v4211_v56 = vsel %vm4180_vm3, %v4208_v45, %v4210_v48  ;;  %v4214_v61 = vrot.slane %v23100_v52, 1  ;;  %v11721_v45 = vrot.slane %v23117_v36, 2  ;;  %v23120_v48 = vld [vmem:[%s23639_s10 + $0xd0] sm:$0xff]  }
 0x261   : > { %21207 = vmatprep.mubr.bf16.mxu0 %v11684_v57  ;;  %20664 = vmatpush3.bf16.msra.mxu1 %v23104_v47  ;;  %v11701_v47 = vrot.slane %v23095_v37, 2  ;;  %v23118_v37 = vld [vmem:[%s23639_s10 + $0xc8] sm:$0xff]  }
 0x262   : > { %20665 = vmatprep.subr.bf16.mxu1 %v23122_v58 }
 0x263   : > { %v11702_v55 = vsel %vm9870_vm1, %v11699_v35, %v11701_v47  ;;  %v11704_v57 = vsel %vm9870_vm1, %v11701_v47, %v11703_v49  ;;  %v23116_v35 = vld [vmem:[%s23639_s10 + $0xc0] sm:$0xff]  }
 0x264   : > { %v4228_v44 = vrot.slane %v23116_v35, 1  ;;  %v23121_v49 = vld [vmem:[%s23639_s10 + $0x200] sm:$0xff]  }
 0x265   : > { %20666 = vmatpush3.bf16.msra.mxu1 %v23122_v58  ;;  %v23101_v58 = vld [vmem:[%s23639_s10 + $0x1b8] sm:$0xff]  }
 0x266   : > { %20667 = vmatprep.subr.bf16.mxu1 %v23144_v1  ;;  %v11707_v62 = vrot.slane %v23101_v58, 2  ;;  %v4229_v51 = vsel %vm4180_vm3, %v4226_v33, %v4228_v44  ;;  %v11725_v58 = vrot.slane %v23121_v49, 2 }
 0x267   : > { %20532 = vmatmul.mubr.bf16.gmra.mrb[8].mxu1 %v4193_v31  ;;  %v4215_v31 = vsel %vm4180_vm3, %v4212_v59, %v4214_v61  ;;  %v4234_v59 = vrot.slane %v23124_v50, 1 }
 0x268   : > { %21208 = vmatmul.mubr.bf16.gmra.mrb[76].mxu0 %v11686_v4  ;;  %20535 = vmatprep.mubr.bf16.mxu1 %v4195_v5  ;;  %v11708_v4 = vsel %vm9870_vm1, %v11705_v60, %v11707_v62  ;;  %v23107_v5 = vld [vmem:[%s23639_s10 + $0x1c8] sm:$0xff]   ;;  %v11710_v14 = vsel %vm9870_vm1, %v11707_v62, %v11709_v7  ;;  %v23127_v62 = vld [vmem:[%s23639_s10 + $0x210] sm:$0xff]  }
 0x269   : > { %21211 = vmatprep.mubr.bf16.mxu0 %v11688_v6  ;;  %20668 = vmatpush3.bf16.msra.mxu1 %v23144_v1  ;;  %v23106_v1 = vld [vmem:[%s23639_s10 + $0x98] sm:$0xff]   ;;  %v4216_v6 = vrot.slane %v23102_v63, 1  ;;  %v11711_v9 = vrot.slane %v23107_v5, 2  ;;  %v23128_v63 = vld [vmem:[%s23639_s10 + $0xe8] sm:$0xff]   ;;  %v11729_v5 = vrot.slane %v23127_v62, 2 }
 0x26a   : > { %20669 = vmatprep.subr.bf16.mxu1 %v23163_v46  ;;  %v4218_v8 = vrot.slane %v23106_v1, 1 }
 0x26b   : > { %v4217_v13 = vsel %vm4180_vm3, %v4214_v61, %v4216_v6  ;;  %v11714_v25 = vsel %vm9870_vm1, %v11711_v9, %v11713_v18  ;;  %v23126_v61 = vld [vmem:[%s23639_s10 + $0xe0] sm:$0xff]  }
 0x26d   : > { %20670 = vmatpush3.bf16.msra.mxu1 %v23163_v46  ;;  %v4230_v46 = vrot.slane %v23118_v37, 1  ;;  %v11737_v37 = vrot.slane %v23135_v22, 2  ;;  %v23151_v22 = vld [vmem:[%s23639_s10 + $0x138] sm:$0xff]  }
 0x26e   : > { %20671 = vmatprep.subr.bf16.mxu1 %v23181_v30 }
 0x26f   : > { %20536 = vmatmul.mubr.bf16.gmra.mrb[12].mxu1 %v4197_v15  ;;  %v4219_v15 = vsel %vm4180_vm3, %v4216_v6, %v4218_v8  ;;  %v4238_v6 = vrot.slane %v23128_v63, 1 }
 0x270   : > { %21212 = vmatmul.mubr.bf16.gmra.mrb[80].mxu0 %v11690_v16  ;;  %20539 = vmatprep.mubr.bf16.mxu1 %v4199_v40  ;;  %v11712_v16 = vsel %vm9870_vm1, %v11709_v7, %v11711_v9  ;;  %v23111_v40 = vld [vmem:[%s23639_s10 + $0x1d8] sm:$0xff]   ;;  %v23131_v9 = vld [vmem:[%s23639_s10 + $0x220] sm:$0xff]  }
 0x271   : > { %21215 = vmatprep.mubr.bf16.mxu0 %v11692_v17  ;;  %v4220_v17 = vrot.slane %v23108_v10, 1  ;;  %v11715_v20 = vrot.slane %v23111_v40, 2  ;;  %20672 = vmatpush3.bf16.msra.mxu1 %v23181_v30  ;;  %v23132_v10 = vld [vmem:[%s23639_s10 + $0xf8] sm:$0xff]  }
 0x272   : > { %v23199_v40 = vld [vmem:[%s25538_s1 + $0xf8] sm:$0xff]  }
 0x273   : > { %v4221_v24 = vsel %vm4180_vm3, %v4218_v8, %v4220_v17  ;;  %v23130_v8 = vld [vmem:[%s23639_s10 + $0xf0] sm:$0xff]   ;;  %20673 = vmatprep.subr.bf16.mxu1 %v23199_v40 }
 0x275   : > { %20674 = vmatpush3.bf16.msra.mxu1 %v23199_v40 }
 0x277   : > { %20540 = vmatmul.mubr.bf16.gmra.mrb[16].mxu1 %v4201_v26  ;;  %v4223_v26 = vsel %vm4180_vm3, %v4220_v17, %v4222_v19  ;;  %v11733_v17 = vrot.slane %v23131_v9, 2 }
 0x278   : > { %21216 = vmatmul.mubr.bf16.gmra.mrb[84].mxu0 %v11694_v27  ;;  %20543 = vmatprep.mubr.bf16.mxu1 %v4203_v28  ;;  %v11716_v27 = vsel %vm9870_vm1, %v11713_v18, %v11715_v20  ;;  %v23115_v28 = vld [vmem:[%s23639_s10 + $0x1e8] sm:$0xff]   ;;  %v4242_v18 = vrot.slane %v23132_v10, 1 }
 0x279   : > { %21219 = vmatprep.mubr.bf16.mxu0 %v11696_v29  ;;  %v4224_v29 = vrot.slane %v23112_v21, 1  ;;  %v11719_v34 = vrot.slane %v23115_v28, 2  ;;  %v23141_v21 = vld [vmem:[%s23639_s10 + $0x20] sm:$0xfc]  }
 0x27b   : > { %v4225_v38 = vsel %vm4180_vm3, %v4222_v19, %v4224_v29  ;;  %v11722_v52 = vsel %vm9870_vm1, %v11719_v34, %v11721_v45 }
 0x27f   : > { %20544 = vmatmul.mubr.bf16.gmra.mrb[20].mxu1 %v4205_v39  ;;  %v11718_v39 = vsel %vm9870_vm1, %v11715_v20, %v11717_v32  ;;  %v23134_v20 = vld [vmem:[%s23639_s10 + $0x100] sm:$0xff]  }
 0x280   : > { %21220 = vmatmul.mubr.bf16.gmra.mrb[88].mxu0 %v11698_v41  ;;  %20547 = vmatprep.mubr.bf16.mxu1 %v4207_v42  ;;  %v4227_v41 = vsel %vm4180_vm3, %v4224_v29, %v4226_v33  ;;  %v11720_v42 = vsel %vm9870_vm1, %v11717_v32, %v11719_v34  ;;  %v13343_v32 = vshrl.u32 %v23141_v21, 16  ;;  %v23145_v33 = vld [vmem:[%s23639_s10 + $0x30] sm:$0xff]   ;;  %v13346_v34 = vshll.u32 %v23141_v21, 16 }
 0x281   : > { %21223 = vmatprep.mubr.bf16.mxu0 %v11700_v43  ;;  %v23119_v43 = vld [vmem:[%s23639_s10 + $0x1f8] sm:$0xff]   ;;  %v4244_v36 = vrot.slane %v23134_v20, 1  ;;  %v13363_v49 = vshll.u32 %v23145_v33, 16 }
 0x282   : > { %v11723_v47 = vrot.slane %v23119_v43, 2  ;;  %v13360_v43 = vshrl.u32 %v23145_v33, 16 }
 0x283   : > { %v4245_v50 = vsel %vm4180_vm3, %v4242_v18, %v4244_v36  ;;  %v13365_v62 = vrot.slane %v13363_v49, 3 }
 0x284   : > { %v11726_v1 = vsel %vm9870_vm1, %v11723_v47, %v11725_v58 }
 0x287   : > { %20548 = vmatmul.mubr.bf16.gmra.mrb[24].mxu1 %v4209_v53  ;;  %v4231_v53 = vsel %vm4180_vm3, %v4228_v44, %v4230_v46  ;;  %v23139_v44 = vld [vmem:[%s23639_s10 + $0x240] ss:$0 sps:$4 sm:$0x33]  }
 0x288   : > { %21224 = vmatmul.mubr.bf16.gmra.mrb[92].mxu0 %v11702_v55  ;;  %20551 = vmatprep.mubr.bf16.mxu1 %v4211_v56  ;;  %v11724_v55 = vsel %vm9870_vm1, %v11721_v45, %v11723_v47  ;;  %v23125_v56 = vld [vmem:[%s23639_s10 + $0x208] sm:$0xff]   ;;  %v23140_v45 = vld [vmem:[%s23639_s10 + $0x118] sm:$0xff]   ;;  %v13348_v47 = vrot.slane %v13346_v34, 3 }
 0x289   : > { %21227 = vmatprep.mubr.bf16.mxu0 %v11704_v57  ;;  %v4232_v57 = vrot.slane %v23120_v48, 1  ;;  %v11727_v60 = vrot.slane %v23125_v56, 2  ;;  %v23148_v56 = vld [vmem:[%s23639_s10 + $0x38] sm:$0xff]  }
 0x28b   : > { %v4233_v0 = vsel %vm4180_vm3, %v4230_v46, %v4232_v57  ;;  %v11730_v12 = vsel %vm9870_vm1, %v11727_v60, %v11729_v5  ;;  %v13345_v46 = vrot.slane %v13343_v32, 2  ;;  %v23164_v32 = vld [vmem:[%s25538_s1 + $0x208] sm:$0xff]  }
 0x28d   : > { %v13349_v63 = vor.u32 %v13348_v47, %v13345_v46  ;;  %v23155_v46 = vld [vmem:[%s23639_s10 + $0x148] sm:$0xff]  }
 0x28f   : > { %20552 = vmatmul.mubr.bf16.gmra.mrb[28].mxu1 %v4213_v2  ;;  %v4235_v2 = vsel %vm4180_vm3, %v4232_v57, %v4234_v59  ;;  %v23150_v57 = vld [vmem:[%s23639_s10 + $0x40] sm:$0xff]  }
 0x290   : > { %21228 = vmatmul.mubr.bf16.gmra.mrb[96].mxu0 %v11706_v3  ;;  %20555 = vmatprep.mubr.bf16.mxu1 %v4215_v31  ;;  %v11728_v3 = vsel %vm9870_vm1, %v11725_v58, %v11727_v60  ;;  %v23129_v31 = vld [vmem:[%s23639_s10 + $0x218] sm:$0xff]   ;;  %v4250_v60 = vrot.slane %v23140_v45, 1 }
 0x291   : > { %21231 = vmatprep.mubr.bf16.mxu0 %v11708_v4  ;;  %v4236_v4 = vrot.slane %v23126_v61, 1  ;;  %v11731_v7 = vrot.slane %v23129_v31, 2  ;;  %v13362_v61 = vrot.slane %v13360_v43, 2  ;;  %v23147_v31 = vld [vmem:[%s23639_s10 + $0x128] sm:$0xff]  }
 0x292   : > { %v4254_v40 = vrot.slane %v23147_v31, 1 }
 0x293   : > { %v4237_v11 = vsel %vm4180_vm3, %v4234_v59, %v4236_v4  ;;  %v11734_v28 = vsel %vm9870_vm1, %v11731_v7, %v11733_v17  ;;  %v11741_v59 = vrot.slane %v23139_v44, 2  ;;  %v23182_v44 = vld [vmem:[%s25538_s1 + $0x210] sm:$0xff]  }
 0x297   : > { %20556 = vmatmul.mubr.bf16.gmra.mrb[32].mxu1 %v4217_v13  ;;  %v4239_v13 = vsel %vm4180_vm3, %v4236_v4, %v4238_v6  ;;  %v13378_v4 = vshrl.u32 %v23150_v57, 16 }
 0x298   : > { %21232 = vmatmul.mubr.bf16.gmra.mrb[100].mxu0 %v11710_v14  ;;  %20559 = vmatprep.mubr.bf16.mxu1 %v4219_v15  ;;  %v11732_v14 = vsel %vm9870_vm1, %v11729_v5, %v11731_v7  ;;  %v23133_v15 = vld [vmem:[%s23639_s10 + $0x228] sm:$0xff]   ;;  %v13381_v5 = vshll.u32 %v23150_v57, 16 }
 0x299   : > { %21235 = vmatprep.mubr.bf16.mxu0 %v11712_v16  ;;  %v4240_v16 = vrot.slane %v23130_v8, 1  ;;  %v11735_v19 = vrot.slane %v23133_v15, 2 }
 0x29a   : > { %v13383_v20 = vrot.slane %v13381_v5, 3 }
 0x29b   : > { %v4243_v29 = vsel %vm4180_vm3, %v4240_v16, %v4242_v18  ;;  %v11736_v30 = vsel %vm9870_vm1, %v11733_v17, %v11735_v19  ;;  %v23149_v18 = vld [vmem:[%s23639_s10 + $0x130] sm:$0xff]  }
 0x29f   : > { %20560 = vmatmul.mubr.bf16.gmra.mrb[36].mxu1 %v4221_v24  ;;  %v23142_v24 = vld [vmem:[%s23639_s10 + $0x28] sm:$0xff]  }
 0x2a0   : > { %21236 = vmatmul.mubr.bf16.gmra.mrb[104].mxu0 %v11714_v25  ;;  %20563 = vmatprep.mubr.bf16.mxu1 %v4223_v26  ;;  %v4241_v25 = vsel %vm4180_vm3, %v4238_v6, %v4240_v16  ;;  %v23137_v26 = vld [vmem:[%s23639_s10 + $0x238] sm:$0xff]   ;;  %v13351_v35 = vshrl.u32 %v23142_v24, 16  ;;  %v23152_v6 = vld [vmem:[%s23639_s10 + $0x48] sm:$0xff]   ;;  %v13366_v16 = vor.u32 %v13365_v62, %v13362_v61 }
 0x2a1   : > { %21239 = vmatprep.mubr.bf16.mxu0 %v11716_v27  ;;  %v23429_v27 = vld [vmem:[%s25538_s1 + $0x100] sm:$0xff]   ;;  %v13390_v21 = vshll.u32 %v23152_v6, 16 }
 0x2a2   : > { %21571 = vmatprep.subr.bf16.mxu1 %v23429_v27  ;;  %v13353_v48 = vrot.slane %v13351_v35, 2  ;;  %v4256_v35 = vrot.slane %v23149_v18, 1 }
 0x2a4   : > { %v4257_v49 = vsel %vm4180_vm3, %v4254_v40, %v4256_v35 }
 0x2a7   : > { %20564 = vmatmul.mubr.bf16.gmra.mrb[40].mxu1 %v4225_v38  ;;  %v4246_v38 = vrot.slane %v23136_v23, 1 }
 0x2a8   : > { %21240 = vmatmul.mubr.bf16.gmra.mrb[108].mxu0 %v11718_v39  ;;  %20567 = vmatprep.mubr.bf16.mxu1 %v4227_v41  ;;  %v11739_v39 = vrot.slane %v23137_v26, 2  ;;  %v23138_v41 = vld [vmem:[%s23639_s10 + $0x110] sm:$0xff]  }
 0x2a9   : > { %21243 = vmatprep.mubr.bf16.mxu0 %v11720_v42  ;;  %v13354_v42 = vshll.u32 %v23142_v24, 16  ;;  %v4248_v58 = vrot.slane %v23138_v41, 1  ;;  %v23153_v41 = vld [vmem:[%s23639_s10 + $0x140] sm:$0xff]  }
 0x2aa   : > { %v11742_v8 = vsel %vm9870_vm1, %v11739_v39, %v11741_v59  ;;  %v4260_v57 = vrot.slane %v23153_v41, 1  ;;  %v4262_v59 = vrot.slane %v23155_v46, 1 }
 0x2ab   : > { %v4249_v7 = vsel %vm4180_vm3, %v4246_v38, %v4248_v58  ;;  %v4251_v9 = vsel %vm4180_vm3, %v4248_v58, %v4250_v60 }
 0x2af   : > { %20568 = vmatmul.mubr.bf16.gmra.mrb[44].mxu1 %v4229_v51  ;;  %v11738_v51 = vsel %vm9870_vm1, %v11735_v19, %v11737_v37  ;;  %v13380_v19 = vrot.slane %v13378_v4, 2  ;;  %v4263_v4 = vsel %vm4180_vm3, %v4260_v57, %v4262_v59 }
 0x2b0   : > { %21244 = vmatmul.mubr.bf16.gmra.mrb[112].mxu0 %v11722_v52  ;;  %20571 = vmatprep.mubr.bf16.mxu1 %v4231_v53  ;;  %v4247_v52 = vsel %vm4180_vm3, %v4244_v36, %v4246_v38  ;;  %v11740_v53 = vsel %vm9870_vm1, %v11737_v37, %v11739_v39  ;;  %v23430_v36 = vld [vmem:[%s25538_s1 + $0x200] sm:$0xff]   ;;  %v4258_v38 = vrot.slane %v23151_v22, 1 }
 0x2b1   : > { %21247 = vmatprep.mubr.bf16.mxu0 %v11724_v55  ;;  %v13356_v55 = vrot.slane %v13354_v42, 3  ;;  %v13384_v37 = vor.u32 %v13383_v20, %v13380_v19 }
 0x2b7   : > { %20572 = vmatmul.mubr.bf16.gmra.mrb[48].mxu1 %v4233_v0  ;;  %v13357_v0 = vor.u32 %v13356_v55, %v13353_v48  ;;  %v23158_v48 = vld [vmem:[%s23639_s10 + $0x60] sm:$0xff]  }
 0x2b8   : > { %21248 = vmatmul.mubr.bf16.gmra.mrb[116].mxu0 %v11726_v1  ;;  %20575 = vmatprep.mubr.bf16.mxu1 %v4235_v2  ;;  %v23143_v1 = vld [vmem:[%s23639_s10 + $0x120] sm:$0xff]   ;;  %v13369_v2 = vshrl.u32 %v23148_v56, 16  ;;  %v13417_v61 = vshll.u32 %v23158_v48, 16 }
 0x2b9   : > { %21251 = vmatprep.mubr.bf16.mxu0 %v11728_v3  ;;  %v13372_v3 = vshll.u32 %v23148_v56, 16  ;;  %v13358_v10 = vsel %vm13341_vm4, %v13349_v63, %v13357_v0  ;;  %v4252_v15 = vrot.slane %v23143_v1, 1  ;;  %v13367_v27 = vsel %vm13341_vm4, %v13357_v0, %v13366_v16  ;;  %v23200_v56 = vld [vmem:[%s25538_s1 + $0x218] sm:$0xff]   ;;  %v23222_v1 = vld [vmem:[%s25538_s1 + $0x220] sm:$0xff]  }
 0x2bb   : > { %v4253_v26 = vsel %vm4180_vm3, %v4250_v60, %v4252_v15  ;;  %v13414_v60 = vshrl.u32 %v23158_v48, 16  ;;  %v23169_v48 = vld [vmem:[%s23639_s10 + $0x178] sm:$0xff]  }
 0x2bd   : > { %v13416_v5 = vrot.slane %v13414_v60, 2 }
 0x2bf   : > { %20576 = vmatmul.mubr.bf16.gmra.mrb[52].mxu1 %v4237_v11  ;;  %v13371_v11 = vrot.slane %v13369_v2, 2  ;;  %v4261_v2 = vsel %vm4180_vm3, %v4258_v38, %v4260_v57  ;;  %v4274_v57 = vrot.slane %v23169_v48, 1 }
 0x2c0   : > { %21252 = vmatmul.mubr.bf16.gmra.mrb[120].mxu0 %v11730_v12  ;;  %20579 = vmatprep.mubr.bf16.mxu1 %v4239_v13  ;;  %v13374_v12 = vrot.slane %v13372_v3, 3  ;;  %v13387_v13 = vshrl.u32 %v23152_v6, 16  ;;  %v23157_v3 = vld [vmem:[%s23639_s10 + $0x150] sm:$0xff]   ;;  %v13419_v6 = vrot.slane %v13417_v61, 3 }
 0x2c1   : > { %21255 = vmatprep.mubr.bf16.mxu0 %v11732_v14  ;;  %v23154_v14 = vld [vmem:[%s23639_s10 + $0x50] sm:$0xff]  }
 0x2c2   : > { %v13375_v17 = vor.u32 %v13374_v12, %v13371_v11  ;;  %v13389_v23 = vrot.slane %v13387_v13, 2  ;;  %v13396_v24 = vshrl.u32 %v23154_v14, 16  ;;  %v13399_v33 = vshll.u32 %v23154_v14, 16  ;;  %v23166_v12 = vld [vmem:[%s23639_s10 + $0x78] sm:$0xff]  }
 0x2c3   : > { %v4264_v13 = vrot.slane %v23157_v3, 1  ;;  %v13420_v14 = vor.u32 %v13419_v6, %v13416_v5  ;;  %v13441_v18 = vshrl.u32 %v23166_v12, 16  ;;  %v13444_v19 = vshll.u32 %v23166_v12, 16  ;;  %v23176_v5 = vld [vmem:[%s23639_s10 + $0xa0] sm:$0xff]  }
 0x2c4   : > { %v13398_v42 = vrot.slane %v13396_v24, 2  ;;  %v13401_v45 = vrot.slane %v13399_v33, 3 }
 0x2c5   : > { %v4265_v20 = vsel %vm4180_vm3, %v4262_v59, %v4264_v13 }
 0x2c6   : > { %v13402_v58 = vor.u32 %v13401_v45, %v13398_v42 }
 0x2c7   : > { %20580 = vmatmul.mubr.bf16.gmra.mrb[56].mxu1 %v4241_v25  ;;  %v23156_v25 = vld [vmem:[%s23639_s10 + $0x58] sm:$0xff]  }
 0x2c8   : > { %21256 = vmatmul.mubr.bf16.gmra.mrb[124].mxu0 %v11734_v28  ;;  %20583 = vmatprep.mubr.bf16.mxu1 %v4243_v29  ;;  %v4255_v28 = vsel %vm4180_vm3, %v4252_v15, %v4254_v40  ;;  %v13376_v29 = vsel %vm13341_vm4, %v13366_v16, %v13375_v17  ;;  %v13405_v34 = vshrl.u32 %v23156_v25, 16  ;;  %v13408_v43 = vshll.u32 %v23156_v25, 16 }
 0x2c9   : > { %21259 = vmatprep.mubr.bf16.mxu0 %v11736_v30  ;;  %v13392_v30 = vrot.slane %v13390_v21, 3  ;;  %v23161_v21 = vld [vmem:[%s23639_s10 + $0x160] sm:$0xff]  }
 0x2ca   : > { %v13407_v47 = vrot.slane %v13405_v34, 2  ;;  %v13410_v55 = vrot.slane %v13408_v43, 3  ;;  %v4268_v33 = vrot.slane %v23161_v21, 1  ;;  %v23167_v43 = vld [vmem:[%s23639_s10 + $0x170] sm:$0xff]  }
 0x2cb   : > { %v13393_v39 = vor.u32 %v13392_v30, %v13389_v23  ;;  %v13446_v30 = vrot.slane %v13444_v19, 3  ;;  %v23175_v19 = vld [vmem:[%s23639_s10 + $0x190] sm:$0xff]  }
 0x2cc   : > { %v13411_v62 = vor.u32 %v13410_v55, %v13407_v47  ;;  %v4272_v55 = vrot.slane %v23167_v43, 1 }
 0x2cd   : > { %v13403_v31 = vsel %vm13341_vm4, %v13393_v39, %v13402_v58 }
 0x2ce   : > { %v13421_v22 = vsel %vm13341_vm4, %v13411_v62, %v13420_v14 }
 0x2cf   : > { %20584 = vmatmul.mubr.bf16.gmra.mrb[60].mxu1 %v4245_v50  ;;  %v23160_v50 = vld [vmem:[%s23639_s10 + $0x68] sm:$0xff]  }
 0x2d0   : > { %21260 = vmatmul.mubr.bf16.gmra.mrb[128].mxu0 %v11738_v51  ;;  %20587 = vmatprep.mubr.bf16.mxu1 %v4247_v52  ;;  %v13385_v51 = vsel %vm13341_vm4, %v13375_v17, %v13384_v37  ;;  %v4259_v52 = vsel %vm4180_vm3, %v4256_v35, %v4258_v38  ;;  %v13423_v63 = vshrl.u32 %v23160_v50, 16  ;;  %v13426_v0 = vshll.u32 %v23160_v50, 16 }
 0x2d1   : > { %21263 = vmatprep.mubr.bf16.mxu0 %v11740_v53  ;;  %v13394_v53 = vsel %vm13341_vm4, %v13384_v37, %v13393_v39 }
 0x2d2   : > { %v13428_v11 = vrot.slane %v13426_v0, 3  ;;  %v23171_v0 = vld [vmem:[%s23639_s10 + $0x180] sm:$0xff]  }
 0x2d7   : > { %20588 = vmatmul.mubr.bf16.gmra.mrb[64].mxu1 %v4249_v7  ;;  %v23159_v7 = vld [vmem:[%s23639_s10 + $0x158] sm:$0xff]  }
 0x2d8   : > { %21264 = vmatmul.mubr.bf16.gmra.mrb[132].mxu0 %v11742_v8  ;;  %20591 = vmatprep.mubr.bf16.mxu1 %v4251_v9  ;;  %v23162_v8 = vld [vmem:[%s23639_s10 + $0x70] sm:$0xff]   ;;  %v13412_v9 = vsel %vm13341_vm4, %v13402_v58, %v13411_v62  ;;  %v4266_v15 = vrot.slane %v23159_v7, 1 }
 0x2d9   : > { %21283 = vmatprep.mubr.bf16.mxu0 %v13358_v10  ;;  %v13425_v10 = vrot.slane %v13423_v63, 2  ;;  %v13432_v16 = vshrl.u32 %v23162_v8, 16  ;;  %v13435_v40 = vshll.u32 %v23162_v8, 16 }
 0x2da   : > { %v4267_v23 = vsel %vm4180_vm3, %v4264_v13, %v4266_v15  ;;  %v4269_v42 = vsel %vm4180_vm3, %v4266_v15, %v4268_v33  ;;  %v13489_v15 = vshll.u32 %v23176_v5, 16 }
 0x2db   : > { %v13429_v17 = vor.u32 %v13428_v11, %v13425_v10  ;;  %v13434_v24 = vrot.slane %v13432_v16, 2  ;;  %v13437_v25 = vrot.slane %v13435_v40, 3  ;;  %v4276_v10 = vrot.slane %v23171_v0, 1  ;;  %v23239_v11 = vld [vmem:[%s25538_s1 + $0x228] sm:$0xff]  }
 0x2dd   : > { %v13438_v34 = vor.u32 %v13437_v25, %v13434_v24  ;;  %v23177_v24 = vld [vmem:[%s23639_s10 + $0x198] sm:$0xff]   ;;  %v23180_v25 = vld [vmem:[%s23639_s10 + $0xb0] sm:$0xff]  }
 0x2df   : > { %20592 = vmatmul.mubr.bf16.gmra.mrb[68].mxu1 %v4253_v26  ;;  %v23165_v26 = vld [vmem:[%s23639_s10 + $0x168] sm:$0xff]  }
 0x2e0   : > { %21284 = vmatmul.mubr.bf16.vlgmr.msra.gmra.mrb[0].mxu0 %v13367_v27  ;;  %20595 = vmatprep.mubr.bf16.mxu1 %v4255_v28  ;;  %v23168_v27 = vld [vmem:[%s23639_s10 + $0x80] sm:$0xff]   ;;  %v13430_v28 = vsel %vm13341_vm4, %v13420_v14, %v13429_v17  ;;  %v4270_v35 = vrot.slane %v23165_v26, 1  ;;  %v13486_v14 = vshrl.u32 %v23176_v5, 16 }
 0x2e1   : > { %21420 = vmatpush3.bf16.msra.mxu0 %v23430_v36  ;;  %21287 = vmatprep.mubr.bf16.mxu0 %v13376_v29  ;;  %v13443_v29 = vrot.slane %v13441_v18, 2  ;;  %v13450_v36 = vshrl.u32 %v23168_v27, 16  ;;  %v13453_v37 = vshll.u32 %v23168_v27, 16  ;;  %v4277_v18 = vsel %vm4180_vm3, %v4274_v57, %v4276_v10 }
 0x2e2   : > { %21421 = vmatprep.subr.bf16.mxu0 %v23164_v32  ;;  %v4271_v45 = vsel %vm4180_vm3, %v4268_v33, %v4270_v35  ;;  %v4273_v63 = vsel %vm4180_vm3, %v4270_v35, %v4272_v55  ;;  %v4282_v33 = vrot.slane %v23177_v24, 1  ;;  %v13507_v35 = vshll.u32 %v23180_v25, 16 }
 0x2e3   : > { %v13447_v38 = vor.u32 %v13446_v30, %v13443_v29  ;;  %v13452_v46 = vrot.slane %v13450_v36, 2  ;;  %v13455_v47 = vrot.slane %v13453_v37, 3  ;;  %v23184_v29 = vld [vmem:[%s23639_s10 + $0xb8] sm:$0xff]   ;;  %v4280_v30 = vrot.slane %v23175_v19, 1 }
 0x2e4   : > { %v13513_v37 = vshrl.u32 %v23184_v29, 16 }
 0x2e5   : > { %21422 = vmatpush3.bf16.msra.mxu0 %v23164_v32  ;;  %v23170_v32 = vld [vmem:[%s23639_s10 + $0x88] sm:$0xff]   ;;  %v13448_v50 = vsel %vm13341_vm4, %v13438_v34, %v13447_v38  ;;  %v4283_v43 = vsel %vm4180_vm3, %v4280_v30, %v4282_v33 }
 0x2e6   : > { %21423 = vmatprep.subr.bf16.mxu0 %v23182_v44  ;;  %v13459_v39 = vshrl.u32 %v23170_v32, 16  ;;  %v13462_v41 = vshll.u32 %v23170_v32, 16 }
 0x2e7   : > { %20596 = vmatmul.mubr.bf16.gmra.mrb[72].mxu1 %v4257_v49  ;;  %v23172_v49 = vld [vmem:[%s23639_s10 + $0x90] sm:$0xff]  }
 0x2e8   : > { %21288 = vmatmul.mubr.bf16.gmra.mrb[4].mxu0 %v13385_v51  ;;  %20599 = vmatprep.mubr.bf16.mxu1 %v4259_v52  ;;  %v13461_v51 = vrot.slane %v13459_v39, 2  ;;  %v13464_v52 = vrot.slane %v13462_v41, 3  ;;  %v13468_v58 = vshrl.u32 %v23172_v49, 16  ;;  %v13471_v59 = vshll.u32 %v23172_v49, 16  ;;  %v23179_v41 = vld [vmem:[%s23639_s10 + $0x1a0] sm:$0xff]  }
 0x2e9   : > { %21291 = vmatprep.mubr.bf16.mxu0 %v13394_v53  ;;  %21424 = vmatpush3.bf16.msra.mxu0 %v23182_v44  ;;  %v13439_v44 = vsel %vm13341_vm4, %v13429_v17, %v13438_v34  ;;  %v23174_v53 = vld [vmem:[%s23639_s10 + $0x98] sm:$0xff]   ;;  %v13504_v34 = vshrl.u32 %v23180_v25, 16  ;;  %v13515_v49 = vrot.slane %v13513_v37, 2 }
 0x2ea   : > { %21425 = vmatprep.subr.bf16.mxu0 %v23200_v56  ;;  %v13465_v60 = vor.u32 %v13464_v52, %v13461_v51  ;;  %v13477_v61 = vshrl.u32 %v23174_v53, 16  ;;  %v13480_v62 = vshll.u32 %v23174_v53, 16  ;;  %v13470_v3 = vrot.slane %v13468_v58, 2  ;;  %v23188_v51 = vld [vmem:[%s23639_s10 + $0xc8] sm:$0xff]  }
 0x2eb   : > { %v4284_v52 = vrot.slane %v23179_v41, 1 }
 0x2ec   : > { %v13479_v7 = vrot.slane %v13477_v61, 2  ;;  %v13482_v8 = vrot.slane %v13480_v62, 3  ;;  %v23185_v62 = vld [vmem:[%s23639_s10 + $0x1b0] sm:$0xff]  }
 0x2ed   : > { %21426 = vmatpush3.bf16.msra.mxu0 %v23200_v56  ;;  %v13456_v56 = vor.u32 %v13455_v47, %v13452_v46  ;;  %v23183_v46 = vld [vmem:[%s23639_s10 + $0x1a8] sm:$0xff]   ;;  %v23186_v47 = vld [vmem:[%s23639_s10 + $0xc0] sm:$0xff]   ;;  %v4285_v61 = vsel %vm4180_vm3, %v4282_v33, %v4284_v52 }
 0x2ee   : > { %21427 = vmatprep.subr.bf16.mxu0 %v23222_v1  ;;  %v13483_v16 = vor.u32 %v13482_v8, %v13479_v7  ;;  %v23192_v7 = vld [vmem:[%s23639_s10 + $0xd8] sm:$0xff]   ;;  %v4288_v8 = vrot.slane %v23185_v62, 1 }
 0x2ef   : > { %20600 = vmatmul.mubr.bf16.gmra.mrb[76].mxu1 %v4261_v2  ;;  %v4275_v2 = vsel %vm4180_vm3, %v4272_v55, %v4274_v57  ;;  %v13466_v6 = vsel %vm13341_vm4, %v13456_v56, %v13465_v60  ;;  %v4286_v55 = vrot.slane %v23183_v46, 1  ;;  %v13525_v57 = vshll.u32 %v23186_v47, 16 }
 0x2f0   : > { %21292 = vmatmul.mubr.bf16.gmra.mrb[8].mxu0 %v13403_v31  ;;  %20603 = vmatprep.mubr.bf16.mxu1 %v4263_v4  ;;  %v13473_v31 = vrot.slane %v13471_v59, 3  ;;  %v23173_v4 = vld [vmem:[%s23639_s10 + $0x188] sm:$0xff]   ;;  %v13531_v59 = vshrl.u32 %v23188_v51, 16 }
 0x2f1   : > { %21295 = vmatprep.mubr.bf16.mxu0 %v13412_v9  ;;  %21428 = vmatpush3.bf16.msra.mxu0 %v23222_v1  ;;  %v13457_v1 = vsel %vm13341_vm4, %v13447_v38, %v13456_v56  ;;  %v23178_v9 = vld [vmem:[%s23639_s10 + $0xa8] sm:$0xff]   ;;  %v4278_v13 = vrot.slane %v23173_v4, 1  ;;  %v13516_v38 = vshll.u32 %v23184_v29, 16  ;;  %v13522_v56 = vshrl.u32 %v23186_v47, 16 }
 0x2f2   : > { %v13474_v12 = vor.u32 %v13473_v31, %v13470_v3  ;;  %v13495_v40 = vshrl.u32 %v23178_v9, 16  ;;  %v13498_v17 = vshll.u32 %v23178_v9, 16  ;;  %21429 = vmatprep.subr.bf16.mxu0 %v23239_v11  ;;  %v4287_v0 = vsel %vm4180_vm3, %v4284_v52, %v4286_v55  ;;  %v23187_v3 = vld [vmem:[%s23639_s10 + $0x1b8] sm:$0xff]   ;;  %v23190_v31 = vld [vmem:[%s23639_s10 + $0xd0] sm:$0xff]  }
 0x2f3   : > { %v4279_v21 = vsel %vm4180_vm3, %v4276_v10, %v4278_v13  ;;  %v4281_v39 = vsel %vm4180_vm3, %v4278_v13, %v4280_v30  ;;  %v13533_v5 = vrot.slane %v13531_v59, 2  ;;  %v4290_v10 = vrot.slane %v23187_v3, 1 }
 0x2f4   : > { %v13484_v26 = vsel %vm13341_vm4, %v13474_v12, %v13483_v16  ;;  %v13497_v27 = vrot.slane %v13495_v40, 2  ;;  %v23189_v40 = vld [vmem:[%s23639_s10 + $0x1c0] sm:$0xff]  }
 0x2f5   : > { %21430 = vmatpush3.bf16.msra.mxu0 %v23239_v11  ;;  %v13540_v11 = vshrl.u32 %v23190_v31, 16 }
 0x2f7   : > { %20604 = vmatmul.mubr.bf16.gmra.mrb[80].mxu1 %v4265_v20  ;;  %v13475_v20 = vsel %vm13341_vm4, %v13465_v60, %v13474_v12  ;;  %v13534_v60 = vshll.u32 %v23188_v51, 16  ;;  %v13543_v12 = vshll.u32 %v23190_v31, 16  ;;  %v13542_v19 = vrot.slane %v13540_v11, 2 }
 0x2f8   : > { %21296 = vmatmul.mubr.bf16.gmra.mrb[12].mxu0 %v13421_v22  ;;  %20607 = vmatprep.mubr.bf16.mxu1 %v4267_v23  ;;  %v13488_v22 = vrot.slane %v13486_v14, 2  ;;  %v13491_v23 = vrot.slane %v13489_v15, 3  ;;  %v13549_v14 = vshrl.u32 %v23192_v7, 16  ;;  %v13552_v15 = vshll.u32 %v23192_v7, 16 }
 0x2f9   : > { %21299 = vmatprep.mubr.bf16.mxu0 %v13430_v28  ;;  %v13500_v28 = vrot.slane %v13498_v17, 3 }
 0x2fa   : > { %v13492_v32 = vor.u32 %v13491_v23, %v13488_v22  ;;  %v23194_v22 = vld [vmem:[%s23639_s10 + $0xe0] sm:$0xff]   ;;  %v13551_v24 = vrot.slane %v13549_v14, 2  ;;  %v13554_v25 = vrot.slane %v13552_v15, 3  ;;  %v23203_v15 = vld [vmem:[%s23639_s10 + $0x1f0] sm:$0xff]  }
 0x2fb   : > { %v13501_v36 = vor.u32 %v13500_v28, %v13497_v27  ;;  %v4292_v27 = vrot.slane %v23189_v40, 1  ;;  %v23256_v28 = vld [vmem:[%s25538_s1 + $0x230] sm:$0xff]   ;;  %v13561_v33 = vshll.u32 %v23194_v22, 16 }
 0x2fc   : > { %21431 = vmatprep.subr.bf16.mxu0 %v23256_v28 }
 0x2fd   : > { %v13502_v48 = vsel %vm13341_vm4, %v13492_v32, %v13501_v36  ;;  %21432 = vmatpush3.bf16.msra.mxu0 %v23256_v28  ;;  %v4293_v37 = vsel %vm4180_vm3, %v4290_v10, %v4292_v27 }
 0x2ff   : > { %20608 = vmatmul.mubr.bf16.gmra.mrb[84].mxu1 %v4269_v42  ;;  %v13493_v42 = vsel %vm13341_vm4, %v13483_v16, %v13492_v32  ;;  %v4289_v16 = vsel %vm4180_vm3, %v4286_v55, %v4288_v8  ;;  %v13558_v32 = vshrl.u32 %v23194_v22, 16 }
 0x300   : > { %21300 = vmatmul.mubr.bf16.gmra.mrb[16].mxu0 %v13439_v44  ;;  %20611 = vmatprep.mubr.bf16.mxu1 %v4271_v45  ;;  %v13506_v44 = vrot.slane %v13504_v34, 2  ;;  %v13509_v45 = vrot.slane %v13507_v35, 3  ;;  %v13555_v34 = vor.u32 %v13554_v25, %v13551_v24  ;;  %v23210_v24 = vld [vmem:[%s23639_s10 + $0x118] sm:$0xff]   ;;  %v4304_v25 = vrot.slane %v23203_v15, 1 }
 0x301   : > { %21303 = vmatprep.mubr.bf16.mxu0 %v13448_v50  ;;  %v13518_v50 = vrot.slane %v13516_v38, 3  ;;  %v23193_v38 = vld [vmem:[%s23639_s10 + $0x1d0] sm:$0xff]  }
 0x302   : > { %v13510_v53 = vor.u32 %v13509_v45, %v13506_v44  ;;  %v23195_v44 = vld [vmem:[%s23639_s10 + $0x1d8] sm:$0xff]   ;;  %v23198_v45 = vld [vmem:[%s23639_s10 + $0xf0] sm:$0xff]  }
 0x303   : > { %v13519_v58 = vor.u32 %v13518_v50, %v13515_v49  ;;  %v23202_v49 = vld [vmem:[%s23639_s10 + $0xf8] sm:$0xff]   ;;  %v4296_v50 = vrot.slane %v23193_v38, 1  ;;  %v4298_v52 = vrot.slane %v23195_v44, 1  ;;  %v13579_v55 = vshll.u32 %v23198_v45, 16 }
 0x305   : > { %v13520_v4 = vsel %vm13341_vm4, %v13510_v53, %v13519_v58  ;;  %v4299_v62 = vsel %vm4180_vm3, %v4296_v50, %v4298_v52 }
 0x307   : > { %20612 = vmatmul.mubr.bf16.gmra.mrb[88].mxu1 %v4273_v63  ;;  %v13511_v63 = vsel %vm13341_vm4, %v13501_v36, %v13510_v53  ;;  %v13576_v53 = vshrl.u32 %v23198_v45, 16 }
 0x308   : > { %21304 = vmatmul.mubr.bf16.gmra.mrb[20].mxu0 %v13457_v1  ;;  %20615 = vmatprep.mubr.bf16.mxu1 %v4275_v2  ;;  %v13524_v1 = vrot.slane %v13522_v56, 2  ;;  %v13527_v2 = vrot.slane %v13525_v57, 3  ;;  %v13585_v57 = vshrl.u32 %v23202_v49, 16 }
 0x309   : > { %21307 = vmatprep.mubr.bf16.mxu0 %v13466_v6  ;;  %v13536_v6 = vrot.slane %v13534_v60, 3  ;;  %v23197_v60 = vld [vmem:[%s23639_s10 + $0x1e0] sm:$0xff]  }
 0x30a   : > { %v13528_v9 = vor.u32 %v13527_v2, %v13524_v1  ;;  %v23201_v1 = vld [vmem:[%s23639_s10 + $0x1e8] sm:$0xff]   ;;  %v23204_v2 = vld [vmem:[%s23639_s10 + $0x100] sm:$0xff]   ;;  %v13587_v31 = vrot.slane %v13585_v57, 2 }
 0x30b   : > { %v13537_v13 = vor.u32 %v13536_v6, %v13533_v5  ;;  %v23206_v5 = vld [vmem:[%s23639_s10 + $0x108] sm:$0xff]   ;;  %v4300_v6 = vrot.slane %v23197_v60, 1 }
 0x30c   : > { %v13529_v17 = vsel %vm13341_vm4, %v13519_v58, %v13528_v9  ;;  %v13588_v58 = vshll.u32 %v23202_v49, 16 }
 0x30d   : > { %v13538_v23 = vsel %vm13341_vm4, %v13528_v9, %v13537_v13  ;;  %v13594_v9 = vshrl.u32 %v23204_v2, 16  ;;  %v4301_v14 = vsel %vm4180_vm3, %v4298_v52, %v4300_v6 }
 0x30f   : > { %20616 = vmatmul.mubr.bf16.gmra.mrb[92].mxu1 %v4277_v18  ;;  %v4291_v18 = vsel %vm4180_vm3, %v4288_v8, %v4290_v10  ;;  %v4302_v8 = vrot.slane %v23201_v1, 1  ;;  %v13597_v10 = vshll.u32 %v23204_v2, 16 }
 0x310   : > { %21308 = vmatmul.mubr.bf16.gmra.mrb[24].mxu0 %v13475_v20  ;;  %20619 = vmatprep.mubr.bf16.mxu1 %v4279_v21  ;;  %v13545_v20 = vrot.slane %v13543_v12, 3  ;;  %v23191_v21 = vld [vmem:[%s23639_s10 + $0x1c8] sm:$0xff]   ;;  %v13603_v12 = vshrl.u32 %v23206_v5, 16 }
 0x311   : > { %21311 = vmatprep.mubr.bf16.mxu0 %v13484_v26  ;;  %v23196_v26 = vld [vmem:[%s23639_s10 + $0xe8] sm:$0xff]   ;;  %v4294_v30 = vrot.slane %v23191_v21, 1  ;;  %v4303_v40 = vsel %vm4180_vm3, %v4300_v6, %v4302_v8 }
 0x312   : > { %v13546_v29 = vor.u32 %v13545_v20, %v13542_v19  ;;  %v13567_v35 = vshrl.u32 %v23196_v26, 16  ;;  %v13570_v36 = vshll.u32 %v23196_v26, 16  ;;  %v23205_v19 = vld [vmem:[%s23639_s10 + $0x1f8] sm:$0xff]   ;;  %v23208_v20 = vld [vmem:[%s23639_s10 + $0x110] sm:$0xff]   ;;  %v13605_v22 = vrot.slane %v13603_v12, 2 }
 0x313   : > { %v4295_v41 = vsel %vm4180_vm3, %v4292_v27, %v4294_v30  ;;  %v4297_v59 = vsel %vm4180_vm3, %v4294_v30, %v4296_v50  ;;  %v4306_v27 = vrot.slane %v23205_v19, 1  ;;  %v13612_v28 = vshrl.u32 %v23208_v20, 16  ;;  %v23221_v19 = vld [vmem:[%s23639_s10 + $0x140] sm:$0xff]  }
 0x314   : > { %v13556_v46 = vsel %vm13341_vm4, %v13546_v29, %v13555_v34  ;;  %v13569_v47 = vrot.slane %v13567_v35, 2  ;;  %v23207_v35 = vld [vmem:[%s23639_s10 + $0x200] sm:$0xff]  }
 0x315   : > { %v13614_v38 = vrot.slane %v13612_v28, 2  ;;  %v13666_v28 = vshrl.u32 %v23221_v19, 16 }
 0x317   : > { %20620 = vmatmul.mubr.bf16.gmra.mrb[96].mxu1 %v4281_v39  ;;  %v13547_v39 = vsel %vm13341_vm4, %v13537_v13, %v13546_v29  ;;  %v13606_v13 = vshll.u32 %v23206_v5, 16  ;;  %v13615_v29 = vshll.u32 %v23208_v20, 16 }
 0x318   : > { %21312 = vmatmul.mubr.bf16.gmra.mrb[28].mxu0 %v13493_v42  ;;  %20623 = vmatprep.mubr.bf16.mxu1 %v4283_v43  ;;  %v13560_v42 = vrot.slane %v13558_v32, 2  ;;  %v13563_v43 = vrot.slane %v13561_v33, 3  ;;  %v13621_v32 = vshrl.u32 %v23210_v24, 16  ;;  %v13624_v33 = vshll.u32 %v23210_v24, 16 }
 0x319   : > { %21315 = vmatprep.mubr.bf16.mxu0 %v13502_v48  ;;  %v13572_v48 = vrot.slane %v13570_v36, 3 }
 0x31a   : > { %v13564_v51 = vor.u32 %v13563_v43, %v13560_v42  ;;  %v23212_v42 = vld [vmem:[%s23639_s10 + $0x120] sm:$0xff]   ;;  %v13623_v44 = vrot.slane %v13621_v32, 2  ;;  %v13626_v45 = vrot.slane %v13624_v33, 3 }
 0x31b   : > { %v13573_v56 = vor.u32 %v13572_v48, %v13569_v47  ;;  %v4308_v47 = vrot.slane %v23207_v35, 1  ;;  %v23273_v48 = vld [vmem:[%s25538_s1 + $0x238] sm:$0xff]   ;;  %v13633_v52 = vshll.u32 %v23212_v42, 16  ;;  %v23220_v35 = vld [vmem:[%s23639_s10 + $0x20] sm:$0xff]  }
 0x31c   : > { %21433 = vmatprep.subr.bf16.mxu0 %v23273_v48 }
 0x31d   : > { %v13574_v3 = vsel %vm13341_vm4, %v13564_v51, %v13573_v56  ;;  %21434 = vmatpush3.bf16.msra.mxu0 %v23273_v48  ;;  %v4309_v57 = vsel %vm4180_vm3, %v4306_v27, %v4308_v47 }
 0x31f   : > { %20624 = vmatmul.mubr.bf16.gmra.mrb[100].mxu1 %v4285_v61  ;;  %v13565_v61 = vsel %vm13341_vm4, %v13555_v34, %v13564_v51  ;;  %v4305_v34 = vsel %vm4180_vm3, %v4302_v8, %v4304_v25  ;;  %v13630_v51 = vshrl.u32 %v23212_v42, 16 }
 0x320   : > { %21316 = vmatmul.mubr.bf16.gmra.mrb[32].mxu0 %v13511_v63  ;;  %20627 = vmatprep.mubr.bf16.mxu1 %v4287_v0  ;;  %v13578_v63 = vrot.slane %v13576_v53, 2  ;;  %v13581_v0 = vrot.slane %v13579_v55, 3  ;;  %v13627_v53 = vor.u32 %v13626_v45, %v13623_v44 }
 0x321   : > { %21319 = vmatprep.mubr.bf16.mxu0 %v13520_v4  ;;  %v13590_v4 = vrot.slane %v13588_v58, 3  ;;  %v23211_v58 = vld [vmem:[%s23639_s10 + $0x210] sm:$0xff]  }
 0x322   : > { %v13582_v7 = vor.u32 %v13581_v0, %v13578_v63  ;;  %v13635_v63 = vrot.slane %v13633_v52, 3  ;;  %v23213_v0 = vld [vmem:[%s23639_s10 + $0x218] sm:$0xff]  }
 0x323   : > { %v13591_v11 = vor.u32 %v13590_v4, %v13587_v31  ;;  %v23219_v31 = vld [vmem:[%s23639_s10 + $0x138] sm:$0xff]   ;;  %v4312_v4 = vrot.slane %v23211_v58, 1  ;;  %v4314_v8 = vrot.slane %v23213_v0, 1 }
 0x325   : > { %v13592_v21 = vsel %vm13341_vm4, %v13582_v7, %v13591_v11 }
 0x327   : > { %20628 = vmatmul.mubr.bf16.gmra.mrb[104].mxu1 %v4289_v16  ;;  %v13583_v16 = vsel %vm13341_vm4, %v13573_v56, %v13582_v7 }
 0x328   : > { %21320 = vmatmul.mubr.bf16.gmra.mrb[36].mxu0 %v13529_v17  ;;  %20631 = vmatprep.mubr.bf16.mxu1 %v4291_v18  ;;  %v13596_v17 = vrot.slane %v13594_v9, 2  ;;  %v13599_v18 = vrot.slane %v13597_v10, 3  ;;  %v13657_v10 = vshrl.u32 %v23219_v31, 16 }
 0x329   : > { %21323 = vmatprep.mubr.bf16.mxu0 %v13538_v23  ;;  %v13608_v23 = vrot.slane %v13606_v13, 3  ;;  %v23215_v13 = vld [vmem:[%s23639_s10 + $0x220] ss:$0 sps:$4 sm:$0x11]  }
 0x32a   : > { %v13600_v26 = vor.u32 %v13599_v18, %v13596_v17  ;;  %v23217_v17 = vld [vmem:[%s23639_s10 + $0x10] sm:$0xfe]   ;;  %v23218_v18 = vld [vmem:[%s23639_s10 + $0x18] sm:$0xff]   ;;  %v4316_v24 = vrot.slane %v23215_v13, 1 }
 0x32b   : > { %v13609_v30 = vor.u32 %v13608_v23, %v13605_v22  ;;  %v23224_v23 = vld [vmem:[%s23639_s10 + $0x148] sm:$0xff]  }
 0x32c   : > { %v13601_v36 = vsel %vm13341_vm4, %v13591_v11, %v13600_v26  ;;  %v13660_v11 = vshll.u32 %v23219_v31, 16  ;;  %v13675_v32 = vshrl.u32 %v23224_v23, 16  ;;  %v13678_v33 = vshll.u32 %v23224_v23, 16  ;;  %v23431_v31 = vld [vmem:[%s25538_s1 + $0x100] sm:$0xff]  }
 0x32d   : > { %v13610_v43 = vsel %vm13341_vm4, %v13600_v26, %v13609_v30  ;;  %v5916_v26 = vrot.slane %v23217_v17, 1 }
 0x32e   : > { %v13662_v22 = vrot.slane %v13660_v11, 3  ;;  %v13677_v44 = vrot.slane %v13675_v32, 2  ;;  %v13680_v45 = vrot.slane %v13678_v33, 3 }
 0x32f   : > { %20632 = vmatmul.mubr.bf16.gmra.mrb[108].mxu1 %v4293_v37  ;;  %v4307_v37 = vsel %vm4180_vm3, %v4304_v25, %v4306_v27  ;;  %v5917_v27 = vrot.slane %v23218_v18, 1  ;;  %v23231_v18 = vld [vmem:[%s23639_s10 + $0x48] sm:$0xff]  }
 0x330   : > { %21324 = vmatmul.mubr.bf16.gmra.mrb[40].mxu0 %v13547_v39  ;;  %20635 = vmatprep.mubr.bf16.mxu1 %v4295_v41  ;;  %v13617_v39 = vrot.slane %v13615_v29, 3  ;;  %v23209_v41 = vld [vmem:[%s23639_s10 + $0x208] sm:$0xff]   ;;  %v13669_v29 = vshll.u32 %v23221_v19, 16  ;;  %v13681_v52 = vor.u32 %v13680_v45, %v13677_v44  ;;  %v23234_v19 = vld [vmem:[%s23639_s10 + $0x170] sm:$0xff]  }
 0x331   : > { %21327 = vmatprep.mubr.bf16.mxu0 %v13556_v46  ;;  %v23214_v46 = vld [vmem:[%s23639_s10 + $0x128] sm:$0xff]   ;;  %v4310_v50 = vrot.slane %v23209_v41, 1  ;;  %v23226_v41 = vld [vmem:[%s23639_s10 + $0x150] sm:$0xff]  }
 0x332   : > { %v13618_v49 = vor.u32 %v13617_v39, %v13614_v38  ;;  %v13639_v55 = vshrl.u32 %v23214_v46, 16  ;;  %v13642_v56 = vshll.u32 %v23214_v46, 16  ;;  %v13668_v38 = vrot.slane %v13666_v28, 2  ;;  %v23228_v46 = vld [vmem:[%s23639_s10 + $0x158] sm:$0xff]  }
 0x333   : > { %v4313_v12 = vsel %vm4180_vm3, %v4310_v50, %v4312_v4  ;;  %v13671_v39 = vrot.slane %v13669_v29, 3  ;;  %v13720_v28 = vshrl.u32 %v23234_v19, 16  ;;  %v13723_v29 = vshll.u32 %v23234_v19, 16 }
 0x334   : > { %v13619_v60 = vsel %vm13341_vm4, %v13609_v30, %v13618_v49  ;;  %v13628_v1 = vsel %vm13341_vm4, %v13618_v49, %v13627_v53  ;;  %v13641_v2 = vrot.slane %v13639_v55, 2  ;;  %v13684_v49 = vshrl.u32 %v23226_v41, 16 }
 0x335   : > { %v13672_v48 = vor.u32 %v13671_v39, %v13668_v38  ;;  %v13696_v55 = vshll.u32 %v23228_v46, 16  ;;  %v13722_v39 = vrot.slane %v13720_v28, 2 }
 0x337   : > { %20636 = vmatmul.mubr.bf16.gmra.mrb[112].mxu1 %v4297_v59  ;;  %v23216_v59 = vld [vmem:[%s23639_s10 + $0x130] sm:$0xff]   ;;  %v13682_v0 = vsel %vm13341_vm4, %v13672_v48, %v13681_v52 }
 0x338   : > { %21328 = vmatmul.mubr.bf16.gmra.mrb[44].mxu0 %v13565_v61  ;;  %20639 = vmatprep.mubr.bf16.mxu1 %v4299_v62  ;;  %v4311_v61 = vsel %vm4180_vm3, %v4308_v47, %v4310_v50  ;;  %v13632_v62 = vrot.slane %v13630_v51, 2  ;;  %v13648_v5 = vshrl.u32 %v23216_v59, 16  ;;  %v13651_v6 = vshll.u32 %v23216_v59, 16 }
 0x339   : > { %21331 = vmatprep.mubr.bf16.mxu0 %v13574_v3  ;;  %v13644_v3 = vrot.slane %v13642_v56, 3  ;;  %v5919_v47 = vrot.slane %v23220_v35, 1  ;;  %v13687_v50 = vshll.u32 %v23226_v41, 16  ;;  %v13686_v59 = vrot.slane %v13684_v49, 2 }
 0x33a   : > { %v13636_v7 = vor.u32 %v13635_v63, %v13632_v62  ;;  %v13653_v15 = vrot.slane %v13651_v6, 3  ;;  %v23230_v62 = vld [vmem:[%s23639_s10 + $0x160] sm:$0xff]   ;;  %v13725_v41 = vrot.slane %v13723_v29, 3 }
 0x33b   : > { %v13645_v9 = vor.u32 %v13644_v3, %v13641_v2  ;;  %v5920_v56 = vsel %vm4180_vm3, %v5917_v27, %v5919_v47  ;;  %v13698_v2 = vrot.slane %v13696_v55, 3  ;;  %v23232_v3 = vld [vmem:[%s23639_s10 + $0x168] sm:$0xff]  }
 0x33c   : > { %v13714_v11 = vshll.u32 %v23232_v3, 16 }
 0x33d   : > { %v13646_v20 = vsel %vm13341_vm4, %v13636_v7, %v13645_v9 }
 0x33e   : > { %v13716_v23 = vrot.slane %v13714_v11, 3 }
 0x33f   : > { %20640 = vmatmul.mubr.bf16.gmra.mrb[116].mxu1 %v4301_v14  ;;  %v13650_v14 = vrot.slane %v13648_v5, 2 }
 0x340   : > { %21332 = vmatmul.mubr.bf16.gmra.mrb[48].mxu0 %v13583_v16  ;;  %20643 = vmatprep.mubr.bf16.mxu1 %v4303_v40  ;;  %v13637_v16 = vsel %vm13341_vm4, %v13627_v53, %v13636_v7  ;;  %v4315_v40 = vsel %vm4180_vm3, %v4312_v4, %v4314_v8  ;;  %v13693_v53 = vshrl.u32 %v23228_v46, 16  ;;  %v13702_v7 = vshrl.u32 %v23230_v62, 16 }
 0x341   : > { %21335 = vmatprep.mubr.bf16.mxu0 %v13592_v21  ;;  %v13659_v21 = vrot.slane %v13657_v10, 2  ;;  %v13654_v25 = vor.u32 %v13653_v15, %v13650_v14  ;;  %v13711_v10 = vshrl.u32 %v23232_v3, 16  ;;  %v23229_v14 = vld [vmem:[%s23639_s10 + $0x40] sm:$0xff]  }
 0x343   : > { %v13663_v30 = vor.u32 %v13662_v22, %v13659_v21  ;;  %v13713_v22 = vrot.slane %v13711_v10, 2 }
 0x345   : > { %v13664_v42 = vsel %vm13341_vm4, %v13654_v25, %v13663_v30  ;;  %v13673_v58 = vsel %vm13341_vm4, %v13663_v30, %v13672_v48  ;;  %v13717_v30 = vor.u32 %v13716_v23, %v13713_v22  ;;  %v23435_v48 = vld [vmem:[%s25538_s1 + $0x120] sm:$0xff]  }
 0x346   : > { %v23247_v22 = vld [vmem:[%s23639_s10 + $0x1a0] sm:$0xff]  }
 0x347   : > { %20644 = vmatmul.mubr.bf16.gmra.mrb[120].mxu1 %v4305_v34  ;;  %v4317_v34 = vsel %vm4180_vm3, %v4314_v8, %v4316_v24  ;;  %v13705_v8 = vshll.u32 %v23230_v62, 16  ;;  %v23236_v24 = vld [vmem:[%s23639_s10 + $0x178] sm:$0xff]  }
 0x348   : > { %21336 = vmatmul.mubr.bf16.gmra.mrb[52].mxu0 %v13601_v36  ;;  %20647 = vmatprep.mubr.bf16.mxu1 %v4307_v37  ;;  %v13655_v36 = vsel %vm13341_vm4, %v13645_v9, %v13654_v25  ;;  %v5918_v37 = vsel %vm4180_vm3, %v5916_v26, %v5917_v27  ;;  %v5927_v25 = vrot.slane %v23229_v14, 1  ;;  %v5929_v27 = vrot.slane %v23231_v18, 1 }
 0x349   : > { %21339 = vmatprep.mubr.bf16.mxu0 %v13610_v43  ;;  %v23223_v43 = vld [vmem:[%s23639_s10 + $0x28] sm:$0xff]   ;;  %v13707_v17 = vrot.slane %v13705_v8, 3  ;;  %v13729_v32 = vshrl.u32 %v23236_v24, 16  ;;  %v13732_v33 = vshll.u32 %v23236_v24, 16 }
 0x34a   : > { %v5921_v51 = vrot.slane %v23223_v43, 1  ;;  %v5930_v38 = vsel %vm4180_vm3, %v5927_v25, %v5929_v27  ;;  %v23238_v43 = vld [vmem:[%s23639_s10 + $0x180] sm:$0xff]  }
 0x34b   : > { %v13731_v45 = vrot.slane %v13729_v32, 2  ;;  %v13734_v46 = vrot.slane %v13732_v33, 3  ;;  %v13777_v32 = vshll.u32 %v23247_v22, 16 }
 0x34c   : > { %v5922_v63 = vsel %vm4180_vm3, %v5919_v47, %v5921_v51  ;;  %v23241_v47 = vld [vmem:[%s23639_s10 + $0x188] sm:$0xff]  }
 0x34d   : > { %v13735_v55 = vor.u32 %v13734_v46, %v13731_v45 }
 0x34f   : > { %20648 = vmatmul.mubr.bf16.gmra.mrb[124].mxu1 %v4309_v57  ;;  %v23225_v57 = vld [vmem:[%s23639_s10 + $0x30] sm:$0xff]  }
 0x350   : > { %21340 = vmatmul.mubr.bf16.gmra.mrb[56].mxu0 %v13619_v60  ;;  %20651 = vmatprep.mubr.bf16.mxu1 %v4311_v61  ;;  %v13689_v60 = vrot.slane %v13687_v50, 3  ;;  %v23227_v61 = vld [vmem:[%s23639_s10 + $0x38] sm:$0xff]   ;;  %v5923_v4 = vrot.slane %v23225_v57, 1  ;;  %v13726_v50 = vor.u32 %v13725_v41, %v13722_v39  ;;  %v13750_v57 = vshll.u32 %v23241_v47, 16 }
 0x351   : > { %21343 = vmatprep.mubr.bf16.mxu0 %v13628_v1  ;;  %v13695_v1 = vrot.slane %v13693_v53, 2  ;;  %v5925_v6 = vrot.slane %v23227_v61, 1  ;;  %v13741_v53 = vshll.u32 %v23238_v43, 16 }
 0x352   : > { %v13690_v5 = vor.u32 %v13689_v60, %v13686_v59  ;;  %v5924_v13 = vsel %vm4180_vm3, %v5921_v51, %v5923_v4  ;;  %v23237_v60 = vld [vmem:[%s23639_s10 + $0x60] sm:$0xff]   ;;  %v13727_v61 = vsel %vm13341_vm4, %v13717_v30, %v13726_v50  ;;  %v13736_v3 = vsel %vm13341_vm4, %v13726_v50, %v13735_v55 }
 0x353   : > { %v13699_v9 = vor.u32 %v13698_v2, %v13695_v1  ;;  %v5928_v35 = vsel %vm4180_vm3, %v5925_v6, %v5927_v25  ;;  %v23240_v1 = vld [vmem:[%s23639_s10 + $0x68] sm:$0xff]   ;;  %v23243_v2 = vld [vmem:[%s23639_s10 + $0x190] sm:$0xff]  }
 0x354   : > { %v13691_v15 = vsel %vm13341_vm4, %v13681_v52, %v13690_v5  ;;  %v13738_v52 = vshrl.u32 %v23238_v43, 16  ;;  %v13756_v10 = vshrl.u32 %v23243_v2, 16  ;;  %v13759_v11 = vshll.u32 %v23243_v2, 16  ;;  %v23248_v43 = vld [vmem:[%s23639_s10 + $0x88] sm:$0xff]  }
 0x355   : > { %v13700_v21 = vsel %vm13341_vm4, %v13690_v5, %v13699_v9  ;;  %v23245_v5 = vld [vmem:[%s23639_s10 + $0x198] sm:$0xff]  }
 0x356   : > { %v13768_v14 = vshll.u32 %v23245_v5, 16  ;;  %v13758_v19 = vrot.slane %v13756_v10, 2 }
 0x357   : > { %20652 = vmatmul.mubr.bf16.gmra.mrb[128].mxu1 %v4313_v12  ;;  %v23432_v12 = vld [vmem:[%s25538_s1 + $0x108] sm:$0xff]  }
 0x358   : > { %21344 = vmatmul.mubr.bf16.gmra.mrb[60].mxu0 %v13637_v16  ;;  %20655 = vmatprep.mubr.bf16.mxu1 %v4315_v40  ;;  %v5926_v16 = vsel %vm4180_vm3, %v5923_v4, %v5925_v6  ;;  %v13704_v40 = vrot.slane %v13702_v7, 2  ;;  %v13752_v4 = vrot.slane %v13750_v57, 3  ;;  %v23437_v6 = vld [vmem:[%s25538_s1 + $0x130] sm:$0xff]   ;;  %v5935_v7 = vrot.slane %v23237_v60, 1 }
 0x359   : > { %21347 = vmatprep.mubr.bf16.mxu0 %v13646_v20  ;;  %v23433_v20 = vld [vmem:[%s25538_s1 + $0x110] sm:$0xff]   ;;  %v13770_v25 = vrot.slane %v13768_v14, 3  ;;  %v23254_v14 = vld [vmem:[%s23639_s10 + $0xa0] sm:$0xff]  }
 0x35a   : > { %v13708_v26 = vor.u32 %v13707_v17, %v13704_v40  ;;  %v23242_v40 = vld [vmem:[%s23639_s10 + $0x70] sm:$0xff]  }
 0x35c   : > { %v13718_v44 = vsel %vm13341_vm4, %v13708_v26, %v13717_v30  ;;  %v13774_v30 = vshrl.u32 %v23247_v22, 16 }
 0x35e   : > { %v13776_v41 = vrot.slane %v13774_v30, 2 }
 0x35f   : > { %20656 = vmatmul.mubr.bf16.gmra.mrb[132].mxu1 %v4317_v34  ;;  %v23434_v34 = vld [vmem:[%s25538_s1 + $0x118] sm:$0xff]  }
 0x360   : > { %21348 = vmatmul.mubr.bf16.gmra.mrb[64].mxu0 %v13655_v36  ;;  %20675 = vmatprep.mubr.bf16.mxu1 %v5918_v37  ;;  %v23233_v36 = vld [vmem:[%s23639_s10 + $0x50] sm:$0xff]   ;;  %v13709_v37 = vsel %vm13341_vm4, %v13699_v9, %v13708_v26  ;;  %v5937_v9 = vrot.slane %v23240_v1, 1  ;;  %v23249_v26 = vld [vmem:[%s23639_s10 + $0x1a8] sm:$0xff]   ;;  %v23255_v1 = vld [vmem:[%s23639_s10 + $0x1c0] sm:$0xff]  }
 0x361   : > { %21351 = vmatprep.mubr.bf16.mxu0 %v13664_v42  ;;  %v23235_v42 = vld [vmem:[%s23639_s10 + $0x58] sm:$0xff]   ;;  %v5931_v49 = vrot.slane %v23233_v36, 1 }
 0x362   : > { %v5933_v51 = vrot.slane %v23235_v42, 1  ;;  %v5938_v18 = vsel %vm4180_vm3, %v5935_v7, %v5937_v9  ;;  %v13779_v42 = vrot.slane %v13777_v32, 3 }
 0x363   : > { %v5932_v59 = vsel %vm4180_vm3, %v5929_v27, %v5931_v49  ;;  %v5939_v27 = vrot.slane %v23242_v40, 1 }
 0x364   : > { %v5934_v62 = vsel %vm4180_vm3, %v5931_v49, %v5933_v51  ;;  %v13780_v50 = vor.u32 %v13779_v42, %v13776_v41  ;;  %v23264_v41 = vld [vmem:[%s23639_s10 + $0x1e0] sm:$0xff]  }
 0x365   : > { %v5940_v36 = vsel %vm4180_vm3, %v5937_v9, %v5939_v27  ;;  %v13813_v9 = vshll.u32 %v23255_v1, 16 }
 0x367   : > { %20676 = vmatmul.mubr.bf16.vlgmr.msra.gmra.mrb[0].mxu1 %v5920_v56  ;;  %v13747_v56 = vshrl.u32 %v23241_v47, 16 }
 0x368   : > { %21352 = vmatmul.mubr.bf16.gmra.mrb[68].mxu0 %v13673_v58  ;;  %21579 = vmatpush3.bf16.msra.mxu1 %v23431_v31  ;;  %v23436_v58 = vld [vmem:[%s25538_s1 + $0x128] sm:$0xff]  }
 0x369   : > { %20679 = vmatprep.mubr.bf16.mxu1 %v5922_v63  ;;  %21355 = vmatprep.mubr.bf16.mxu0 %v13682_v0  ;;  %v13740_v63 = vrot.slane %v13738_v52, 2  ;;  %v13743_v0 = vrot.slane %v13741_v53, 3  ;;  %v13749_v31 = vrot.slane %v13747_v56, 2 }
 0x36a   : > { %21572 = vmatprep.subr.bf16.mxu1 %v23432_v12 }
 0x36b   : > { %v13744_v8 = vor.u32 %v13743_v0, %v13740_v63  ;;  %v23252_v0 = vld [vmem:[%s23639_s10 + $0x98] sm:$0xff]  }
 0x36c   : > { %21580 = vmatpush3.bf16.msra.mxu1 %v23432_v12  ;;  %v13753_v12 = vor.u32 %v13752_v4, %v13749_v31  ;;  %v23258_v4 = vld [vmem:[%s23639_s10 + $0x1c8] sm:$0xff]  }
 0x36d   : > { %21573 = vmatprep.subr.bf16.mxu1 %v23433_v20  ;;  %v13745_v17 = vsel %vm13341_vm4, %v13735_v55, %v13744_v8 }
 0x36e   : > { %v13754_v23 = vsel %vm13341_vm4, %v13744_v8, %v13753_v12  ;;  %v13810_v8 = vshrl.u32 %v23255_v1, 16 }
 0x36f   : > { %20680 = vmatmul.mubr.bf16.gmra.mrb[4].mxu1 %v5924_v13  ;;  %v13765_v13 = vshrl.u32 %v23245_v5, 16 }
 0x370   : > { %21356 = vmatmul.mubr.bf16.gmra.mrb[72].mxu0 %v13691_v15  ;;  %20683 = vmatprep.mubr.bf16.mxu1 %v5926_v16  ;;  %v23438_v15 = vld [vmem:[%s25538_s1 + $0x138] sm:$0xff]   ;;  %v5936_v16 = vsel %vm4180_vm3, %v5933_v51, %v5935_v7  ;;  %v5945_v51 = vrot.slane %v23248_v43, 1  ;;  %v5949_v7 = vrot.slane %v23252_v0, 1  ;;  %v13812_v40 = vrot.slane %v13810_v8, 2 }
 0x371   : > { %21359 = vmatprep.mubr.bf16.mxu0 %v13700_v21  ;;  %21581 = vmatpush3.bf16.msra.mxu1 %v23433_v20  ;;  %v13761_v20 = vrot.slane %v13759_v11, 3  ;;  %v23244_v21 = vld [vmem:[%s23639_s10 + $0x78] sm:$0xff]   ;;  %v13767_v24 = vrot.slane %v13765_v13, 2  ;;  %v13819_v11 = vshrl.u32 %v23258_v4, 16 }
 0x372   : > { %21574 = vmatprep.subr.bf16.mxu1 %v23434_v34  ;;  %v5941_v29 = vrot.slane %v23244_v21, 1 }
 0x373   : > { %v13762_v28 = vor.u32 %v13761_v20, %v13758_v19  ;;  %v13771_v33 = vor.u32 %v13770_v25, %v13767_v24  ;;  %v23260_v19 = vld [vmem:[%s23639_s10 + $0x1d0] sm:$0xff]   ;;  %v13821_v21 = vrot.slane %v13819_v11, 2  ;;  %v5951_v24 = vrot.slane %v23254_v14, 1 }
 0x374   : > { %v5942_v39 = vsel %vm4180_vm3, %v5939_v27, %v5941_v29  ;;  %v13828_v27 = vshrl.u32 %v23260_v19, 16  ;;  %v23267_v11 = vld [vmem:[%s23639_s10 + $0xd0] sm:$0xff]  }
 0x375   : > { %21582 = vmatpush3.bf16.msra.mxu1 %v23434_v34  ;;  %v13783_v34 = vshrl.u32 %v23249_v26, 16  ;;  %v13772_v45 = vsel %vm13341_vm4, %v13762_v28, %v13771_v33  ;;  %v13781_v60 = vsel %vm13341_vm4, %v13771_v33, %v13780_v50  ;;  %v5952_v33 = vsel %vm4180_vm3, %v5949_v7, %v5951_v24 }
 0x376   : > { %21575 = vmatprep.subr.bf16.mxu1 %v23435_v48 }
 0x377   : > { %20684 = vmatmul.mubr.bf16.gmra.mrb[8].mxu1 %v5928_v35  ;;  %v13786_v35 = vshll.u32 %v23249_v26, 16  ;;  %v13785_v46 = vrot.slane %v13783_v34, 2  ;;  %v23259_v34 = vld [vmem:[%s23639_s10 + $0xb0] sm:$0xff]  }
 0x378   : > { %21360 = vmatmul.mubr.bf16.gmra.mrb[76].mxu0 %v13709_v37  ;;  %20687 = vmatprep.mubr.bf16.mxu1 %v5930_v38  ;;  %v23246_v37 = vld [vmem:[%s23639_s10 + $0x80] sm:$0xff]   ;;  %v13763_v38 = vsel %vm13341_vm4, %v13753_v12, %v13762_v28  ;;  %v13822_v12 = vshll.u32 %v23258_v4, 16  ;;  %v13831_v28 = vshll.u32 %v23260_v19, 16 }
 0x379   : > { %21363 = vmatprep.mubr.bf16.mxu0 %v13718_v44  ;;  %21583 = vmatpush3.bf16.msra.mxu1 %v23435_v48  ;;  %v23251_v44 = vld [vmem:[%s23639_s10 + $0x1b0] sm:$0xff]   ;;  %v13788_v47 = vrot.slane %v13786_v35, 3  ;;  %v23253_v48 = vld [vmem:[%s23639_s10 + $0x1b8] sm:$0xff]   ;;  %v5943_v49 = vrot.slane %v23246_v37, 1  ;;  %v13830_v37 = vrot.slane %v13828_v27, 2 }
 0x37a   : > { %21576 = vmatprep.subr.bf16.mxu1 %v23436_v58  ;;  %v13792_v52 = vshrl.u32 %v23251_v44, 16  ;;  %v13795_v53 = vshll.u32 %v23251_v44, 16  ;;  %v13801_v56 = vshrl.u32 %v23253_v48, 16  ;;  %v13804_v57 = vshll.u32 %v23253_v48, 16 }
 0x37b   : > { %v13789_v55 = vor.u32 %v13788_v47, %v13785_v46  ;;  %v13824_v22 = vrot.slane %v13822_v12, 3  ;;  %v5955_v46 = vrot.slane %v23259_v34, 1 }
 0x37c   : > { %v13797_v63 = vrot.slane %v13795_v53, 3  ;;  %v13806_v31 = vrot.slane %v13804_v57, 3 }
 0x37d   : > { %21584 = vmatpush3.bf16.msra.mxu1 %v23436_v58  ;;  %v5944_v58 = vsel %vm4180_vm3, %v5941_v29, %v5943_v49  ;;  %v13790_v2 = vsel %vm13341_vm4, %v13780_v50, %v13789_v55  ;;  %v13825_v29 = vor.u32 %v13824_v22, %v13821_v21  ;;  %v13849_v50 = vshll.u32 %v23264_v41, 16 }
 0x37e   : > { %21577 = vmatprep.subr.bf16.mxu1 %v23437_v6  ;;  %v5963_v21 = vrot.slane %v23267_v11, 1 }
 0x37f   : > { %20688 = vmatmul.mubr.bf16.gmra.mrb[12].mxu1 %v5932_v59  ;;  %v23250_v59 = vld [vmem:[%s23639_s10 + $0x90] sm:$0xff]  }
 0x380   : > { %21364 = vmatmul.mubr.bf16.gmra.mrb[80].mxu0 %v13727_v61  ;;  %20691 = vmatprep.mubr.bf16.mxu1 %v5934_v62  ;;  %v5946_v61 = vsel %vm4180_vm3, %v5943_v49, %v5945_v51  ;;  %v13794_v62 = vrot.slane %v13792_v52, 2  ;;  %v5947_v5 = vrot.slane %v23250_v59, 1  ;;  %v13846_v49 = vshrl.u32 %v23264_v41, 16 }
 0x381   : > { %21367 = vmatprep.mubr.bf16.mxu0 %v13736_v3  ;;  %21585 = vmatpush3.bf16.msra.mxu1 %v23437_v6  ;;  %v13803_v3 = vrot.slane %v13801_v56, 2  ;;  %v23263_v56 = vld [vmem:[%s23639_s10 + $0xc0] sm:$0xff]  }
 0x382   : > { %21578 = vmatprep.subr.bf16.mxu1 %v23438_v15  ;;  %v13798_v6 = vor.u32 %v13797_v63, %v13794_v62  ;;  %v5948_v13 = vsel %vm4180_vm3, %v5945_v51, %v5947_v5  ;;  %v13848_v59 = vrot.slane %v13846_v49, 2  ;;  %v23268_v62 = vld [vmem:[%s23639_s10 + $0x1f0] sm:$0xff]  }
 0x383   : > { %v13807_v10 = vor.u32 %v13806_v31, %v13803_v3  ;;  %v5959_v3 = vrot.slane %v23263_v56, 1 }
 0x385   : > { %21586 = vmatpush3.bf16.msra.mxu1 %v23438_v15  ;;  %v13799_v15 = vsel %vm13341_vm4, %v13789_v55, %v13798_v6  ;;  %v13808_v20 = vsel %vm13341_vm4, %v13798_v6, %v13807_v10  ;;  %v13867_v6 = vshll.u32 %v23268_v62, 16 }
 0x387   : > { %20692 = vmatmul.mubr.bf16.gmra.mrb[16].mxu1 %v5936_v16  ;;  %v5950_v16 = vsel %vm4180_vm3, %v5947_v5, %v5949_v7  ;;  %v13864_v5 = vshrl.u32 %v23268_v62, 16 }
 0x388   : > { %21368 = vmatmul.mubr.bf16.gmra.mrb[84].mxu0 %v13745_v17  ;;  %20695 = vmatprep.mubr.bf16.mxu1 %v5938_v18  ;;  %v13815_v17 = vrot.slane %v13813_v9, 3  ;;  %v23257_v18 = vld [vmem:[%s23639_s10 + $0xa8] sm:$0xff]  }
 0x389   : > { %21371 = vmatprep.mubr.bf16.mxu0 %v13754_v23  ;;  %v23262_v23 = vld [vmem:[%s23639_s10 + $0x1d8] sm:$0xff]   ;;  %v5953_v26 = vrot.slane %v23257_v18, 1  ;;  %v13866_v14 = vrot.slane %v13864_v5, 2 }
 0x38a   : > { %v13816_v25 = vor.u32 %v13815_v17, %v13812_v40  ;;  %v13837_v30 = vshrl.u32 %v23262_v23, 16  ;;  %v13840_v32 = vshll.u32 %v23262_v23, 16  ;;  %v23272_v40 = vld [vmem:[%s23639_s10 + $0x200] sm:$0xff]  }
 0x38b   : > { %v5956_v55 = vsel %vm4180_vm3, %v5953_v26, %v5955_v46 }
 0x38c   : > { %v13817_v35 = vsel %vm13341_vm4, %v13807_v10, %v13816_v25  ;;  %v13826_v42 = vsel %vm13341_vm4, %v13816_v25, %v13825_v29  ;;  %v13839_v43 = vrot.slane %v13837_v30, 2  ;;  %v13842_v44 = vrot.slane %v13840_v32, 3  ;;  %v23271_v30 = vld [vmem:[%s23639_s10 + $0xe0] sm:$0xff]  }
 0x38d   : > { %v13885_v25 = vshll.u32 %v23272_v40, 16 }
 0x38e   : > { %v13843_v51 = vor.u32 %v13842_v44, %v13839_v43  ;;  %v5967_v43 = vrot.slane %v23271_v30, 1 }
 0x38f   : > { %20696 = vmatmul.mubr.bf16.gmra.mrb[20].mxu1 %v5940_v36  ;;  %v5954_v36 = vsel %vm4180_vm3, %v5951_v24, %v5953_v26  ;;  %v13882_v24 = vshrl.u32 %v23272_v40, 16 }
 0x390   : > { %21372 = vmatmul.mubr.bf16.gmra.mrb[88].mxu0 %v13763_v38  ;;  %20699 = vmatprep.mubr.bf16.mxu1 %v5942_v39  ;;  %v13833_v38 = vrot.slane %v13831_v28, 3  ;;  %v23261_v39 = vld [vmem:[%s23639_s10 + $0xb8] sm:$0xff]  }
 0x391   : > { %21375 = vmatprep.mubr.bf16.mxu0 %v13772_v45  ;;  %v23266_v45 = vld [vmem:[%s23639_s10 + $0x1e8] sm:$0xff]   ;;  %v5957_v48 = vrot.slane %v23261_v39, 1  ;;  %v13884_v34 = vrot.slane %v13882_v24, 2 }
 0x392   : > { %v13834_v47 = vor.u32 %v13833_v38, %v13830_v37  ;;  %v13855_v52 = vshrl.u32 %v23266_v45, 16  ;;  %v13858_v53 = vshll.u32 %v23266_v45, 16  ;;  %v23277_v37 = vld [vmem:[%s23639_s10 + $0x210] sm:$0xff]  }
 0x393   : > { %v5960_v10 = vsel %vm4180_vm3, %v5957_v48, %v5959_v3 }
 0x394   : > { %v13835_v57 = vsel %vm13341_vm4, %v13825_v29, %v13834_v47  ;;  %v13844_v63 = vsel %vm13341_vm4, %v13834_v47, %v13843_v51  ;;  %v13857_v0 = vrot.slane %v13855_v52, 2  ;;  %v13860_v1 = vrot.slane %v13858_v53, 3  ;;  %v23276_v52 = vld [vmem:[%s23639_s10 + $0xf0] sm:$0xff]  }
 0x395   : > { %v13903_v47 = vshll.u32 %v23277_v37, 16 }
 0x396   : > { %v13861_v7 = vor.u32 %v13860_v1, %v13857_v0  ;;  %v5971_v0 = vrot.slane %v23276_v52, 1 }
 0x397   : > { %20700 = vmatmul.mubr.bf16.gmra.mrb[24].mxu1 %v5944_v58  ;;  %v5958_v58 = vsel %vm4180_vm3, %v5955_v46, %v5957_v48  ;;  %v13900_v46 = vshrl.u32 %v23277_v37, 16 }
 0x398   : > { %21376 = vmatmul.mubr.bf16.gmra.mrb[92].mxu0 %v13781_v60  ;;  %20703 = vmatprep.mubr.bf16.mxu1 %v5946_v61  ;;  %v13851_v60 = vrot.slane %v13849_v50, 3  ;;  %v23265_v61 = vld [vmem:[%s23639_s10 + $0xc8] sm:$0xff]  }
 0x399   : > { %21379 = vmatprep.mubr.bf16.mxu0 %v13790_v2  ;;  %v23270_v2 = vld [vmem:[%s23639_s10 + $0x1f8] sm:$0xff]   ;;  %v5961_v4 = vrot.slane %v23265_v61, 1  ;;  %v13902_v56 = vrot.slane %v13900_v46, 2  ;;  %v23288_v46 = vld [vmem:[%s23639_s10 + $0x120] sm:$0xff]  }
 0x39a   : > { %v13852_v31 = vor.u32 %v13851_v60, %v13848_v59  ;;  %v13873_v8 = vshrl.u32 %v23270_v2, 16  ;;  %v13876_v9 = vshll.u32 %v23270_v2, 16  ;;  %v23281_v59 = vld [vmem:[%s23639_s10 + $0x220] sm:$0xff]  }
 0x39b   : > { %v5964_v29 = vsel %vm4180_vm3, %v5961_v4, %v5963_v21 }
 0x39c   : > { %v13853_v12 = vsel %vm13341_vm4, %v13843_v51, %v13852_v31  ;;  %v13862_v17 = vsel %vm13341_vm4, %v13852_v31, %v13861_v7  ;;  %v13875_v18 = vrot.slane %v13873_v8, 2  ;;  %v13878_v19 = vrot.slane %v13876_v9, 3  ;;  %v23280_v8 = vld [vmem:[%s23639_s10 + $0x100] sm:$0xff]  }
 0x39d   : > { %v13921_v31 = vshll.u32 %v23281_v59, 16 }
 0x39e   : > { %v13879_v26 = vor.u32 %v13878_v19, %v13875_v18  ;;  %v5975_v18 = vrot.slane %v23280_v8, 1 }
 0x39f   : > { %20704 = vmatmul.mubr.bf16.gmra.mrb[28].mxu1 %v5948_v13  ;;  %v5962_v13 = vsel %vm4180_vm3, %v5959_v3, %v5961_v4  ;;  %v13918_v3 = vshrl.u32 %v23281_v59, 16 }
 0x3a0   : > { %21380 = vmatmul.mubr.bf16.gmra.mrb[96].mxu0 %v13799_v15  ;;  %20707 = vmatprep.mubr.bf16.mxu1 %v5950_v16  ;;  %v13869_v15 = vrot.slane %v13867_v6, 3  ;;  %v23269_v16 = vld [vmem:[%s23639_s10 + $0xd8] sm:$0xff]  }
 0x3a1   : > { %21383 = vmatprep.mubr.bf16.mxu0 %v13808_v20  ;;  %v23275_v20 = vld [vmem:[%s23639_s10 + $0x208] sm:$0xff]   ;;  %v5965_v23 = vrot.slane %v23269_v16, 1  ;;  %v13920_v11 = vrot.slane %v13918_v3, 2 }
 0x3a2   : > { %v13870_v22 = vor.u32 %v13869_v15, %v13866_v14  ;;  %v13891_v27 = vshrl.u32 %v23275_v20, 16  ;;  %v13894_v28 = vshll.u32 %v23275_v20, 16  ;;  %v23285_v14 = vld [vmem:[%s23639_s10 + $0x230] sm:$0xff]  }
 0x3a3   : > { %v5968_v51 = vsel %vm4180_vm3, %v5965_v23, %v5967_v43 }
 0x3a4   : > { %v13871_v32 = vsel %vm13341_vm4, %v13861_v7, %v13870_v22  ;;  %v13880_v38 = vsel %vm13341_vm4, %v13870_v22, %v13879_v26  ;;  %v13893_v39 = vrot.slane %v13891_v27, 2  ;;  %v13896_v41 = vrot.slane %v13894_v28, 3  ;;  %v23284_v27 = vld [vmem:[%s23639_s10 + $0x110] sm:$0xff]  }
 0x3a5   : > { %v13939_v22 = vshll.u32 %v23285_v14, 16 }
 0x3a6   : > { %v13897_v48 = vor.u32 %v13896_v41, %v13893_v39 }
 0x3a7   : > { %20708 = vmatmul.mubr.bf16.gmra.mrb[32].mxu1 %v5952_v33  ;;  %v5966_v33 = vsel %vm4180_vm3, %v5963_v21, %v5965_v23  ;;  %v13936_v21 = vshrl.u32 %v23285_v14, 16 }
 0x3a8   : > { %21384 = vmatmul.mubr.bf16.gmra.mrb[100].mxu0 %v13817_v35  ;;  %20711 = vmatprep.mubr.bf16.mxu1 %v5954_v36  ;;  %v13887_v35 = vrot.slane %v13885_v25, 3  ;;  %v23274_v36 = vld [vmem:[%s23639_s10 + $0xe8] sm:$0xff]  }
 0x3a9   : > { %21387 = vmatprep.mubr.bf16.mxu0 %v13826_v42  ;;  %v23279_v42 = vld [vmem:[%s23639_s10 + $0x218] sm:$0xff]   ;;  %v5969_v45 = vrot.slane %v23274_v36, 1  ;;  %v13938_v30 = vrot.slane %v13936_v21, 2 }
 0x3aa   : > { %v13888_v44 = vor.u32 %v13887_v35, %v13884_v34  ;;  %v13909_v49 = vshrl.u32 %v23279_v42, 16  ;;  %v13912_v50 = vshll.u32 %v23279_v42, 16  ;;  %v23289_v34 = vld [vmem:[%s23639_s10 + $0x240] ss:$0 sps:$4 sm:$0x77]  }
 0x3ab   : > { %v5972_v7 = vsel %vm4180_vm3, %v5969_v45, %v5971_v0  ;;  %v13954_v42 = vshrl.u32 %v23289_v34, 16 }
 0x3ac   : > { %v13889_v53 = vsel %vm13341_vm4, %v13879_v26, %v13888_v44  ;;  %v13898_v60 = vsel %vm13341_vm4, %v13888_v44, %v13897_v48  ;;  %v13911_v61 = vrot.slane %v13909_v49, 2  ;;  %v13914_v62 = vrot.slane %v13912_v50, 3 }
 0x3ad   : > { %v13956_v49 = vrot.slane %v13954_v42, 2 }
 0x3ae   : > { %v13915_v4 = vor.u32 %v13914_v62, %v13911_v61  ;;  %v23293_v62 = vld [vmem:[%s23639_s10 + $0x130] sm:$0xff]  }
 0x3af   : > { %20712 = vmatmul.mubr.bf16.gmra.mrb[36].mxu1 %v5956_v55  ;;  %v5970_v55 = vsel %vm4180_vm3, %v5967_v43, %v5969_v45  ;;  %v13957_v43 = vshll.u32 %v23289_v34, 16 }
 0x3b0   : > { %21388 = vmatmul.mubr.bf16.gmra.mrb[104].mxu0 %v13835_v57  ;;  %20715 = vmatprep.mubr.bf16.mxu1 %v5958_v58  ;;  %v13905_v57 = vrot.slane %v13903_v47, 3  ;;  %v23278_v58 = vld [vmem:[%s23639_s10 + $0xf8] sm:$0xff]  }
 0x3b1   : > { %21391 = vmatprep.mubr.bf16.mxu0 %v13844_v63  ;;  %v23283_v63 = vld [vmem:[%s23639_s10 + $0x228] sm:$0xff]   ;;  %v5973_v2 = vrot.slane %v23278_v58, 1  ;;  %v13959_v50 = vrot.slane %v13957_v43, 3 }
 0x3b2   : > { %v13906_v1 = vor.u32 %v13905_v57, %v13902_v56  ;;  %v13927_v5 = vshrl.u32 %v23283_v63, 16  ;;  %v13930_v6 = vshll.u32 %v23283_v63, 16  ;;  %v5983_v56 = vrot.slane %v23288_v46, 1  ;;  %v23309_v46 = vld [vmem:[%s23639_s10 + $0x170] sm:$0xff]  }
 0x3b3   : > { %v5976_v26 = vsel %vm4180_vm3, %v5973_v2, %v5975_v18  ;;  %v13960_v57 = vor.u32 %v13959_v50, %v13956_v49  ;;  %v23310_v49 = vld [vmem:[%s23639_s10 + $0x70] sm:$0xff]   ;;  %v23311_v50 = vld [vmem:[%s23639_s10 + $0x178] sm:$0xff]  }
 0x3b4   : > { %v13907_v9 = vsel %vm13341_vm4, %v13897_v48, %v13906_v1  ;;  %v13916_v15 = vsel %vm13341_vm4, %v13906_v1, %v13915_v4  ;;  %v13929_v16 = vrot.slane %v13927_v5, 2  ;;  %v13932_v40 = vrot.slane %v13930_v6, 3  ;;  %v23294_v1 = vld [vmem:[%s23639_s10 + $0x30] sm:$0xff]  }
 0x3b5   : > { %v15564_v5 = vrot.slane %v23294_v1, 3  ;;  %v23316_v1 = vld [vmem:[%s23639_s10 + $0x88] sm:$0xff]  }
 0x3b6   : > { %v13933_v23 = vor.u32 %v13932_v40, %v13929_v16 }
 0x3b7   : > { %20716 = vmatmul.mubr.bf16.gmra.mrb[40].mxu1 %v5960_v10  ;;  %v5974_v10 = vsel %vm4180_vm3, %v5971_v0, %v5973_v2  ;;  %v23295_v2 = vld [vmem:[%s23639_s10 + $0x138] sm:$0xff]  }
 0x3b8   : > { %21392 = vmatmul.mubr.bf16.gmra.mrb[108].mxu0 %v13853_v12  ;;  %20719 = vmatprep.mubr.bf16.mxu1 %v5962_v13  ;;  %v13923_v12 = vrot.slane %v13921_v31, 3  ;;  %v23282_v13 = vld [vmem:[%s23639_s10 + $0x108] sm:$0xff]   ;;  %v23296_v31 = vld [vmem:[%s23639_s10 + $0x38] sm:$0xff]   ;;  %v5989_v6 = vrot.slane %v23295_v2, 1 }
 0x3b9   : > { %21395 = vmatprep.mubr.bf16.mxu0 %v13862_v17  ;;  %v23287_v17 = vld [vmem:[%s23639_s10 + $0x238] sm:$0xff]   ;;  %v5977_v20 = vrot.slane %v23282_v13, 1  ;;  %v23299_v13 = vld [vmem:[%s23639_s10 + $0x148] sm:$0xff]  }
 0x3ba   : > { %v13924_v19 = vor.u32 %v13923_v12, %v13920_v11  ;;  %v13945_v24 = vshrl.u32 %v23287_v17, 16  ;;  %v13948_v25 = vshll.u32 %v23287_v17, 16  ;;  %v23298_v12 = vld [vmem:[%s23639_s10 + $0x40] sm:$0xff]   ;;  %v5993_v17 = vrot.slane %v23299_v13, 1 }
 0x3bb   : > { %v15568_v40 = vrot.slane %v23298_v12, 3  ;;  %v23320_v12 = vld [vmem:[%s23639_s10 + $0x98] sm:$0xff]  }
 0x3bc   : > { %v13925_v28 = vsel %vm13341_vm4, %v13915_v4, %v13924_v19  ;;  %v13934_v35 = vsel %vm13341_vm4, %v13924_v19, %v13933_v23  ;;  %v13947_v36 = vrot.slane %v13945_v24, 2  ;;  %v13950_v37 = vrot.slane %v13948_v25, 3  ;;  %v23303_v24 = vld [vmem:[%s23639_s10 + $0x158] sm:$0xff]  }
 0x3bd   : > { %v5987_v4 = vrot.slane %v23293_v62, 1  ;;  %v23314_v62 = vld [vmem:[%s23639_s10 + $0x80] sm:$0xff]  }
 0x3be   : > { %v13951_v44 = vor.u32 %v13950_v37, %v13947_v36  ;;  %v23306_v36 = vld [vmem:[%s23639_s10 + $0x60] sm:$0xff]   ;;  %v23307_v37 = vld [vmem:[%s23639_s10 + $0x168] sm:$0xff]  }
 0x3bf   : > { %20720 = vmatmul.mubr.bf16.gmra.mrb[44].mxu1 %v5964_v29  ;;  %v5978_v29 = vsel %vm4180_vm3, %v5975_v18, %v5977_v20  ;;  %v5990_v11 = vsel %vm4180_vm3, %v5987_v4, %v5989_v6  ;;  %v15576_v42 = vrot.slane %v23306_v36, 3  ;;  %v6001_v43 = vrot.slane %v23307_v37, 1  ;;  %v23328_v36 = vld [vmem:[%s23639_s10 + $0xb8] sm:$0xff]  }
 0x3c0   : > { %21396 = vmatmul.mubr.bf16.gmra.mrb[112].mxu0 %v13871_v32  ;;  %20723 = vmatprep.mubr.bf16.mxu1 %v5966_v33  ;;  %v13941_v32 = vrot.slane %v13939_v22, 3  ;;  %v23286_v33 = vld [vmem:[%s23639_s10 + $0x118] sm:$0xff]   ;;  %v13961_v63 = vsel %vm13341_vm4, %v13951_v44, %v13960_v57 }
 0x3c1   : > { %21399 = vmatprep.mubr.bf16.mxu0 %v13880_v38  ;;  %v5979_v38 = vrot.slane %v23284_v27, 1  ;;  %v5981_v41 = vrot.slane %v23286_v33, 1  ;;  %v23305_v33 = vld [vmem:[%s23639_s10 + $0x160] sm:$0xff]  }
 0x3c2   : > { %v13942_v39 = vor.u32 %v13941_v32, %v13938_v30 }
 0x3c3   : > { %v5980_v45 = vsel %vm4180_vm3, %v5977_v20, %v5979_v38  ;;  %v5982_v48 = vsel %vm4180_vm3, %v5979_v38, %v5981_v41  ;;  %v5984_v61 = vsel %vm4180_vm3, %v5981_v41, %v5983_v56  ;;  %v23301_v20 = vld [vmem:[%s23639_s10 + $0x150] sm:$0xff]   ;;  %v5999_v41 = vrot.slane %v23305_v33, 1 }
 0x3c4   : > { %v13943_v47 = vsel %vm13341_vm4, %v13933_v23, %v13942_v39  ;;  %v13952_v52 = vsel %vm13341_vm4, %v13942_v39, %v13951_v44  ;;  %v23302_v23 = vld [vmem:[%s23639_s10 + $0x50] sm:$0xff]   ;;  %v5995_v27 = vrot.slane %v23301_v20, 1  ;;  %v23308_v39 = vld [vmem:[%s23639_s10 + $0x68] sm:$0xff]   ;;  %v23322_v20 = vld [vmem:[%s23639_s10 + $0xa0] sm:$0xff]  }
 0x3c5   : > { %v15578_v44 = vrot.slane %v23308_v39, 3  ;;  %v23326_v33 = vld [vmem:[%s23639_s10 + $0xb0] sm:$0xff]  }
 0x3c6   : > { %v5996_v32 = vsel %vm4180_vm3, %v5993_v17, %v5995_v27 }
 0x3c7   : > { %20724 = vmatmul.mubr.bf16.gmra.mrb[48].mxu1 %v5968_v51  ;;  %v23290_v51 = vld [vmem:[%s23639_s10 + $0x128] sm:$0xff]  }
 0x3c8   : > { %21400 = vmatmul.mubr.bf16.gmra.mrb[116].mxu0 %v13889_v53  ;;  %20727 = vmatprep.mubr.bf16.mxu1 %v5970_v55  ;;  %v23291_v53 = vld [vmem:[%s23639_s10 + $0x20] sm:$0xf8]   ;;  %v23292_v55 = vld [vmem:[%s23639_s10 + $0x28] sm:$0xff]   ;;  %v5985_v58 = vrot.slane %v23290_v51, 1  ;;  %v15579_v51 = vsel %vm15560_vm5, %v15576_v42, %v15578_v44 }
 0x3c9   : > { %21403 = vmatprep.mubr.bf16.mxu0 %v13898_v60  ;;  %v15561_v59 = vrot.slane %v23291_v53, 3  ;;  %v15562_v60 = vrot.slane %v23292_v55, 3  ;;  %v6003_v53 = vrot.slane %v23309_v46, 1  ;;  %v15580_v55 = vrot.slane %v23310_v49, 3  ;;  %v23330_v46 = vld [vmem:[%s23639_s10 + $0xc0] sm:$0xff]   ;;  %v23332_v49 = vld [vmem:[%s23639_s10 + $0xc8] sm:$0xff]  }
 0x3ca   : > { %v5986_v0 = vsel %vm4180_vm3, %v5983_v56, %v5985_v58  ;;  %v5988_v8 = vsel %vm4180_vm3, %v5985_v58, %v5987_v4  ;;  %v6005_v56 = vrot.slane %v23311_v50, 1  ;;  %v15586_v4 = vrot.slane %v23316_v1, 3 }
 0x3cb   : > { %v15563_v3 = vsel %vm15560_vm5, %v15561_v59, %v15562_v60  ;;  %v6004_v58 = vsel %vm4180_vm3, %v6001_v43, %v6003_v53  ;;  %v23313_v59 = vld [vmem:[%s23639_s10 + $0x180] sm:$0xff]  }
 0x3cc   : > { %v6007_v2 = vrot.slane %v23313_v59, 1  ;;  %v23334_v59 = vld [vmem:[%s23639_s10 + $0xd0] sm:$0xff]  }
 0x3cf   : > { %20728 = vmatmul.mubr.bf16.gmra.mrb[52].mxu1 %v5972_v7  ;;  %v15566_v7 = vrot.slane %v23296_v31, 3 }
 0x3d0   : > { %21404 = vmatmul.mubr.bf16.gmra.mrb[120].mxu0 %v13907_v9  ;;  %20731 = vmatprep.mubr.bf16.mxu1 %v5974_v10  ;;  %v23297_v9 = vld [vmem:[%s23639_s10 + $0x140] sm:$0xff]   ;;  %v15565_v10 = vsel %vm15560_vm5, %v15562_v60, %v15564_v5  ;;  %v15581_v60 = vsel %vm15560_vm5, %v15578_v44, %v15580_v55 }
 0x3d1   : > { %21407 = vmatprep.mubr.bf16.mxu0 %v13916_v15  ;;  %v15567_v14 = vsel %vm15560_vm5, %v15564_v5, %v15566_v7  ;;  %v23300_v15 = vld [vmem:[%s23639_s10 + $0x48] sm:$0xff]   ;;  %v5991_v16 = vrot.slane %v23297_v9, 1  ;;  %v15569_v21 = vsel %vm15560_vm5, %v15566_v7, %v15568_v40  ;;  %v6008_v5 = vsel %vm4180_vm3, %v6005_v56, %v6007_v2  ;;  %v23318_v9 = vld [vmem:[%s23639_s10 + $0x90] sm:$0xff]  }
 0x3d2   : > { %v15570_v18 = vrot.slane %v23300_v15, 3 }
 0x3d3   : > { %v5992_v19 = vsel %vm4180_vm3, %v5989_v6, %v5991_v16  ;;  %v5994_v22 = vsel %vm4180_vm3, %v5991_v16, %v5993_v17  ;;  %v23317_v6 = vld [vmem:[%s23639_s10 + $0x190] sm:$0xff]   ;;  %v15590_v16 = vrot.slane %v23320_v12, 3  ;;  %v23321_v17 = vld [vmem:[%s23639_s10 + $0x1a0] sm:$0xff]  }
 0x3d4   : > { %v15571_v25 = vsel %vm15560_vm5, %v15568_v40, %v15570_v18  ;;  %v6011_v13 = vrot.slane %v23317_v6, 1  ;;  %v23337_v6 = vld [vmem:[%s23639_s10 + $0x1e0] sm:$0xff]  }
 0x3d7   : > { %20732 = vmatmul.mubr.bf16.gmra.mrb[56].mxu1 %v5976_v26  ;;  %v23304_v26 = vld [vmem:[%s23639_s10 + $0x58] sm:$0xff]  }
 0x3d8   : > { %21408 = vmatmul.mubr.bf16.gmra.mrb[124].mxu0 %v13925_v28  ;;  %20735 = vmatprep.mubr.bf16.mxu1 %v5978_v29  ;;  %v15572_v28 = vrot.slane %v23302_v23, 3  ;;  %v5997_v29 = vrot.slane %v23303_v24, 1  ;;  %v15574_v30 = vrot.slane %v23304_v26, 3  ;;  %v23324_v23 = vld [vmem:[%s23639_s10 + $0xa8] sm:$0xff]   ;;  %v6015_v24 = vrot.slane %v23321_v17, 1 }
 0x3d9   : > { %21411 = vmatprep.mubr.bf16.mxu0 %v13934_v35 }
 0x3da   : > { %v15573_v34 = vsel %vm15560_vm5, %v15570_v18, %v15572_v28  ;;  %v5998_v35 = vsel %vm4180_vm3, %v5995_v27, %v5997_v29  ;;  %v15575_v38 = vsel %vm15560_vm5, %v15572_v28, %v15574_v30  ;;  %v15594_v27 = vrot.slane %v23324_v23, 3 }
 0x3df   : > { %20736 = vmatmul.mubr.bf16.gmra.mrb[60].mxu1 %v5980_v45  ;;  %v6000_v45 = vsel %vm4180_vm3, %v5997_v29, %v5999_v41  ;;  %v23325_v29 = vld [vmem:[%s23639_s10 + $0x1b0] sm:$0xff]  }
 0x3e0   : > { %21412 = vmatmul.mubr.bf16.gmra.mrb[128].mxu0 %v13943_v47  ;;  %20739 = vmatprep.mubr.bf16.mxu1 %v5982_v48  ;;  %v15577_v47 = vsel %vm15560_vm5, %v15574_v30, %v15576_v42  ;;  %v6002_v48 = vsel %vm4180_vm3, %v5999_v41, %v6001_v43  ;;  %v6019_v37 = vrot.slane %v23325_v29, 1  ;;  %v15598_v41 = vrot.slane %v23328_v36, 3  ;;  %v23329_v43 = vld [vmem:[%s23639_s10 + $0x1c0] sm:$0xff]  }
 0x3e1   : > { %21415 = vmatprep.mubr.bf16.mxu0 %v13952_v52  ;;  %v23312_v52 = vld [vmem:[%s23639_s10 + $0x78] sm:$0xff]   ;;  %v6023_v50 = vrot.slane %v23329_v43, 1  ;;  %v23346_v43 = vld [vmem:[%s23639_s10 + $0x100] sm:$0xff]  }
 0x3e2   : > { %v15582_v57 = vrot.slane %v23312_v52, 3 }
 0x3e7   : > { %20740 = vmatmul.mubr.bf16.gmra.mrb[64].mxu1 %v5984_v61  ;;  %v6006_v61 = vsel %vm4180_vm3, %v6003_v53, %v6005_v56  ;;  %v15602_v53 = vrot.slane %v23332_v49, 3  ;;  %v23333_v56 = vld [vmem:[%s23639_s10 + $0x1d0] sm:$0xff]  }
 0x3e8   : > { %21416 = vmatmul.mubr.bf16.gmra.mrb[132].mxu0 %v13961_v63  ;;  %20743 = vmatprep.mubr.bf16.mxu1 %v5986_v0  ;;  %v23315_v63 = vld [vmem:[%s23639_s10 + $0x188] sm:$0xff]   ;;  %v15583_v0 = vsel %vm15560_vm5, %v15580_v55, %v15582_v57 }
 0x3e9   : > { %21435 = vmatprep.mubr.bf16.mxu0 %v15563_v3  ;;  %v15584_v3 = vrot.slane %v23314_v62, 3  ;;  %v6009_v31 = vrot.slane %v23315_v63, 1  ;;  %v23336_v62 = vld [vmem:[%s23639_s10 + $0xd8] sm:$0xff]   ;;  %v6027_v63 = vrot.slane %v23333_v56, 1  ;;  %v23349_v56 = vld [vmem:[%s23639_s10 + $0x210] sm:$0xff]  }
 0x3eb   : > { %v15585_v7 = vsel %vm15560_vm5, %v15582_v57, %v15584_v3  ;;  %v6012_v40 = vsel %vm4180_vm3, %v6009_v31, %v6011_v13 }
 0x3ef   : > { %20744 = vmatmul.mubr.bf16.gmra.mrb[68].mxu1 %v5988_v8  ;;  %v6010_v8 = vsel %vm4180_vm3, %v6007_v2, %v6009_v31 }
 0x3f0   : > { %21436 = vmatmul.mubr.bf16.vlgmr.msra.gmra.mrb[0].mxu0 %v15565_v10  ;;  %20747 = vmatprep.mubr.bf16.mxu1 %v5990_v11  ;;  %v23319_v10 = vld [vmem:[%s23639_s10 + $0x198] sm:$0xff]   ;;  %v15587_v11 = vsel %vm15560_vm5, %v15584_v3, %v15586_v4  ;;  %v15606_v3 = vrot.slane %v23336_v62, 3 }
 0x3f1   : > { %21439 = vmatprep.mubr.bf16.mxu0 %v15567_v14  ;;  %v15588_v14 = vrot.slane %v23318_v9, 3  ;;  %v6013_v15 = vrot.slane %v23319_v10, 1  ;;  %v23338_v10 = vld [vmem:[%s23639_s10 + $0xe0] sm:$0xff]  }
 0x3f3   : > { %v15589_v18 = vsel %vm15560_vm5, %v15586_v4, %v15588_v14  ;;  %v6016_v28 = vsel %vm4180_vm3, %v6013_v15, %v6015_v24 }
 0x3f7   : > { %20748 = vmatmul.mubr.bf16.gmra.mrb[72].mxu1 %v5992_v19  ;;  %v6014_v19 = vsel %vm4180_vm3, %v6011_v13, %v6013_v15  ;;  %v23340_v13 = vld [vmem:[%s23639_s10 + $0xe8] sm:$0xff]   ;;  %v15608_v15 = vrot.slane %v23338_v10, 3 }
 0x3f8   : > { %21440 = vmatmul.mubr.bf16.gmra.mrb[4].mxu0 %v15569_v21  ;;  %20751 = vmatprep.mubr.bf16.mxu1 %v5994_v22  ;;  %v23323_v21 = vld [vmem:[%s23639_s10 + $0x1a8] sm:$0xff]   ;;  %v15591_v22 = vsel %vm15560_vm5, %v15588_v14, %v15590_v16  ;;  %v6031_v14 = vrot.slane %v23337_v6, 1  ;;  %v15610_v17 = vrot.slane %v23340_v13, 3 }
 0x3f9   : > { %21443 = vmatprep.mubr.bf16.mxu0 %v15571_v25  ;;  %v15592_v25 = vrot.slane %v23322_v20, 3  ;;  %v6017_v26 = vrot.slane %v23323_v21, 1  ;;  %v23341_v21 = vld [vmem:[%s23639_s10 + $0x1f0] sm:$0xff]   ;;  %v15609_v23 = vsel %vm15560_vm5, %v15606_v3, %v15608_v15 }
 0x3fa   : > { %v6035_v29 = vrot.slane %v23341_v21, 1  ;;  %v23356_v21 = vld [vmem:[%s23639_s10 + $0x128] sm:$0xff]  }
 0x3fb   : > { %v15593_v30 = vsel %vm15560_vm5, %v15590_v16, %v15592_v25  ;;  %v6020_v42 = vsel %vm4180_vm3, %v6017_v26, %v6019_v37 }
 0x3ff   : > { %20752 = vmatmul.mubr.bf16.gmra.mrb[76].mxu1 %v5996_v32  ;;  %v6018_v32 = vsel %vm4180_vm3, %v6015_v24, %v6017_v26  ;;  %v23343_v26 = vld [vmem:[%s23639_s10 + $0x1f8] sm:$0xff]  }
 0x400   : > { %21444 = vmatmul.mubr.bf16.gmra.mrb[8].mxu0 %v15573_v34  ;;  %20755 = vmatprep.mubr.bf16.mxu1 %v5998_v35  ;;  %v23327_v34 = vld [vmem:[%s23639_s10 + $0x1b8] sm:$0xff]   ;;  %v15595_v35 = vsel %vm15560_vm5, %v15592_v25, %v15594_v27  ;;  %v23342_v25 = vld [vmem:[%s23639_s10 + $0xf0] sm:$0xff]  }
 0x401   : > { %21447 = vmatprep.mubr.bf16.mxu0 %v15575_v38  ;;  %v15596_v38 = vrot.slane %v23326_v33, 3  ;;  %v6021_v39 = vrot.slane %v23327_v34, 1 }
 0x403   : > { %v15597_v44 = vsel %vm15560_vm5, %v15594_v27, %v15596_v38  ;;  %v6024_v55 = vsel %vm4180_vm3, %v6021_v39, %v6023_v50  ;;  %v15611_v27 = vsel %vm15560_vm5, %v15608_v15, %v15610_v17  ;;  %v23354_v15 = vld [vmem:[%s23639_s10 + $0x120] sm:$0xff]  }
 0x407   : > { %20756 = vmatmul.mubr.bf16.gmra.mrb[80].mxu1 %v6000_v45  ;;  %v6022_v45 = vsel %vm4180_vm3, %v6019_v37, %v6021_v39 }
 0x408   : > { %21448 = vmatmul.mubr.bf16.gmra.mrb[12].mxu0 %v15577_v47  ;;  %20759 = vmatprep.mubr.bf16.mxu1 %v6002_v48  ;;  %v23331_v47 = vld [vmem:[%s23639_s10 + $0x1c8] sm:$0xff]   ;;  %v15599_v48 = vsel %vm15560_vm5, %v15596_v38, %v15598_v41  ;;  %v23345_v38 = vld [vmem:[%s23639_s10 + $0x200] sm:$0xff]  }
 0x409   : > { %21451 = vmatprep.mubr.bf16.mxu0 %v15579_v51  ;;  %v15600_v51 = vrot.slane %v23330_v46, 3  ;;  %v6025_v52 = vrot.slane %v23331_v47, 1  ;;  %v23348_v46 = vld [vmem:[%s23639_s10 + $0x108] sm:$0xff]   ;;  %v6039_v47 = vrot.slane %v23345_v38, 1  ;;  %v23361_v38 = vld [vmem:[%s23639_s10 + $0x130] sm:$0xff]  }
 0x40b   : > { %v15601_v57 = vsel %vm15560_vm5, %v15598_v41, %v15600_v51 }
 0x40f   : > { %20760 = vmatmul.mubr.bf16.gmra.mrb[84].mxu1 %v6004_v58  ;;  %v6026_v58 = vsel %vm4180_vm3, %v6023_v50, %v6025_v52 }
 0x410   : > { %21452 = vmatmul.mubr.bf16.gmra.mrb[16].mxu0 %v15581_v60  ;;  %20763 = vmatprep.mubr.bf16.mxu1 %v6006_v61  ;;  %v23335_v60 = vld [vmem:[%s23639_s10 + $0x1d8] sm:$0xff]   ;;  %v15603_v61 = vsel %vm15560_vm5, %v15600_v51, %v15602_v53  ;;  %v15618_v51 = vrot.slane %v23348_v46, 3 }
 0x411   : > { %21455 = vmatprep.mubr.bf16.mxu0 %v15583_v0  ;;  %v15604_v0 = vrot.slane %v23334_v59, 3  ;;  %v6029_v1 = vrot.slane %v23335_v60, 1  ;;  %v23350_v60 = vld [vmem:[%s23639_s10 + $0x110] sm:$0xff]  }
 0x413   : > { %v6030_v9 = vsel %vm4180_vm3, %v6027_v63, %v6029_v1  ;;  %v15607_v12 = vsel %vm15560_vm5, %v15604_v0, %v15606_v3  ;;  %v6032_v20 = vsel %vm4180_vm3, %v6029_v1, %v6031_v14  ;;  %v15620_v1 = vrot.slane %v23350_v60, 3 }
 0x415   : > { %v15621_v13 = vsel %vm15560_vm5, %v15618_v51, %v15620_v1 }
 0x417   : > { %20764 = vmatmul.mubr.bf16.gmra.mrb[88].mxu1 %v6008_v5  ;;  %v6028_v5 = vsel %vm4180_vm3, %v6025_v52, %v6027_v63  ;;  %v23352_v63 = vld [vmem:[%s23639_s10 + $0x118] sm:$0xff]  }
 0x418   : > { %21456 = vmatmul.mubr.bf16.gmra.mrb[20].mxu0 %v15585_v7  ;;  %20767 = vmatprep.mubr.bf16.mxu1 %v6010_v8  ;;  %v15605_v8 = vsel %vm15560_vm5, %v15602_v53, %v15604_v0  ;;  %v6043_v0 = vrot.slane %v23349_v56, 1  ;;  %v15622_v6 = vrot.slane %v23352_v63, 3  ;;  %v7979_v56 = vshll.u32 %v23361_v38, 16 }
 0x419   : > { %21459 = vmatprep.mubr.bf16.mxu0 %v15587_v11  ;;  %v23339_v11 = vld [vmem:[%s23639_s10 + $0x1e8] sm:$0xff]  }
 0x41a   : > { %v6033_v16 = vrot.slane %v23339_v11, 1  ;;  %v23353_v11 = vld [vmem:[%s23639_s10 + $0x220] sm:$0xff]  }
 0x41c   : > { %v6034_v24 = vsel %vm4180_vm3, %v6031_v14, %v6033_v16  ;;  %v6036_v37 = vsel %vm4180_vm3, %v6033_v16, %v6035_v29  ;;  %v23355_v16 = vld [vmem:[%s23639_s10 + $0x228] sm:$0xff]  }
 0x41f   : > { %20768 = vmatmul.mubr.bf16.gmra.mrb[92].mxu1 %v6012_v40 }
 0x420   : > { %21460 = vmatmul.mubr.bf16.gmra.mrb[24].mxu0 %v15589_v18  ;;  %20771 = vmatprep.mubr.bf16.mxu1 %v6014_v19 }
 0x421   : > { %21463 = vmatprep.mubr.bf16.mxu0 %v15591_v22 }
 0x427   : > { %20772 = vmatmul.mubr.bf16.gmra.mrb[96].mxu1 %v6016_v28  ;;  %v23344_v28 = vld [vmem:[%s23639_s10 + $0xf8] sm:$0xff]  }
 0x428   : > { %21464 = vmatmul.mubr.bf16.gmra.mrb[28].mxu0 %v15593_v30  ;;  %20775 = vmatprep.mubr.bf16.mxu1 %v6018_v32  ;;  %v15612_v30 = vrot.slane %v23342_v25, 3  ;;  %v6037_v32 = vrot.slane %v23343_v26, 1  ;;  %v15614_v34 = vrot.slane %v23344_v28, 3  ;;  %v6049_v25 = vrot.slane %v23355_v16, 1  ;;  %v23362_v16 = vld [vmem:[%s23639_s10 + $0x140] sm:$0xff]  }
 0x429   : > { %21467 = vmatprep.mubr.bf16.mxu0 %v15595_v35 }
 0x42a   : > { %v15613_v41 = vsel %vm15560_vm5, %v15610_v17, %v15612_v30  ;;  %v23359_v17 = vld [vmem:[%s23639_s10 + $0x128] sm:$0xff]  }
 0x42b   : > { %v7967_v26 = vshrl.u32 %v23359_v17, 16 }
 0x42f   : > { %20776 = vmatmul.mubr.bf16.gmra.mrb[100].mxu1 %v6020_v42  ;;  %v6038_v42 = vsel %vm4180_vm3, %v6035_v29, %v6037_v32  ;;  %v15626_v29 = vrot.slane %v23356_v21, 3  ;;  %v23367_v21 = vld [vmem:[%s23639_s10 + $0x148] sm:$0xff]  }
 0x430   : > { %21468 = vmatmul.mubr.bf16.gmra.mrb[32].mxu0 %v15597_v44  ;;  %20779 = vmatprep.mubr.bf16.mxu1 %v6022_v45  ;;  %v23347_v44 = vld [vmem:[%s23639_s10 + $0x208] sm:$0xff]   ;;  %v15615_v45 = vsel %vm15560_vm5, %v15612_v30, %v15614_v34 }
 0x431   : > { %21471 = vmatprep.mubr.bf16.mxu0 %v15599_v48  ;;  %v15616_v48 = vrot.slane %v23346_v43, 3  ;;  %v6041_v49 = vrot.slane %v23347_v44, 1  ;;  %v23358_v44 = vld [vmem:[%s23639_s10 + $0x130] sm:$0xff]  }
 0x433   : > { %v6042_v59 = vsel %vm4180_vm3, %v6039_v47, %v6041_v49  ;;  %v15619_v62 = vsel %vm15560_vm5, %v15616_v48, %v15618_v51  ;;  %v6044_v10 = vsel %vm4180_vm3, %v6041_v49, %v6043_v0  ;;  %v23360_v49 = vld [vmem:[%s23639_s10 + $0x138] sm:$0xff]  }
 0x434   : > { %v15630_v63 = vrot.slane %v23360_v49, 3 }
 0x437   : > { %20780 = vmatmul.mubr.bf16.gmra.mrb[104].mxu1 %v6024_v55  ;;  %v6040_v55 = vsel %vm4180_vm3, %v6037_v32, %v6039_v47  ;;  %v23363_v47 = vld [vmem:[%s23639_s10 + $0x138] sm:$0xff]  }
 0x438   : > { %21472 = vmatmul.mubr.bf16.gmra.mrb[36].mxu0 %v15601_v57  ;;  %20783 = vmatprep.mubr.bf16.mxu1 %v6026_v58  ;;  %v15617_v58 = vsel %vm15560_vm5, %v15614_v34, %v15616_v48  ;;  %v7985_v60 = vshrl.u32 %v23363_v47, 16 }
 0x439   : > { %21475 = vmatprep.mubr.bf16.mxu0 %v15603_v61  ;;  %v23351_v61 = vld [vmem:[%s23639_s10 + $0x218] sm:$0xff]  }
 0x43a   : > { %v24848_v2 = vpop.f32.mrb[0].mxu1  ;;  %v6045_v3 = vrot.slane %v23351_v61, 1  ;;  %v7988_v61 = vshll.u32 %v23363_v47, 16 }
 0x43b   : > { %v24850_v31 = vpop.f32.mrb[1].mxu1 }
 0x43c   : > { %v24852_v4 = vpop.f32.mrb[2].mxu1  ;;  %v6046_v14 = vsel %vm4180_vm3, %v6043_v0, %v6045_v3 }
 0x43d   : > { %v24856_v7 = vpop.f32.mrb[3].mxu1 }
 0x43f   : > { %20784 = vmatmul.mubr.bf16.gmra.mrb[108].mxu1 %v6028_v5 }
 0x440   : > { %21476 = vmatmul.mubr.bf16.gmra.mrb[40].mxu0 %v15605_v8  ;;  %20787 = vmatprep.mubr.bf16.mxu1 %v6030_v9 }
 0x441   : > { %21479 = vmatprep.mubr.bf16.mxu0 %v15607_v12 }
 0x442   : > { %v24864_v40 = vpop.f32.mrb[4].mxu1 }
 0x443   : > { %v24866_v18 = vpop.f32.mrb[5].mxu1 }
 0x444   : > { %v24868_v19 = vpop.f32.mrb[6].mxu1 }
 0x445   : > { %v24872_v22 = vpop.f32.mrb[7].mxu1 }
 0x447   : > { %20788 = vmatmul.mubr.bf16.gmra.mrb[112].mxu1 %v6032_v20  ;;  %v15623_v20 = vsel %vm15560_vm5, %v15620_v1, %v15622_v6 }
 0x448   : > { %21480 = vmatmul.mubr.bf16.gmra.mrb[44].mxu0 %v15609_v23  ;;  %20791 = vmatprep.mubr.bf16.mxu1 %v6034_v24  ;;  %v6047_v23 = vrot.slane %v23353_v11, 1  ;;  %v15624_v24 = vrot.slane %v23354_v15, 3  ;;  %v23365_v11 = vld [vmem:[%s23639_s10 + $0x140] sm:$0xff]  }
 0x449   : > { %21483 = vmatprep.mubr.bf16.mxu0 %v15611_v27  ;;  %v7970_v27 = vshll.u32 %v23359_v17, 16  ;;  %v7987_v17 = vrot.slane %v7985_v60, 1 }
 0x44a   : > { %v24880_v33 = vpop.f32.mrb[8].mxu1  ;;  %v6048_v34 = vsel %vm4180_vm3, %v6045_v3, %v6047_v23  ;;  %v6050_v43 = vsel %vm4180_vm3, %v6047_v23, %v6049_v25  ;;  %v15627_v48 = vsel %vm15560_vm5, %v15624_v24, %v15626_v29 }
 0x44b   : > { %v24882_v35 = vpop.f32.mrb[9].mxu1  ;;  %v7972_v46 = vrot.slane %v7970_v27, 2  ;;  %v7997_v27 = vshll.u32 %v23365_v11, 16 }
 0x44c   : > { %v24884_v36 = vpop.f32.mrb[10].mxu1 }
 0x44d   : > { %v24888_v39 = vpop.f32.mrb[11].mxu1  ;;  %v7999_v47 = vrot.slane %v7997_v27, 2  ;;  %v23373_v27 = vld [vmem:[%s23639_s10 + $0x160] sm:$0xff]  }
 0x44f   : > { %20792 = vmatmul.mubr.bf16.gmra.mrb[116].mxu1 %v6036_v37  ;;  %v23357_v37 = vld [vmem:[%s23639_s10 + $0x230] ss:$0 sps:$4 sm:$0x11]  }
 0x450   : > { %21484 = vmatmul.mubr.bf16.gmra.mrb[48].mxu0 %v15613_v41  ;;  %20795 = vmatprep.mubr.bf16.mxu1 %v6038_v42  ;;  %v15625_v42 = vsel %vm15560_vm5, %v15622_v6, %v15624_v24  ;;  %v6051_v51 = vrot.slane %v23357_v37, 1  ;;  %v23364_v24 = vld [vmem:[%s23639_s10 + $0x148] sm:$0xff]   ;;  %v8003_v37 = vshrl.u32 %v23367_v21, 16 }
 0x451   : > { %21487 = vmatprep.mubr.bf16.mxu0 %v15615_v45  ;;  %v7969_v45 = vrot.slane %v7967_v26, 1  ;;  %v7994_v26 = vshrl.u32 %v23365_v11, 16 }
 0x452   : > { %v24896_v50 = vpop.f32.mrb[12].mxu1  ;;  %v6052_v3 = vsel %vm4180_vm3, %v6049_v25, %v6051_v51 }
 0x453   : > { %v24898_v52 = vpop.f32.mrb[13].mxu1 }
 0x454   : > { %v24900_v53 = vpop.f32.mrb[14].mxu1 }
 0x455   : > { %v24904_v57 = vpop.f32.mrb[15].mxu1 }
 0x457   : > { %20796 = vmatmul.mubr.bf16.gmra.mrb[120].mxu1 %v6040_v55  ;;  %v7976_v55 = vshrl.u32 %v23361_v38, 16 }
 0x458   : > { %21488 = vmatmul.mubr.bf16.gmra.mrb[52].mxu0 %v15617_v58  ;;  %20799 = vmatprep.mubr.bf16.mxu1 %v6042_v59  ;;  %v15628_v58 = vrot.slane %v23358_v44, 3  ;;  %v7973_v59 = vor.u32 %v7972_v46, %v7969_v45  ;;  %v7996_v46 = vrot.slane %v7994_v26, 1 }
 0x459   : > { %21491 = vmatprep.mubr.bf16.mxu0 %v15619_v62  ;;  %v7978_v6 = vrot.slane %v7976_v55, 1 }
 0x45a   : > { %v24912_v5 = vpop.f32.mrb[16].mxu1  ;;  %v7974_v15 = vsel %vm7651_vm0, %v23807_v54, %v7973_v59  ;;  %v15631_v23 = vsel %vm15560_vm5, %v15628_v58, %v15630_v63  ;;  %v8006_v54 = vshll.u32 %v23367_v21, 16 }
 0x45b   : > { %v24914_v8 = vpop.f32.mrb[17].mxu1 }
 0x45c   : > { %v24916_v9 = vpop.f32.mrb[18].mxu1  ;;  %v8008_v60 = vrot.slane %v8006_v54, 2 }
 0x45d   : > { %v24920_v12 = vpop.f32.mrb[19].mxu1 }
 0x45f   : > { %20800 = vmatmul.mubr.bf16.gmra.mrb[124].mxu1 %v6044_v10  ;;  %v7981_v10 = vrot.slane %v7979_v56, 2  ;;  %v23366_v56 = vld [vmem:[%s23639_s10 + $0x150] sm:$0xff]  }
 0x460   : > { %21492 = vmatmul.mubr.bf16.gmra.mrb[56].mxu0 %v15621_v13  ;;  %20803 = vmatprep.mubr.bf16.mxu1 %v6046_v14  ;;  %v15629_v14 = vsel %vm15560_vm5, %v15626_v29, %v15628_v58  ;;  %v15632_v29 = vrot.slane %v23362_v16, 3  ;;  %v8005_v58 = vrot.slane %v8003_v37, 1 }
 0x461   : > { %21495 = vmatprep.mubr.bf16.mxu0 %v15623_v20  ;;  %v7990_v20 = vrot.slane %v7988_v61, 2  ;;  %v7982_v25 = vor.u32 %v7981_v10, %v7978_v6  ;;  %v23371_v61 = vld [vmem:[%s23639_s10 + $0x158] sm:$0xff]  }
 0x462   : > { %v24929_v28 = vpop.f32.mrb[20].mxu1  ;;  %v15633_v51 = vsel %vm15560_vm5, %v15630_v63, %v15632_v29  ;;  %v23368_v6 = vld [vmem:[%s23639_s10 + $0x158] sm:$0xff]   ;;  %v8009_v63 = vor.u32 %v8008_v60, %v8005_v58  ;;  %v8024_v16 = vshll.u32 %v23371_v61, 16  ;;  %v8033_v58 = vshll.u32 %v23373_v27, 16 }
 0x463   : > { %v24931_v30 = vpop.f32.mrb[21].mxu1  ;;  %v7983_v45 = vsel %vm7651_vm0, %v7973_v59, %v7982_v25  ;;  %v8000_v59 = vor.u32 %v7999_v47, %v7996_v46 }
 0x464   : > { %v24933_v32 = vpop.f32.mrb[22].mxu1  ;;  %v8026_v47 = vrot.slane %v8024_v16, 2  ;;  %v8035_v16 = vrot.slane %v8033_v58, 2 }
 0x465   : > { %v24938_v41 = vpop.f32.mrb[23].mxu1  ;;  %v8010_v54 = vsel %vm7651_vm0, %v8000_v59, %v8009_v63 }
 0x467   : > { %20804 = vmatmul.mubr.bf16.gmra.mrb[128].mxu1 %v6048_v34  ;;  %v7991_v34 = vor.u32 %v7990_v20, %v7987_v17  ;;  %v15638_v20 = vrot.slane %v23368_v6, 3 }
 0x468   : > { %21496 = vmatmul.mubr.bf16.gmra.mrb[60].mxu0 %v15625_v42  ;;  %20807 = vmatprep.mubr.bf16.mxu1 %v6050_v43  ;;  %v15634_v42 = vrot.slane %v23364_v24, 3 }
 0x469   : > { %21499 = vmatprep.mubr.bf16.mxu0 %v15627_v48  ;;  %v23369_v48 = vld [vmem:[%s23639_s10 + $0x150] sm:$0xff]   ;;  %v7992_v55 = vsel %vm7651_vm0, %v7982_v25, %v7991_v34  ;;  %v8001_v24 = vsel %vm7651_vm0, %v7991_v34, %v8000_v59 }
 0x46a   : > { %v24946_v62 = vpop.f32.mrb[24].mxu1  ;;  %v8012_v10 = vshrl.u32 %v23369_v48, 16  ;;  %v8015_v11 = vshll.u32 %v23369_v48, 16  ;;  %v23375_v48 = vld [vmem:[%s23639_s10 + $0x168] sm:$0xff]  }
 0x46b   : > { %v24948_v0 = vpop.f32.mrb[25].mxu1 }
 0x46c   : > { %v24950_v1 = vpop.f32.mrb[26].mxu1  ;;  %v8014_v25 = vrot.slane %v8012_v10, 1  ;;  %v8017_v26 = vrot.slane %v8015_v11, 2 }
 0x46d   : > { %v24954_v13 = vpop.f32.mrb[27].mxu1 }
 0x46e   : > { %v8018_v34 = vor.u32 %v8017_v26, %v8014_v25 }
 0x46f   : > { %20808 = vmatmul.mubr.bf16.gmra.mrb[132].mxu1 %v6052_v3  ;;  %v15635_v3 = vsel %vm15560_vm5, %v15632_v29, %v15634_v42 }
 0x470   : > { %21500 = vmatmul.mubr.bf16.gmra.mrb[64].mxu0 %v15629_v14  ;;  %20895 = vmatprep.mubr.bf16.mxu1 %v7974_v15  ;;  %v15636_v14 = vrot.slane %v23366_v56, 3  ;;  %v8021_v15 = vshrl.u32 %v23371_v61, 16  ;;  %v8030_v56 = vshrl.u32 %v23373_v27, 16  ;;  %v8039_v61 = vshrl.u32 %v23375_v48, 16 }
 0x471   : > { %21503 = vmatprep.mubr.bf16.mxu0 %v15631_v23 }
 0x472   : > { %v24963_v38 = vpop.f32.mrb[28].mxu1  ;;  %v15637_v37 = vsel %vm15560_vm5, %v15634_v42, %v15636_v14  ;;  %v8023_v46 = vrot.slane %v8021_v15, 1  ;;  %v8032_v15 = vrot.slane %v8030_v56, 1 }
 0x473   : > { %v24965_v43 = vpop.f32.mrb[29].mxu1 }
 0x474   : > { %v24967_v44 = vpop.f32.mrb[30].mxu1  ;;  %v8027_v42 = vor.u32 %v8026_v47, %v8023_v46  ;;  %v23379_v46 = vld [vmem:[%s23639_s10 + $0x178] sm:$0xff]  }
 0x475   : > { %v24971_v49 = vpop.f32.mrb[31].mxu1  ;;  %v8057_v58 = vshrl.u32 %v23379_v46, 16 }
 0x476   : > { %v8028_v27 = vsel %vm7651_vm0, %v8018_v34, %v8027_v42 }
 0x477   : > { %20896 = vmatmul.mubr.bf16.vlgmr.msra.gmra.mrb[68].mxu1 %v7983_v45  ;;  %v23370_v45 = vld [vmem:[%s23639_s10 + $0x160] sm:$0xff]  }
 0x478   : > { %21504 = vmatmul.mubr.bf16.gmra.mrb[68].mxu0 %v15633_v51  ;;  %20899 = vmatprep.mubr.bf16.mxu1 %v7992_v55  ;;  %v15639_v51 = vsel %vm15560_vm5, %v15636_v14, %v15638_v20  ;;  %v23372_v55 = vld [vmem:[%s23639_s10 + $0x168] sm:$0xff]   ;;  %v15640_v60 = vrot.slane %v23370_v45, 3  ;;  %v8019_v14 = vsel %vm7651_vm0, %v8009_v63, %v8018_v34  ;;  %v8036_v63 = vor.u32 %v8035_v16, %v8032_v15 }
 0x479   : > { %21507 = vmatprep.mubr.bf16.mxu0 %v15635_v3  ;;  %v8042_v3 = vshll.u32 %v23375_v48, 16  ;;  %v15642_v59 = vrot.slane %v23372_v55, 3  ;;  %v23376_v48 = vld [vmem:[%s23639_s10 + $0x178] sm:$0xff]   ;;  %v8060_v34 = vshll.u32 %v23379_v46, 16  ;;  %v8059_v46 = vrot.slane %v8057_v58, 1 }
 0x47a   : > { %v24979_v17 = vpop.f32.mrb[32].mxu1  ;;  %v15641_v26 = vsel %vm15560_vm5, %v15638_v20, %v15640_v60 }
 0x47b   : > { %v24981_v21 = vpop.f32.mrb[33].mxu1  ;;  %v8044_v45 = vrot.slane %v8042_v3, 2  ;;  %v15643_v47 = vsel %vm15560_vm5, %v15640_v60, %v15642_v59  ;;  %v15646_v3 = vrot.slane %v23376_v48, 3 }
 0x47c   : > { %v24983_v23 = vpop.f32.mrb[34].mxu1 }
 0x47d   : > { %v24987_v29 = vpop.f32.mrb[35].mxu1 }
 0x47e   : > { %25543 = vst [vmem:[#allocation6_spill] sm:$0xff] %v24987_v29 }
 0x47f   : > { %20900 = vmatmul.mubr.bf16.gmra.mrb[72].mxu1 %v8001_v24  ;;  %v23377_v24 = vld [vmem:[%s23639_s10 + $0x170] sm:$0xff]  }
 0x480   : > { %21508 = vmatmul.mubr.bf16.gmra.mrb[72].mxu0 %v15637_v37  ;;  %20903 = vmatprep.mubr.bf16.mxu1 %v8010_v54  ;;  %v23374_v37 = vld [vmem:[%s23639_s10 + $0x170] sm:$0xff]   ;;  %v8041_v54 = vrot.slane %v8039_v61, 1  ;;  %v8051_v55 = vshll.u32 %v23377_v24, 16 }
 0x481   : > { %21511 = vmatprep.mubr.bf16.mxu0 %v15639_v51  ;;  %v8048_v51 = vshrl.u32 %v23377_v24, 16  ;;  %v15644_v56 = vrot.slane %v23374_v37, 3  ;;  %v23381_v24 = vld [vmem:[%s23639_s10 + $0x180] sm:$0xff]  }
 0x482   : > { %v24995_v6 = vpop.f32.mrb[36].mxu1  ;;  %v8045_v20 = vor.u32 %v8044_v45, %v8041_v54  ;;  %v8053_v16 = vrot.slane %v8051_v55, 2  ;;  %v23378_v45 = vld [vmem:[%s23639_s10 + $0x180] sm:$0xff]   ;;  %v8069_v55 = vshll.u32 %v23381_v24, 16 }
 0x483   : > { %25544 = vst [vmem:[#allocation7_spill] sm:$0xff] %v24995_v6  ;;  %v24997_v10 = vpop.f32.mrb[37].mxu1  ;;  %v8050_v15 = vrot.slane %v8048_v51, 1  ;;  %v15645_v37 = vsel %vm15560_vm5, %v15642_v59, %v15644_v56  ;;  %v15647_v48 = vsel %vm15560_vm5, %v15644_v56, %v15646_v3  ;;  %v8066_v51 = vshrl.u32 %v23381_v24, 16  ;;  %v23385_v24 = vld [vmem:[%s23639_s10 + $0x190] sm:$0xff]   ;;  %v25144_v6 = vld [vmem:[%s23639_s10 + $0x1f8] sm:$0xff]  }
 0x484   : > { %25545 = vst [vmem:[#allocation8_spill] sm:$0xff] %v24997_v10  ;;  %v24999_v11 = vpop.f32.mrb[38].mxu1  ;;  %v8046_v54 = vsel %vm7651_vm0, %v8036_v63, %v8045_v20 }
 0x485   : > { %25546 = vst [vmem:[#allocation9_spill] sm:$0xff] %v24999_v11  ;;  %v25003_v25 = vpop.f32.mrb[39].mxu1  ;;  %v23405_v11 = vld [vmem:[%s23639_s10 + $0x1e0] sm:$0xff]  }
 0x486   : > { %25547 = vst [vmem:[#allocation10_spill] sm:$0xff] %v25003_v25  ;;  %v23401_v25 = vld [vmem:[%s23639_s10 + $0x1d0] sm:$0xff]  }
 0x487   : > { %20904 = vmatmul.mubr.bf16.gmra.mrb[76].mxu1 %v8019_v14 }
 0x488   : > { %21512 = vmatmul.mubr.bf16.gmra.mrb[76].mxu0 %v15641_v26  ;;  %20907 = vmatprep.mubr.bf16.mxu1 %v8028_v27  ;;  %v8037_v26 = vsel %vm7651_vm0, %v8027_v42, %v8036_v63  ;;  %v8054_v42 = vor.u32 %v8053_v16, %v8050_v15  ;;  %v8068_v15 = vrot.slane %v8066_v51, 1  ;;  %v8071_v16 = vrot.slane %v8069_v55, 2 }
 0x489   : > { %21515 = vmatprep.mubr.bf16.mxu0 %v15643_v47  ;;  %v8062_v47 = vrot.slane %v8060_v34, 2  ;;  %v8084_v51 = vshrl.u32 %v23385_v24, 16  ;;  %v8087_v55 = vshll.u32 %v23385_v24, 16  ;;  %v23389_v24 = vld [vmem:[%s23639_s10 + $0x1a0] sm:$0xff]  }
 0x48a   : > { %v25011_v61 = vpop.f32.mrb[40].mxu1 }
 0x48b   : > { %25548 = vst [vmem:[#allocation11_spill] sm:$0xff] %v25011_v61  ;;  %v25013_v60 = vpop.f32.mrb[41].mxu1  ;;  %v23383_v61 = vld [vmem:[%s23639_s10 + $0x188] sm:$0xff]   ;;  %v8063_v59 = vor.u32 %v8062_v47, %v8059_v46 }
 0x48c   : > { %25549 = vst [vmem:[#allocation12_spill] sm:$0xff] %v25013_v60  ;;  %v25015_v14 = vpop.f32.mrb[42].mxu1  ;;  %v23380_v60 = vld [vmem:[%s23639_s10 + $0x188] sm:$0xff]   ;;  %v8078_v63 = vshll.u32 %v23383_v61, 16 }
 0x48d   : > { %25550 = vst [vmem:[#allocation13_spill] sm:$0xff] %v25015_v14  ;;  %v25019_v27 = vpop.f32.mrb[43].mxu1  ;;  %v8075_v14 = vshrl.u32 %v23383_v61, 16  ;;  %v15650_v34 = vrot.slane %v23380_v60, 3  ;;  %v8064_v46 = vsel %vm7651_vm0, %v8054_v42, %v8063_v59  ;;  %v23382_v61 = vld [vmem:[%s23639_s10 + $0x190] sm:$0xff]  }
 0x48e   : > { %25551 = vst [vmem:[#allocation14_spill] sm:$0xff] %v25019_v27  ;;  %v15648_v27 = vrot.slane %v23378_v45, 3 }
 0x48f   : > { %20908 = vmatmul.mubr.bf16.gmra.mrb[80].mxu1 %v8037_v26  ;;  %v8077_v47 = vrot.slane %v8075_v14, 1 }
 0x490   : > { %21516 = vmatmul.mubr.bf16.gmra.mrb[80].mxu0 %v15645_v37  ;;  %20911 = vmatprep.mubr.bf16.mxu1 %v8046_v54  ;;  %v8055_v37 = vsel %vm7651_vm0, %v8045_v20, %v8054_v42  ;;  %v15649_v45 = vsel %vm15560_vm5, %v15646_v3, %v15648_v27  ;;  %v15651_v60 = vsel %vm15560_vm5, %v15648_v27, %v15650_v34 }
 0x491   : > { %21519 = vmatprep.mubr.bf16.mxu0 %v15647_v48  ;;  %v8080_v48 = vrot.slane %v8078_v63, 2  ;;  %v8072_v20 = vor.u32 %v8071_v16, %v8068_v15  ;;  %v8086_v15 = vrot.slane %v8084_v51, 1  ;;  %v8089_v16 = vrot.slane %v8087_v55, 2 }
 0x492   : > { %v25027_v58 = vpop.f32.mrb[44].mxu1  ;;  %v8102_v51 = vshrl.u32 %v23389_v24, 16  ;;  %v8105_v55 = vshll.u32 %v23389_v24, 16  ;;  %v23393_v24 = vld [vmem:[%s23639_s10 + $0x1b0] sm:$0xff]  }
 0x493   : > { %25552 = vst [vmem:[#allocation15_spill] sm:$0xff] %v25027_v58  ;;  %v25029_v56 = vpop.f32.mrb[45].mxu1  ;;  %v23387_v58 = vld [vmem:[%s23639_s10 + $0x198] sm:$0xff]   ;;  %v8081_v3 = vor.u32 %v8080_v48, %v8077_v47 }
 0x494   : > { %25553 = vst [vmem:[#allocation16_spill] sm:$0xff] %v25029_v56  ;;  %v25031_v26 = vpop.f32.mrb[46].mxu1  ;;  %v23384_v56 = vld [vmem:[%s23639_s10 + $0x198] sm:$0xff]   ;;  %v8096_v42 = vshll.u32 %v23387_v58, 16 }
 0x495   : > { %25554 = vst [vmem:[#allocation17_spill] sm:$0xff] %v25031_v26  ;;  %v25035_v54 = vpop.f32.mrb[47].mxu1  ;;  %v8093_v26 = vshrl.u32 %v23387_v58, 16  ;;  %v15654_v63 = vrot.slane %v23384_v56, 3  ;;  %v8082_v47 = vsel %vm7651_vm0, %v8072_v20, %v8081_v3  ;;  %v23386_v58 = vld [vmem:[%s23639_s10 + $0x1a0] sm:$0xff]  }
 0x496   : > { %25555 = vst [vmem:[#allocation18_spill] sm:$0xff] %v25035_v54  ;;  %v15652_v54 = vrot.slane %v23382_v61, 3 }
 0x497   : > { %20912 = vmatmul.mubr.bf16.gmra.mrb[84].mxu1 %v8055_v37  ;;  %v8095_v48 = vrot.slane %v8093_v26, 1 }
 0x498   : > { %21520 = vmatmul.mubr.bf16.gmra.mrb[84].mxu0 %v15649_v45  ;;  %20915 = vmatprep.mubr.bf16.mxu1 %v8064_v46  ;;  %v8073_v45 = vsel %vm7651_vm0, %v8063_v59, %v8072_v20  ;;  %v15653_v61 = vsel %vm15560_vm5, %v15650_v34, %v15652_v54  ;;  %v15655_v56 = vsel %vm15560_vm5, %v15652_v54, %v15654_v63 }
 0x499   : > { %21523 = vmatprep.mubr.bf16.mxu0 %v15651_v60  ;;  %v8098_v60 = vrot.slane %v8096_v42, 2  ;;  %v8090_v59 = vor.u32 %v8089_v16, %v8086_v15  ;;  %v8104_v15 = vrot.slane %v8102_v51, 1  ;;  %v8107_v16 = vrot.slane %v8105_v55, 2 }
 0x49a   : > { %v25043_v14 = vpop.f32.mrb[48].mxu1  ;;  %v8120_v51 = vshrl.u32 %v23393_v24, 16  ;;  %v8123_v55 = vshll.u32 %v23393_v24, 16  ;;  %v23397_v24 = vld [vmem:[%s23639_s10 + $0x1c0] sm:$0xff]  }
 0x49b   : > { %25556 = vst [vmem:[#allocation19_spill] sm:$0xff] %v25043_v14  ;;  %v25045_v27 = vpop.f32.mrb[49].mxu1  ;;  %v23391_v14 = vld [vmem:[%s23639_s10 + $0x1a8] sm:$0xff]   ;;  %v8099_v34 = vor.u32 %v8098_v60, %v8095_v48 }
 0x49c   : > { %25557 = vst [vmem:[#allocation20_spill] sm:$0xff] %v25045_v27  ;;  %v25047_v37 = vpop.f32.mrb[50].mxu1  ;;  %v23388_v27 = vld [vmem:[%s23639_s10 + $0x1a8] sm:$0xff]   ;;  %v8114_v20 = vshll.u32 %v23391_v14, 16 }
 0x49d   : > { %25558 = vst [vmem:[#allocation21_spill] sm:$0xff] %v25047_v37  ;;  %v25051_v46 = vpop.f32.mrb[51].mxu1  ;;  %v8111_v37 = vshrl.u32 %v23391_v14, 16  ;;  %v15658_v42 = vrot.slane %v23388_v27, 3  ;;  %v8100_v48 = vsel %vm7651_vm0, %v8090_v59, %v8099_v34  ;;  %v23390_v14 = vld [vmem:[%s23639_s10 + $0x1b0] sm:$0xff]  }
 0x49e   : > { %25559 = vst [vmem:[#allocation22_spill] sm:$0xff] %v25051_v46  ;;  %v15656_v46 = vrot.slane %v23386_v58, 3 }
 0x49f   : > { %20916 = vmatmul.mubr.bf16.gmra.mrb[88].mxu1 %v8073_v45  ;;  %v8113_v60 = vrot.slane %v8111_v37, 1 }
 0x4a0   : > { %21524 = vmatmul.mubr.bf16.gmra.mrb[88].mxu0 %v15653_v61  ;;  %20919 = vmatprep.mubr.bf16.mxu1 %v8082_v47  ;;  %v8091_v61 = vsel %vm7651_vm0, %v8081_v3, %v8090_v59  ;;  %v15657_v58 = vsel %vm15560_vm5, %v15654_v63, %v15656_v46  ;;  %v15659_v27 = vsel %vm15560_vm5, %v15656_v46, %v15658_v42 }
 0x4a1   : > { %21527 = vmatprep.mubr.bf16.mxu0 %v15655_v56  ;;  %v8116_v56 = vrot.slane %v8114_v20, 2  ;;  %v8108_v3 = vor.u32 %v8107_v16, %v8104_v15  ;;  %v8122_v15 = vrot.slane %v8120_v51, 1  ;;  %v8125_v16 = vrot.slane %v8123_v55, 2 }
 0x4a2   : > { %v25059_v26 = vpop.f32.mrb[52].mxu1  ;;  %v8138_v51 = vshrl.u32 %v23397_v24, 16  ;;  %v8141_v55 = vshll.u32 %v23397_v24, 16  ;;  %v23403_v24 = vld [vmem:[%s23639_s10 + $0x1d8] sm:$0xff]  }
 0x4a3   : > { %25560 = vst [vmem:[#allocation23_spill] sm:$0xff] %v25059_v26  ;;  %v25061_v54 = vpop.f32.mrb[53].mxu1  ;;  %v23395_v26 = vld [vmem:[%s23639_s10 + $0x1b8] sm:$0xff]   ;;  %v8117_v63 = vor.u32 %v8116_v56, %v8113_v60 }
 0x4a4   : > { %25561 = vst [vmem:[#allocation24_spill] sm:$0xff] %v25061_v54  ;;  %v25063_v45 = vpop.f32.mrb[54].mxu1  ;;  %v23392_v54 = vld [vmem:[%s23639_s10 + $0x1b8] sm:$0xff]   ;;  %v8132_v59 = vshll.u32 %v23395_v26, 16 }
 0x4a5   : > { %25562 = vst [vmem:[#allocation25_spill] sm:$0xff] %v25063_v45  ;;  %v25067_v47 = vpop.f32.mrb[55].mxu1  ;;  %v8129_v45 = vshrl.u32 %v23395_v26, 16  ;;  %v15662_v20 = vrot.slane %v23392_v54, 3  ;;  %v8118_v60 = vsel %vm7651_vm0, %v8108_v3, %v8117_v63  ;;  %v23394_v26 = vld [vmem:[%s23639_s10 + $0x1c0] sm:$0xff]  }
 0x4a6   : > { %25563 = vst [vmem:[#allocation26_spill] sm:$0xff] %v25067_v47  ;;  %v15660_v47 = vrot.slane %v23390_v14, 3 }
 0x4a7   : > { %20920 = vmatmul.mubr.bf16.gmra.mrb[92].mxu1 %v8091_v61  ;;  %v8131_v56 = vrot.slane %v8129_v45, 1 }
 0x4a8   : > { %21528 = vmatmul.mubr.bf16.gmra.mrb[92].mxu0 %v15657_v58  ;;  %20923 = vmatprep.mubr.bf16.mxu1 %v8100_v48  ;;  %v8109_v58 = vsel %vm7651_vm0, %v8099_v34, %v8108_v3  ;;  %v15661_v14 = vsel %vm15560_vm5, %v15658_v42, %v15660_v47  ;;  %v15663_v54 = vsel %vm15560_vm5, %v15660_v47, %v15662_v20 }
 0x4a9   : > { %21531 = vmatprep.mubr.bf16.mxu0 %v15659_v27  ;;  %v8134_v27 = vrot.slane %v8132_v59, 2  ;;  %v8126_v34 = vor.u32 %v8125_v16, %v8122_v15  ;;  %v8140_v16 = vrot.slane %v8138_v51, 1  ;;  %v8165_v51 = vshrl.u32 %v23403_v24, 16 }
 0x4aa   : > { %v25075_v37 = vpop.f32.mrb[56].mxu1 }
 0x4ab   : > { %25564 = vst [vmem:[#allocation27_spill] sm:$0xff] %v25075_v37  ;;  %v25077_v46 = vpop.f32.mrb[57].mxu1  ;;  %v23399_v37 = vld [vmem:[%s23639_s10 + $0x1c8] sm:$0xff]   ;;  %v8135_v42 = vor.u32 %v8134_v27, %v8131_v56  ;;  %v8127_v15 = vsel %vm7651_vm0, %v8117_v63, %v8126_v34  ;;  %v23398_v56 = vld [vmem:[%s23639_s10 + $0x1d0] sm:$0xff]  }
 0x4ac   : > { %25565 = vst [vmem:[#allocation28_spill] sm:$0xff] %v25077_v46  ;;  %v25079_v61 = vpop.f32.mrb[58].mxu1  ;;  %v23396_v46 = vld [vmem:[%s23639_s10 + $0x1c8] sm:$0xff]   ;;  %v8147_v3 = vshrl.u32 %v23399_v37, 16 }
 0x4ad   : > { %25566 = vst [vmem:[#allocation29_spill] sm:$0xff] %v25079_v61  ;;  %v25083_v48 = vpop.f32.mrb[59].mxu1  ;;  %v8150_v61 = vshll.u32 %v23399_v37, 16  ;;  %v15666_v59 = vrot.slane %v23396_v46, 3  ;;  %v8136_v37 = vsel %vm7651_vm0, %v8126_v34, %v8135_v42 }
 0x4ae   : > { %25567 = vst [vmem:[#allocation30_spill] sm:$0xff] %v25083_v48  ;;  %v15664_v48 = vrot.slane %v23394_v26, 3  ;;  %v8149_v27 = vrot.slane %v8147_v3, 1 }
 0x4af   : > { %20924 = vmatmul.mubr.bf16.gmra.mrb[96].mxu1 %v8109_v58 }
 0x4b0   : > { %21532 = vmatmul.mubr.bf16.gmra.mrb[96].mxu0 %v15661_v14  ;;  %20927 = vmatprep.mubr.bf16.mxu1 %v8118_v60  ;;  %v8143_v14 = vrot.slane %v8141_v55, 2  ;;  %v15665_v26 = vsel %vm15560_vm5, %v15662_v20, %v15664_v48  ;;  %v15667_v46 = vsel %vm15560_vm5, %v15664_v48, %v15666_v59  ;;  %v8168_v55 = vshll.u32 %v23403_v24, 16 }
 0x4b1   : > { %21535 = vmatprep.mubr.bf16.mxu0 %v15663_v54  ;;  %v8152_v54 = vrot.slane %v8150_v61, 2  ;;  %v15668_v20 = vrot.slane %v23398_v56, 3 }
 0x4b2   : > { %v25091_v45 = vpop.f32.mrb[60].mxu1  ;;  %v8144_v63 = vor.u32 %v8143_v14, %v8140_v16  ;;  %v23402_v16 = vld [vmem:[%s23639_s10 + $0x1e0] sm:$0xff]   ;;  %v8167_v14 = vrot.slane %v8165_v51, 1  ;;  %v8170_v24 = vrot.slane %v8168_v55, 2 }
 0x4b3   : > { %25568 = vst [vmem:[#allocation31_spill] sm:$0xff] %v25091_v45  ;;  %v25093_v47 = vpop.f32.mrb[61].mxu1  ;;  %v8159_v45 = vshll.u32 %v23401_v25, 16  ;;  %v8153_v34 = vor.u32 %v8152_v54, %v8149_v27  ;;  %v15669_v56 = vsel %vm15560_vm5, %v15666_v59, %v15668_v20  ;;  %v15672_v51 = vrot.slane %v23402_v16, 3 }
 0x4b4   : > { %25569 = vst [vmem:[#allocation32_spill] sm:$0xff] %v25093_v47  ;;  %v25096_v58 = vpop.f32.mrb[62].mxu1  ;;  %v23400_v47 = vld [vmem:[%s23639_s10 + $0x1d8] sm:$0xff]   ;;  %v8171_v55 = vor.u32 %v8170_v24, %v8167_v14 }
 0x4b5   : > { %25570 = vst [vmem:[#allocation33_spill] sm:$0xff] %v25096_v58  ;;  %v25100_v60 = vpop.f32.mrb[63].mxu1  ;;  %v8156_v58 = vshrl.u32 %v23401_v25, 16  ;;  %v15670_v61 = vrot.slane %v23400_v47, 3  ;;  %v8154_v27 = vsel %vm7651_vm0, %v8144_v63, %v8153_v34  ;;  %v23407_v47 = vld [vmem:[%s23639_s10 + $0x1e8] sm:$0xff]  }
 0x4b6   : > { %25571 = vst [vmem:[#allocation34_spill] sm:$0xff] %v25100_v60  ;;  %v8183_v59 = vshrl.u32 %v23407_v47, 16 }
 0x4b7   : > { %20928 = vmatmul.mubr.bf16.gmra.mrb[100].mxu1 %v8127_v15  ;;  %v8158_v3 = vrot.slane %v8156_v58, 1  ;;  %v8161_v15 = vrot.slane %v8159_v45, 2  ;;  %v15671_v54 = vsel %vm15560_vm5, %v15668_v20, %v15670_v61  ;;  %v25123_v58 = vld [vmem:[%s23639_s10 + $0x1e8] sm:$0xff]   ;;  %v15673_v24 = vsel %vm15560_vm5, %v15670_v61, %v15672_v51 }
 0x4b8   : > { %21536 = vmatmul.mubr.bf16.gmra.mrb[100].mxu0 %v15665_v26  ;;  %20931 = vmatprep.mubr.bf16.mxu1 %v8136_v37  ;;  %v8145_v26 = vsel %vm7651_vm0, %v8135_v42, %v8144_v63  ;;  %v8177_v42 = vshll.u32 %v23405_v11, 16  ;;  %v8186_v63 = vshll.u32 %v23407_v47, 16 }
 0x4b9   : > { %21539 = vmatprep.mubr.bf16.mxu0 %v15667_v46  ;;  %v8162_v45 = vor.u32 %v8161_v15, %v8158_v3  ;;  %v8174_v46 = vshrl.u32 %v23405_v11, 16  ;;  %v25130_v3 = vld [vmem:[%s25539_s2] ss:$0 sm:$0xff] }
 0x4ba   : > { %v25107_v60 = vpop.f32.mrb[64].mxu1 }
 0x4bb   : > { %25572 = vst [vmem:[#allocation35_spill] sm:$0xff] %v25107_v60  ;;  %v25109_v48 = vpop.f32.mrb[65].mxu1  ;;  %v8163_v11 = vsel %vm7651_vm0, %v8153_v34, %v8162_v45  ;;  %v8176_v15 = vrot.slane %v8174_v46, 1  ;;  %v8185_v60 = vrot.slane %v8183_v59, 1  ;;  %v8188_v34 = vrot.slane %v8186_v63, 2 }
 0x4bc   : > { %25573 = vst [vmem:[#allocation36_spill] sm:$0xff] %v25109_v48  ;;  %v25112_v25 = vpop.f32.mrb[66].mxu1 }
 0x4bd   : > { %25574 = vst [vmem:[#allocation37_spill] sm:$0xff] %v25112_v25  ;;  %v25116_v37 = vpop.f32.mrb[67].mxu1  ;;  %v15674_v25 = vrot.slane %v25123_v58, 3  ;;  %v8189_v63 = vor.u32 %v8188_v34, %v8185_v60 }
 0x4be   : > { %25575 = vst [vmem:[#allocation38_spill] sm:$0xff] %v25116_v37  ;;  %v23409_v37 = vld [vmem:[%s23639_s10 + $0x1f0] sm:$0xff]  }
 0x4bf   : > { %20932 = vmatmul.mubr.bf16.gmra.mrb[104].mxu1 %v8145_v26  ;;  %v8179_v26 = vrot.slane %v8177_v42, 2  ;;  %v8192_v47 = vshrl.u32 %v23409_v37, 16  ;;  %v8195_v46 = vshll.u32 %v23409_v37, 16  ;;  %v15675_v10 = vsel %vm15560_vm5, %v15672_v51, %v15674_v25 }
 0x4c0   : > { %21540 = vmatmul.mubr.bf16.gmra.mrb[104].mxu0 %v15669_v56  ;;  %20935 = vmatprep.mubr.bf16.mxu1 %v8154_v27  ;;  %v23406_v56 = vld [vmem:[%s23639_s10 + $0x1f0] sm:$0xff]   ;;  %v8172_v27 = vsel %vm7651_vm0, %v8162_v45, %v8171_v55 }
 0x4c1   : > { %21543 = vmatprep.mubr.bf16.mxu0 %v15671_v54  ;;  %v23411_v54 = vld [vmem:[%s23639_s10 + $0x1f8] sm:$0xff]   ;;  %v8180_v45 = vor.u32 %v8179_v26, %v8176_v15  ;;  %v15676_v37 = vrot.slane %v23406_v56, 3 }
 0x4c3   : > { %v21437_v20 = vpop.f32.mrb[0].mxu0 }
 0x4c4   : > { %v21587_v16 = vadd.f32 %v21437_v20, %v24848_v2  ;;  %v15848_v14 = vpop.f32.mrb[1].mxu0 }
 0x4c5   : > { %v21588_v58 = vadd.f32 %v15848_v14, %v24850_v31  ;;  %v21438_v48 = vpop.f32.mrb[2].mxu0  ;;  %v8197_v14 = vrot.slane %v8195_v46, 2 }
 0x4c6   : > { %v16944_v42 = vadd.f32 %v21587_v16, %v25130_v3  ;;  %v21589_v2 = vadd.f32 %v21438_v48, %v24852_v4  ;;  %v15851_v20 = vpop.f32.mrb[3].mxu0  ;;  %v8201_v4 = vshrl.u32 %v23411_v54, 16  ;;  %v8204_v48 = vshll.u32 %v23411_v54, 16  ;;  %v23413_v54 = vld [vmem:[%s23639_s10 + $0x200] sm:$0xff]  }
 0x4c7   : > { %v16942_v61 = vadd.f32 %v21588_v58, %v25130_v3  ;;  %v21590_v31 = vadd.f32 %v15851_v20, %v24856_v7  ;;  %20936 = vmatmul.mubr.bf16.gmra.mrb[108].mxu1 %v8163_v11  ;;  %v8194_v16 = vrot.slane %v8192_v47, 1  ;;  %v15678_v7 = vrot.slane %v25144_v6, 3  ;;  %v25156_v11 = vld [vmem:[%s23639_s10 + $0x200] sm:$0xff]  }
 0x4c8   : > { %v16945_v59 = vadd.f32 %v21589_v2, %v25130_v3  ;;  %21544 = vmatmul.mubr.bf16.gmra.mrb[108].mxu0 %v15673_v24  ;;  %20939 = vmatprep.mubr.bf16.mxu1 %v8172_v27  ;;  %v17080_v58 = vmax.f32 %v16944_v42, 0.0  ;;  %v8181_v24 = vsel %vm7651_vm0, %v8171_v55, %v8180_v45  ;;  %v15677_v27 = vsel %vm15560_vm5, %v15674_v25, %v15676_v37 }
 0x4c9   : > { %v16943_v51 = vadd.f32 %v21590_v31, %v25130_v3  ;;  %21547 = vmatprep.mubr.bf16.mxu0 %v15675_v10  ;;  %v17078_v15 = vmax.f32 %v16942_v61, 0.0  ;;  %v8203_v34 = vrot.slane %v8201_v4, 1  ;;  %v8206_v46 = vrot.slane %v8204_v48, 2  ;;  %v23415_v31 = vld [vmem:[%s23639_s10 + $0x208] sm:$0xff]  }
 0x4ca   : > { %v17081_v29 = vmax.f32 %v16945_v59, 0.0  ;;  %v8190_v20 = vsel %vm7651_vm0, %v8180_v45, %v8189_v63  ;;  %v8198_v61 = vor.u32 %v8197_v14, %v8194_v16  ;;  %v15679_v55 = vsel %vm15560_vm5, %v15676_v37, %v15678_v7  ;;  %v25174_v59 = vld [vmem:[%s23639_s10 + $0x208] sm:$0xff]   ;;  %v23417_v14 = vld [vmem:[%s23639_s10 + $0x210] sm:$0xff]  }
 0x4cb   : > { %v17079_v26 = vmax.f32 %v16943_v51, 0.0  ;;  %v21441_v56 = vpop.f32.mrb[4].mxu0  ;;  %v8210_v48 = vshrl.u32 %v23413_v54, 16  ;;  %v8213_v51 = vshll.u32 %v23413_v54, 16 }
 0x4cc   : > { %v19120_v10 = vpack.c.bf16 %v17081_v29, %v17080_v58  ;;  %v21591_v60 = vadd.f32 %v21441_v56, %v24864_v40  ;;  %v15864_v47 = vpop.f32.mrb[5].mxu0  ;;  %v8199_v58 = vsel %vm7651_vm0, %v8189_v63, %v8198_v61 }
 0x4cd   : > { %v19115_v6 = vpack.c.bf16 %v17079_v26, %v17078_v15  ;;  %v21592_v42 = vadd.f32 %v15864_v47, %v24866_v18  ;;  %v21442_v2 = vpop.f32.mrb[6].mxu0  ;;  %v15680_v18 = vrot.slane %v25156_v11, 3  ;;  %v8219_v11 = vshrl.u32 %v23415_v31, 16 }
 0x4ce   : > { %19452 = vst [vmem:[%s25166_s23 + $0x8] sm:$0xff] %v19120_v10   ;;  %v16948_v29 = vadd.f32 %v21591_v60, %v25130_v3  ;;  %v21593_v40 = vadd.f32 %v21442_v2, %v24868_v19  ;;  %v15867_v25 = vpop.f32.mrb[7].mxu0  ;;  %v8207_v19 = vor.u32 %v8206_v46, %v8203_v34  ;;  %v8222_v15 = vshll.u32 %v23415_v31, 16  ;;  %v23419_v2 = vld [vmem:[%s23639_s10 + $0x218] sm:$0xff]  }
 0x4cf   : > { %19116 = vst [vmem:[%s25166_s23] sm:$0xff] %v19115_v6   ;;  %v16946_v45 = vadd.f32 %v21592_v42, %v25130_v3  ;;  %v21594_v4 = vadd.f32 %v15867_v25, %v24872_v22  ;;  %20940 = vmatmul.mubr.bf16.gmra.mrb[112].mxu1 %v8181_v24  ;;  %v15681_v22 = vsel %vm15560_vm5, %v15678_v7, %v15680_v18  ;;  %v15682_v24 = vrot.slane %v25174_v59, 3 }
 0x4d0   : > { %v16949_v16 = vadd.f32 %v21593_v40, %v25130_v3  ;;  %21548 = vmatmul.mubr.bf16.gmra.mrb[112].mxu0 %v15677_v27  ;;  %20943 = vmatprep.mubr.bf16.mxu1 %v8190_v20  ;;  %v17084_v26 = vmax.f32 %v16948_v29, 0.0  ;;  %v8212_v60 = vrot.slane %v8210_v48, 1  ;;  %v8215_v47 = vrot.slane %v8213_v51, 2  ;;  %v23414_v29 = vld [vmem:[%s23639_s10 + $0x210] sm:$0xff]  }
 0x4d1   : > { %v16947_v37 = vadd.f32 %v21594_v4, %v25130_v3  ;;  %21551 = vmatprep.mubr.bf16.mxu0 %v15679_v55  ;;  %v17082_v54 = vmax.f32 %v16946_v45, 0.0  ;;  %v8208_v6 = vsel %vm7651_vm0, %v8198_v61, %v8207_v19  ;;  %v8228_v42 = vshrl.u32 %v23417_v14, 16  ;;  %v25195_v4 = vld [vmem:[%s23639_s10 + $0x218] sm:$0xff]  }
 0x4d2   : > { %v17085_v56 = vmax.f32 %v16949_v16, 0.0  ;;  %v8221_v40 = vrot.slane %v8219_v11, 1  ;;  %v8224_v25 = vrot.slane %v8222_v15, 2  ;;  %v15683_v45 = vsel %vm15560_vm5, %v15680_v18, %v15682_v24 }
 0x4d3   : > { %v17083_v27 = vmax.f32 %v16947_v37, 0.0  ;;  %v21445_v10 = vpop.f32.mrb[8].mxu0  ;;  %v8231_v61 = vshll.u32 %v23417_v14, 16  ;;  %v8216_v51 = vor.u32 %v8215_v47, %v8212_v60  ;;  %v8237_v37 = vshrl.u32 %v23419_v2, 16  ;;  %v23421_v60 = vld [vmem:[%s23639_s10 + $0x220] sm:$0xff]  }
 0x4d4   : > { %v19130_v34 = vpack.c.bf16 %v17085_v56, %v17084_v26  ;;  %v21595_v46 = vadd.f32 %v21445_v10, %v24880_v33  ;;  %v15880_v63 = vpop.f32.mrb[9].mxu0  ;;  %v15684_v18 = vrot.slane %v23414_v29, 3  ;;  %v8225_v14 = vor.u32 %v8224_v25, %v8221_v40  ;;  %v23423_v40 = vld [vmem:[%s23639_s10 + $0x228] sm:$0xff]  }
 0x4d5   : > { %v19125_v7 = vpack.c.bf16 %v17083_v27, %v17082_v54  ;;  %v21596_v20 = vadd.f32 %v15880_v63, %v24882_v35  ;;  %v21446_v31 = vpop.f32.mrb[10].mxu0  ;;  %v8230_v15 = vrot.slane %v8228_v42, 1  ;;  %v8217_v10 = vsel %vm7651_vm0, %v8207_v19, %v8216_v51  ;;  %v23418_v63 = vld [vmem:[%s23639_s10 + $0x220] sm:$0xff]  }
 0x4d6   : > { %19454 = vst [vmem:[%s25166_s23 + $0x18] sm:$0xff] %v19130_v34   ;;  %v16952_v55 = vadd.f32 %v21595_v46, %v25130_v3  ;;  %v21597_v59 = vadd.f32 %v21446_v31, %v24884_v36  ;;  %v15883_v33 = vpop.f32.mrb[11].mxu0  ;;  %v8240_v36 = vshll.u32 %v23419_v2, 16  ;;  %v15685_v31 = vsel %vm15560_vm5, %v15682_v24, %v15684_v18 }
 0x4d7   : > { %19453 = vst [vmem:[%s25166_s23 + $0x10] sm:$0xff] %v19125_v7   ;;  %v16950_v48 = vadd.f32 %v21596_v20, %v25130_v3  ;;  %v21598_v35 = vadd.f32 %v15883_v33, %v24888_v39  ;;  %20944 = vmatmul.mubr.bf16.gmra.mrb[116].mxu1 %v8199_v58  ;;  %v15686_v39 = vrot.slane %v25195_v4, 3  ;;  %v8233_v58 = vrot.slane %v8231_v61, 2  ;;  %v25216_v33 = vld [vmem:[%s23639_s10 + $0x228] sm:$0xff]  }
 0x4d8   : > { %v16953_v16 = vadd.f32 %v21597_v59, %v25130_v3  ;;  %21552 = vmatmul.mubr.bf16.gmra.mrb[116].mxu0 %v15681_v22  ;;  %20947 = vmatprep.mubr.bf16.mxu1 %v8208_v6  ;;  %v17088_v26 = vmax.f32 %v16952_v55, 0.0  ;;  %v8239_v6 = vrot.slane %v8237_v37, 1  ;;  %v8242_v42 = vrot.slane %v8240_v36, 2 }
 0x4d9   : > { %v16951_v11 = vadd.f32 %v21598_v35, %v25130_v3  ;;  %21555 = vmatprep.mubr.bf16.mxu0 %v15683_v45  ;;  %v17086_v54 = vmax.f32 %v16950_v48, 0.0  ;;  %v8226_v29 = vsel %vm7651_vm0, %v8216_v51, %v8225_v14  ;;  %v15687_v55 = vsel %vm15560_vm5, %v15684_v18, %v15686_v39 }
 0x4da   : > { %v17089_v56 = vmax.f32 %v16953_v16, 0.0  ;;  %v8234_v59 = vor.u32 %v8233_v58, %v8230_v15  ;;  %v8246_v24 = vshrl.u32 %v23421_v60, 16  ;;  %v8249_v4 = vshll.u32 %v23421_v60, 16 }
 0x4db   : > { %v17087_v27 = vmax.f32 %v16951_v11, 0.0  ;;  %v21449_v22 = vpop.f32.mrb[12].mxu0  ;;  %v15688_v48 = vrot.slane %v23418_v63, 3  ;;  %v8255_v51 = vshrl.u32 %v23423_v40, 16  ;;  %v8258_v16 = vshll.u32 %v23423_v40, 16  ;;  %v23422_v63 = vld [vmem:[%s23639_s10 + $0x230] sm:$0xff]  }
 0x4dc   : > { %v19140_v47 = vpack.c.bf16 %v17089_v56, %v17088_v26  ;;  %v21599_v34 = vadd.f32 %v21449_v22, %v24896_v50  ;;  %v15896_v46 = vpop.f32.mrb[13].mxu0  ;;  %v8235_v11 = vsel %vm7651_vm0, %v8225_v14, %v8234_v59  ;;  %v8248_v56 = vrot.slane %v8246_v24, 1  ;;  %v23425_v14 = vld [vmem:[%s23639_s10 + $0x230] ss:$0 sps:$4 sm:$0x33]  }
 0x4dd   : > { %v19135_v2 = vpack.c.bf16 %v17087_v27, %v17086_v54  ;;  %v21600_v7 = vadd.f32 %v15896_v46, %v24898_v52  ;;  %v21450_v20 = vpop.f32.mrb[14].mxu0  ;;  %v8251_v58 = vrot.slane %v8249_v4, 2 }
 0x4de   : > { %19456 = vst [vmem:[%s25166_s23 + $0x28] sm:$0xff] %v19140_v47   ;;  %v16956_v19 = vadd.f32 %v21599_v34, %v25130_v3  ;;  %v21601_v50 = vadd.f32 %v21450_v20, %v24900_v53  ;;  %v15899_v25 = vpop.f32.mrb[15].mxu0  ;;  %v8243_v53 = vor.u32 %v8242_v42, %v8239_v6  ;;  %v8257_v6 = vrot.slane %v8255_v51, 1 }
 0x4df   : > { %19455 = vst [vmem:[%s25166_s23 + $0x20] sm:$0xff] %v19135_v2   ;;  %v16954_v52 = vadd.f32 %v21600_v7, %v25130_v3  ;;  %v21602_v45 = vadd.f32 %v15899_v25, %v24904_v57  ;;  %20948 = vmatmul.mubr.bf16.gmra.mrb[120].mxu1 %v8217_v10  ;;  %v15690_v57 = vrot.slane %v25216_v33, 3  ;;  %v15689_v10 = vsel %vm15560_vm5, %v15686_v39, %v15688_v48 }
 0x4e0   : > { %v16957_v61 = vadd.f32 %v21601_v50, %v25130_v3  ;;  %21556 = vmatmul.mubr.bf16.gmra.mrb[120].mxu0 %v15685_v31  ;;  %20951 = vmatprep.mubr.bf16.mxu1 %v8226_v29  ;;  %v17092_v37 = vmax.f32 %v16956_v19, 0.0  ;;  %v8244_v60 = vsel %vm7651_vm0, %v8234_v59, %v8243_v53  ;;  %v8260_v42 = vrot.slane %v8258_v16, 2  ;;  %v25236_v31 = vld [vmem:[%s23639_s10 + $0x238] sm:$0xff]  }
 0x4e1   : > { %v16955_v35 = vadd.f32 %v21602_v45, %v25130_v3  ;;  %21559 = vmatprep.mubr.bf16.mxu0 %v15687_v55  ;;  %v17090_v18 = vmax.f32 %v16954_v52, 0.0  ;;  %v15691_v20 = vsel %vm15560_vm5, %v15688_v48, %v15690_v57  ;;  %v8264_v19 = vshrl.u32 %v23425_v14, 16 }
 0x4e2   : > { %v17093_v36 = vmax.f32 %v16957_v61, 0.0  ;;  %v8267_v50 = vshll.u32 %v23425_v14, 16  ;;  %v15692_v25 = vrot.slane %v23422_v63, 3  ;;  %v8261_v55 = vor.u32 %v8260_v42, %v8257_v6 }
 0x4e3   : > { %v17091_v15 = vmax.f32 %v16955_v35, 0.0  ;;  %v21453_v26 = vpop.f32.mrb[16].mxu0  ;;  %v15694_v52 = vrot.slane %v25236_v31, 3  ;;  %v8266_v51 = vrot.slane %v8264_v19, 1 }
 0x4e4   : > { %v19150_v54 = vpack.c.bf16 %v17093_v36, %v17092_v37  ;;  %v21603_v27 = vadd.f32 %v21453_v26, %v24912_v5  ;;  %v15912_v22 = vpop.f32.mrb[17].mxu0  ;;  %v8269_v16 = vrot.slane %v8267_v50, 2  ;;  %v23426_v26 = vld [vmem:[%s23639_s10 + $0x240] ss:$0 sps:$4 sm:$0x77]  }
 0x4e5   : > { %v19145_v47 = vpack.c.bf16 %v17091_v15, %v17090_v18  ;;  %v21604_v34 = vadd.f32 %v15912_v22, %v24914_v8  ;;  %v21454_v46 = vpop.f32.mrb[18].mxu0  ;;  %v8252_v8 = vor.u32 %v8251_v58, %v8248_v56  ;;  %v15693_v18 = vsel %vm15560_vm5, %v15690_v57, %v15692_v25 }
 0x4e6   : > { %19458 = vst [vmem:[%s25166_s23 + $0x38] sm:$0xff] %v19150_v54   ;;  %v16960_v2 = vadd.f32 %v21603_v27, %v25130_v3  ;;  %v21605_v5 = vadd.f32 %v21454_v46, %v24916_v9  ;;  %v15915_v7 = vpop.f32.mrb[19].mxu0  ;;  %v8270_v57 = vor.u32 %v8269_v16, %v8266_v51 }
 0x4e7   : > { %19457 = vst [vmem:[%s25166_s23 + $0x30] sm:$0xff] %v19145_v47   ;;  %v16958_v39 = vadd.f32 %v21604_v34, %v25130_v3  ;;  %v21606_v29 = vadd.f32 %v15915_v7, %v24920_v12  ;;  %20952 = vmatmul.mubr.bf16.gmra.mrb[124].mxu1 %v8235_v11  ;;  %v8253_v4 = vsel %vm7651_vm0, %v8243_v53, %v8252_v8 }
 0x4e8   : > { %v16961_v40 = vadd.f32 %v21605_v5, %v25130_v3  ;;  %21560 = vmatmul.mubr.bf16.gmra.mrb[124].mxu0 %v15689_v10  ;;  %20955 = vmatprep.mubr.bf16.mxu1 %v8244_v60  ;;  %v17096_v59 = vmax.f32 %v16960_v2, 0.0  ;;  %v8262_v15 = vsel %vm7651_vm0, %v8252_v8, %v8261_v55  ;;  %v15696_v10 = vrot.slane %v23426_v26, 3 }
 0x4e9   : > { %v16959_v9 = vadd.f32 %v21606_v29, %v25130_v3  ;;  %21563 = vmatprep.mubr.bf16.mxu0 %v15691_v20  ;;  %v17094_v12 = vmax.f32 %v16958_v39, 0.0  ;;  %v8271_v6 = vsel %vm7651_vm0, %v8261_v55, %v8270_v57 }
 0x4ea   : > { %v17097_v33 = vmax.f32 %v16961_v40, 0.0  ;;  %v15697_v7 = vsel %vm15560_vm5, %v15694_v52, %v15696_v10 }
 0x4eb   : > { %v17095_v45 = vmax.f32 %v16959_v9, 0.0  ;;  %v21457_v24 = vpop.f32.mrb[20].mxu0 }
 0x4ec   : > { %v19160_v61 = vpack.c.bf16 %v17097_v33, %v17096_v59  ;;  %v21607_v48 = vadd.f32 %v21457_v24, %v24929_v28  ;;  %v15928_v35 = vpop.f32.mrb[21].mxu0  ;;  %v15695_v28 = vsel %vm15560_vm5, %v15692_v25, %v15694_v52 }
 0x4ed   : > { %v19155_v37 = vpack.c.bf16 %v17095_v45, %v17094_v12  ;;  %v21608_v36 = vadd.f32 %v15928_v35, %v24931_v30  ;;  %v21458_v11 = vpop.f32.mrb[22].mxu0 }
 0x4ee   : > { %19460 = vst [vmem:[%s25166_s23 + $0x48] sm:$0xff] %v19160_v61   ;;  %v16964_v56 = vadd.f32 %v21607_v48, %v25130_v3  ;;  %v21609_v53 = vadd.f32 %v21458_v11, %v24933_v32  ;;  %v15931_v58 = vpop.f32.mrb[23].mxu0 }
 0x4ef   : > { %19459 = vst [vmem:[%s25166_s23 + $0x40] sm:$0xff] %v19155_v37   ;;  %v16962_v54 = vadd.f32 %v21608_v36, %v25130_v3  ;;  %v21610_v27 = vadd.f32 %v15931_v58, %v24938_v41  ;;  %20956 = vmatmul.mubr.bf16.gmra.mrb[128].mxu1 %v8253_v4 }
 0x4f0   : > { %v16965_v30 = vadd.f32 %v21609_v53, %v25130_v3  ;;  %21564 = vmatmul.mubr.bf16.gmra.mrb[128].mxu0 %v15693_v18  ;;  %20959 = vmatprep.mubr.bf16.mxu1 %v8262_v15  ;;  %v17100_v32 = vmax.f32 %v16964_v56, 0.0 }
 0x4f1   : > { %v16963_v22 = vadd.f32 %v21610_v27, %v25130_v3  ;;  %21567 = vmatprep.mubr.bf16.mxu0 %v15695_v28  ;;  %v17098_v14 = vmax.f32 %v16962_v54, 0.0  ;;  %v25576_v28 = vld [vmem:[#allocation6_spill] sm:$0xff] }
 0x4f2   : > { %v17101_v60 = vmax.f32 %v16965_v30, 0.0 }
 0x4f3   : > { %v17099_v47 = vmax.f32 %v16963_v22, 0.0  ;;  %v21461_v34 = vpop.f32.mrb[24].mxu0 }
 0x4f4   : > { %v19170_v46 = vpack.c.bf16 %v17101_v60, %v17100_v32  ;;  %v21611_v41 = vadd.f32 %v21461_v34, %v24946_v62  ;;  %v15944_v63 = vpop.f32.mrb[25].mxu0  ;;  %v25577_v60 = vld [vmem:[#allocation7_spill] sm:$0xff]  ;;  %v25578_v34 = vld [vmem:[#allocation8_spill] sm:$0xff] }
 0x4f5   : > { %v19165_v42 = vpack.c.bf16 %v17099_v47, %v17098_v14  ;;  %v21612_v2 = vadd.f32 %v15944_v63, %v24948_v0  ;;  %v21462_v5 = vpop.f32.mrb[26].mxu0 }
 0x4f6   : > { %19462 = vst [vmem:[%s25166_s23 + $0x58] sm:$0xff] %v19170_v46   ;;  %v16968_v20 = vadd.f32 %v21611_v41, %v25130_v3  ;;  %v21613_v31 = vadd.f32 %v21462_v5, %v24950_v1  ;;  %v15947_v39 = vpop.f32.mrb[27].mxu0 }
 0x4f7   : > { %19461 = vst [vmem:[%s25166_s23 + $0x50] sm:$0xff] %v19165_v42   ;;  %v16966_v29 = vadd.f32 %v21612_v2, %v25130_v3  ;;  %v21614_v62 = vadd.f32 %v15947_v39, %v24954_v13  ;;  %20960 = vmatmul.mubr.bf16.gmra.mrb[132].mxu1 %v8271_v6  ;;  %v25579_v6 = vld [vmem:[#allocation9_spill] sm:$0xff] }
 0x4f8   : > { %v16969_v8 = vadd.f32 %v21613_v31, %v25130_v3  ;;  %21568 = vmatmul.mubr.bf16.gmra.mrb[132].mxu0 %v15697_v7  ;;  %v17104_v40 = vmax.f32 %v16968_v20, 0.0  ;;  %v25580_v7 = vld [vmem:[#allocation10_spill] sm:$0xff] }
 0x4f9   : > { %v16967_v0 = vadd.f32 %v21614_v62, %v25130_v3  ;;  %v17102_v50 = vmax.f32 %v16966_v29, 0.0 }
 0x4fa   : > { %v17105_v19 = vmax.f32 %v16969_v8, 0.0 }
 0x4fb   : > { %v17103_v9 = vmax.f32 %v16967_v0, 0.0  ;;  %v21465_v25 = vpop.f32.mrb[28].mxu0 }
 0x4fc   : > { %v19180_v1 = vpack.c.bf16 %v17105_v19, %v17104_v40  ;;  %v21615_v55 = vadd.f32 %v21465_v25, %v24963_v38  ;;  %v15960_v59 = vpop.f32.mrb[29].mxu0 }
 0x4fd   : > { %v19175_v33 = vpack.c.bf16 %v17103_v9, %v17102_v50  ;;  %v21616_v13 = vadd.f32 %v15960_v59, %v24965_v43  ;;  %v21466_v52 = vpop.f32.mrb[30].mxu0  ;;  %v25581_v50 = vld [vmem:[#allocation11_spill] sm:$0xff] }
 0x4fe   : > { %19464 = vst [vmem:[%s25166_s23 + $0x68] sm:$0xff] %v19180_v1   ;;  %v16972_v12 = vadd.f32 %v21615_v55, %v25130_v3  ;;  %v21617_v45 = vadd.f32 %v21466_v52, %v24967_v44  ;;  %v15963_v24 = vpop.f32.mrb[31].mxu0  ;;  %v25582_v55 = vld [vmem:[#allocation12_spill] sm:$0xff]  ;;  %v25583_v52 = vld [vmem:[#allocation13_spill] sm:$0xff] }
 0x4ff   : > { %19463 = vst [vmem:[%s25166_s23 + $0x60] sm:$0xff] %v19175_v33   ;;  %v16970_v4 = vadd.f32 %v21616_v13, %v25130_v3  ;;  %v21618_v61 = vadd.f32 %v15963_v24, %v24971_v49 }
 0x500   : > { %v16973_v48 = vadd.f32 %v21617_v45, %v25130_v3  ;;  %v17108_v35 = vmax.f32 %v16972_v12, 0.0 }
 0x501   : > { %v16971_v38 = vadd.f32 %v21618_v61, %v25130_v3  ;;  %v17106_v51 = vmax.f32 %v16970_v4, 0.0  ;;  %v25584_v4 = vld [vmem:[#allocation14_spill] sm:$0xff] }
 0x502   : > { %v17109_v43 = vmax.f32 %v16973_v48, 0.0 }
 0x503   : > { %v17107_v16 = vmax.f32 %v16971_v38, 0.0  ;;  %v21469_v37 = vpop.f32.mrb[32].mxu0 }
 0x504   : > { %v19190_v36 = vpack.c.bf16 %v17109_v43, %v17108_v35  ;;  %v21619_v44 = vadd.f32 %v21469_v37, %v24979_v17  ;;  %v15976_v11 = vpop.f32.mrb[33].mxu0 }
 0x505   : > { %v19185_v18 = vpack.c.bf16 %v17107_v16, %v17106_v51  ;;  %v21620_v15 = vadd.f32 %v15976_v11, %v24981_v21  ;;  %v21470_v26 = vpop.f32.mrb[34].mxu0 }
 0x506   : > { %19466 = vst [vmem:[%s25166_s23 + $0x78] sm:$0xff] %v19190_v36   ;;  %v16976_v49 = vadd.f32 %v21619_v44, %v25130_v3  ;;  %v21621_v56 = vadd.f32 %v21470_v26, %v24983_v23  ;;  %v15979_v53 = vpop.f32.mrb[35].mxu0  ;;  %v25585_v44 = vld [vmem:[#allocation15_spill] sm:$0xff]  ;;  %v25586_v26 = vld [vmem:[#allocation16_spill] sm:$0xff] }
 0x507   : > { %19465 = vst [vmem:[%s25166_s23 + $0x70] sm:$0xff] %v19185_v18   ;;  %v16974_v58 = vadd.f32 %v21620_v15, %v25130_v3  ;;  %v21622_v54 = vadd.f32 %v15979_v53, %v25576_v28 }
 0x508   : > { %v16977_v27 = vadd.f32 %v21621_v56, %v25130_v3  ;;  %v17112_v30 = vmax.f32 %v16976_v49, 0.0 }
 0x509   : > { %v16975_v17 = vadd.f32 %v21622_v54, %v25130_v3  ;;  %v17110_v57 = vmax.f32 %v16974_v58, 0.0  ;;  %v25587_v58 = vld [vmem:[#allocation17_spill] sm:$0xff] }
 0x50a   : > { %v17113_v21 = vmax.f32 %v16977_v27, 0.0 }
 0x50b   : > { %v17111_v22 = vmax.f32 %v16975_v17, 0.0  ;;  %v21473_v10 = vpop.f32.mrb[36].mxu0  ;;  %v25588_v17 = vld [vmem:[#allocation18_spill] sm:$0xff] }
 0x50c   : > { %v19200_v32 = vpack.c.bf16 %v17113_v21, %v17112_v30  ;;  %v21623_v23 = vadd.f32 %v21473_v10, %v25577_v60  ;;  %v15992_v14 = vpop.f32.mrb[37].mxu0 }
 0x50d   : > { %v19195_v47 = vpack.c.bf16 %v17111_v22, %v17110_v57  ;;  %v21624_v46 = vadd.f32 %v15992_v14, %v25578_v34  ;;  %v21474_v41 = vpop.f32.mrb[38].mxu0 }
 0x50e   : > { %19468 = vst [vmem:[%s25166_s23 + $0x88] sm:$0xff] %v19200_v32   ;;  %v16980_v63 = vadd.f32 %v21623_v23, %v25130_v3  ;;  %v21625_v42 = vadd.f32 %v21474_v41, %v25579_v6  ;;  %v15995_v2 = vpop.f32.mrb[39].mxu0 }
 0x50f   : > { %19467 = vst [vmem:[%s25166_s23 + $0x80] sm:$0xff] %v19195_v47   ;;  %v16978_v5 = vadd.f32 %v21624_v46, %v25130_v3  ;;  %v21626_v20 = vadd.f32 %v15995_v2, %v25580_v7  ;;  %v25589_v47 = vld [vmem:[#allocation19_spill] sm:$0xff] }
 0x510   : > { %v16981_v31 = vadd.f32 %v21625_v42, %v25130_v3  ;;  %v17116_v29 = vmax.f32 %v16980_v63, 0.0  ;;  %v25590_v63 = vld [vmem:[#allocation20_spill] sm:$0xff] }
 0x511   : > { %v16979_v39 = vadd.f32 %v21626_v20, %v25130_v3  ;;  %v17114_v8 = vmax.f32 %v16978_v5, 0.0  ;;  %v25591_v5 = vld [vmem:[#allocation21_spill] sm:$0xff] }
 0x512   : > { %v17117_v62 = vmax.f32 %v16981_v31, 0.0 }
 0x513   : > { %v17115_v0 = vmax.f32 %v16979_v39, 0.0  ;;  %v21477_v40 = vpop.f32.mrb[40].mxu0  ;;  %v25592_v39 = vld [vmem:[#allocation22_spill] sm:$0xff] }
 0x514   : > { %v19210_v19 = vpack.c.bf16 %v17117_v62, %v17116_v29  ;;  %v21627_v9 = vadd.f32 %v21477_v40, %v25581_v50  ;;  %v16008_v25 = vpop.f32.mrb[41].mxu0 }
 0x515   : > { %v19205_v1 = vpack.c.bf16 %v17115_v0, %v17114_v8  ;;  %v21628_v59 = vadd.f32 %v16008_v25, %v25582_v55  ;;  %v21478_v33 = vpop.f32.mrb[42].mxu0 }
 0x516   : > { %19470 = vst [vmem:[%s25166_s23 + $0x98] sm:$0xff] %v19210_v19   ;;  %v16984_v13 = vadd.f32 %v21627_v9, %v25130_v3  ;;  %v21629_v12 = vadd.f32 %v21478_v33, %v25583_v52  ;;  %v16011_v45 = vpop.f32.mrb[43].mxu0 }
 0x517   : > { %19469 = vst [vmem:[%s25166_s23 + $0x90] sm:$0xff] %v19205_v1   ;;  %v16982_v24 = vadd.f32 %v21628_v59, %v25130_v3  ;;  %v21630_v61 = vadd.f32 %v16011_v45, %v25584_v4  ;;  %v25593_v1 = vld [vmem:[#allocation23_spill] sm:$0xff] }
 0x518   : > { %v16985_v48 = vadd.f32 %v21629_v12, %v25130_v3  ;;  %v17120_v35 = vmax.f32 %v16984_v13, 0.0  ;;  %v25594_v13 = vld [vmem:[#allocation24_spill] sm:$0xff] }
 0x519   : > { %v16983_v38 = vadd.f32 %v21630_v61, %v25130_v3  ;;  %v17118_v51 = vmax.f32 %v16982_v24, 0.0  ;;  %v25595_v24 = vld [vmem:[#allocation25_spill] sm:$0xff] }
 0x51a   : > { %v17121_v43 = vmax.f32 %v16985_v48, 0.0 }
 0x51b   : > { %v17119_v16 = vmax.f32 %v16983_v38, 0.0  ;;  %v21481_v37 = vpop.f32.mrb[44].mxu0  ;;  %v25596_v38 = vld [vmem:[#allocation26_spill] sm:$0xff] }
 0x51c   : > { %v19220_v36 = vpack.c.bf16 %v17121_v43, %v17120_v35  ;;  %v21631_v11 = vadd.f32 %v21481_v37, %v25585_v44  ;;  %v16024_v18 = vpop.f32.mrb[45].mxu0 }
 0x51d   : > { %v19215_v15 = vpack.c.bf16 %v17119_v16, %v17118_v51  ;;  %v21632_v49 = vadd.f32 %v16024_v18, %v25586_v26  ;;  %v21482_v56 = vpop.f32.mrb[46].mxu0 }
 0x51e   : > { %19472 = vst [vmem:[%s25166_s23 + $0xa8] sm:$0xff] %v19220_v36   ;;  %v16988_v53 = vadd.f32 %v21631_v11, %v25130_v3  ;;  %v21633_v28 = vadd.f32 %v21482_v56, %v25587_v58  ;;  %v16027_v54 = vpop.f32.mrb[47].mxu0 }
 0x51f   : > { %19471 = vst [vmem:[%s25166_s23 + $0xa0] sm:$0xff] %v19215_v15   ;;  %v16986_v27 = vadd.f32 %v21632_v49, %v25130_v3  ;;  %v21634_v30 = vadd.f32 %v16027_v54, %v25588_v17  ;;  %v25597_v15 = vld [vmem:[#allocation27_spill] sm:$0xff] }
 0x520   : > { %v16989_v21 = vadd.f32 %v21633_v28, %v25130_v3  ;;  %v17124_v22 = vmax.f32 %v16988_v53, 0.0  ;;  %v25598_v53 = vld [vmem:[#allocation28_spill] sm:$0xff] }
 0x521   : > { %v16987_v57 = vadd.f32 %v21634_v30, %v25130_v3  ;;  %v17122_v32 = vmax.f32 %v16986_v27, 0.0  ;;  %v25599_v27 = vld [vmem:[#allocation29_spill] sm:$0xff] }
 0x522   : > { %v17125_v10 = vmax.f32 %v16989_v21, 0.0 }
 0x523   : > { %v17123_v60 = vmax.f32 %v16987_v57, 0.0  ;;  %v21485_v23 = vpop.f32.mrb[48].mxu0  ;;  %v25600_v57 = vld [vmem:[#allocation30_spill] sm:$0xff] }
 0x524   : > { %v19230_v14 = vpack.c.bf16 %v17125_v10, %v17124_v22  ;;  %v21635_v34 = vadd.f32 %v21485_v23, %v25589_v47  ;;  %v16040_v46 = vpop.f32.mrb[49].mxu0 }
 0x525   : > { %v19225_v41 = vpack.c.bf16 %v17123_v60, %v17122_v32  ;;  %v21636_v6 = vadd.f32 %v16040_v46, %v25590_v63  ;;  %v21486_v42 = vpop.f32.mrb[50].mxu0 }
 0x526   : > { %19474 = vst [vmem:[%s25166_s23 + $0xb8] sm:$0xff] %v19230_v14   ;;  %v16992_v2 = vadd.f32 %v21635_v34, %v25130_v3  ;;  %v21637_v7 = vadd.f32 %v21486_v42, %v25591_v5  ;;  %v16043_v20 = vpop.f32.mrb[51].mxu0 }
 0x527   : > { %19473 = vst [vmem:[%s25166_s23 + $0xb0] sm:$0xff] %v19225_v41   ;;  %v16990_v31 = vadd.f32 %v21636_v6, %v25130_v3  ;;  %v21638_v29 = vadd.f32 %v16043_v20, %v25592_v39  ;;  %v25601_v41 = vld [vmem:[#allocation31_spill] sm:$0xff] }
 0x528   : > { %v16993_v62 = vadd.f32 %v21637_v7, %v25130_v3  ;;  %v17128_v0 = vmax.f32 %v16992_v2, 0.0  ;;  %v25602_v2 = vld [vmem:[#allocation32_spill] sm:$0xff] }
 0x529   : > { %v16991_v8 = vadd.f32 %v21638_v29, %v25130_v3  ;;  %v17126_v19 = vmax.f32 %v16990_v31, 0.0  ;;  %v25603_v31 = vld [vmem:[#allocation33_spill] sm:$0xff] }
 0x52a   : > { %v17129_v40 = vmax.f32 %v16993_v62, 0.0 }
 0x52b   : > { %v17127_v50 = vmax.f32 %v16991_v8, 0.0  ;;  %v21489_v9 = vpop.f32.mrb[52].mxu0  ;;  %v25604_v8 = vld [vmem:[#allocation34_spill] sm:$0xff] }
 0x52c   : > { %v19240_v25 = vpack.c.bf16 %v17129_v40, %v17128_v0  ;;  %v21639_v55 = vadd.f32 %v21489_v9, %v25593_v1  ;;  %v16056_v59 = vpop.f32.mrb[53].mxu0 }
 0x52d   : > { %v19235_v33 = vpack.c.bf16 %v17127_v50, %v17126_v19  ;;  %v21640_v52 = vadd.f32 %v16056_v59, %v25594_v13  ;;  %v21490_v12 = vpop.f32.mrb[54].mxu0 }
 0x52e   : > { %19476 = vst [vmem:[%s25166_s23 + $0xc8] sm:$0xff] %v19240_v25   ;;  %v16996_v45 = vadd.f32 %v21639_v55, %v25130_v3  ;;  %v21641_v4 = vadd.f32 %v21490_v12, %v25595_v24  ;;  %v16059_v61 = vpop.f32.mrb[55].mxu0 }
 0x52f   : > { %19475 = vst [vmem:[%s25166_s23 + $0xc0] sm:$0xff] %v19235_v33   ;;  %v16994_v48 = vadd.f32 %v21640_v52, %v25130_v3  ;;  %v21642_v35 = vadd.f32 %v16059_v61, %v25596_v38  ;;  %v25605_v33 = vld [vmem:[#allocation35_spill] sm:$0xff] }
 0x530   : > { %v16997_v43 = vadd.f32 %v21641_v4, %v25130_v3  ;;  %v17132_v16 = vmax.f32 %v16996_v45, 0.0  ;;  %v25606_v45 = vld [vmem:[#allocation36_spill] sm:$0xff] }
 0x531   : > { %v16995_v51 = vadd.f32 %v21642_v35, %v25130_v3  ;;  %v17130_v36 = vmax.f32 %v16994_v48, 0.0  ;;  %v25607_v48 = vld [vmem:[#allocation37_spill] sm:$0xff] }
 0x532   : > { %v17133_v37 = vmax.f32 %v16997_v43, 0.0 }
 0x533   : > { %v17131_v44 = vmax.f32 %v16995_v51, 0.0  ;;  %v21493_v11 = vpop.f32.mrb[56].mxu0  ;;  %v25608_v51 = vld [vmem:[#allocation38_spill] sm:$0xff] }
 0x534   : > { %v19250_v18 = vpack.c.bf16 %v17133_v37, %v17132_v16  ;;  %v21643_v26 = vadd.f32 %v21493_v11, %v25597_v15  ;;  %v16072_v49 = vpop.f32.mrb[57].mxu0 }
 0x535   : > { %v19245_v56 = vpack.c.bf16 %v17131_v44, %v17130_v36  ;;  %v21644_v58 = vadd.f32 %v16072_v49, %v25598_v53  ;;  %v21494_v28 = vpop.f32.mrb[58].mxu0 }
 0x536   : > { %19478 = vst [vmem:[%s25166_s23 + $0xd8] sm:$0xff] %v19250_v18   ;;  %v17000_v54 = vadd.f32 %v21643_v26, %v25130_v3  ;;  %v21645_v17 = vadd.f32 %v21494_v28, %v25599_v27  ;;  %v16075_v30 = vpop.f32.mrb[59].mxu0 }
 0x537   : > { %19477 = vst [vmem:[%s25166_s23 + $0xd0] sm:$0xff] %v19245_v56   ;;  %v16998_v21 = vadd.f32 %v21644_v58, %v25130_v3  ;;  %v21646_v22 = vadd.f32 %v16075_v30, %v25600_v57 }
 0x538   : > { %v17001_v10 = vadd.f32 %v21645_v17, %v25130_v3  ;;  %v17136_v60 = vmax.f32 %v17000_v54, 0.0 }
 0x539   : > { %v16999_v32 = vadd.f32 %v21646_v22, %v25130_v3  ;;  %v17134_v14 = vmax.f32 %v16998_v21, 0.0 }
 0x53a   : > { %v17137_v23 = vmax.f32 %v17001_v10, 0.0 }
 0x53b   : > { %v17135_v47 = vmax.f32 %v16999_v32, 0.0  ;;  %v21497_v34 = vpop.f32.mrb[60].mxu0 }
 0x53c   : > { %v19260_v46 = vpack.c.bf16 %v17137_v23, %v17136_v60  ;;  %v21647_v63 = vadd.f32 %v21497_v34, %v25601_v41  ;;  %v16088_v6 = vpop.f32.mrb[61].mxu0 }
 0x53d   : > { %v19255_v42 = vpack.c.bf16 %v17135_v47, %v17134_v14  ;;  %v21648_v5 = vadd.f32 %v16088_v6, %v25602_v2  ;;  %v21498_v7 = vpop.f32.mrb[62].mxu0 }
 0x53e   : > { %19480 = vst [vmem:[%s25166_s23 + $0xe8] sm:$0xff] %v19260_v46   ;;  %v17004_v20 = vadd.f32 %v21647_v63, %v25130_v3  ;;  %v21649_v39 = vadd.f32 %v21498_v7, %v25603_v31  ;;  %v16091_v29 = vpop.f32.mrb[63].mxu0 }
 0x53f   : > { %19479 = vst [vmem:[%s25166_s23 + $0xe0] sm:$0xff] %v19255_v42   ;;  %v17002_v62 = vadd.f32 %v21648_v5, %v25130_v3  ;;  %v21650_v0 = vadd.f32 %v16091_v29, %v25604_v8 }
 0x540   : > { %v17005_v40 = vadd.f32 %v21649_v39, %v25130_v3  ;;  %v17140_v50 = vmax.f32 %v17004_v20, 0.0 }
 0x541   : > { %v17003_v19 = vadd.f32 %v21650_v0, %v25130_v3  ;;  %v17138_v25 = vmax.f32 %v17002_v62, 0.0 }
 0x542   : > { %v17141_v9 = vmax.f32 %v17005_v40, 0.0 }
 0x543   : > { %v17139_v1 = vmax.f32 %v17003_v19, 0.0  ;;  %v21501_v55 = vpop.f32.mrb[64].mxu0  ;;  %v25383_v19 = vld [vmem:[%s25539_s2] ss:$0 sm:$0xff] }
 0x544   : > { %v19270_v59 = vpack.c.bf16 %v17141_v9, %v17140_v50  ;;  %v21651_v13 = vadd.f32 %v21501_v55, %v25605_v33  ;;  %v16104_v52 = vpop.f32.mrb[65].mxu0 }
 0x545   : > { %v19265_v12 = vpack.c.bf16 %v17139_v1, %v17138_v25  ;;  %v21652_v24 = vadd.f32 %v16104_v52, %v25606_v45  ;;  %v21502_v4 = vpop.f32.mrb[66].mxu0 }
 0x546   : > { %19482 = vst [vmem:[%s25166_s23 + $0xf8] sm:$0xff] %v19270_v59   ;;  %v17008_v61 = vadd.f32 %v21651_v13, %v25130_v3  ;;  %v21653_v38 = vadd.f32 %v21502_v4, %v25607_v48  ;;  %v16107_v35 = vpop.f32.mrb[67].mxu0 }
 0x547   : > { %19481 = vst [vmem:[%s25166_s23 + $0xf0] sm:$0xff] %v19265_v12   ;;  %v17006_v43 = vadd.f32 %v21652_v24, %v25130_v3  ;;  %v21654_v16 = vadd.f32 %v16107_v35, %v25608_v51 }
 0x548   : > { %v17009_v37 = vadd.f32 %v21653_v38, %v25130_v3  ;;  %v17144_v44 = vmax.f32 %v17008_v61, 0.0 }
 0x549   : > { %v17007_v36 = vadd.f32 %v21654_v16, %v25130_v3  ;;  %v17142_v15 = vmax.f32 %v17006_v43, 0.0 }
 0x54a   : > { %v17145_v11 = vmax.f32 %v17009_v37, 0.0  ;;  %v20897_v18 = vpop.f32.mrb[68].mxu1 }
 0x54b   : > { %v17143_v26 = vmax.f32 %v17007_v36, 0.0  ;;  %v21505_v49 = vpop.f32.mrb[68].mxu0  ;;  %v8694_v56 = vpop.f32.mrb[69].mxu1 }
 0x54c   : > { %v19280_v53 = vpack.c.bf16 %v17145_v11, %v17144_v44  ;;  %v21655_v58 = vadd.f32 %v21505_v49, %v20897_v18  ;;  %v16120_v28 = vpop.f32.mrb[69].mxu0  ;;  %v20898_v54 = vpop.f32.mrb[70].mxu1 }
 0x54d   : > { %v19275_v27 = vpack.c.bf16 %v17143_v26, %v17142_v15  ;;  %v21656_v17 = vadd.f32 %v16120_v28, %v8694_v56  ;;  %v21506_v30 = vpop.f32.mrb[70].mxu0  ;;  %v8697_v21 = vpop.f32.mrb[71].mxu1 }
 0x54e   : > { %19484 = vst [vmem:[%s25166_s23 + $0x108] sm:$0xff] %v19280_v53   ;;  %v17012_v57 = vadd.f32 %v21655_v58, %v25130_v3  ;;  %v21657_v22 = vadd.f32 %v21506_v30, %v20898_v54  ;;  %v16123_v10 = vpop.f32.mrb[71].mxu0 }
 0x54f   : > { %19483 = vst [vmem:[%s25166_s23 + $0x100] sm:$0xff] %v19275_v27   ;;  %v17010_v32 = vadd.f32 %v21656_v17, %v25130_v3  ;;  %v21658_v60 = vadd.f32 %v16123_v10, %v8697_v21 }
 0x550   : > { %v17013_v23 = vadd.f32 %v21657_v22, %v25130_v3  ;;  %v17148_v47 = vmax.f32 %v17012_v57, 0.0 }
 0x551   : > { %v17011_v14 = vadd.f32 %v21658_v60, %v25130_v3  ;;  %v17146_v41 = vmax.f32 %v17010_v32, 0.0 }
 0x552   : > { %v17149_v34 = vmax.f32 %v17013_v23, 0.0  ;;  %v20901_v46 = vpop.f32.mrb[72].mxu1 }
 0x553   : > { %v17147_v63 = vmax.f32 %v17011_v14, 0.0  ;;  %v21509_v6 = vpop.f32.mrb[72].mxu0  ;;  %v8710_v42 = vpop.f32.mrb[73].mxu1 }
 0x554   : > { %v19290_v2 = vpack.c.bf16 %v17149_v34, %v17148_v47  ;;  %v21659_v5 = vadd.f32 %v21509_v6, %v20901_v46  ;;  %v16136_v7 = vpop.f32.mrb[73].mxu0  ;;  %v20902_v20 = vpop.f32.mrb[74].mxu1 }
 0x555   : > { %v19285_v31 = vpack.c.bf16 %v17147_v63, %v17146_v41  ;;  %v21660_v39 = vadd.f32 %v16136_v7, %v8710_v42  ;;  %v21510_v29 = vpop.f32.mrb[74].mxu0  ;;  %v8713_v62 = vpop.f32.mrb[75].mxu1 }
 0x556   : > { %19486 = vst [vmem:[%s25166_s23 + $0x118] sm:$0xff] %v19290_v2   ;;  %v17016_v8 = vadd.f32 %v21659_v5, %v25130_v3  ;;  %v21661_v0 = vadd.f32 %v21510_v29, %v20902_v20  ;;  %v16139_v40 = vpop.f32.mrb[75].mxu0 }
 0x557   : > { %19485 = vst [vmem:[%s25166_s23 + $0x110] sm:$0xff] %v19285_v31   ;;  %v17014_v50 = vadd.f32 %v25383_v19, %v21660_v39  ;;  %v21662_v9 = vadd.f32 %v16139_v40, %v8713_v62 }
 0x558   : > { %v17017_v25 = vadd.f32 %v25383_v19, %v21661_v0  ;;  %v17152_v55 = vmax.f32 %v17016_v8, 0.0 }
 0x559   : > { %v17015_v1 = vadd.f32 %v25383_v19, %v21662_v9  ;;  %v17150_v3 = vmax.f32 %v17014_v50, 0.0 }
 0x55a   : > { %v17153_v59 = vmax.f32 %v17017_v25, 0.0  ;;  %v20905_v33 = vpop.f32.mrb[76].mxu1 }
 0x55b   : > { %v17151_v13 = vmax.f32 %v17015_v1, 0.0  ;;  %v21513_v52 = vpop.f32.mrb[76].mxu0  ;;  %v8726_v12 = vpop.f32.mrb[77].mxu1 }
 0x55c   : > { %v19300_v45 = vpack.c.bf16 %v17153_v59, %v17152_v55  ;;  %v21663_v24 = vadd.f32 %v21513_v52, %v20905_v33  ;;  %v16152_v4 = vpop.f32.mrb[77].mxu0  ;;  %v20906_v61 = vpop.f32.mrb[78].mxu1 }
 0x55d   : > { %v19295_v48 = vpack.c.bf16 %v17151_v13, %v17150_v3  ;;  %v21664_v38 = vadd.f32 %v16152_v4, %v8726_v12  ;;  %v21514_v35 = vpop.f32.mrb[78].mxu0  ;;  %v8729_v43 = vpop.f32.mrb[79].mxu1 }
 0x55e   : > { %19488 = vst [vmem:[%s25166_s23 + $0x128] sm:$0xff] %v19300_v45   ;;  %v17020_v51 = vadd.f32 %v25383_v19, %v21663_v24  ;;  %v21665_v16 = vadd.f32 %v21514_v35, %v20906_v61  ;;  %v16155_v37 = vpop.f32.mrb[79].mxu0 }
 0x55f   : > { %19487 = vst [vmem:[%s25166_s23 + $0x120] sm:$0xff] %v19295_v48   ;;  %v17018_v36 = vadd.f32 %v25383_v19, %v21664_v38  ;;  %v21666_v44 = vadd.f32 %v16155_v37, %v8729_v43 }
 0x560   : > { %v17021_v11 = vadd.f32 %v25383_v19, %v21665_v16  ;;  %v17156_v15 = vmax.f32 %v17020_v51, 0.0 }
 0x561   : > { %v17019_v18 = vadd.f32 %v25383_v19, %v21666_v44  ;;  %v17154_v56 = vmax.f32 %v17018_v36, 0.0 }
 0x562   : > { %v17157_v26 = vmax.f32 %v17021_v11, 0.0  ;;  %v20909_v49 = vpop.f32.mrb[80].mxu1 }
 0x563   : > { %v17155_v53 = vmax.f32 %v17019_v18, 0.0  ;;  %v21517_v58 = vpop.f32.mrb[80].mxu0  ;;  %v8742_v28 = vpop.f32.mrb[81].mxu1 }
 0x564   : > { %v19310_v54 = vpack.c.bf16 %v17157_v26, %v17156_v15  ;;  %v21667_v27 = vadd.f32 %v21517_v58, %v20909_v49  ;;  %v16168_v17 = vpop.f32.mrb[81].mxu0  ;;  %v20910_v30 = vpop.f32.mrb[82].mxu1 }
 0x565   : > { %v19305_v21 = vpack.c.bf16 %v17155_v53, %v17154_v56  ;;  %v21668_v57 = vadd.f32 %v16168_v17, %v8742_v28  ;;  %v21518_v22 = vpop.f32.mrb[82].mxu0  ;;  %v8745_v10 = vpop.f32.mrb[83].mxu1 }
 0x566   : > { %19490 = vst [vmem:[%s25166_s23 + $0x138] sm:$0xff] %v19310_v54   ;;  %v17024_v32 = vadd.f32 %v25383_v19, %v21667_v27  ;;  %v21669_v60 = vadd.f32 %v21518_v22, %v20910_v30  ;;  %v16171_v23 = vpop.f32.mrb[83].mxu0 }
 0x567   : > { %19489 = vst [vmem:[%s25166_s23 + $0x130] sm:$0xff] %v19305_v21   ;;  %v17022_v14 = vadd.f32 %v25383_v19, %v21668_v57  ;;  %v21670_v47 = vadd.f32 %v16171_v23, %v8745_v10 }
 0x568   : > { %v17025_v34 = vadd.f32 %v25383_v19, %v21669_v60  ;;  %v17160_v41 = vmax.f32 %v17024_v32, 0.0 }
 0x569   : > { %v17023_v46 = vadd.f32 %v25383_v19, %v21670_v47  ;;  %v17158_v42 = vmax.f32 %v17022_v14, 0.0 }
 0x56a   : > { %v17161_v63 = vmax.f32 %v17025_v34, 0.0  ;;  %v20913_v6 = vpop.f32.mrb[84].mxu1 }
 0x56b   : > { %v17159_v2 = vmax.f32 %v17023_v46, 0.0  ;;  %v21521_v5 = vpop.f32.mrb[84].mxu0  ;;  %v8758_v7 = vpop.f32.mrb[85].mxu1 }
 0x56c   : > { %v19320_v20 = vpack.c.bf16 %v17161_v63, %v17160_v41  ;;  %v21671_v31 = vadd.f32 %v21521_v5, %v20913_v6  ;;  %v16184_v39 = vpop.f32.mrb[85].mxu0  ;;  %v20914_v29 = vpop.f32.mrb[86].mxu1 }
 0x56d   : > { %v19315_v62 = vpack.c.bf16 %v17159_v2, %v17158_v42  ;;  %v21672_v8 = vadd.f32 %v16184_v39, %v8758_v7  ;;  %v21522_v0 = vpop.f32.mrb[86].mxu0  ;;  %v8761_v40 = vpop.f32.mrb[87].mxu1 }
 0x56e   : > { %19492 = vst [vmem:[%s25166_s23 + $0x148] sm:$0xff] %v19320_v20   ;;  %v17028_v50 = vadd.f32 %v25383_v19, %v21671_v31  ;;  %v21673_v9 = vadd.f32 %v21522_v0, %v20914_v29  ;;  %v16187_v25 = vpop.f32.mrb[87].mxu0 }
 0x56f   : > { %19491 = vst [vmem:[%s25166_s23 + $0x140] sm:$0xff] %v19315_v62   ;;  %v17026_v1 = vadd.f32 %v25383_v19, %v21672_v8  ;;  %v21674_v55 = vadd.f32 %v16187_v25, %v8761_v40 }
 0x570   : > { %v17029_v59 = vadd.f32 %v25383_v19, %v21673_v9  ;;  %v17164_v3 = vmax.f32 %v17028_v50, 0.0 }
 0x571   : > { %v17027_v33 = vadd.f32 %v25383_v19, %v21674_v55  ;;  %v17162_v12 = vmax.f32 %v17026_v1, 0.0 }
 0x572   : > { %v17165_v13 = vmax.f32 %v17029_v59, 0.0  ;;  %v20917_v52 = vpop.f32.mrb[88].mxu1 }
 0x573   : > { %v17163_v45 = vmax.f32 %v17027_v33, 0.0  ;;  %v21525_v24 = vpop.f32.mrb[88].mxu0  ;;  %v8774_v4 = vpop.f32.mrb[89].mxu1 }
 0x574   : > { %v19330_v61 = vpack.c.bf16 %v17165_v13, %v17164_v3  ;;  %v21675_v48 = vadd.f32 %v21525_v24, %v20917_v52  ;;  %v16200_v38 = vpop.f32.mrb[89].mxu0  ;;  %v20918_v35 = vpop.f32.mrb[90].mxu1 }
 0x575   : > { %v19325_v43 = vpack.c.bf16 %v17163_v45, %v17162_v12  ;;  %v21676_v51 = vadd.f32 %v16200_v38, %v8774_v4  ;;  %v21526_v16 = vpop.f32.mrb[90].mxu0  ;;  %v8777_v37 = vpop.f32.mrb[91].mxu1 }
 0x576   : > { %19494 = vst [vmem:[%s25166_s23 + $0x158] sm:$0xff] %v19330_v61   ;;  %v17032_v36 = vadd.f32 %v25383_v19, %v21675_v48  ;;  %v21677_v44 = vadd.f32 %v21526_v16, %v20918_v35  ;;  %v16203_v11 = vpop.f32.mrb[91].mxu0 }
 0x577   : > { %19493 = vst [vmem:[%s25166_s23 + $0x150] sm:$0xff] %v19325_v43   ;;  %v17030_v18 = vadd.f32 %v25383_v19, %v21676_v51  ;;  %v21678_v15 = vadd.f32 %v16203_v11, %v8777_v37 }
 0x578   : > { %v17033_v26 = vadd.f32 %v25383_v19, %v21677_v44  ;;  %v17168_v56 = vmax.f32 %v17032_v36, 0.0 }
 0x579   : > { %v17031_v49 = vadd.f32 %v25383_v19, %v21678_v15  ;;  %v17166_v28 = vmax.f32 %v17030_v18, 0.0 }
 0x57a   : > { %v17169_v53 = vmax.f32 %v17033_v26, 0.0  ;;  %v20921_v58 = vpop.f32.mrb[92].mxu1 }
 0x57b   : > { %v17167_v54 = vmax.f32 %v17031_v49, 0.0  ;;  %v21529_v27 = vpop.f32.mrb[92].mxu0  ;;  %v8790_v17 = vpop.f32.mrb[93].mxu1 }
 0x57c   : > { %v19340_v30 = vpack.c.bf16 %v17169_v53, %v17168_v56  ;;  %v21679_v21 = vadd.f32 %v21529_v27, %v20921_v58  ;;  %v16216_v57 = vpop.f32.mrb[93].mxu0  ;;  %v20922_v22 = vpop.f32.mrb[94].mxu1 }
 0x57d   : > { %v19335_v10 = vpack.c.bf16 %v17167_v54, %v17166_v28  ;;  %v21680_v32 = vadd.f32 %v16216_v57, %v8790_v17  ;;  %v21530_v60 = vpop.f32.mrb[94].mxu0  ;;  %v8793_v23 = vpop.f32.mrb[95].mxu1 }
 0x57e   : > { %19496 = vst [vmem:[%s25166_s23 + $0x168] sm:$0xff] %v19340_v30   ;;  %v17036_v14 = vadd.f32 %v25383_v19, %v21679_v21  ;;  %v21681_v47 = vadd.f32 %v21530_v60, %v20922_v22  ;;  %v16219_v34 = vpop.f32.mrb[95].mxu0 }
 0x57f   : > { %19495 = vst [vmem:[%s25166_s23 + $0x160] sm:$0xff] %v19335_v10   ;;  %v17034_v46 = vadd.f32 %v25383_v19, %v21680_v32  ;;  %v21682_v41 = vadd.f32 %v16219_v34, %v8793_v23 }
 0x580   : > { %v17037_v63 = vadd.f32 %v25383_v19, %v21681_v47  ;;  %v17172_v42 = vmax.f32 %v17036_v14, 0.0 }
 0x581   : > { %v17035_v6 = vadd.f32 %v25383_v19, %v21682_v41  ;;  %v17170_v7 = vmax.f32 %v17034_v46, 0.0 }
 0x582   : > { %v17173_v2 = vmax.f32 %v17037_v63, 0.0  ;;  %v20925_v5 = vpop.f32.mrb[96].mxu1 }
 0x583   : > { %v17171_v20 = vmax.f32 %v17035_v6, 0.0  ;;  %v21533_v31 = vpop.f32.mrb[96].mxu0  ;;  %v8806_v39 = vpop.f32.mrb[97].mxu1 }
 0x584   : > { %v19350_v29 = vpack.c.bf16 %v17173_v2, %v17172_v42  ;;  %v21683_v62 = vadd.f32 %v21533_v31, %v20925_v5  ;;  %v16232_v8 = vpop.f32.mrb[97].mxu0  ;;  %v20926_v0 = vpop.f32.mrb[98].mxu1 }
 0x585   : > { %v19345_v40 = vpack.c.bf16 %v17171_v20, %v17170_v7  ;;  %v21684_v50 = vadd.f32 %v16232_v8, %v8806_v39  ;;  %v21534_v9 = vpop.f32.mrb[98].mxu0  ;;  %v8809_v25 = vpop.f32.mrb[99].mxu1 }
 0x586   : > { %19498 = vst [vmem:[%s25166_s23 + $0x178] sm:$0xff] %v19350_v29   ;;  %v17040_v1 = vadd.f32 %v25383_v19, %v21683_v62  ;;  %v21685_v55 = vadd.f32 %v21534_v9, %v20926_v0  ;;  %v16235_v59 = vpop.f32.mrb[99].mxu0 }
 0x587   : > { %19497 = vst [vmem:[%s25166_s23 + $0x170] sm:$0xff] %v19345_v40   ;;  %v17038_v33 = vadd.f32 %v25383_v19, %v21684_v50  ;;  %v21686_v3 = vadd.f32 %v16235_v59, %v8809_v25 }
 0x588   : > { %v17041_v13 = vadd.f32 %v25383_v19, %v21685_v55  ;;  %v17176_v12 = vmax.f32 %v17040_v1, 0.0 }
 0x589   : > { %v17039_v52 = vadd.f32 %v25383_v19, %v21686_v3  ;;  %v17174_v4 = vmax.f32 %v17038_v33, 0.0 }
 0x58a   : > { %v17177_v45 = vmax.f32 %v17041_v13, 0.0  ;;  %v20929_v24 = vpop.f32.mrb[100].mxu1 }
 0x58b   : > { %v17175_v61 = vmax.f32 %v17039_v52, 0.0  ;;  %v21537_v48 = vpop.f32.mrb[100].mxu0  ;;  %v8822_v38 = vpop.f32.mrb[101].mxu1 }
 0x58c   : > { %v19360_v35 = vpack.c.bf16 %v17177_v45, %v17176_v12  ;;  %v21687_v43 = vadd.f32 %v21537_v48, %v20929_v24  ;;  %v16248_v51 = vpop.f32.mrb[101].mxu0  ;;  %v20930_v16 = vpop.f32.mrb[102].mxu1 }
 0x58d   : > { %v19355_v37 = vpack.c.bf16 %v17175_v61, %v17174_v4  ;;  %v21688_v36 = vadd.f32 %v16248_v51, %v8822_v38  ;;  %v21538_v44 = vpop.f32.mrb[102].mxu0  ;;  %v8825_v11 = vpop.f32.mrb[103].mxu1 }
 0x58e   : > { %19500 = vst [vmem:[%s25166_s23 + $0x188] sm:$0xff] %v19360_v35   ;;  %v17044_v18 = vadd.f32 %v25383_v19, %v21687_v43  ;;  %v21689_v15 = vadd.f32 %v21538_v44, %v20930_v16  ;;  %v16251_v26 = vpop.f32.mrb[103].mxu0 }
 0x58f   : > { %19499 = vst [vmem:[%s25166_s23 + $0x180] sm:$0xff] %v19355_v37   ;;  %v17042_v49 = vadd.f32 %v25383_v19, %v21688_v36  ;;  %v21690_v56 = vadd.f32 %v16251_v26, %v8825_v11 }
 0x590   : > { %v17045_v53 = vadd.f32 %v25383_v19, %v21689_v15  ;;  %v17180_v28 = vmax.f32 %v17044_v18, 0.0 }
 0x591   : > { %v17043_v58 = vadd.f32 %v25383_v19, %v21690_v56  ;;  %v17178_v17 = vmax.f32 %v17042_v49, 0.0 }
 0x592   : > { %v17181_v54 = vmax.f32 %v17045_v53, 0.0  ;;  %v20933_v27 = vpop.f32.mrb[104].mxu1 }
 0x593   : > { %v17179_v30 = vmax.f32 %v17043_v58, 0.0  ;;  %v21541_v21 = vpop.f32.mrb[104].mxu0  ;;  %v8838_v57 = vpop.f32.mrb[105].mxu1 }
 0x594   : > { %v19370_v22 = vpack.c.bf16 %v17181_v54, %v17180_v28  ;;  %v21691_v10 = vadd.f32 %v21541_v21, %v20933_v27  ;;  %v16264_v32 = vpop.f32.mrb[105].mxu0  ;;  %v20934_v60 = vpop.f32.mrb[106].mxu1 }
 0x595   : > { %v19365_v23 = vpack.c.bf16 %v17179_v30, %v17178_v17  ;;  %v21692_v14 = vadd.f32 %v16264_v32, %v8838_v57  ;;  %v21542_v47 = vpop.f32.mrb[106].mxu0  ;;  %v8841_v34 = vpop.f32.mrb[107].mxu1 }
 0x596   : > { %19502 = vst [vmem:[%s25166_s23 + $0x198] sm:$0xff] %v19370_v22   ;;  %v17048_v46 = vadd.f32 %v25383_v19, %v21691_v10  ;;  %v21693_v41 = vadd.f32 %v21542_v47, %v20934_v60  ;;  %v16267_v63 = vpop.f32.mrb[107].mxu0 }
 0x597   : > { %19501 = vst [vmem:[%s25166_s23 + $0x190] sm:$0xff] %v19365_v23   ;;  %v17046_v6 = vadd.f32 %v25383_v19, %v21692_v14  ;;  %v21694_v42 = vadd.f32 %v16267_v63, %v8841_v34 }
 0x598   : > { %v17049_v2 = vadd.f32 %v25383_v19, %v21693_v41  ;;  %v17184_v7 = vmax.f32 %v17048_v46, 0.0 }
 0x599   : > { %v17047_v5 = vadd.f32 %v25383_v19, %v21694_v42  ;;  %v17182_v39 = vmax.f32 %v17046_v6, 0.0 }
 0x59a   : > { %v17185_v20 = vmax.f32 %v17049_v2, 0.0  ;;  %v20937_v31 = vpop.f32.mrb[108].mxu1 }
 0x59b   : > { %v17183_v29 = vmax.f32 %v17047_v5, 0.0  ;;  %v21545_v62 = vpop.f32.mrb[108].mxu0  ;;  %v8854_v8 = vpop.f32.mrb[109].mxu1 }
 0x59c   : > { %v19380_v0 = vpack.c.bf16 %v17185_v20, %v17184_v7  ;;  %v21695_v40 = vadd.f32 %v21545_v62, %v20937_v31  ;;  %v16280_v50 = vpop.f32.mrb[109].mxu0  ;;  %v20938_v9 = vpop.f32.mrb[110].mxu1 }
 0x59d   : > { %v19375_v25 = vpack.c.bf16 %v17183_v29, %v17182_v39  ;;  %v21696_v1 = vadd.f32 %v16280_v50, %v8854_v8  ;;  %v21546_v55 = vpop.f32.mrb[110].mxu0  ;;  %v8857_v59 = vpop.f32.mrb[111].mxu1 }
 0x59e   : > { %19504 = vst [vmem:[%s25166_s23 + $0x1a8] sm:$0xff] %v19380_v0   ;;  %v17052_v33 = vadd.f32 %v25383_v19, %v21695_v40  ;;  %v21697_v3 = vadd.f32 %v21546_v55, %v20938_v9  ;;  %v16283_v13 = vpop.f32.mrb[111].mxu0 }
 0x59f   : > { %19503 = vst [vmem:[%s25166_s23 + $0x1a0] sm:$0xff] %v19375_v25   ;;  %v17050_v52 = vadd.f32 %v25383_v19, %v21696_v1  ;;  %v21698_v12 = vadd.f32 %v16283_v13, %v8857_v59 }
 0x5a0   : > { %v17053_v45 = vadd.f32 %v25383_v19, %v21697_v3  ;;  %v17188_v4 = vmax.f32 %v17052_v33, 0.0 }
 0x5a1   : > { %v17051_v24 = vadd.f32 %v25383_v19, %v21698_v12  ;;  %v17186_v38 = vmax.f32 %v17050_v52, 0.0 }
 0x5a2   : > { %v17189_v61 = vmax.f32 %v17053_v45, 0.0  ;;  %v20941_v48 = vpop.f32.mrb[112].mxu1 }
 0x5a3   : > { %v17187_v35 = vmax.f32 %v17051_v24, 0.0  ;;  %v21549_v43 = vpop.f32.mrb[112].mxu0  ;;  %v8870_v51 = vpop.f32.mrb[113].mxu1 }
 0x5a4   : > { %v19390_v16 = vpack.c.bf16 %v17189_v61, %v17188_v4  ;;  %v21699_v37 = vadd.f32 %v21549_v43, %v20941_v48  ;;  %v16296_v36 = vpop.f32.mrb[113].mxu0  ;;  %v20942_v44 = vpop.f32.mrb[114].mxu1 }
 0x5a5   : > { %v19385_v11 = vpack.c.bf16 %v17187_v35, %v17186_v38  ;;  %v21700_v18 = vadd.f32 %v16296_v36, %v8870_v51  ;;  %v21550_v15 = vpop.f32.mrb[114].mxu0  ;;  %v8873_v26 = vpop.f32.mrb[115].mxu1 }
 0x5a6   : > { %19506 = vst [vmem:[%s25166_s23 + $0x1b8] sm:$0xff] %v19390_v16   ;;  %v17056_v49 = vadd.f32 %v25383_v19, %v21699_v37  ;;  %v21701_v56 = vadd.f32 %v21550_v15, %v20942_v44  ;;  %v16299_v53 = vpop.f32.mrb[115].mxu0 }
 0x5a7   : > { %19505 = vst [vmem:[%s25166_s23 + $0x1b0] sm:$0xff] %v19385_v11   ;;  %v17054_v58 = vadd.f32 %v25383_v19, %v21700_v18  ;;  %v21702_v28 = vadd.f32 %v16299_v53, %v8873_v26 }
 0x5a8   : > { %v17057_v54 = vadd.f32 %v25383_v19, %v21701_v56  ;;  %v17192_v17 = vmax.f32 %v17056_v49, 0.0 }
 0x5a9   : > { %v17055_v27 = vadd.f32 %v25383_v19, %v21702_v28  ;;  %v17190_v57 = vmax.f32 %v17054_v58, 0.0 }
 0x5aa   : > { %v17193_v30 = vmax.f32 %v17057_v54, 0.0  ;;  %v20945_v21 = vpop.f32.mrb[116].mxu1 }
 0x5ab   : > { %v17191_v22 = vmax.f32 %v17055_v27, 0.0  ;;  %v21553_v10 = vpop.f32.mrb[116].mxu0  ;;  %v8886_v32 = vpop.f32.mrb[117].mxu1 }
 0x5ac   : > { %v19400_v60 = vpack.c.bf16 %v17193_v30, %v17192_v17  ;;  %v21703_v23 = vadd.f32 %v21553_v10, %v20945_v21  ;;  %v16312_v14 = vpop.f32.mrb[117].mxu0  ;;  %v20946_v47 = vpop.f32.mrb[118].mxu1 }
 0x5ad   : > { %v19395_v34 = vpack.c.bf16 %v17191_v22, %v17190_v57  ;;  %v21704_v46 = vadd.f32 %v16312_v14, %v8886_v32  ;;  %v21554_v41 = vpop.f32.mrb[118].mxu0  ;;  %v8889_v63 = vpop.f32.mrb[119].mxu1 }
 0x5ae   : > { %19508 = vst [vmem:[%s25166_s23 + $0x1c8] sm:$0xff] %v19400_v60   ;;  %v17060_v6 = vadd.f32 %v25383_v19, %v21703_v23  ;;  %v21705_v42 = vadd.f32 %v21554_v41, %v20946_v47  ;;  %v16315_v2 = vpop.f32.mrb[119].mxu0 }
 0x5af   : > { %19507 = vst [vmem:[%s25166_s23 + $0x1c0] sm:$0xff] %v19395_v34   ;;  %v17058_v5 = vadd.f32 %v25383_v19, %v21704_v46  ;;  %v21706_v7 = vadd.f32 %v16315_v2, %v8889_v63 }
 0x5b0   : > { %v17061_v20 = vadd.f32 %v25383_v19, %v21705_v42  ;;  %v17196_v39 = vmax.f32 %v17060_v6, 0.0 }
 0x5b1   : > { %v17059_v31 = vadd.f32 %v25383_v19, %v21706_v7  ;;  %v17194_v8 = vmax.f32 %v17058_v5, 0.0 }
 0x5b2   : > { %v17197_v29 = vmax.f32 %v17061_v20, 0.0  ;;  %v20949_v62 = vpop.f32.mrb[120].mxu1 }
 0x5b3   : > { %v17195_v0 = vmax.f32 %v17059_v31, 0.0  ;;  %v21557_v40 = vpop.f32.mrb[120].mxu0  ;;  %v8902_v50 = vpop.f32.mrb[121].mxu1 }
 0x5b4   : > { %v19410_v9 = vpack.c.bf16 %v17197_v29, %v17196_v39  ;;  %v21707_v25 = vadd.f32 %v21557_v40, %v20949_v62  ;;  %v16328_v1 = vpop.f32.mrb[121].mxu0  ;;  %v20950_v55 = vpop.f32.mrb[122].mxu1 }
 0x5b5   : > { %v19405_v59 = vpack.c.bf16 %v17195_v0, %v17194_v8  ;;  %v21708_v33 = vadd.f32 %v16328_v1, %v8902_v50  ;;  %v21558_v3 = vpop.f32.mrb[122].mxu0  ;;  %v8905_v13 = vpop.f32.mrb[123].mxu1 }
 0x5b6   : > { %19510 = vst [vmem:[%s25166_s23 + $0x1d8] sm:$0xff] %v19410_v9   ;;  %v17064_v52 = vadd.f32 %v25383_v19, %v21707_v25  ;;  %v21709_v12 = vadd.f32 %v21558_v3, %v20950_v55  ;;  %v16331_v45 = vpop.f32.mrb[123].mxu0 }
 0x5b7   : > { %19509 = vst [vmem:[%s25166_s23 + $0x1d0] sm:$0xff] %v19405_v59   ;;  %v17062_v24 = vadd.f32 %v25383_v19, %v21708_v33  ;;  %v21710_v4 = vadd.f32 %v16331_v45, %v8905_v13 }
 0x5b8   : > { %v17065_v61 = vadd.f32 %v25383_v19, %v21709_v12  ;;  %v17200_v38 = vmax.f32 %v17064_v52, 0.0 }
 0x5b9   : > { %v17063_v48 = vadd.f32 %v25383_v19, %v21710_v4  ;;  %v17198_v51 = vmax.f32 %v17062_v24, 0.0 }
 0x5ba   : > { %v17201_v35 = vmax.f32 %v17065_v61, 0.0  ;;  %v20953_v43 = vpop.f32.mrb[124].mxu1 }
 0x5bb   : > { %v17199_v16 = vmax.f32 %v17063_v48, 0.0  ;;  %v21561_v37 = vpop.f32.mrb[124].mxu0  ;;  %v8918_v36 = vpop.f32.mrb[125].mxu1 }
 0x5bc   : > { %v19420_v44 = vpack.c.bf16 %v17201_v35, %v17200_v38  ;;  %v21711_v11 = vadd.f32 %v21561_v37, %v20953_v43  ;;  %v16344_v18 = vpop.f32.mrb[125].mxu0  ;;  %v20954_v15 = vpop.f32.mrb[126].mxu1 }
 0x5bd   : > { %v19415_v26 = vpack.c.bf16 %v17199_v16, %v17198_v51  ;;  %v21712_v49 = vadd.f32 %v16344_v18, %v8918_v36  ;;  %v21562_v56 = vpop.f32.mrb[126].mxu0  ;;  %v8921_v53 = vpop.f32.mrb[127].mxu1 }
 0x5be   : > { %19512 = vst [vmem:[%s25166_s23 + $0x1e8] sm:$0xff] %v19420_v44   ;;  %v17068_v58 = vadd.f32 %v25383_v19, %v21711_v11  ;;  %v21713_v28 = vadd.f32 %v21562_v56, %v20954_v15  ;;  %v16347_v54 = vpop.f32.mrb[127].mxu0 }
 0x5bf   : > { %19511 = vst [vmem:[%s25166_s23 + $0x1e0] sm:$0xff] %v19415_v26   ;;  %v17066_v27 = vadd.f32 %v25383_v19, %v21712_v49  ;;  %v21714_v17 = vadd.f32 %v16347_v54, %v8921_v53 }
 0x5c0   : > { %v17069_v30 = vadd.f32 %v25383_v19, %v21713_v28  ;;  %v17204_v57 = vmax.f32 %v17068_v58, 0.0 }
 0x5c1   : > { %v17067_v21 = vadd.f32 %v25383_v19, %v21714_v17  ;;  %v17202_v32 = vmax.f32 %v17066_v27, 0.0 }
 0x5c2   : > { %v17205_v22 = vmax.f32 %v17069_v30, 0.0  ;;  %v20957_v10 = vpop.f32.mrb[128].mxu1 }
 0x5c3   : > { %v17203_v60 = vmax.f32 %v17067_v21, 0.0  ;;  %v21565_v23 = vpop.f32.mrb[128].mxu0  ;;  %v8934_v14 = vpop.f32.mrb[129].mxu1 }
 0x5c4   : > { %v19430_v47 = vpack.c.bf16 %v17205_v22, %v17204_v57  ;;  %v21715_v34 = vadd.f32 %v21565_v23, %v20957_v10  ;;  %v16360_v46 = vpop.f32.mrb[129].mxu0  ;;  %v20958_v41 = vpop.f32.mrb[130].mxu1 }
 0x5c5   : > { %v19425_v63 = vpack.c.bf16 %v17203_v60, %v17202_v32  ;;  %v21716_v6 = vadd.f32 %v16360_v46, %v8934_v14  ;;  %v21566_v42 = vpop.f32.mrb[130].mxu0  ;;  %v8937_v2 = vpop.f32.mrb[131].mxu1 }
 0x5c6   : > { %19514 = vst [vmem:[%s25166_s23 + $0x1f8] sm:$0xff] %v19430_v47   ;;  %v17072_v5 = vadd.f32 %v25383_v19, %v21715_v34  ;;  %v21717_v7 = vadd.f32 %v21566_v42, %v20958_v41  ;;  %v16363_v20 = vpop.f32.mrb[131].mxu0 }
 0x5c7   : > { %19513 = vst [vmem:[%s25166_s23 + $0x1f0] sm:$0xff] %v19425_v63   ;;  %v17070_v31 = vadd.f32 %v25383_v19, %v21716_v6  ;;  %v21718_v39 = vadd.f32 %v16363_v20, %v8937_v2 }
 0x5c8   : > { %v17073_v29 = vadd.f32 %v25383_v19, %v21717_v7  ;;  %v17208_v8 = vmax.f32 %v17072_v5, 0.0 }
 0x5c9   : > { %v17071_v62 = vadd.f32 %v25383_v19, %v21718_v39  ;;  %v17206_v50 = vmax.f32 %v17070_v31, 0.0 }
 0x5ca   : > { %v17209_v0 = vmax.f32 %v17073_v29, 0.0  ;;  %v20961_v40 = vpop.f32.mrb[132].mxu1 }
 0x5cb   : > { %v17207_v9 = vmax.f32 %v17071_v62, 0.0  ;;  %v21569_v25 = vpop.f32.mrb[132].mxu0  ;;  %v8950_v1 = vpop.f32.mrb[133].mxu1 }
 0x5cc   : > { %v19440_v55 = vpack.c.bf16 %v17209_v0, %v17208_v8  ;;  %v21719_v59 = vadd.f32 %v21569_v25, %v20961_v40  ;;  %v16376_v33 = vpop.f32.mrb[133].mxu0  ;;  %v20962_v3 = vpop.f32.mrb[134].mxu1 }
 0x5cd   : > { %v19435_v13 = vpack.c.bf16 %v17207_v9, %v17206_v50  ;;  %v21720_v52 = vadd.f32 %v16376_v33, %v8950_v1  ;;  %v21570_v12 = vpop.f32.mrb[134].mxu0  ;;  %v8953_v45 = vpop.f32.mrb[135].mxu1 }
 0x5ce   : > { %19516 = vst [vmem:[%s25166_s23 + $0x208] sm:$0xff] %v19440_v55   ;;  %v17076_v24 = vadd.f32 %v25383_v19, %v21719_v59  ;;  %v21721_v4 = vadd.f32 %v21570_v12, %v20962_v3  ;;  %v16379_v61 = vpop.f32.mrb[135].mxu0 }
 0x5cf   : > { %19515 = vst [vmem:[%s25166_s23 + $0x200] sm:$0xff] %v19435_v13   ;;  %v17074_v48 = vadd.f32 %v25383_v19, %v21720_v52  ;;  %v21722_v38 = vadd.f32 %v16379_v61, %v8953_v45 }
 0x5d0   : > { %v17077_v35 = vadd.f32 %v25383_v19, %v21721_v4  ;;  %v17212_v51 = vmax.f32 %v17076_v24, 0.0 }
 0x5d1   : > { %v17075_v43 = vadd.f32 %v25383_v19, %v21722_v38  ;;  %v17210_v37 = vmax.f32 %v17074_v48, 0.0 }
 0x5d2   : > { %v17213_v16 = vmax.f32 %v17077_v35, 0.0 }
 0x5d3   : > { %v17211_v36 = vmax.f32 %v17075_v43, 0.0 }
 0x5d4   : > { %v19450_v44 = vpack.c.bf16 %v17213_v16, %v17212_v51 }
 0x5d5   : > { %v19445_v11 = vpack.c.bf16 %v17211_v36, %v17210_v37 }
 0x5d6   : > { %19518 = vst [vmem:[%s25166_s23 + $0x218] sm:$0xff] %v19450_v44  }
 0x5d7   : > { %19517 = vst [vmem:[%s25166_s23 + $0x210] sm:$0xff] %v19445_v11  }
 0x5d8   : > { %23453 = shalt.err (!%p23450_p5)
}
 0x5d9   : > { %s23454_s9 = scalar_lea.hbm %s25483_s4, 8704  ;;  %s23458_s19 = scalar_lea.hbm %s25540_s3, 34816 }
 0x5da   : > { %p23455_p6 = scmp.ne.s32.totalorder %s25483_s4, %s23454_s9  ;;  %p23459_p10 = scmp.lt.u32.totalorder %s25483_s4, %s25540_s3 }
 0x5db   : > { %p23460_p11 = scmp.lt.u32.totalorder %s23458_s19, %s23454_s9  ;;  %p23462_p13 = scmp.lt.u32.totalorder %s23454_s9, %s25483_s4 }
 0x5dc   : > { %p23456_p7 = pnand %p23455_p6, %p23583_p4 }
 0x5dd   : > { %p23461_p12 = por %p23460_p11, %p23459_p10 }
 0x5de   : > { %p23457_p9 = pneg %p23456_p7 }
 0x5df   : > { %p23463_p0 = por %p23462_p13, %p23461_p12 }
 0x5e1   : > { %p23464_p1 = pnand %p23463_p0, %p23457_p9 }
 0x5e3   : > { %23467 = shalt.err (!%p23464_p1)
}
 0x5e4   : > { %s23521_s10 = smov 64   ;;  %s23522_s26 = smov 4  }
 0x5e5   : > { %22678 = dma.vmem_to_hbm [thread:$0]  (%p23583_p4), %s25485_s28, 8704, %s25483_s4, %s25491_s15, %s23521_s10, %s23521_s10, %s23522_s26  }
 0x5e6 PF: > { %p22684_p2 = scmp.ge.s32.totalorder %s23518_s17, 2  ;;  %s17924_s27 = sand.u32 1, %s23498_s12  }
 0x5e7   : > { %s17925_s29 = scalar_lea.sflag [#allocation4], %s17924_s27 }
 0x5e8   : > { %p22681_p3 = pnand %p22684_p2, %p23590_p8 }
 0x5ea   : > { %23493 = dma.done.wait (!%p22681_p3), %s17925_s29, 8704  }
 0x5eb   : > { %23495 = vsyncadd (!%p22681_p3), %s17925_s29, 4294958592  ;;  %s16_s17 = sadd.s32 1, %s23518_s17   ;;  %s25609_s12 = smov %s23502_s13 }
 0x5ec   : > { %p13_p5 = scmp.ge.s32.totalorder %s16_s17, 6   ;;  %s25610_s13 = smov %s23506_s14 }
 0x5ed   : > { %s25611_s14 = smov %s23596_s25  ;;  %s25612_s15 = smov %s23514_s16 }
 0x5ee   : > { %s25613_s16 = smov %s25615_s20  ;;  %15 = sbr.rel (!%p13_p5) target bundleno = 4 (0x4), region = 81 }
 0x5f5   :  { %17930 = vsyncpa [#allocation4], 1 }
 0x5f6   :  { %17932 = vsyncpa [#allocation4 + $0x1], 1 }

</bundles_post_ra>
